<compile_context>
chip_gen: v5e
topology: v5e:2x2
jax: 0.10.0
libtpu: 0.0.40
codegen_flags: <defaults>
</compile_context>

<pallas_src>
import numpy as np
import jax
import jax.numpy as jnp
from jax import lax
from jax.experimental import pallas as pl
from jax.experimental.pallas import tpu as pltpu

BN_EPS = 1e-5
PAD = 48          # >= max tap offset (2*16 + 2 = 34), kept a multiple of 8


def _fused_kernel_factory(n):
    R = n * 256                       # rows: per-image 16x16 grid, stride 256
    f32, bf16 = jnp.float32, jnp.bfloat16
    inv_cnt = 1.0 / float(n * 144)    # BN count: N * 12 * 12 valid positions

    def kernel(x_ref, w1r_ref, b1_ref, w2_ref, b2_ref, g_ref, be_ref,
               m_ref, p_ref, w1p_ref, bf1_ref, wf2_ref, bf2_ref, o_ref):
        # ---- conv1 (1->16) + ReLU: 9 shifted whole-batch views, VPU FMA ------
        xp = jnp.concatenate(
            [x_ref[...], jnp.zeros((PAD, 1), f32)], axis=0)     # [R+PAD, 1]
        h1 = jnp.zeros((R, 16), f32)
        for k in range(9):
            dy, dx = divmod(k, 3)
            off = dy * 16 + dx
            h1 = h1 + xp[off:off + R, :] * w1r_ref[k:k + 1, :]  # [R,1]*[1,16]
        h1 = jnp.maximum(h1 + b1_ref[...], 0.0)                 # [R, 16]

        # ---- conv2 (16->32): shift-and-accumulate, 9 whole-batch matmuls -----
        h1p = jnp.concatenate(
            [h1, jnp.zeros((PAD, 16), f32)], axis=0)            # [R+PAD, 16]
        z = jnp.zeros((R, 32), f32)
        for k in range(9):
            dy, dx = divmod(k, 3)
            off = dy * 16 + dx
            z = z + jnp.dot(h1p[off:off + R, :].astype(bf16), w2_ref[k],
                            preferred_element_type=f32)
        z = z + b2_ref[...]                                     # [R, 32]

        # ---- BatchNorm2d training-mode stats over the N*144 valid rows -------
        maskc = m_ref[...]                                      # [R, 1] 0/1
        zm = z * maskc
        s1 = jnp.sum(zm, axis=0, keepdims=True)                 # [1, 32]
        s2 = jnp.sum(zm * z, axis=0, keepdims=True)             # [1, 32]
        mean = s1 * inv_cnt
        var = s2 * inv_cnt - mean * mean                        # biased variance
        scale = g_ref[...] * lax.rsqrt(var + BN_EPS)
        shift = be_ref[...] - mean * scale
        h = jnp.maximum(z * scale + shift, 0.0)                 # BN + ReLU

        # ---- adaptive_avg_pool2d(12->4): MXU selection/average matmul --------
        h3 = h.astype(bf16).reshape(n, 256, 32)
        pooled = jnp.einsum('nsj,njc->nsc', p_ref[...], h3,
                            preferred_element_type=f32)         # [n, 16, 32]

        # ---- fc1 (flatten (c,oh,ow) order folded into w1p) + ReLU ------------
        a = jnp.zeros((n, 32), f32)
        for s in range(16):
            a = a + jnp.dot(pooled[:, s, :].astype(bf16), w1p_ref[s],
                            preferred_element_type=f32)
        a = jnp.maximum(a + bf1_ref[...], 0.0)                  # [n, 32]

        # ---- fc2 ---------------------------------------------------------------
        o_ref[...] = (jnp.dot(a.astype(bf16), wf2_ref[...],
                              preferred_element_type=f32)
                      + bf2_ref[...])                           # [n, 10]

    return kernel


def forward(x_nchw, params):
    (w1, b1, w2, b2, gamma, beta, wfc1, bfc1, wfc2, bfc2) = params
    n = x_nchw.shape[0]
    bf16 = jnp.bfloat16

    # ---- tiny parameter / constant prep (one XLA fusion; constants fold) -----
    xf = x_nchw.reshape(n * 256, 1)                             # C_in = 1: pure reshape
    w1r = w1.reshape(16, 9).T                                   # [9(tap), 16]
    w2t = jnp.transpose(w2, (2, 3, 1, 0)).reshape(9, 16, 32).astype(bf16)
    # fold torch.flatten's (c, oh, ow) feature order into the fc1 weight:
    # w1p[s, c, m] = wfc1[m, c*16 + s] with s = oy*4 + ox.
    w1p = jnp.transpose(wfc1.reshape(32, 32, 16), (2, 1, 0)).astype(bf16)
    wf2 = wfc2.T.astype(bf16)                                   # [32, 10]

    # constant BN-validity mask (conv2 output defined where y<12 and x<12 on the
    # 16x16 grid) and the pooling selection/average matrix (1/9 one-hot rows).
    mask_np = np.zeros((n, 16, 16), np.float32)
    mask_np[:, :12, :12] = 1.0
    maskc = jnp.asarray(mask_np.reshape(n * 256, 1))
    p_np = np.zeros((16, 256), np.float32)
    for oy in range(4):
        for ox in range(4):
            for ky in range(3):
                for kx in range(3):
                    p_np[oy * 4 + ox, (3 * oy + ky) * 16 + (3 * ox + kx)] = 1.0 / 9.0
    pmat = jnp.broadcast_to(jnp.asarray(p_np).astype(bf16)[None], (n, 16, 256))

    def vmem():
        return pl.BlockSpec(memory_space=pltpu.MemorySpace.VMEM)

    return pl.pallas_call(
        _fused_kernel_factory(n),
        out_shape=jax.ShapeDtypeStruct((n, 10), jnp.float32),
        in_specs=[vmem() for _ in range(13)],
        out_specs=vmem(),
    )(xf, w1r, b1.reshape(1, 16), w2t, b2.reshape(1, 32),
      gamma.reshape(1, 32), beta.reshape(1, 32),
      maskc, pmat, w1p, bfc1.reshape(1, 32), wf2, bfc2.reshape(1, 10))


# ----------------------------- pure-JAX reference -----------------------------
def reference(x_nchw, params):
    (w1, b1, w2, b2, gamma, beta, wfc1, bfc1, wfc2, bfc2) = params
    y = lax.conv_general_dilated(x_nchw, w1, (1, 1), "VALID",
                                 dimension_numbers=("NCHW", "OIHW", "NCHW"))
    y = jnp.maximum(y + b1[None, :, None, None], 0.0)
    y = lax.conv_general_dilated(y, w2, (1, 1), "VALID",
                                 dimension_numbers=("NCHW", "OIHW", "NCHW"))
    y = y + b2[None, :, None, None]
    mean = y.mean(axis=(0, 2, 3))
    var = y.var(axis=(0, 2, 3))
    y = (y - mean[None, :, None, None]) * lax.rsqrt(var + BN_EPS)[None, :, None, None]
    y = y * gamma[None, :, None, None] + beta[None, :, None, None]
    y = jnp.maximum(y, 0.0)
    n, c = y.shape[0], y.shape[1]
    y = y.reshape(n, c, 4, 3, 4, 3).mean(axis=(3, 5))           # adaptive pool
    f = y.reshape(n, c * 16)
    a = jnp.maximum(f @ wfc1.T + bfc1, 0.0)
    return a @ wfc2.T + bfc2


# ------------------------------------ main -------------------------------------
if __name__ == "__main__":
    key = jax.random.PRNGKey(0)
    ks = jax.random.split(key, 9)

    def uni(k, shape, fan_in):
        bound = 1.0 / (fan_in ** 0.5)
        return jax.random.uniform(k, shape, jnp.float32, -bound, bound)

    w1 = uni(ks[0], (16, 1, 3, 3), 9)
    b1 = uni(ks[1], (16,), 9)
    w2 = uni(ks[2], (32, 16, 3, 3), 16 * 9)
    b2 = uni(ks[3], (32,), 16 * 9)
    gamma = jnp.ones((32,), jnp.float32)          # BatchNorm2d default init
    beta = jnp.zeros((32,), jnp.float32)
    wfc1 = uni(ks[4], (32, 32 * 16), 32 * 16)
    bfc1 = uni(ks[5], (32,), 32 * 16)
    wfc2 = uni(ks[6], (10, 32), 32)
    bfc2 = uni(ks[7], (10,), 32)
    params = (w1, b1, w2, b2, gamma, beta, wfc1, bfc1, wfc2, bfc2)

    x = jax.random.normal(ks[8], (2, 1, 16, 16), jnp.float32)   # NCHW, like PyTorch

    out = jax.block_until_ready(jax.jit(forward)(x, params))
    assert out.shape == (2, 10), out.shape

    ref = jax.block_until_ready(reference(x, params))
    assert jnp.allclose(out, ref, atol=2e-2, rtol=2e-2), (out, ref)

    print("KERNEL_OK")
</pallas_src>

<mosaic_0001>
module attributes {stable_mosaic.version = 11 : i64} {
  func.func @kernel(%arg0: memref<512x1xf32, #tpu.memory_space<vmem>>, %arg1: memref<9x16xf32, #tpu.memory_space<vmem>>, %arg2: memref<1x16xf32, #tpu.memory_space<vmem>>, %arg3: memref<9x16x32xbf16, #tpu.memory_space<vmem>>, %arg4: memref<1x32xf32, #tpu.memory_space<vmem>>, %arg5: memref<1x32xf32, #tpu.memory_space<vmem>>, %arg6: memref<1x32xf32, #tpu.memory_space<vmem>>, %arg7: memref<512x1xf32, #tpu.memory_space<vmem>>, %arg8: memref<2x16x256xbf16, #tpu.memory_space<vmem>>, %arg9: memref<16x32x32xbf16, #tpu.memory_space<vmem>>, %arg10: memref<1x32xf32, #tpu.memory_space<vmem>>, %arg11: memref<32x10xbf16, #tpu.memory_space<vmem>>, %arg12: memref<1x10xf32, #tpu.memory_space<vmem>>, %arg13: memref<2x10xf32, #tpu.memory_space<vmem>>) attributes {dimension_semantics = [], scalar_prefetch = 0 : i64, scratch_operands = 0 : i64, tpu.core_type = #tpu.core_type<tc>} {
    %c0 = arith.constant 0 : index
    %c0_0 = arith.constant 0 : index
    %0 = vector.load %arg0[%c0, %c0_0] : memref<512x1xf32, #tpu.memory_space<vmem>>, vector<512x1xf32>
    %cst = arith.constant 0.000000e+00 : f32
    %1 = vector.broadcast %cst : f32 to vector<48x1xf32>
    %2 = tpu.concatenate %0, %1 in 0 : vector<512x1xf32>, vector<48x1xf32> -> vector<560x1xf32>
    %cst_1 = arith.constant 0.000000e+00 : f32
    %3 = vector.broadcast %cst_1 : f32 to vector<512x16xf32>
    %4 = vector.extract_strided_slice %2 {offsets = [0, 0], sizes = [512, 1], strides = [1, 1]} : vector<560x1xf32> to vector<512x1xf32>
    %c0_2 = arith.constant 0 : index
    %c0_3 = arith.constant 0 : index
    %5 = vector.load %arg1[%c0_2, %c0_3] : memref<9x16xf32, #tpu.memory_space<vmem>>, vector<1x16xf32>
    %6 = vector.broadcast %4 : vector<512x1xf32> to vector<512x16xf32>
    %7 = vector.broadcast %5 : vector<1x16xf32> to vector<512x16xf32>
    %8 = arith.mulf %6, %7 : vector<512x16xf32>
    %9 = arith.addf %3, %8 : vector<512x16xf32>
    %10 = vector.extract_strided_slice %2 {offsets = [1, 0], sizes = [512, 1], strides = [1, 1]} : vector<560x1xf32> to vector<512x1xf32>
    %c1 = arith.constant 1 : index
    %c0_4 = arith.constant 0 : index
    %11 = vector.load %arg1[%c1, %c0_4] : memref<9x16xf32, #tpu.memory_space<vmem>>, vector<1x16xf32>
    %12 = vector.broadcast %10 : vector<512x1xf32> to vector<512x16xf32>
    %13 = vector.broadcast %11 : vector<1x16xf32> to vector<512x16xf32>
    %14 = arith.mulf %12, %13 : vector<512x16xf32>
    %15 = arith.addf %9, %14 : vector<512x16xf32>
    %16 = vector.extract_strided_slice %2 {offsets = [2, 0], sizes = [512, 1], strides = [1, 1]} : vector<560x1xf32> to vector<512x1xf32>
    %c2 = arith.constant 2 : index
    %c0_5 = arith.constant 0 : index
    %17 = vector.load %arg1[%c2, %c0_5] : memref<9x16xf32, #tpu.memory_space<vmem>>, vector<1x16xf32>
    %18 = vector.broadcast %16 : vector<512x1xf32> to vector<512x16xf32>
    %19 = vector.broadcast %17 : vector<1x16xf32> to vector<512x16xf32>
    %20 = arith.mulf %18, %19 : vector<512x16xf32>
    %21 = arith.addf %15, %20 : vector<512x16xf32>
    %22 = vector.extract_strided_slice %2 {offsets = [16, 0], sizes = [512, 1], strides = [1, 1]} : vector<560x1xf32> to vector<512x1xf32>
    %c3 = arith.constant 3 : index
    %c0_6 = arith.constant 0 : index
    %23 = vector.load %arg1[%c3, %c0_6] : memref<9x16xf32, #tpu.memory_space<vmem>>, vector<1x16xf32>
    %24 = vector.broadcast %22 : vector<512x1xf32> to vector<512x16xf32>
    %25 = vector.broadcast %23 : vector<1x16xf32> to vector<512x16xf32>
    %26 = arith.mulf %24, %25 : vector<512x16xf32>
    %27 = arith.addf %21, %26 : vector<512x16xf32>
    %28 = vector.extract_strided_slice %2 {offsets = [17, 0], sizes = [512, 1], strides = [1, 1]} : vector<560x1xf32> to vector<512x1xf32>
    %c4 = arith.constant 4 : index
    %c0_7 = arith.constant 0 : index
    %29 = vector.load %arg1[%c4, %c0_7] : memref<9x16xf32, #tpu.memory_space<vmem>>, vector<1x16xf32>
    %30 = vector.broadcast %28 : vector<512x1xf32> to vector<512x16xf32>
    %31 = vector.broadcast %29 : vector<1x16xf32> to vector<512x16xf32>
    %32 = arith.mulf %30, %31 : vector<512x16xf32>
    %33 = arith.addf %27, %32 : vector<512x16xf32>
    %34 = vector.extract_strided_slice %2 {offsets = [18, 0], sizes = [512, 1], strides = [1, 1]} : vector<560x1xf32> to vector<512x1xf32>
    %c5 = arith.constant 5 : index
    %c0_8 = arith.constant 0 : index
    %35 = vector.load %arg1[%c5, %c0_8] : memref<9x16xf32, #tpu.memory_space<vmem>>, vector<1x16xf32>
    %36 = vector.broadcast %34 : vector<512x1xf32> to vector<512x16xf32>
    %37 = vector.broadcast %35 : vector<1x16xf32> to vector<512x16xf32>
    %38 = arith.mulf %36, %37 : vector<512x16xf32>
    %39 = arith.addf %33, %38 : vector<512x16xf32>
    %40 = vector.extract_strided_slice %2 {offsets = [32, 0], sizes = [512, 1], strides = [1, 1]} : vector<560x1xf32> to vector<512x1xf32>
    %c6 = arith.constant 6 : index
    %c0_9 = arith.constant 0 : index
    %41 = vector.load %arg1[%c6, %c0_9] : memref<9x16xf32, #tpu.memory_space<vmem>>, vector<1x16xf32>
    %42 = vector.broadcast %40 : vector<512x1xf32> to vector<512x16xf32>
    %43 = vector.broadcast %41 : vector<1x16xf32> to vector<512x16xf32>
    %44 = arith.mulf %42, %43 : vector<512x16xf32>
    %45 = arith.addf %39, %44 : vector<512x16xf32>
    %46 = vector.extract_strided_slice %2 {offsets = [33, 0], sizes = [512, 1], strides = [1, 1]} : vector<560x1xf32> to vector<512x1xf32>
    %c7 = arith.constant 7 : index
    %c0_10 = arith.constant 0 : index
    %47 = vector.load %arg1[%c7, %c0_10] : memref<9x16xf32, #tpu.memory_space<vmem>>, vector<1x16xf32>
    %48 = vector.broadcast %46 : vector<512x1xf32> to vector<512x16xf32>
    %49 = vector.broadcast %47 : vector<1x16xf32> to vector<512x16xf32>
    %50 = arith.mulf %48, %49 : vector<512x16xf32>
    %51 = arith.addf %45, %50 : vector<512x16xf32>
    %52 = vector.extract_strided_slice %2 {offsets = [34, 0], sizes = [512, 1], strides = [1, 1]} : vector<560x1xf32> to vector<512x1xf32>
    %c8 = arith.constant 8 : index
    %c0_11 = arith.constant 0 : index
    %53 = vector.load %arg1[%c8, %c0_11] : memref<9x16xf32, #tpu.memory_space<vmem>>, vector<1x16xf32>
    %54 = vector.broadcast %52 : vector<512x1xf32> to vector<512x16xf32>
    %55 = vector.broadcast %53 : vector<1x16xf32> to vector<512x16xf32>
    %56 = arith.mulf %54, %55 : vector<512x16xf32>
    %57 = arith.addf %51, %56 : vector<512x16xf32>
    %c0_12 = arith.constant 0 : index
    %c0_13 = arith.constant 0 : index
    %58 = vector.load %arg2[%c0_12, %c0_13] : memref<1x16xf32, #tpu.memory_space<vmem>>, vector<1x16xf32>
    %59 = vector.broadcast %58 : vector<1x16xf32> to vector<512x16xf32>
    %60 = arith.addf %57, %59 : vector<512x16xf32>
    %cst_14 = arith.constant 0.000000e+00 : f32
    %61 = vector.broadcast %cst_14 : f32 to vector<512x16xf32>
    %62 = arith.maximumf %60, %61 : vector<512x16xf32>
    %cst_15 = arith.constant 0.000000e+00 : f32
    %63 = vector.broadcast %cst_15 : f32 to vector<48x16xf32>
    %64 = tpu.concatenate %62, %63 in 0 : vector<512x16xf32>, vector<48x16xf32> -> vector<560x16xf32>
    %cst_16 = arith.constant 0.000000e+00 : f32
    %65 = vector.broadcast %cst_16 : f32 to vector<512x32xf32>
    %66 = vector.extract_strided_slice %64 {offsets = [0, 0], sizes = [512, 16], strides = [1, 1]} : vector<560x16xf32> to vector<512x16xf32>
    %67 = arith.truncf %66 : vector<512x16xf32> to vector<512x16xbf16>
    %c0_17 = arith.constant 0 : index
    %c0_18 = arith.constant 0 : index
    %c0_19 = arith.constant 0 : index
    %68 = vector.load %arg3[%c0_17, %c0_18, %c0_19] : memref<9x16x32xbf16, #tpu.memory_space<vmem>>, vector<1x16x32xbf16>
    %69 = vector.shape_cast %68 : vector<1x16x32xbf16> to vector<16x32xbf16>
    %cst_20 = arith.constant dense<0.000000e+00> : vector<512x32xf32>
    %70 = tpu.matmul %67, %69, %cst_20 {dimension_numbers = #tpu.dot_dimension_numbers<[1], [0], [0], [1], [0, 0, 1, 1], [], []>} : vector<512x16xbf16>, vector<16x32xbf16>, vector<512x32xf32> -> vector<512x32xf32>
    %71 = arith.addf %65, %70 : vector<512x32xf32>
    %72 = vector.extract_strided_slice %64 {offsets = [1, 0], sizes = [512, 16], strides = [1, 1]} : vector<560x16xf32> to vector<512x16xf32>
    %73 = arith.truncf %72 : vector<512x16xf32> to vector<512x16xbf16>
    %c1_21 = arith.constant 1 : index
    %c0_22 = arith.constant 0 : index
    %c0_23 = arith.constant 0 : index
    %74 = vector.load %arg3[%c1_21, %c0_22, %c0_23] : memref<9x16x32xbf16, #tpu.memory_space<vmem>>, vector<1x16x32xbf16>
    %75 = vector.shape_cast %74 : vector<1x16x32xbf16> to vector<16x32xbf16>
    %cst_24 = arith.constant dense<0.000000e+00> : vector<512x32xf32>
    %76 = tpu.matmul %73, %75, %cst_24 {dimension_numbers = #tpu.dot_dimension_numbers<[1], [0], [0], [1], [0, 0, 1, 1], [], []>} : vector<512x16xbf16>, vector<16x32xbf16>, vector<512x32xf32> -> vector<512x32xf32>
    %77 = arith.addf %71, %76 : vector<512x32xf32>
    %78 = vector.extract_strided_slice %64 {offsets = [2, 0], sizes = [512, 16], strides = [1, 1]} : vector<560x16xf32> to vector<512x16xf32>
    %79 = arith.truncf %78 : vector<512x16xf32> to vector<512x16xbf16>
    %c2_25 = arith.constant 2 : index
    %c0_26 = arith.constant 0 : index
    %c0_27 = arith.constant 0 : index
    %80 = vector.load %arg3[%c2_25, %c0_26, %c0_27] : memref<9x16x32xbf16, #tpu.memory_space<vmem>>, vector<1x16x32xbf16>
    %81 = vector.shape_cast %80 : vector<1x16x32xbf16> to vector<16x32xbf16>
    %cst_28 = arith.constant dense<0.000000e+00> : vector<512x32xf32>
    %82 = tpu.matmul %79, %81, %cst_28 {dimension_numbers = #tpu.dot_dimension_numbers<[1], [0], [0], [1], [0, 0, 1, 1], [], []>} : vector<512x16xbf16>, vector<16x32xbf16>, vector<512x32xf32> -> vector<512x32xf32>
    %83 = arith.addf %77, %82 : vector<512x32xf32>
    %84 = vector.extract_strided_slice %64 {offsets = [16, 0], sizes = [512, 16], strides = [1, 1]} : vector<560x16xf32> to vector<512x16xf32>
    %85 = arith.truncf %84 : vector<512x16xf32> to vector<512x16xbf16>
    %c3_29 = arith.constant 3 : index
    %c0_30 = arith.constant 0 : index
    %c0_31 = arith.constant 0 : index
    %86 = vector.load %arg3[%c3_29, %c0_30, %c0_31] : memref<9x16x32xbf16, #tpu.memory_space<vmem>>, vector<1x16x32xbf16>
    %87 = vector.shape_cast %86 : vector<1x16x32xbf16> to vector<16x32xbf16>
    %cst_32 = arith.constant dense<0.000000e+00> : vector<512x32xf32>
    %88 = tpu.matmul %85, %87, %cst_32 {dimension_numbers = #tpu.dot_dimension_numbers<[1], [0], [0], [1], [0, 0, 1, 1], [], []>} : vector<512x16xbf16>, vector<16x32xbf16>, vector<512x32xf32> -> vector<512x32xf32>
    %89 = arith.addf %83, %88 : vector<512x32xf32>
    %90 = vector.extract_strided_slice %64 {offsets = [17, 0], sizes = [512, 16], strides = [1, 1]} : vector<560x16xf32> to vector<512x16xf32>
    %91 = arith.truncf %90 : vector<512x16xf32> to vector<512x16xbf16>
    %c4_33 = arith.constant 4 : index
    %c0_34 = arith.constant 0 : index
    %c0_35 = arith.constant 0 : index
    %92 = vector.load %arg3[%c4_33, %c0_34, %c0_35] : memref<9x16x32xbf16, #tpu.memory_space<vmem>>, vector<1x16x32xbf16>
    %93 = vector.shape_cast %92 : vector<1x16x32xbf16> to vector<16x32xbf16>
    %cst_36 = arith.constant dense<0.000000e+00> : vector<512x32xf32>
    %94 = tpu.matmul %91, %93, %cst_36 {dimension_numbers = #tpu.dot_dimension_numbers<[1], [0], [0], [1], [0, 0, 1, 1], [], []>} : vector<512x16xbf16>, vector<16x32xbf16>, vector<512x32xf32> -> vector<512x32xf32>
    %95 = arith.addf %89, %94 : vector<512x32xf32>
    %96 = vector.extract_strided_slice %64 {offsets = [18, 0], sizes = [512, 16], strides = [1, 1]} : vector<560x16xf32> to vector<512x16xf32>
    %97 = arith.truncf %96 : vector<512x16xf32> to vector<512x16xbf16>
    %c5_37 = arith.constant 5 : index
    %c0_38 = arith.constant 0 : index
    %c0_39 = arith.constant 0 : index
    %98 = vector.load %arg3[%c5_37, %c0_38, %c0_39] : memref<9x16x32xbf16, #tpu.memory_space<vmem>>, vector<1x16x32xbf16>
    %99 = vector.shape_cast %98 : vector<1x16x32xbf16> to vector<16x32xbf16>
    %cst_40 = arith.constant dense<0.000000e+00> : vector<512x32xf32>
    %100 = tpu.matmul %97, %99, %cst_40 {dimension_numbers = #tpu.dot_dimension_numbers<[1], [0], [0], [1], [0, 0, 1, 1], [], []>} : vector<512x16xbf16>, vector<16x32xbf16>, vector<512x32xf32> -> vector<512x32xf32>
    %101 = arith.addf %95, %100 : vector<512x32xf32>
    %102 = vector.extract_strided_slice %64 {offsets = [32, 0], sizes = [512, 16], strides = [1, 1]} : vector<560x16xf32> to vector<512x16xf32>
    %103 = arith.truncf %102 : vector<512x16xf32> to vector<512x16xbf16>
    %c6_41 = arith.constant 6 : index
    %c0_42 = arith.constant 0 : index
    %c0_43 = arith.constant 0 : index
    %104 = vector.load %arg3[%c6_41, %c0_42, %c0_43] : memref<9x16x32xbf16, #tpu.memory_space<vmem>>, vector<1x16x32xbf16>
    %105 = vector.shape_cast %104 : vector<1x16x32xbf16> to vector<16x32xbf16>
    %cst_44 = arith.constant dense<0.000000e+00> : vector<512x32xf32>
    %106 = tpu.matmul %103, %105, %cst_44 {dimension_numbers = #tpu.dot_dimension_numbers<[1], [0], [0], [1], [0, 0, 1, 1], [], []>} : vector<512x16xbf16>, vector<16x32xbf16>, vector<512x32xf32> -> vector<512x32xf32>
    %107 = arith.addf %101, %106 : vector<512x32xf32>
    %108 = vector.extract_strided_slice %64 {offsets = [33, 0], sizes = [512, 16], strides = [1, 1]} : vector<560x16xf32> to vector<512x16xf32>
    %109 = arith.truncf %108 : vector<512x16xf32> to vector<512x16xbf16>
    %c7_45 = arith.constant 7 : index
    %c0_46 = arith.constant 0 : index
    %c0_47 = arith.constant 0 : index
    %110 = vector.load %arg3[%c7_45, %c0_46, %c0_47] : memref<9x16x32xbf16, #tpu.memory_space<vmem>>, vector<1x16x32xbf16>
    %111 = vector.shape_cast %110 : vector<1x16x32xbf16> to vector<16x32xbf16>
    %cst_48 = arith.constant dense<0.000000e+00> : vector<512x32xf32>
    %112 = tpu.matmul %109, %111, %cst_48 {dimension_numbers = #tpu.dot_dimension_numbers<[1], [0], [0], [1], [0, 0, 1, 1], [], []>} : vector<512x16xbf16>, vector<16x32xbf16>, vector<512x32xf32> -> vector<512x32xf32>
    %113 = arith.addf %107, %112 : vector<512x32xf32>
    %114 = vector.extract_strided_slice %64 {offsets = [34, 0], sizes = [512, 16], strides = [1, 1]} : vector<560x16xf32> to vector<512x16xf32>
    %115 = arith.truncf %114 : vector<512x16xf32> to vector<512x16xbf16>
    %c8_49 = arith.constant 8 : index
    %c0_50 = arith.constant 0 : index
    %c0_51 = arith.constant 0 : index
    %116 = vector.load %arg3[%c8_49, %c0_50, %c0_51] : memref<9x16x32xbf16, #tpu.memory_space<vmem>>, vector<1x16x32xbf16>
    %117 = vector.shape_cast %116 : vector<1x16x32xbf16> to vector<16x32xbf16>
    %cst_52 = arith.constant dense<0.000000e+00> : vector<512x32xf32>
    %118 = tpu.matmul %115, %117, %cst_52 {dimension_numbers = #tpu.dot_dimension_numbers<[1], [0], [0], [1], [0, 0, 1, 1], [], []>} : vector<512x16xbf16>, vector<16x32xbf16>, vector<512x32xf32> -> vector<512x32xf32>
    %119 = arith.addf %113, %118 : vector<512x32xf32>
    %c0_53 = arith.constant 0 : index
    %c0_54 = arith.constant 0 : index
    %120 = vector.load %arg4[%c0_53, %c0_54] : memref<1x32xf32, #tpu.memory_space<vmem>>, vector<1x32xf32>
    %121 = vector.broadcast %120 : vector<1x32xf32> to vector<512x32xf32>
    %122 = arith.addf %119, %121 : vector<512x32xf32>
    %c0_55 = arith.constant 0 : index
    %c0_56 = arith.constant 0 : index
    %123 = vector.load %arg7[%c0_55, %c0_56] : memref<512x1xf32, #tpu.memory_space<vmem>>, vector<512x1xf32>
    %124 = vector.broadcast %123 : vector<512x1xf32> to vector<512x32xf32>
    %125 = arith.mulf %122, %124 : vector<512x32xf32>
    %cst_57 = arith.constant dense<0.000000e+00> : vector<32xf32>
    %126 = vector.multi_reduction <add>, %125, %cst_57 [0] : vector<512x32xf32> to vector<32xf32>
    %127 = vector.shape_cast %126 : vector<32xf32> to vector<1x32xf32>
    %128 = arith.mulf %125, %122 : vector<512x32xf32>
    %cst_58 = arith.constant dense<0.000000e+00> : vector<32xf32>
    %129 = vector.multi_reduction <add>, %128, %cst_58 [0] : vector<512x32xf32> to vector<32xf32>
    %130 = vector.shape_cast %129 : vector<32xf32> to vector<1x32xf32>
    %cst_59 = arith.constant 0.00347222225 : f32
    %131 = vector.broadcast %cst_59 : f32 to vector<1x32xf32>
    %132 = arith.mulf %127, %131 : vector<1x32xf32>
    %cst_60 = arith.constant 0.00347222225 : f32
    %133 = vector.broadcast %cst_60 : f32 to vector<1x32xf32>
    %134 = arith.mulf %130, %133 : vector<1x32xf32>
    %135 = arith.mulf %132, %132 : vector<1x32xf32>
    %136 = arith.subf %134, %135 : vector<1x32xf32>
    %c0_61 = arith.constant 0 : index
    %c0_62 = arith.constant 0 : index
    %137 = vector.load %arg5[%c0_61, %c0_62] : memref<1x32xf32, #tpu.memory_space<vmem>>, vector<1x32xf32>
    %cst_63 = arith.constant 9.99999974E-6 : f32
    %138 = vector.broadcast %cst_63 : f32 to vector<1x32xf32>
    %139 = arith.addf %136, %138 : vector<1x32xf32>
    %140 = math.rsqrt %139 : vector<1x32xf32>
    %141 = arith.mulf %137, %140 : vector<1x32xf32>
    %c0_64 = arith.constant 0 : index
    %c0_65 = arith.constant 0 : index
    %142 = vector.load %arg6[%c0_64, %c0_65] : memref<1x32xf32, #tpu.memory_space<vmem>>, vector<1x32xf32>
    %143 = arith.mulf %132, %141 : vector<1x32xf32>
    %144 = arith.subf %142, %143 : vector<1x32xf32>
    %145 = vector.broadcast %141 : vector<1x32xf32> to vector<512x32xf32>
    %146 = arith.mulf %122, %145 : vector<512x32xf32>
    %147 = vector.broadcast %144 : vector<1x32xf32> to vector<512x32xf32>
    %148 = arith.addf %146, %147 : vector<512x32xf32>
    %cst_66 = arith.constant 0.000000e+00 : f32
    %149 = vector.broadcast %cst_66 : f32 to vector<512x32xf32>
    %150 = arith.maximumf %148, %149 : vector<512x32xf32>
    %151 = arith.truncf %150 : vector<512x32xf32> to vector<512x32xbf16>
    %152 = vector.shape_cast %151 : vector<512x32xbf16> to vector<2x256x32xbf16>
    %c0_67 = arith.constant 0 : index
    %c0_68 = arith.constant 0 : index
    %c0_69 = arith.constant 0 : index
    %153 = vector.load %arg8[%c0_67, %c0_68, %c0_69] : memref<2x16x256xbf16, #tpu.memory_space<vmem>>, vector<2x16x256xbf16>
    "tpu.trace_start"() <{level = 10 : i32, message = "nsj,njc->nsc"}> : () -> ()
    %cst_70 = arith.constant dense<0.000000e+00> : vector<2x16x32xf32>
    %154 = tpu.matmul %153, %152, %cst_70 {dimension_numbers = #tpu.dot_dimension_numbers<[2], [1], [1], [2], [0, 0, 0, 1, 1, 2], [0], [0]>} : vector<2x16x256xbf16>, vector<2x256x32xbf16>, vector<2x16x32xf32> -> vector<2x16x32xf32>
    %cst_71 = arith.constant 0.000000e+00 : f32
    "tpu.trace_stop"() : () -> ()
    %155 = vector.broadcast %cst_71 : f32 to vector<2x32xf32>
    %156 = vector.extract_strided_slice %154 {offsets = [0, 0, 0], sizes = [2, 1, 32], strides = [1, 1, 1]} : vector<2x16x32xf32> to vector<2x1x32xf32>
    %157 = vector.shape_cast %156 : vector<2x1x32xf32> to vector<2x32xf32>
    %158 = arith.truncf %157 : vector<2x32xf32> to vector<2x32xbf16>
    %c0_72 = arith.constant 0 : index
    %c0_73 = arith.constant 0 : index
    %c0_74 = arith.constant 0 : index
    %159 = vector.load %arg9[%c0_72, %c0_73, %c0_74] : memref<16x32x32xbf16, #tpu.memory_space<vmem>>, vector<1x32x32xbf16>
    %160 = vector.shape_cast %159 : vector<1x32x32xbf16> to vector<32x32xbf16>
    %cst_75 = arith.constant dense<0.000000e+00> : vector<2x32xf32>
    %161 = tpu.matmul %158, %160, %cst_75 {dimension_numbers = #tpu.dot_dimension_numbers<[1], [0], [0], [1], [0, 0, 1, 1], [], []>} : vector<2x32xbf16>, vector<32x32xbf16>, vector<2x32xf32> -> vector<2x32xf32>
    %162 = arith.addf %155, %161 : vector<2x32xf32>
    %163 = vector.extract_strided_slice %154 {offsets = [0, 1, 0], sizes = [2, 1, 32], strides = [1, 1, 1]} : vector<2x16x32xf32> to vector<2x1x32xf32>
    %164 = vector.shape_cast %163 : vector<2x1x32xf32> to vector<2x32xf32>
    %165 = arith.truncf %164 : vector<2x32xf32> to vector<2x32xbf16>
    %c1_76 = arith.constant 1 : index
    %c0_77 = arith.constant 0 : index
    %c0_78 = arith.constant 0 : index
    %166 = vector.load %arg9[%c1_76, %c0_77, %c0_78] : memref<16x32x32xbf16, #tpu.memory_space<vmem>>, vector<1x32x32xbf16>
    %167 = vector.shape_cast %166 : vector<1x32x32xbf16> to vector<32x32xbf16>
    %cst_79 = arith.constant dense<0.000000e+00> : vector<2x32xf32>
    %168 = tpu.matmul %165, %167, %cst_79 {dimension_numbers = #tpu.dot_dimension_numbers<[1], [0], [0], [1], [0, 0, 1, 1], [], []>} : vector<2x32xbf16>, vector<32x32xbf16>, vector<2x32xf32> -> vector<2x32xf32>
    %169 = arith.addf %162, %168 : vector<2x32xf32>
    %170 = vector.extract_strided_slice %154 {offsets = [0, 2, 0], sizes = [2, 1, 32], strides = [1, 1, 1]} : vector<2x16x32xf32> to vector<2x1x32xf32>
    %171 = vector.shape_cast %170 : vector<2x1x32xf32> to vector<2x32xf32>
    %172 = arith.truncf %171 : vector<2x32xf32> to vector<2x32xbf16>
    %c2_80 = arith.constant 2 : index
    %c0_81 = arith.constant 0 : index
    %c0_82 = arith.constant 0 : index
    %173 = vector.load %arg9[%c2_80, %c0_81, %c0_82] : memref<16x32x32xbf16, #tpu.memory_space<vmem>>, vector<1x32x32xbf16>
    %174 = vector.shape_cast %173 : vector<1x32x32xbf16> to vector<32x32xbf16>
    %cst_83 = arith.constant dense<0.000000e+00> : vector<2x32xf32>
    %175 = tpu.matmul %172, %174, %cst_83 {dimension_numbers = #tpu.dot_dimension_numbers<[1], [0], [0], [1], [0, 0, 1, 1], [], []>} : vector<2x32xbf16>, vector<32x32xbf16>, vector<2x32xf32> -> vector<2x32xf32>
    %176 = arith.addf %169, %175 : vector<2x32xf32>
    %177 = vector.extract_strided_slice %154 {offsets = [0, 3, 0], sizes = [2, 1, 32], strides = [1, 1, 1]} : vector<2x16x32xf32> to vector<2x1x32xf32>
    %178 = vector.shape_cast %177 : vector<2x1x32xf32> to vector<2x32xf32>
    %179 = arith.truncf %178 : vector<2x32xf32> to vector<2x32xbf16>
    %c3_84 = arith.constant 3 : index
    %c0_85 = arith.constant 0 : index
    %c0_86 = arith.constant 0 : index
    %180 = vector.load %arg9[%c3_84, %c0_85, %c0_86] : memref<16x32x32xbf16, #tpu.memory_space<vmem>>, vector<1x32x32xbf16>
    %181 = vector.shape_cast %180 : vector<1x32x32xbf16> to vector<32x32xbf16>
    %cst_87 = arith.constant dense<0.000000e+00> : vector<2x32xf32>
    %182 = tpu.matmul %179, %181, %cst_87 {dimension_numbers = #tpu.dot_dimension_numbers<[1], [0], [0], [1], [0, 0, 1, 1], [], []>} : vector<2x32xbf16>, vector<32x32xbf16>, vector<2x32xf32> -> vector<2x32xf32>
    %183 = arith.addf %176, %182 : vector<2x32xf32>
    %184 = vector.extract_strided_slice %154 {offsets = [0, 4, 0], sizes = [2, 1, 32], strides = [1, 1, 1]} : vector<2x16x32xf32> to vector<2x1x32xf32>
    %185 = vector.shape_cast %184 : vector<2x1x32xf32> to vector<2x32xf32>
    %186 = arith.truncf %185 : vector<2x32xf32> to vector<2x32xbf16>
    %c4_88 = arith.constant 4 : index
    %c0_89 = arith.constant 0 : index
    %c0_90 = arith.constant 0 : index
    %187 = vector.load %arg9[%c4_88, %c0_89, %c0_90] : memref<16x32x32xbf16, #tpu.memory_space<vmem>>, vector<1x32x32xbf16>
    %188 = vector.shape_cast %187 : vector<1x32x32xbf16> to vector<32x32xbf16>
    %cst_91 = arith.constant dense<0.000000e+00> : vector<2x32xf32>
    %189 = tpu.matmul %186, %188, %cst_91 {dimension_numbers = #tpu.dot_dimension_numbers<[1], [0], [0], [1], [0, 0, 1, 1], [], []>} : vector<2x32xbf16>, vector<32x32xbf16>, vector<2x32xf32> -> vector<2x32xf32>
    %190 = arith.addf %183, %189 : vector<2x32xf32>
    %191 = vector.extract_strided_slice %154 {offsets = [0, 5, 0], sizes = [2, 1, 32], strides = [1, 1, 1]} : vector<2x16x32xf32> to vector<2x1x32xf32>
    %192 = vector.shape_cast %191 : vector<2x1x32xf32> to vector<2x32xf32>
    %193 = arith.truncf %192 : vector<2x32xf32> to vector<2x32xbf16>
    %c5_92 = arith.constant 5 : index
    %c0_93 = arith.constant 0 : index
    %c0_94 = arith.constant 0 : index
    %194 = vector.load %arg9[%c5_92, %c0_93, %c0_94] : memref<16x32x32xbf16, #tpu.memory_space<vmem>>, vector<1x32x32xbf16>
    %195 = vector.shape_cast %194 : vector<1x32x32xbf16> to vector<32x32xbf16>
    %cst_95 = arith.constant dense<0.000000e+00> : vector<2x32xf32>
    %196 = tpu.matmul %193, %195, %cst_95 {dimension_numbers = #tpu.dot_dimension_numbers<[1], [0], [0], [1], [0, 0, 1, 1], [], []>} : vector<2x32xbf16>, vector<32x32xbf16>, vector<2x32xf32> -> vector<2x32xf32>
    %197 = arith.addf %190, %196 : vector<2x32xf32>
    %198 = vector.extract_strided_slice %154 {offsets = [0, 6, 0], sizes = [2, 1, 32], strides = [1, 1, 1]} : vector<2x16x32xf32> to vector<2x1x32xf32>
    %199 = vector.shape_cast %198 : vector<2x1x32xf32> to vector<2x32xf32>
    %200 = arith.truncf %199 : vector<2x32xf32> to vector<2x32xbf16>
    %c6_96 = arith.constant 6 : index
    %c0_97 = arith.constant 0 : index
    %c0_98 = arith.constant 0 : index
    %201 = vector.load %arg9[%c6_96, %c0_97, %c0_98] : memref<16x32x32xbf16, #tpu.memory_space<vmem>>, vector<1x32x32xbf16>
    %202 = vector.shape_cast %201 : vector<1x32x32xbf16> to vector<32x32xbf16>
    %cst_99 = arith.constant dense<0.000000e+00> : vector<2x32xf32>
    %203 = tpu.matmul %200, %202, %cst_99 {dimension_numbers = #tpu.dot_dimension_numbers<[1], [0], [0], [1], [0, 0, 1, 1], [], []>} : vector<2x32xbf16>, vector<32x32xbf16>, vector<2x32xf32> -> vector<2x32xf32>
    %204 = arith.addf %197, %203 : vector<2x32xf32>
    %205 = vector.extract_strided_slice %154 {offsets = [0, 7, 0], sizes = [2, 1, 32], strides = [1, 1, 1]} : vector<2x16x32xf32> to vector<2x1x32xf32>
    %206 = vector.shape_cast %205 : vector<2x1x32xf32> to vector<2x32xf32>
    %207 = arith.truncf %206 : vector<2x32xf32> to vector<2x32xbf16>
    %c7_100 = arith.constant 7 : index
    %c0_101 = arith.constant 0 : index
    %c0_102 = arith.constant 0 : index
    %208 = vector.load %arg9[%c7_100, %c0_101, %c0_102] : memref<16x32x32xbf16, #tpu.memory_space<vmem>>, vector<1x32x32xbf16>
    %209 = vector.shape_cast %208 : vector<1x32x32xbf16> to vector<32x32xbf16>
    %cst_103 = arith.constant dense<0.000000e+00> : vector<2x32xf32>
    %210 = tpu.matmul %207, %209, %cst_103 {dimension_numbers = #tpu.dot_dimension_numbers<[1], [0], [0], [1], [0, 0, 1, 1], [], []>} : vector<2x32xbf16>, vector<32x32xbf16>, vector<2x32xf32> -> vector<2x32xf32>
    %211 = arith.addf %204, %210 : vector<2x32xf32>
    %212 = vector.extract_strided_slice %154 {offsets = [0, 8, 0], sizes = [2, 1, 32], strides = [1, 1, 1]} : vector<2x16x32xf32> to vector<2x1x32xf32>
    %213 = vector.shape_cast %212 : vector<2x1x32xf32> to vector<2x32xf32>
    %214 = arith.truncf %213 : vector<2x32xf32> to vector<2x32xbf16>
    %c8_104 = arith.constant 8 : index
    %c0_105 = arith.constant 0 : index
    %c0_106 = arith.constant 0 : index
    %215 = vector.load %arg9[%c8_104, %c0_105, %c0_106] : memref<16x32x32xbf16, #tpu.memory_space<vmem>>, vector<1x32x32xbf16>
    %216 = vector.shape_cast %215 : vector<1x32x32xbf16> to vector<32x32xbf16>
    %cst_107 = arith.constant dense<0.000000e+00> : vector<2x32xf32>
    %217 = tpu.matmul %214, %216, %cst_107 {dimension_numbers = #tpu.dot_dimension_numbers<[1], [0], [0], [1], [0, 0, 1, 1], [], []>} : vector<2x32xbf16>, vector<32x32xbf16>, vector<2x32xf32> -> vector<2x32xf32>
    %218 = arith.addf %211, %217 : vector<2x32xf32>
    %219 = vector.extract_strided_slice %154 {offsets = [0, 9, 0], sizes = [2, 1, 32], strides = [1, 1, 1]} : vector<2x16x32xf32> to vector<2x1x32xf32>
    %220 = vector.shape_cast %219 : vector<2x1x32xf32> to vector<2x32xf32>
    %221 = arith.truncf %220 : vector<2x32xf32> to vector<2x32xbf16>
    %c9 = arith.constant 9 : index
    %c0_108 = arith.constant 0 : index
    %c0_109 = arith.constant 0 : index
    %222 = vector.load %arg9[%c9, %c0_108, %c0_109] : memref<16x32x32xbf16, #tpu.memory_space<vmem>>, vector<1x32x32xbf16>
    %223 = vector.shape_cast %222 : vector<1x32x32xbf16> to vector<32x32xbf16>
    %cst_110 = arith.constant dense<0.000000e+00> : vector<2x32xf32>
    %224 = tpu.matmul %221, %223, %cst_110 {dimension_numbers = #tpu.dot_dimension_numbers<[1], [0], [0], [1], [0, 0, 1, 1], [], []>} : vector<2x32xbf16>, vector<32x32xbf16>, vector<2x32xf32> -> vector<2x32xf32>
    %225 = arith.addf %218, %224 : vector<2x32xf32>
    %226 = vector.extract_strided_slice %154 {offsets = [0, 10, 0], sizes = [2, 1, 32], strides = [1, 1, 1]} : vector<2x16x32xf32> to vector<2x1x32xf32>
    %227 = vector.shape_cast %226 : vector<2x1x32xf32> to vector<2x32xf32>
    %228 = arith.truncf %227 : vector<2x32xf32> to vector<2x32xbf16>
    %c10 = arith.constant 10 : index
    %c0_111 = arith.constant 0 : index
    %c0_112 = arith.constant 0 : index
    %229 = vector.load %arg9[%c10, %c0_111, %c0_112] : memref<16x32x32xbf16, #tpu.memory_space<vmem>>, vector<1x32x32xbf16>
    %230 = vector.shape_cast %229 : vector<1x32x32xbf16> to vector<32x32xbf16>
    %cst_113 = arith.constant dense<0.000000e+00> : vector<2x32xf32>
    %231 = tpu.matmul %228, %230, %cst_113 {dimension_numbers = #tpu.dot_dimension_numbers<[1], [0], [0], [1], [0, 0, 1, 1], [], []>} : vector<2x32xbf16>, vector<32x32xbf16>, vector<2x32xf32> -> vector<2x32xf32>
    %232 = arith.addf %225, %231 : vector<2x32xf32>
    %233 = vector.extract_strided_slice %154 {offsets = [0, 11, 0], sizes = [2, 1, 32], strides = [1, 1, 1]} : vector<2x16x32xf32> to vector<2x1x32xf32>
    %234 = vector.shape_cast %233 : vector<2x1x32xf32> to vector<2x32xf32>
    %235 = arith.truncf %234 : vector<2x32xf32> to vector<2x32xbf16>
    %c11 = arith.constant 11 : index
    %c0_114 = arith.constant 0 : index
    %c0_115 = arith.constant 0 : index
    %236 = vector.load %arg9[%c11, %c0_114, %c0_115] : memref<16x32x32xbf16, #tpu.memory_space<vmem>>, vector<1x32x32xbf16>
    %237 = vector.shape_cast %236 : vector<1x32x32xbf16> to vector<32x32xbf16>
    %cst_116 = arith.constant dense<0.000000e+00> : vector<2x32xf32>
    %238 = tpu.matmul %235, %237, %cst_116 {dimension_numbers = #tpu.dot_dimension_numbers<[1], [0], [0], [1], [0, 0, 1, 1], [], []>} : vector<2x32xbf16>, vector<32x32xbf16>, vector<2x32xf32> -> vector<2x32xf32>
    %239 = arith.addf %232, %238 : vector<2x32xf32>
    %240 = vector.extract_strided_slice %154 {offsets = [0, 12, 0], sizes = [2, 1, 32], strides = [1, 1, 1]} : vector<2x16x32xf32> to vector<2x1x32xf32>
    %241 = vector.shape_cast %240 : vector<2x1x32xf32> to vector<2x32xf32>
    %242 = arith.truncf %241 : vector<2x32xf32> to vector<2x32xbf16>
    %c12 = arith.constant 12 : index
    %c0_117 = arith.constant 0 : index
    %c0_118 = arith.constant 0 : index
    %243 = vector.load %arg9[%c12, %c0_117, %c0_118] : memref<16x32x32xbf16, #tpu.memory_space<vmem>>, vector<1x32x32xbf16>
    %244 = vector.shape_cast %243 : vector<1x32x32xbf16> to vector<32x32xbf16>
    %cst_119 = arith.constant dense<0.000000e+00> : vector<2x32xf32>
    %245 = tpu.matmul %242, %244, %cst_119 {dimension_numbers = #tpu.dot_dimension_numbers<[1], [0], [0], [1], [0, 0, 1, 1], [], []>} : vector<2x32xbf16>, vector<32x32xbf16>, vector<2x32xf32> -> vector<2x32xf32>
    %246 = arith.addf %239, %245 : vector<2x32xf32>
    %247 = vector.extract_strided_slice %154 {offsets = [0, 13, 0], sizes = [2, 1, 32], strides = [1, 1, 1]} : vector<2x16x32xf32> to vector<2x1x32xf32>
    %248 = vector.shape_cast %247 : vector<2x1x32xf32> to vector<2x32xf32>
    %249 = arith.truncf %248 : vector<2x32xf32> to vector<2x32xbf16>
    %c13 = arith.constant 13 : index
    %c0_120 = arith.constant 0 : index
    %c0_121 = arith.constant 0 : index
    %250 = vector.load %arg9[%c13, %c0_120, %c0_121] : memref<16x32x32xbf16, #tpu.memory_space<vmem>>, vector<1x32x32xbf16>
    %251 = vector.shape_cast %250 : vector<1x32x32xbf16> to vector<32x32xbf16>
    %cst_122 = arith.constant dense<0.000000e+00> : vector<2x32xf32>
    %252 = tpu.matmul %249, %251, %cst_122 {dimension_numbers = #tpu.dot_dimension_numbers<[1], [0], [0], [1], [0, 0, 1, 1], [], []>} : vector<2x32xbf16>, vector<32x32xbf16>, vector<2x32xf32> -> vector<2x32xf32>
    %253 = arith.addf %246, %252 : vector<2x32xf32>
    %254 = vector.extract_strided_slice %154 {offsets = [0, 14, 0], sizes = [2, 1, 32], strides = [1, 1, 1]} : vector<2x16x32xf32> to vector<2x1x32xf32>
    %255 = vector.shape_cast %254 : vector<2x1x32xf32> to vector<2x32xf32>
    %256 = arith.truncf %255 : vector<2x32xf32> to vector<2x32xbf16>
    %c14 = arith.constant 14 : index
    %c0_123 = arith.constant 0 : index
    %c0_124 = arith.constant 0 : index
    %257 = vector.load %arg9[%c14, %c0_123, %c0_124] : memref<16x32x32xbf16, #tpu.memory_space<vmem>>, vector<1x32x32xbf16>
    %258 = vector.shape_cast %257 : vector<1x32x32xbf16> to vector<32x32xbf16>
    %cst_125 = arith.constant dense<0.000000e+00> : vector<2x32xf32>
    %259 = tpu.matmul %256, %258, %cst_125 {dimension_numbers = #tpu.dot_dimension_numbers<[1], [0], [0], [1], [0, 0, 1, 1], [], []>} : vector<2x32xbf16>, vector<32x32xbf16>, vector<2x32xf32> -> vector<2x32xf32>
    %260 = arith.addf %253, %259 : vector<2x32xf32>
    %261 = vector.extract_strided_slice %154 {offsets = [0, 15, 0], sizes = [2, 1, 32], strides = [1, 1, 1]} : vector<2x16x32xf32> to vector<2x1x32xf32>
    %262 = vector.shape_cast %261 : vector<2x1x32xf32> to vector<2x32xf32>
    %263 = arith.truncf %262 : vector<2x32xf32> to vector<2x32xbf16>
    %c15 = arith.constant 15 : index
    %c0_126 = arith.constant 0 : index
    %c0_127 = arith.constant 0 : index
    %264 = vector.load %arg9[%c15, %c0_126, %c0_127] : memref<16x32x32xbf16, #tpu.memory_space<vmem>>, vector<1x32x32xbf16>
    %265 = vector.shape_cast %264 : vector<1x32x32xbf16> to vector<32x32xbf16>
    %cst_128 = arith.constant dense<0.000000e+00> : vector<2x32xf32>
    %266 = tpu.matmul %263, %265, %cst_128 {dimension_numbers = #tpu.dot_dimension_numbers<[1], [0], [0], [1], [0, 0, 1, 1], [], []>} : vector<2x32xbf16>, vector<32x32xbf16>, vector<2x32xf32> -> vector<2x32xf32>
    %267 = arith.addf %260, %266 : vector<2x32xf32>
    %c0_129 = arith.constant 0 : index
    %c0_130 = arith.constant 0 : index
    %268 = vector.load %arg10[%c0_129, %c0_130] : memref<1x32xf32, #tpu.memory_space<vmem>>, vector<1x32xf32>
    %269 = vector.broadcast %268 : vector<1x32xf32> to vector<2x32xf32>
    %270 = arith.addf %267, %269 : vector<2x32xf32>
    %cst_131 = arith.constant 0.000000e+00 : f32
    %271 = vector.broadcast %cst_131 : f32 to vector<2x32xf32>
    %272 = arith.maximumf %270, %271 : vector<2x32xf32>
    %273 = arith.truncf %272 : vector<2x32xf32> to vector<2x32xbf16>
    %c0_132 = arith.constant 0 : index
    %c0_133 = arith.constant 0 : index
    %274 = vector.load %arg11[%c0_132, %c0_133] : memref<32x10xbf16, #tpu.memory_space<vmem>>, vector<32x10xbf16>
    %cst_134 = arith.constant dense<0.000000e+00> : vector<2x10xf32>
    %275 = tpu.matmul %273, %274, %cst_134 {dimension_numbers = #tpu.dot_dimension_numbers<[1], [0], [0], [1], [0, 0, 1, 1], [], []>} : vector<2x32xbf16>, vector<32x10xbf16>, vector<2x10xf32> -> vector<2x10xf32>
    %c0_135 = arith.constant 0 : index
    %c0_136 = arith.constant 0 : index
    %276 = vector.load %arg12[%c0_135, %c0_136] : memref<1x10xf32, #tpu.memory_space<vmem>>, vector<1x10xf32>
    %277 = vector.broadcast %276 : vector<1x10xf32> to vector<2x10xf32>
    %278 = arith.addf %275, %277 : vector<2x10xf32>
    %c0_137 = arith.constant 0 : index
    %c0_138 = arith.constant 0 : index
    %279 = vector.load %arg13[%c0_137, %c0_138] : memref<2x10xf32, #tpu.memory_space<vmem>>, vector<2x10xf32>
    tpu.vector_store %arg13[%c0_137, %c0_138], %278 {strides = array<i32>} : memref<2x10xf32, #tpu.memory_space<vmem>>, vector<2x10xf32>,
    return
  }
}

</mosaic_0001>

<bundles_post_ra>
// kernel: forward.1
= control target key start
LH: loop header
LB: loop body
LE: loop exit
PB: predicated region body
PF: predicated region fallthrough
CT: control target
= control target key end

     0   :  { %v16028_v3 = vmov 0   ;;  %s16014_s0 = inlined_call_operand.vmem [shape: f32[512,1], index: 0, kind: input, shape index: {}]   ;;  %s16015_s1 = inlined_call_operand.vmem [shape: f32[9,16], index: 1, kind: input, shape index: {}]   ;;  %s16016_s2 = inlined_call_operand.vmem [shape: f32[1,16], index: 2, kind: input, shape index: {}]   ;;  %s16017_s3 = inlined_call_operand.vmem [shape: bf16[9,16,32], index: 3, kind: input, shape index: {}]   ;;  %s16018_s4 = inlined_call_operand.vmem [shape: f32[1,32], index: 4, kind: input, shape index: {}]   ;;  %s16019_s5 = inlined_call_operand.vmem [shape: f32[1,32], index: 5, kind: input, shape index: {}]   ;;  %s16020_s6 = inlined_call_operand.vmem [shape: f32[1,32], index: 6, kind: input, shape index: {}]   ;;  %s16021_s7 = inlined_call_operand.vmem [shape: f32[512,1], index: 7, kind: input, shape index: {}]   ;;  %s16022_s8 = inlined_call_operand.vmem [shape: bf16[2,16,256], index: 8, kind: input, shape index: {}]   ;;  %s16023_s9 = inlined_call_operand.vmem [shape: bf16[16,32,32], index: 9, kind: input, shape index: {}]   ;;  %s16024_s10 = inlined_call_operand.vmem [shape: f32[1,32], index: 10, kind: input, shape index: {}]   ;;  %s16025_s11 = inlined_call_operand.vmem [shape: bf16[32,10], index: 11, kind: input, shape index: {}]   ;;  %s16026_s12 = inlined_call_operand.vmem [shape: f32[1,10], index: 12, kind: input, shape index: {}]   ;;  %s16027_s13 = inlined_call_operand.hbm [shape: f32[2,10], index: 13, kind: output, shape index: {}]  }
   0x1   :  { %v50_v0 = vld [vmem:[%s16014_s0 + $0x20] sm:$0xff]  ;;  %v48_v1 = vld [vmem:[%s16014_s0 + $0x10] sm:$0xff]  ;;  %8646 = vset.pattern.permute.xlu2 %v16028_v3  ;;  %8645 = vset.pattern.permute.xlu1 %v16028_v3  ;;  %v51_v4 = vld [vmem:[%s16014_s0 + $0x28] sm:$0xff] }
   0x2   :  { %v46_v2 = vld [vmem:[%s16014_s0] sm:$0xff]  ;;  %8644 = vset.pattern.permute.xlu0 %v16028_v3  ;;  %133 = vperm.xlu2 %8646, %v50_v0   ;;  %v49_v5 = vld [vmem:[%s16014_s0 + $0x18] sm:$0xff]  ;;  %v47_v6 = vld [vmem:[%s16014_s0 + $0x8] sm:$0xff] }
   0x3   :  { %123 = vperm.xlu1 %8645, %v48_v1   ;;  %113 = vperm.xlu0 %8644, %v46_v2  }
   0x4   :  { %18 = vsyncpa [#allocation3], 0  ;;  %v54_v7 = vld [vmem:[%s16014_s0 + $0x40] sm:$0xff]  ;;  %v53_v8 = vld [vmem:[%s16014_s0 + $0x38] sm:$0xff]  ;;  %vm697_vm0 = vcmask 1046528   ;;  %vm1087_vm1 = vcmask 1045504  }
   0x5   :  { %v52_v9 = vld [vmem:[%s16014_s0 + $0x30] sm:$0xff]  ;;  %v57_v10 = vld [vmem:[%s16014_s0 + $0x58] sm:$0xff]  ;;  %v55_v12 = vld [vmem:[%s16014_s0 + $0x48] sm:$0xff]  ;;  %vm3275_vm2 = vsmask.f32 7424  ;;  %vm3542_vm3 = vcmask 130048  }
   0x6   :  { %v56_v11 = vld [vmem:[%s16014_s0 + $0x50] sm:$0xff]  ;;  %v59_v14 = vld [vmem:[%s16014_s0 + $0x68] sm:$0xff]  ;;  %v58_v15 = vld [vmem:[%s16014_s0 + $0x60] sm:$0xff]  ;;  %vm6465_vm4 = vcmask 261120   ;;  %vm7366_vm8 = vcmask 1041409   ;;  %s8722_s17 = smov [#allocation2]  }
   0x7   :  { %v60_v13 = vld [vmem:[%s16014_s0 + $0x70] sm:$0xff]  ;;  %v63_v16 = vld [vmem:[%s16014_s0 + $0x88] sm:$0xff]  ;;  %v62_v17 = vld [vmem:[%s16014_s0 + $0x80] sm:$0xff]  ;;  %s8014_s18 = sshll.u32 %s8722_s17, 4  ;;  %s8016_s21 = sshll.u32 %s16027_s13, 4  ;;  %vm8007_vm9 = vcmask 74752   ;;  %s8015_s18 = int_to_ptr.vmem [resolvable:$true] %s8014_s18  ;;  %s8017_s21 = int_to_ptr.hbm [resolvable:$true] %s8016_s21 }
   0x8   :  { %v61_v18 = vld [vmem:[%s16014_s0 + $0x78] sm:$0xff]  ;;  %v83_v19 = vld [vmem:[%s16014_s0 + $0x128] sm:$0xff]  ;;  %v82_v20 = vld [vmem:[%s16014_s0 + $0x120] sm:$0xff] }
   0x9   :  { %v64_v21 = vld [vmem:[%s16014_s0 + $0x90] sm:$0xff]  ;;  %v86_v22 = vld [vmem:[%s16014_s0 + $0x140] sm:$0xff]  ;;  %v85_v23 = vld [vmem:[%s16014_s0 + $0x138] sm:$0xff] }
   0xa   :  { %138 = vperm.xlu2 %8646, %v51_v4   ;;  %v84_v24 = vld [vmem:[%s16014_s0 + $0x130] sm:$0xff]  ;;  %v98_v25 = vld [vmem:[%s16014_s0 + $0x1a0] sm:$0xff]  ;;  %v97_v26 = vld [vmem:[%s16014_s0 + $0x198] sm:$0xff] }
   0xb   :  { %128 = vperm.xlu1 %8645, %v49_v5   ;;  %118 = vperm.xlu0 %8644, %v47_v6   ;;  %v96_v27 = vld [vmem:[%s16014_s0 + $0x190] sm:$0xff]  ;;  %v65_v28 = vld [vmem:[%s16014_s0 + $0x98] sm:$0xff]  ;;  %v99_v30 = vld [vmem:[%s16014_s0 + $0x1a8] sm:$0xff] }
   0xc   :  { %v100_v29 = vld [vmem:[%s16014_s0 + $0x1b0] sm:$0xff]  ;;  %v87_v32 = vld [vmem:[%s16014_s0 + $0x148] sm:$0xff]  ;;  %v66_v33 = vld [vmem:[%s16014_s0 + $0xa0] sm:$0xff] }
   0xd   :  { %v88_v31 = vld [vmem:[%s16014_s0 + $0x150] sm:$0xff]  ;;  %v89_v34 = vld [vmem:[%s16014_s0 + $0x158] sm:$0xff]  ;;  %v102_v35 = vld [vmem:[%s16014_s0 + $0x1c0] sm:$0xff] }
   0xe   :  { %v101_v36 = vld [vmem:[%s16014_s0 + $0x1b8] sm:$0xff]  ;;  %v104_v38 = vld [vmem:[%s16014_s0 + $0x1d0] sm:$0xff]  ;;  %v103_v39 = vld [vmem:[%s16014_s0 + $0x1c8] sm:$0xff] }
   0xf   :  { %v90_v40 = vld [vmem:[%s16014_s0 + $0x160] sm:$0xff]  ;;  %v91_v45 = vld [vmem:[%s16014_s0 + $0x168] sm:$0xff]  ;;  %v68_v47 = vld [vmem:[%s16014_s0 + $0xb0] sm:$0xff] }
  0x10   :  { %v8916_v41 = vld [vmem:[%s16015_s1 + $0x1] ss:$0 sm:$0xff]  ;;  %v8930_v46 = vld [vmem:[%s16015_s1 + $0x2] ss:$0 sm:$0xff]  ;;  %v67_v48 = vld [vmem:[%s16014_s0 + $0xa8] sm:$0xff] }
  0x11   :  { %v8941_v49 = vld [vmem:[%s16015_s1 + $0x7] ss:$0 sm:$0xff]  ;;  %v8946_v50 = vld [vmem:[%s16015_s1 + $0x4] ss:$0 sm:$0xff]  ;;  %v8951_v51 = vld [vmem:[%s16015_s1 + $0x5] ss:$0 sm:$0xff] }
  0x12   :  { %153 = vperm.xlu2 %8646, %v54_v7   ;;  %v8964_v56 = vld [vmem:[%s16015_s1] ss:$0 sm:$0xff]  ;;  %v8969_v57 = vld [vmem:[%s16015_s1 + $0x8] ss:$0 sm:$0xff]  ;;  %v8988_v1 = vld [vmem:[%s16015_s1 + $0x3] ss:$0 sm:$0xff] }
  0x13   :  { %148 = vperm.xlu1 %8645, %v53_v8   ;;  %143 = vperm.xlu0 %8644, %v52_v9   ;;  %v8997_v5 = vld [vmem:[%s16015_s1 + $0x6] ss:$0 sm:$0xff] }
  0x14   :  { %v106_v9 = vld [vmem:[%s16014_s0 + $0x1e0] sm:$0xff] }
  0x1a   :  { %168 = vperm.xlu2 %8646, %v57_v10  }
  0x1b   :  { %163 = vperm.xlu1 %8645, %v56_v11   ;;  %158 = vperm.xlu0 %8644, %v55_v12  }
  0x22   :  { %183 = vperm.xlu2 %8646, %v60_v13  }
  0x23   :  { %178 = vperm.xlu1 %8645, %v59_v14   ;;  %173 = vperm.xlu0 %8644, %v58_v15   ;;  %v105_v14 = vld [vmem:[%s16014_s0 + $0x1d8] sm:$0xff]  ;;  %v92_v15 = vld [vmem:[%s16014_s0 + $0x170] sm:$0xff] }
  0x2a   :  { %198 = vperm.xlu2 %8646, %v63_v16  }
  0x2b   :  { %193 = vperm.xlu1 %8645, %v62_v17   ;;  %188 = vperm.xlu0 %8644, %v61_v18  }
  0x32   :  { %298 = vperm.xlu2 %8646, %v83_v19  }
  0x33   :  { %293 = vperm.xlu1 %8645, %v82_v20   ;;  %203 = vperm.xlu0 %8644, %v64_v21  }
  0x3a   :  { %313 = vperm.xlu2 %8646, %v86_v22  }
  0x3b   :  { %308 = vperm.xlu1 %8645, %v85_v23   ;;  %303 = vperm.xlu0 %8644, %v84_v24  }
  0x42   :  { %373 = vperm.xlu2 %8646, %v98_v25  }
  0x43   :  { %368 = vperm.xlu1 %8645, %v97_v26   ;;  %363 = vperm.xlu0 %8644, %v96_v27  }
  0x4a   :  { %208 = vperm.xlu2 %8646, %v65_v28  }
  0x4b   :  { %383 = vperm.xlu1 %8645, %v100_v29   ;;  %378 = vperm.xlu0 %8644, %v99_v30  }
  0x52   :  { %323 = vperm.xlu2 %8646, %v88_v31  }
  0x53   :  { %318 = vperm.xlu1 %8645, %v87_v32   ;;  %213 = vperm.xlu0 %8644, %v66_v33  }
  0x5a   :  { %328 = vperm.xlu2 %8646, %v89_v34  }
  0x5b   :  { %393 = vperm.xlu1 %8645, %v102_v35   ;;  %388 = vperm.xlu0 %8644, %v101_v36  }
  0x5c   :  { %v134_v37 = vpop.permute.xlu2 %133 }
  0x5d   :  { %v8922_v44 = vmul.f32 %v8916_v41, %v134_v37  ;;  %v8959_v55 = vmul.f32 %v8930_v46, %v134_v37  ;;  %v8978_v61 = vmul.f32 %v8946_v50, %v134_v37  ;;  %v436_v62 = vmul.f32 %v8964_v56, %v134_v37 }
  0x5e   :  { %v2365_v63 = vmul.f32 %v8941_v49, %v134_v37  ;;  %v8991_v2 = vmul.f32 %v8951_v51, %v134_v37  ;;  %v9006_v8 = vmul.f32 %v8969_v57, %v134_v37  ;;  %v9012_v10 = vmul.f32 %v8988_v1, %v134_v37 }
  0x5f   :  { %v16037_v54 = vrot.slane %v8922_v44, 1  ;;  %v16036_v7 = vrot.slane %v8959_v55, 2  ;;  %v16035_v16 = vrot.slane %v8978_v61, 1  ;;  %v9040_v24 = vmul.f32 %v8997_v5, %v134_v37 }
  0x60   :  { %16505 = vst [vmem:[#allocation6_spill] sm:$0xff] %v9006_v8  ;;  %v16034_v18 = vrot.slane %v8991_v2, 2  ;;  %v2487_v19 = vrot.slane %v2365_v63, 1 }
  0x62   :  { %403 = vperm.xlu2 %8646, %v104_v38  }
  0x63   :  { %398 = vperm.xlu1 %8645, %v103_v39   ;;  %333 = vperm.xlu0 %8644, %v90_v40  }
  0x64   :  { %v139_v42 = vpop.permute.xlu2 %138 }
  0x65   :  { %v8919_v43 = vmul.f32 %v8916_v41, %v139_v42  ;;  %v8955_v53 = vmul.f32 %v8930_v46, %v139_v42  ;;  %v8972_v58 = vmul.f32 %v8946_v50, %v139_v42  ;;  %v8975_v59 = vmul.f32 %v8951_v51, %v139_v42 }
  0x66   :  { %v8983_v0 = vmul.f32 %v8941_v49, %v139_v42  ;;  %v9017_v13 = vmul.f32 %v8969_v57, %v139_v42  ;;  %v9029_v21 = vmul.f32 %v8964_v56, %v139_v42  ;;  %v9057_v32 = vmul.f32 %v8988_v1, %v139_v42 }
  0x67   :  { %v16033_v52 = vrot.slane %v8919_v43, 1  ;;  %v16031_v4 = vrot.slane %v8955_v53, 2  ;;  %v16032_v11 = vrot.slane %v8972_v58, 1  ;;  %v16030_v12 = vrot.slane %v8975_v59, 2 }
  0x68   :  { %16504 = vst [vmem:[#allocation5_spill] sm:$0xff] %v8983_v0  ;;  %v16029_v20 = vrot.slane %v8983_v0, 1  ;;  %v9060_v33 = vmul.f32 %v8997_v5, %v139_v42  ;;  %v108_v0 = vld [vmem:[%s16014_s0 + $0x1f0] sm:$0xff] }
  0x69   :  { %v708_v6 = vsel %vm697_vm0, %v16037_v54, %v16033_v52  ;;  %16506 = vst [vmem:[#allocation7_spill] sm:$0xff] %v9017_v13  ;;  %v1098_v23 = vsel %vm1087_vm1, %v16036_v7, %v16031_v4  ;;  %v9069_v36 = vsel %vm697_vm0, %v16035_v16, %v16032_v11  ;;  %v9076_v37 = vsel %vm1087_vm1, %v16034_v18, %v16030_v12 }
  0x6a   :  { %338 = vperm.xlu2 %8646, %v91_v45   ;;  %v895_v17 = vadd.f32 %v708_v6, %v436_v62  ;;  %v9081_v38 = vsel %vm697_vm0, %v2487_v19, %v16029_v20 }
  0x6b   :  { %223 = vperm.xlu1 %8645, %v68_v47   ;;  %218 = vperm.xlu0 %8644, %v67_v48  }
  0x6c   :  { %v154_v60 = vpop.permute.xlu2 %153  ;;  %v9062_v35 = vadd.f32 %v1098_v23, %v895_v17  ;;  %v69_v23 = vld [vmem:[%s16014_s0 + $0xb8] sm:$0xff] }
  0x6d   :  { %v9032_v22 = vmul.f32 %v8916_v41, %v154_v60  ;;  %v9044_v26 = vmul.f32 %v8930_v46, %v154_v60  ;;  %v9047_v27 = vmul.f32 %v8946_v50, %v154_v60  ;;  %v9050_v28 = vmul.f32 %v8951_v51, %v154_v60 }
  0x6e   :  { %v9054_v30 = vmul.f32 %v8941_v49, %v154_v60  ;;  %v9084_v39 = vmul.f32 %v8964_v56, %v154_v60  ;;  %v9088_v42 = vmul.f32 %v8988_v1, %v154_v60  ;;  %v9091_v45 = vmul.f32 %v8997_v5, %v154_v60 }
  0x6f   :  { %16507 = vst [vmem:[#allocation8_spill] sm:$0xff] %v9050_v28  ;;  %v9097_v6 = vmul.f32 %v8969_v57, %v154_v60  ;;  %v70_v60 = vld [vmem:[%s16014_s0 + $0xc0] sm:$0xff] }
  0x70   :  { %16508 = vst [vmem:[#allocation9_spill] sm:$0xff] %v9054_v30 }
  0x71   :  { %16509 = vst [vmem:[#allocation10_spill] sm:$0xff] %v9084_v39  ;;  %v16526_v39 = vrot.slane %v8922_v44, 1 }
  0x72   :  { %413 = vperm.xlu2 %8646, %v106_v9   ;;  %16510 = vst [vmem:[#allocation11_spill] sm:$0xff] %v9091_v45  ;;  %v93_v9 = vld [vmem:[%s16014_s0 + $0x178] sm:$0xff] }
  0x73   :  { %408 = vperm.xlu1 %8645, %v105_v14   ;;  %343 = vperm.xlu0 %8644, %v92_v15   ;;  %16511 = vst [vmem:[#allocation12_spill] sm:$0xff] %v9097_v6 }
  0x74   :  { %v169_v31 = vpop.permute.xlu2 %168 }
  0x75   :  { %v124_v34 = vpop.permute.xlu1 %123  ;;  %v114_v47 = vpop.permute.xlu0 %113  ;;  %v9104_v15 = vmul.f32 %v8916_v41, %v169_v31  ;;  %v9107_v17 = vmul.f32 %v8930_v46, %v169_v31  ;;  %v9110_v19 = vmul.f32 %v8946_v50, %v169_v31  ;;  %v9119_v3 = vmul.f32 %v8964_v56, %v169_v31 }
  0x76   :  { %v9122_v25 = vmul.f32 %v8951_v51, %v169_v31  ;;  %v9125_v29 = vmul.f32 %v8941_v49, %v169_v31  ;;  %v9128_v20 = vmul.f32 %v8969_v57, %v169_v31  ;;  %v9131_v14 = vmul.f32 %v8988_v1, %v169_v31 }
  0x77   :  { %16512 = vst [vmem:[#allocation13_spill] sm:$0xff] %v9104_v15  ;;  %v9134_v63 = vmul.f32 %v8997_v5, %v169_v31  ;;  %v9137_v48 = vmul.f32 %v8930_v46, %v124_v34  ;;  %v9140_v12 = vmul.f32 %v8946_v50, %v124_v34  ;;  %v9144_v11 = vmul.f32 %v8951_v51, %v124_v34 }
  0x78   :  { %16513 = vst [vmem:[#allocation14_spill] sm:$0xff] %v9107_v17  ;;  %v9147_v62 = vmul.f32 %v8916_v41, %v114_v47  ;;  %v9150_v52 = vmul.f32 %v8930_v46, %v114_v47  ;;  %v9160_v8 = vmul.f32 %v8988_v1, %v124_v34  ;;  %v432_v40 = vmul.f32 %v8964_v56, %v114_v47 }
  0x79   :  { %16514 = vst [vmem:[#allocation15_spill] sm:$0xff] %v9110_v19  ;;  %v1602_v31 = vrot.slane %v9140_v12, 1  ;;  %v569_v18 = vmul.f32 %v8916_v41, %v124_v34  ;;  %v1983_v13 = vrot.slane %v9144_v11, 2  ;;  %v16527_v19 = vrot.slane %v9137_v48, 2 }
  0x7a   :  { %16515 = vst [vmem:[#allocation16_spill] sm:$0xff] %v9119_v3  ;;  %348 = vperm.xlu2 %8646, %v93_v9   ;;  %v434_v9 = vmul.f32 %v8964_v56, %v124_v34  ;;  %v698_v16 = vrot.slane %v9147_v62, 1  ;;  %v1088_v7 = vrot.slane %v9150_v52, 2  ;;  %v107_v52 = vld [vmem:[%s16014_s0 + $0x1e8] sm:$0xff]  ;;  %v94_v62 = vld [vmem:[%s16014_s0 + $0x180] sm:$0xff] }
  0x7b   :  { %16516 = vst [vmem:[#allocation17_spill] sm:$0xff] %v9122_v25  ;;  %233 = vperm.xlu1 %8645, %v70_v60   ;;  %228 = vperm.xlu0 %8644, %v69_v23  }
  0x7c   :  { %16517 = vst [vmem:[#allocation18_spill] sm:$0xff] %v9125_v29  ;;  %v184_v4 = vpop.permute.xlu2 %183 }
  0x7d   :  { %16518 = vst [vmem:[#allocation19_spill] sm:$0xff] %v9128_v20  ;;  %v129_v60 = vpop.permute.xlu1 %128  ;;  %v9170_v54 = vmul.f32 %v8916_v41, %v184_v4  ;;  %v9176_v23 = vmul.f32 %v8964_v56, %v184_v4  ;;  %v9179_v12 = vmul.f32 %v8930_v46, %v184_v4  ;;  %v9182_v34 = vmul.f32 %v8988_v1, %v184_v4  ;;  %v119_v47 = vpop.permute.xlu0 %118 }
  0x7e   :  { %16519 = vst [vmem:[#allocation20_spill] sm:$0xff] %v9131_v14  ;;  %v570_v11 = vmul.f32 %v8916_v41, %v129_v60  ;;  %v960_v3 = vmul.f32 %v8930_v46, %v129_v60  ;;  %v9200_v25 = vmul.f32 %v8997_v5, %v184_v4  ;;  %v1858_v6 = vmul.f32 %v8951_v51, %v129_v60 }
  0x7f   :  { %16520 = vst [vmem:[#allocation21_spill] sm:$0xff] %v9134_v63  ;;  %v9192_v63 = vmul.f32 %v8946_v50, %v184_v4  ;;  %v701_v14 = vrot.slane %v569_v18, 1  ;;  %v9205_v45 = vmul.f32 %v8941_v49, %v184_v4  ;;  %v568_v30 = vmul.f32 %v8916_v41, %v119_v47 }
  0x80   :  { %16521 = vst [vmem:[#allocation22_spill] sm:$0xff] %v9170_v54  ;;  %v703_v17 = vrot.slane %v570_v11, 1  ;;  %v1093_v29 = vrot.slane %v960_v3, 2  ;;  %v9215_v18 = vmul.f32 %v8969_v57, %v184_v4  ;;  %v435_v20 = vmul.f32 %v8964_v56, %v129_v60 }
  0x81   :  { %16522 = vst [vmem:[#allocation23_spill] sm:$0xff] %v9176_v23  ;;  %v9195_v23 = vmul.f32 %v8951_v51, %v184_v4  ;;  %v699_v28 = vrot.slane %v568_v30, 1  ;;  %v76_v4 = vld [vmem:[%s16014_s0 + $0xf0] sm:$0xff] }
  0x82   :  { %16523 = vst [vmem:[#allocation24_spill] sm:$0xff] %v9179_v12  ;;  %423 = vperm.xlu2 %8646, %v108_v0   ;;  %v706_v11 = vsel %vm697_vm0, %v703_v17, %v16526_v39  ;;  %v958_v0 = vmul.f32 %v8930_v46, %v119_v47  ;;  %v1094_v44 = vsel %vm1087_vm1, %v16527_v19, %v1093_v29  ;;  %v1984_v39 = vrot.slane %v1858_v6, 2 }
  0x83   :  { %16524 = vst [vmem:[#allocation25_spill] sm:$0xff] %v9182_v34  ;;  %v1477_v34 = vmul.f32 %v8946_v50, %v129_v60  ;;  %418 = vperm.xlu1 %8645, %v107_v52   ;;  %353 = vperm.xlu0 %8644, %v94_v62   ;;  %v894_v12 = vadd.f32 %v706_v11, %v435_v20  ;;  %v74_v20 = vld [vmem:[%s16014_s0 + $0xe0] sm:$0xff] }
  0x84   :  { %16525 = vst [vmem:[#allocation26_spill] sm:$0xff] %v9200_v25  ;;  %v704_v25 = vsel %vm697_vm0, %v701_v14, %v703_v17  ;;  %v1089_v15 = vrot.slane %v958_v0, 2  ;;  %v1348_v62 = vmul.f32 %v8988_v1, %v129_v60  ;;  %v433_v52 = vmul.f32 %v8964_v56, %v119_v47  ;;  %v199_v19 = vpop.permute.xlu2 %198 }
  0x85   :  { %v1603_v3 = vrot.slane %v1477_v34, 1  ;;  %v893_v54 = vadd.f32 %v704_v25, %v434_v9  ;;  %v16528_v25 = vrot.slane %v8959_v55, 2  ;;  %v700_v55 = vsel %vm697_vm0, %v698_v16, %v699_v28 }
  0x86   :  { %v16529_v60 = vrot.slane %v8978_v61, 1  ;;  %v1985_v11 = vsel %vm1087_vm1, %v1983_v13, %v1984_v39  ;;  %v891_v0 = vadd.f32 %v700_v55, %v432_v40  ;;  %v9255_v13 = vmul.f32 %v8930_v46, %v199_v19  ;;  %v149_v40 = vpop.permute.xlu1 %148 }
  0x87   :  { %v1283_v17 = vadd.f32 %v1094_v44, %v893_v54  ;;  %v1096_v9 = vsel %vm1087_vm1, %v1093_v29, %v16528_v25  ;;  %v75_v54 = vld [vmem:[%s16014_s0 + $0xe8] sm:$0xff]  ;;  %v1604_v6 = vsel %vm697_vm0, %v1602_v31, %v1603_v3  ;;  %v702_v29 = vsel %vm697_vm0, %v699_v28, %v701_v14 }
  0x88   :  { %v1606_v47 = vsel %vm697_vm0, %v1603_v3, %v16529_v60  ;;  %v892_v44 = vadd.f32 %v702_v29, %v433_v52  ;;  %v1284_v34 = vadd.f32 %v1096_v9, %v894_v12  ;;  %v16530_v31 = vrot.slane %v9137_v48, 2  ;;  %16531 = vst [vmem:[#allocation27_spill] sm:$0xff] %v9255_v13 }
  0x89   :  { %v1412_v30 = vadd.f32 %v9012_v10, %v1283_v17  ;;  %v1090_v10 = vsel %vm1087_vm1, %v1088_v7, %v1089_v15  ;;  %v9252_v14 = vmul.f32 %v8916_v41, %v199_v19  ;;  %v16532_v12 = vrot.slane %v8991_v2, 2 }
  0x8a   :  { %263 = vperm.xlu2 %8646, %v76_v4   ;;  %v1092_v16 = vsel %vm1087_vm1, %v1089_v15, %v16530_v31  ;;  %v1281_v28 = vadd.f32 %v1090_v10, %v891_v0  ;;  %v9262_v48 = vmul.f32 %v8964_v56, %v199_v19  ;;  %v9265_v15 = vmul.f32 %v8988_v1, %v199_v19  ;;  %v144_v31 = vpop.permute.xlu0 %143 }
  0x8b   :  { %258 = vperm.xlu1 %8645, %v75_v54   ;;  %253 = vperm.xlu0 %8644, %v74_v20   ;;  %v1282_v61 = vadd.f32 %v1092_v16, %v892_v44  ;;  %v1793_v3 = vadd.f32 %v9069_v36, %v1412_v30  ;;  %v1987_v7 = vsel %vm1087_vm1, %v1984_v39, %v16532_v12 }
  0x8c   :  { %16533 = vst [vmem:[#allocation28_spill] sm:$0xff] %v9262_v48  ;;  %v1410_v52 = vadd.f32 %v9160_v8, %v1281_v28  ;;  %v9269_v4 = vmul.f32 %v8946_v50, %v199_v19  ;;  %v9272_v9 = vmul.f32 %v8951_v51, %v199_v19  ;;  %v9275_v36 = vadd.f32 %v9057_v32, %v1284_v34 }
  0x8d   :  { %v1411_v17 = vadd.f32 %v1348_v62, %v1282_v61  ;;  %v9278_v2 = vmul.f32 %v8941_v49, %v199_v19  ;;  %v9281_v39 = vmul.f32 %v8969_v57, %v199_v19  ;;  %v574_v54 = vmul.f32 %v8916_v41, %v149_v40 }
  0x8e   :  { %16534 = vst [vmem:[#allocation29_spill] sm:$0xff] %v9272_v9  ;;  %v9287_v20 = vmul.f32 %v8997_v5, %v199_v19  ;;  %v9290_v30 = vmul.f32 %v8930_v46, %v149_v40  ;;  %v9293_v32 = vadd.f32 %v9076_v37, %v1793_v3  ;;  %v1791_v34 = vadd.f32 %v1604_v6, %v1410_v52  ;;  %v71_v19 = vld [vmem:[%s16014_s0 + $0xc8] sm:$0xff]  ;;  %v78_v37 = vld [vmem:[%s16014_s0 + $0x100] sm:$0xff]  ;;  %v77_v6 = vld [vmem:[%s16014_s0 + $0xf8] sm:$0xff] }
  0x8f   :  { %16535 = vst [vmem:[#allocation30_spill] sm:$0xff] %v9278_v2  ;;  %v1792_v55 = vadd.f32 %v1606_v47, %v1411_v17  ;;  %v711_v29 = vrot.slane %v574_v54, 1  ;;  %v439_v44 = vmul.f32 %v8964_v56, %v149_v40  ;;  %v1481_v10 = vmul.f32 %v8946_v50, %v149_v40 }
  0x90   :  { %16536 = vst [vmem:[#allocation31_spill] sm:$0xff] %v9281_v39  ;;  %v16538_v28 = vrot.slane %v9032_v22, 1  ;;  %v9314_v3 = vmul.f32 %v8951_v51, %v149_v40  ;;  %v9320_v17 = vmul.f32 %v8988_v1, %v149_v40  ;;  %v9323_v54 = vmul.f32 %v8997_v5, %v149_v40 }
  0x91   :  { %16537 = vst [vmem:[#allocation32_spill] sm:$0xff] %v9287_v20  ;;  %v2172_v0 = vadd.f32 %v1985_v11, %v1791_v34  ;;  %v2173_v62 = vadd.f32 %v1987_v7, %v1792_v55  ;;  %v963_v16 = vmul.f32 %v8930_v46, %v144_v31  ;;  %v1611_v47 = vrot.slane %v1481_v10, 1 }
  0x92   :  { %v714_v61 = vsel %vm697_vm0, %v711_v29, %v16538_v28  ;;  %238 = vperm.xlu2 %8646, %v71_v19   ;;  %v573_v28 = vmul.f32 %v8916_v41, %v144_v31  ;;  %v1351_v19 = vmul.f32 %v8988_v1, %v144_v31  ;;  %v9332_v60 = vmul.f32 %v8941_v49, %v149_v40 }
  0x93   :  { %273 = vperm.xlu1 %8645, %v78_v37   ;;  %v9316_v12 = vadd.f32 %v714_v61, %v439_v44  ;;  %268 = vperm.xlu0 %8644, %v77_v6   ;;  %v1480_v44 = vmul.f32 %v8946_v50, %v144_v31  ;;  %v1861_v37 = vmul.f32 %v8951_v51, %v144_v31  ;;  %v1099_v6 = vrot.slane %v963_v16, 2 }
  0x94   :  { %v709_v8 = vrot.slane %v573_v28, 1  ;;  %v9335_v11 = vmul.f32 %v8969_v57, %v149_v40  ;;  %v438_v7 = vmul.f32 %v8964_v56, %v144_v31  ;;  %v1414_v34 = vadd.f32 %v1351_v19, %v9062_v35  ;;  %v299_v19 = vpop.permute.xlu2 %298 }
  0x95   :  { %v1609_v55 = vrot.slane %v1480_v44, 1  ;;  %v2299_v10 = vadd.f32 %v9040_v24, %v2172_v0  ;;  %v9341_v25 = vadd.f32 %v9060_v33, %v2173_v62  ;;  %v16541_v61 = vrot.slane %v8919_v43, 1  ;;  %v16562_v24 = vld [vmem:[#allocation13_spill] sm:$0xff] }
  0x96   :  { %16539 = vst [vmem:[#allocation33_spill] sm:$0xff] %v9335_v11  ;;  %v712_v28 = vsel %vm697_vm0, %v709_v8, %v711_v29  ;;  %v16542_v16 = vrot.slane %v9047_v27, 1  ;;  %v1990_v35 = vrot.slane %v1861_v37, 2  ;;  %v16543_v62 = vrot.slane %v9290_v30, 2 }
  0x97   :  { %16540 = vst [vmem:[#allocation34_spill] sm:$0xff] %v9341_v25  ;;  %v710_v52 = vsel %vm697_vm0, %v16541_v61, %v709_v8  ;;  %v897_v48 = vadd.f32 %v712_v28, %v438_v7  ;;  %v1612_v20 = vsel %vm697_vm0, %v1609_v55, %v1611_v47  ;;  %v16544_v0 = vrot.slane %v8972_v58, 1 }
  0x98   :  { %v1614_v40 = vsel %vm697_vm0, %v1611_v47, %v16542_v16  ;;  %v896_v33 = vadd.f32 %v710_v52, %v9029_v21  ;;  %v1102_v43 = vsel %vm1087_vm1, %v1099_v6, %v16543_v62  ;;  %v1795_v44 = vadd.f32 %v1612_v20, %v1414_v34 }
  0x99   :  { %v1610_v8 = vsel %vm697_vm0, %v16544_v0, %v1609_v55  ;;  %v1287_v29 = vadd.f32 %v1102_v43, %v897_v48  ;;  %v9360_v61 = vmul.f32 %v8941_v49, %v144_v31  ;;  %v9363_v47 = vmul.f32 %v8969_v57, %v144_v31 }
  0x9a   :  { %v9366_v37 = vadd.f32 %v9081_v38, %v2299_v10  ;;  %v2240_v52 = vmul.f32 %v8997_v5, %v144_v31  ;;  %v9371_v7 = vmul.f32 %v8916_v41, %v299_v19  ;;  %v16548_v58 = vrot.slane %v8955_v53, 2  ;;  %v9387_v10 = vpop.permute.xlu1 %163 }
  0x9b   :  { %16545 = vst [vmem:[#allocation35_spill] sm:$0xff] %v9363_v47  ;;  %v9377_v20 = vadd.f32 %v9088_v42, %v1287_v29  ;;  %v9380_v34 = vadd.f32 %v1610_v8, %v9275_v36  ;;  %v16549_v38 = vrot.slane %v8975_v59, 2  ;;  %v16550_v28 = vrot.slane %v9314_v3, 2  ;;  %v16613_v47 = vld [vmem:[#allocation16_spill] sm:$0xff] }
  0x9c   :  { %16546 = vst [vmem:[#allocation36_spill] sm:$0xff] %v9366_v37  ;;  %v1100_v48 = vsel %vm1087_vm1, %v16548_v58, %v1099_v6  ;;  %v9393_v6 = vadd.f32 %v2240_v52, %v9293_v32  ;;  %v9396_v42 = vmul.f32 %v8930_v46, %v299_v19  ;;  %v9403_v62 = vmul.f32 %v8946_v50, %v299_v19 }
  0x9d   :  { %16547 = vst [vmem:[#allocation37_spill] sm:$0xff] %v9371_v7  ;;  %v9385_v55 = vsel %vm1087_vm1, %v16549_v38, %v1990_v35  ;;  %v1286_v31 = vadd.f32 %v1100_v48, %v896_v33  ;;  %v1993_v53 = vsel %vm1087_vm1, %v1990_v35, %v16550_v28  ;;  %v9406_v33 = vmul.f32 %v8964_v56, %v299_v19 }
  0x9e   :  { %16551 = vst [vmem:[#allocation38_spill] sm:$0xff] %v9393_v6  ;;  %v9398_v36 = vadd.f32 %v1993_v53, %v1795_v44  ;;  %v9410_v32 = vmul.f32 %v8988_v1, %v299_v19  ;;  %v577_v43 = vmul.f32 %v8916_v41, %v9387_v10  ;;  %v9415_v0 = vmul.f32 %v8951_v51, %v299_v19 }
  0x9f   :  { %16552 = vst [vmem:[#allocation39_spill] sm:$0xff] %v9396_v42  ;;  %v9418_v8 = vmul.f32 %v8997_v5, %v299_v19  ;;  %v9421_v29 = vmul.f32 %v8941_v49, %v299_v19  ;;  %v9425_v44 = vmul.f32 %v8930_v46, %v9387_v10  ;;  %v9430_v48 = vmul.f32 %v8946_v50, %v9387_v10 }
  0xa0   :  { %16553 = vst [vmem:[#allocation40_spill] sm:$0xff] %v9403_v62  ;;  %v717_v58 = vrot.slane %v577_v43, 1  ;;  %v9434_v38 = vmul.f32 %v8951_v51, %v9387_v10  ;;  %v442_v53 = vmul.f32 %v8964_v56, %v9387_v10  ;;  %v9441_v35 = vmul.f32 %v8941_v49, %v9387_v10 }
  0xa1   :  { %16554 = vst [vmem:[#allocation41_spill] sm:$0xff] %v9406_v33  ;;  %v16559_v52 = vrot.slane %v9044_v26, 2  ;;  %v16560_v43 = vrot.slane %v9290_v30, 2  ;;  %v9449_v16 = vmul.f32 %v8969_v57, %v299_v19  ;;  %v16563_v59 = vrot.slane %v16562_v24, 1  ;;  %v159_v33 = vpop.permute.xlu0 %158 }
  0xa2   :  { %16555 = vst [vmem:[#allocation42_spill] sm:$0xff] %v9410_v32  ;;  %v1415_v32 = vadd.f32 %v9320_v17, %v1286_v31  ;;  %v1617_v19 = vrot.slane %v9430_v48, 1  ;;  %v966_v31 = vmul.f32 %v8930_v46, %v159_v33  ;;  %v79_v48 = vld [vmem:[%s16014_s0 + $0x108] sm:$0xff]  ;;  %v16566_v7 = vrot.slane %v9314_v3, 2 }
  0xa3   :  { %16556 = vst [vmem:[#allocation43_spill] sm:$0xff] %v9415_v0  ;;  %v1104_v21 = vsel %vm1087_vm1, %v16560_v43, %v16559_v52  ;;  %v720_v28 = vsel %vm697_vm0, %v717_v58, %v16563_v59  ;;  %v9465_v59 = vmul.f32 %v8969_v57, %v9387_v10  ;;  %v441_v52 = vmul.f32 %v8964_v56, %v159_v33 }
  0xa4   :  { %16557 = vst [vmem:[#allocation44_spill] sm:$0xff] %v9418_v8  ;;  %v1288_v8 = vadd.f32 %v1104_v21, %v9316_v12  ;;  %v9458_v9 = vadd.f32 %v720_v28, %v442_v53  ;;  %v1796_v12 = vadd.f32 %v1614_v40, %v1415_v32  ;;  %v576_v21 = vmul.f32 %v8916_v41, %v159_v33  ;;  %v80_v53 = vld [vmem:[%s16014_s0 + $0x110] sm:$0xff]  ;;  %v16564_v32 = vld [vmem:[#allocation8_spill] sm:$0xff] }
  0xa5   :  { %16558 = vst [vmem:[#allocation45_spill] sm:$0xff] %v9421_v29  ;;  %v1354_v28 = vmul.f32 %v8988_v1, %v159_v33  ;;  %v72_v40 = vld [vmem:[%s16014_s0 + $0xd0] sm:$0xff]  ;;  %v16565_v43 = vrot.slane %v16564_v32, 2  ;;  %v1483_v17 = vmul.f32 %v8946_v50, %v159_v33  ;;  %v1864_v30 = vmul.f32 %v8951_v51, %v159_v33  ;;  %283 = vperm.xlu2 %8646, %v80_v53   ;;  %v8592_v29 = vld [vmem:[%s16017_s3 + $0x8] sm:$0xff] }
  0xa6   :  { %16561 = vst [vmem:[#allocation46_spill] sm:$0xff] %v9449_v16  ;;  %v715_v62 = vrot.slane %v576_v21, 1  ;;  %v1105_v13 = vrot.slane %v966_v31, 2  ;;  %278 = vperm.xlu1 %8645, %v79_v48   ;;  %243 = vperm.xlu0 %8644, %v72_v40   ;;  %v16567_v53 = vrot.slane %v9032_v22, 1  ;;  %v2243_v40 = vmul.f32 %v8997_v5, %v159_v33 }
  0xa7   :  { %v1995_v42 = vsel %vm1087_vm1, %v16566_v7, %v16565_v43  ;;  %v1417_v39 = vadd.f32 %v1354_v28, %v1288_v8  ;;  %v1615_v3 = vrot.slane %v1483_v17, 1  ;;  %v1996_v2 = vrot.slane %v1864_v30, 2  ;;  %3646 = vmatpush.bf16.msra.mxu0 %v8592_v29  ;;  %8639 = vmatpush.bf16.msra.mxu2 %v8592_v29  ;;  %v16570_v17 = vld [vmem:[#allocation10_spill] sm:$0xff] }
  0xa8   :  { %v2177_v0 = vadd.f32 %v1995_v42, %v1796_v12  ;;  %v2370_v7 = vmul.f32 %v8941_v49, %v159_v33  ;;  %v2741_v43 = vmul.f32 %v8969_v57, %v159_v33  ;;  %v716_v37 = vsel %vm697_vm0, %v16567_v53, %v715_v62  ;;  %8640 = vmatpush.bf16.msra.mxu3 %v8592_v29 }
  0xa9   :  { %v718_v11 = vsel %vm697_vm0, %v715_v62, %v717_v58  ;;  %v16568_v42 = vrot.slane %v9044_v26, 2  ;;  %v16569_v12 = vrot.slane %v9425_v44, 2  ;;  %v899_v21 = vadd.f32 %v716_v37, %v16570_v17  ;;  %8638 = vmatpush.bf16.msra.mxu1 %v8592_v29  ;;  %v16577_v17 = vld [vmem:[#allocation18_spill] sm:$0xff] }
  0xaa   :  { %v900_v31 = vadd.f32 %v718_v11, %v441_v52  ;;  %v16571_v28 = vrot.slane %v9047_v27, 1  ;;  %v1618_v48 = vsel %vm697_vm0, %v1615_v3, %v1617_v19  ;;  %v2869_v62 = vrot.slane %v9465_v59, 2  ;;  %v314_v27 = vpop.permute.xlu2 %313 }
  0xab   :  { %v1106_v8 = vsel %vm1087_vm1, %v16568_v42, %v1105_v13  ;;  %v1108_v30 = vsel %vm1087_vm1, %v1105_v13, %v16569_v12  ;;  %v1798_v58 = vadd.f32 %v1618_v48, %v1417_v39  ;;  %v16572_v42 = vrot.slane %v16564_v32, 2  ;;  %v16573_v12 = vld [vmem:[#allocation15_spill] sm:$0xff]  ;;  %v16575_v32 = vld [vmem:[#allocation9_spill] sm:$0xff] }
  0xac   :  { %v1616_v22 = vsel %vm697_vm0, %v16571_v28, %v1615_v3  ;;  %v1289_v53 = vadd.f32 %v1106_v8, %v899_v21  ;;  %v1290_v13 = vadd.f32 %v1108_v30, %v900_v31  ;;  %v2496_v37 = vrot.slane %v2370_v7, 1 }
  0xad   :  { %v1797_v26 = vadd.f32 %v1616_v22, %v9377_v20  ;;  %v1997_v11 = vsel %vm1087_vm1, %v16572_v42, %v1996_v2  ;;  %v1355_v29 = vmul.f32 %v8988_v1, %v9387_v10  ;;  %v2867_v59 = vrot.slane %v2741_v43, 2  ;;  %v16581_v43 = vld [vmem:[#allocation11_spill] sm:$0xff] }
  0xae   :  { %v16574_v20 = vrot.slane %v16573_v12, 1  ;;  %v2244_v33 = vmul.f32 %v8997_v5, %v9387_v10  ;;  %v2304_v8 = vadd.f32 %v2243_v40, %v2177_v0  ;;  %v16576_v30 = vrot.slane %v16575_v32, 1  ;;  %v9540_v0 = vpop.permute.xlu1 %178 }
  0xaf   :  { %v2178_v3 = vadd.f32 %v1997_v11, %v1797_v26  ;;  %v16578_v21 = vrot.slane %v16577_v17, 1  ;;  %v16579_v31 = vrot.slane %v9441_v35, 1  ;;  %v2303_v22 = vadd.f32 %v16581_v43, %v9398_v36  ;;  %v16584_v26 = vld [vmem:[#allocation19_spill] sm:$0xff]  ;;  %v16587_v11 = vld [vmem:[#allocation20_spill] sm:$0xff] }
  0xb0   :  { %v1620_v39 = vsel %vm697_vm0, %v1617_v19, %v16574_v20  ;;  %v2497_v7 = vsel %vm697_vm0, %v16576_v30, %v2496_v37  ;;  %v16582_v19 = vrot.slane %v9434_v38, 2  ;;  %v9538_v10 = vmul.f32 %v8916_v41, %v314_v27 }
  0xb1   :  { %v9530_v28 = vsel %vm697_vm0, %v16579_v31, %v16578_v21  ;;  %v16585_v40 = vrot.slane %v16584_v26, 2  ;;  %v9548_v20 = vadd.f32 %v16587_v11, %v1290_v13  ;;  %v9553_v36 = vmul.f32 %v8964_v56, %v314_v27 }
  0xb2   :  { %16580 = vst [vmem:[#allocation13_spill] sm:$0xff] %v9530_v28  ;;  %v1999_v48 = vsel %vm1087_vm1, %v1996_v2, %v16582_v19  ;;  %v9555_v21 = vadd.f32 %v2244_v33, %v2178_v3  ;;  %v16590_v2 = vmov %v16579_v31  ;;  %v9560_v43 = vadd.f32 %v2497_v7, %v2303_v22  ;;  %v16592_v19 = vld [vmem:[#allocation12_spill] sm:$0xff] }
  0xb3   :  { %16583 = vst [vmem:[#allocation8_spill] sm:$0xff] %v9538_v10  ;;  %v9545_v42 = vsel %vm1087_vm1, %v2869_v62, %v16585_v40  ;;  %v9550_v30 = vadd.f32 %v1999_v48, %v1798_v58  ;;  %v2499_v31 = vsel %vm697_vm0, %v2496_v37, %v16590_v2  ;;  %v16593_v52 = vrot.slane %v16592_v19, 2 }
  0xb4   :  { %16586 = vst [vmem:[#allocation10_spill] sm:$0xff] %v9545_v42  ;;  %v9567_v13 = vadd.f32 %v2499_v31, %v2304_v8  ;;  %v9570_v58 = vmul.f32 %v8930_v46, %v314_v27  ;;  %v9573_v48 = vmul.f32 %v8946_v50, %v314_v27  ;;  %v580_v35 = vmul.f32 %v8916_v41, %v9540_v0 }
  0xb5   :  { %16588 = vst [vmem:[#allocation15_spill] sm:$0xff] %v9553_v36  ;;  %v9565_v40 = vsel %vm1087_vm1, %v16593_v52, %v2867_v59  ;;  %v9578_v37 = vsel %vm1087_vm1, %v2867_v59, %v2869_v62  ;;  %v9582_v33 = vmul.f32 %v8951_v51, %v314_v27  ;;  %v9585_v52 = vmul.f32 %v8941_v49, %v314_v27  ;;  %v16604_v36 = vld [vmem:[#allocation22_spill] sm:$0xff] }
  0xb6   :  { %16589 = vst [vmem:[#allocation9_spill] sm:$0xff] %v9555_v21  ;;  %v9588_v8 = vmul.f32 %v8988_v1, %v314_v27  ;;  %v9591_v7 = vmul.f32 %v8969_v57, %v314_v27  ;;  %v723_v22 = vrot.slane %v580_v35, 1  ;;  %v9595_v11 = vmul.f32 %v8930_v46, %v9540_v0  ;;  %v16609_v35 = vld [vmem:[#allocation17_spill] sm:$0xff] }
  0xb7   :  { %16591 = vst [vmem:[#allocation18_spill] sm:$0xff] %v9560_v43  ;;  %v9598_v62 = vmul.f32 %v8997_v5, %v314_v27  ;;  %v445_v59 = vmul.f32 %v8964_v56, %v9540_v0  ;;  %v1487_v2 = vmul.f32 %v8946_v50, %v9540_v0  ;;  %v9606_v31 = vmul.f32 %v8951_v51, %v9540_v0  ;;  %v16606_v27 = vld [vmem:[#allocation14_spill] sm:$0xff] }
  0xb8   :  { %16594 = vst [vmem:[#allocation11_spill] sm:$0xff] %v9565_v40  ;;  %v16605_v42 = vrot.slane %v16604_v36, 1  ;;  %v16608_v21 = vrot.slane %v9425_v44, 2  ;;  %v16610_v40 = vrot.slane %v16609_v35, 2  ;;  %v16615_v25 = vrot.slane %v9595_v11, 2 }
  0xb9   :  { %16595 = vst [vmem:[#allocation19_spill] sm:$0xff] %v9567_v13  ;;  %v1623_v44 = vrot.slane %v1487_v2, 1 }
  0xba   :  { %16596 = vst [vmem:[#allocation20_spill] sm:$0xff] %v9570_v58  ;;  %v726_v28 = vsel %vm697_vm0, %v723_v22, %v16605_v42  ;;  %v2374_v42 = vmul.f32 %v8941_v49, %v9540_v0  ;;  %v16611_v58 = vrot.slane %v9434_v38, 2 }
  0xbb   :  { %16597 = vst [vmem:[#allocation47_spill] sm:$0xff] %v9573_v48  ;;  %v9620_v43 = vadd.f32 %v726_v28, %v445_v59  ;;  %v1418_v48 = vadd.f32 %v1355_v29, %v1289_v53 }
  0xbc   :  { %16598 = vst [vmem:[#allocation48_spill] sm:$0xff] %v9578_v37  ;;  %v174_v37 = vpop.permute.xlu0 %173  ;;  %v2001_v53 = vsel %vm1087_vm1, %v16611_v58, %v16610_v40  ;;  %v16614_v58 = vrot.slane %v16606_v27, 2 }
  0xbd   :  { %16599 = vst [vmem:[#allocation49_spill] sm:$0xff] %v9582_v33  ;;  %v579_v13 = vmul.f32 %v8916_v41, %v174_v37  ;;  %v1799_v28 = vadd.f32 %v1620_v39, %v1418_v48  ;;  %v969_v59 = vmul.f32 %v8930_v46, %v174_v37  ;;  %v1867_v2 = vmul.f32 %v8951_v51, %v174_v37 }
  0xbe   :  { %16600 = vst [vmem:[#allocation50_spill] sm:$0xff] %v9585_v52  ;;  %v444_v33 = vmul.f32 %v8964_v56, %v174_v37  ;;  %v16612_v52 = vrot.slane %v16562_v24, 1 }
  0xbf   :  { %16601 = vst [vmem:[#allocation51_spill] sm:$0xff] %v9588_v8  ;;  %v721_v29 = vrot.slane %v579_v13, 1  ;;  %v1111_v39 = vrot.slane %v969_v59, 2  ;;  %v2002_v38 = vrot.slane %v1867_v2, 2  ;;  %v2504_v59 = vrot.slane %v2374_v42, 1  ;;  %v374_v42 = vpop.permute.xlu2 %373 }
  0xc0   :  { %16602 = vst [vmem:[#allocation52_spill] sm:$0xff] %v9591_v7  ;;  %v2180_v7 = vadd.f32 %v2001_v53, %v1799_v28  ;;  %v16616_v28 = vrot.slane %v16573_v12, 1  ;;  %v2744_v12 = vmul.f32 %v8969_v57, %v174_v37 }
  0xc1   :  { %16603 = vst [vmem:[#allocation53_spill] sm:$0xff] %v9598_v62  ;;  %v16607_v62 = vrot.slane %v16606_v27, 2  ;;  %v722_v16 = vsel %vm697_vm0, %v16612_v52, %v721_v29  ;;  %v724_v19 = vsel %vm697_vm0, %v721_v29, %v723_v22  ;;  %v1112_v6 = vsel %vm1087_vm1, %v16614_v58, %v1111_v39 }
  0xc2   :  { %v902_v40 = vadd.f32 %v722_v16, %v16613_v47  ;;  %v903_v13 = vadd.f32 %v724_v19, %v444_v33  ;;  %v2246_v19 = vmul.f32 %v8997_v5, %v174_v37  ;;  %v9663_v33 = vmul.f32 %v8988_v1, %v9540_v0 }
  0xc3   :  { %v1110_v8 = vsel %vm1087_vm1, %v16608_v21, %v16607_v62  ;;  %v2745_v62 = vmul.f32 %v8969_v57, %v9540_v0  ;;  %v2373_v21 = vmul.f32 %v8941_v49, %v174_v37  ;;  %v16619_v29 = vrot.slane %v9192_v63, 1 }
  0xc4   :  { %v1291_v3 = vadd.f32 %v1110_v8, %v9458_v9  ;;  %v1357_v9 = vmul.f32 %v8988_v1, %v174_v37  ;;  %v1486_v8 = vmul.f32 %v8946_v50, %v174_v37  ;;  %v2307_v53 = vadd.f32 %v2246_v19, %v2180_v7 }
  0xc5   :  { %v2502_v22 = vrot.slane %v2373_v21, 1  ;;  %v16617_v21 = vld [vmem:[#allocation25_spill] sm:$0xff]  ;;  %v9677_v2 = vsel %vm697_vm0, %v1623_v44, %v16619_v29  ;;  %v16620_v37 = vrot.slane %v16577_v17, 1  ;;  %v16624_v7 = vrot.slane %v9606_v31, 2 }
  0xc6   :  { %v1420_v48 = vadd.f32 %v1357_v9, %v1291_v3  ;;  %v1621_v10 = vrot.slane %v1486_v8, 1  ;;  %v1114_v3 = vsel %vm1087_vm1, %v1111_v39, %v16615_v25  ;;  %v9657_v9 = vadd.f32 %v1112_v6, %v902_v40 }
  0xc7   :  { %v1293_v47 = vadd.f32 %v1114_v3, %v903_v13  ;;  %v2875_v25 = vrot.slane %v2745_v62, 2  ;;  %v16618_v8 = vrot.slane %v16609_v35, 2  ;;  %v2503_v39 = vsel %vm697_vm0, %v16620_v37, %v2502_v22  ;;  %v16623_v35 = vld [vmem:[#allocation21_spill] sm:$0xff]  ;;  %v194_v3 = vpop.permute.xlu1 %193 }
  0xc8   :  { %v1622_v24 = vsel %vm697_vm0, %v16616_v28, %v1621_v10  ;;  %v1624_v52 = vsel %vm697_vm0, %v1621_v10, %v1623_v44  ;;  %v2247_v10 = vmul.f32 %v8997_v5, %v9540_v0  ;;  %v16621_v0 = vrot.slane %v9205_v45, 1 }
  0xc9   :  { %v1800_v16 = vadd.f32 %v1622_v24, %v9548_v20  ;;  %v1801_v27 = vadd.f32 %v1624_v52, %v1420_v48  ;;  %v9669_v6 = vadd.f32 %v16617_v21, %v1293_v47  ;;  %v2003_v20 = vsel %vm1087_vm1, %v16618_v8, %v2002_v38 }
  0xca   :  { %v2873_v48 = vrot.slane %v2744_v12, 2  ;;  %v9685_v40 = vsel %vm697_vm0, %v2504_v59, %v16621_v0  ;;  %v2306_v13 = vadd.f32 %v16623_v35, %v9550_v30  ;;  %v2005_v58 = vsel %vm1087_vm1, %v2002_v38, %v16624_v7 }
  0xcb   :  { %v2181_v62 = vadd.f32 %v2003_v20, %v1800_v16  ;;  %16622 = vst [vmem:[#allocation22_spill] sm:$0xff] %v9685_v40  ;;  %v9693_v44 = vmul.f32 %v8916_v41, %v374_v42  ;;  %v16625_v17 = vrot.slane %v9215_v18, 2  ;;  %v9700_v24 = vadd.f32 %v2005_v58, %v1801_v27 }
  0xcc   :  { %v2505_v52 = vsel %vm697_vm0, %v2502_v22, %v2504_v59  ;;  %v9704_v47 = vmul.f32 %v8930_v46, %v374_v42  ;;  %v9706_v30 = vadd.f32 %v2503_v39, %v2306_v13  ;;  %v9711_v38 = vmul.f32 %v8964_v56, %v374_v42 }
  0xcd   :  { %v9698_v28 = vsel %vm1087_vm1, %v2875_v25, %v16625_v17  ;;  %v9708_v16 = vadd.f32 %v2505_v52, %v2307_v53  ;;  %v9714_v19 = vmul.f32 %v8946_v50, %v374_v42  ;;  %v9716_v12 = vadd.f32 %v2247_v10, %v2181_v62  ;;  %v16634_v17 = vld [vmem:[#allocation24_spill] sm:$0xff] }
  0xce   :  { %16626 = vst [vmem:[#allocation14_spill] sm:$0xff] %v9698_v28  ;;  %v16629_v27 = vrot.slane %v16584_v26, 2  ;;  %v9724_v59 = vmul.f32 %v8988_v1, %v374_v42  ;;  %v583_v22 = vmul.f32 %v8916_v41, %v194_v3  ;;  %v9728_v8 = vsel %vm1087_vm1, %v2873_v48, %v2875_v25  ;;  %v9761_v26 = vpop.permute.xlu0 %188 }
  0xcf   :  { %16627 = vst [vmem:[#allocation17_spill] sm:$0xff] %v9708_v16  ;;  %v9732_v53 = vmul.f32 %v8951_v51, %v374_v42  ;;  %v1490_v10 = vmul.f32 %v8946_v50, %v194_v3  ;;  %v9737_v29 = vmul.f32 %v8941_v49, %v374_v42  ;;  %v9740_v62 = vmul.f32 %v8969_v57, %v374_v42 }
  0xd0   :  { %16628 = vst [vmem:[#allocation16_spill] sm:$0xff] %v9716_v12  ;;  %v9721_v21 = vsel %vm1087_vm1, %v16629_v27, %v2873_v48  ;;  %v729_v37 = vrot.slane %v583_v22, 1  ;;  %v448_v25 = vmul.f32 %v8964_v56, %v194_v3  ;;  %v9745_v48 = vmul.f32 %v8930_v46, %v194_v3 }
  0xd1   :  { %16630 = vst [vmem:[#allocation25_spill] sm:$0xff] %v9721_v21  ;;  %v1629_v0 = vrot.slane %v1490_v10, 1  ;;  %v9748_v35 = vmul.f32 %v8997_v5, %v374_v42  ;;  %v16633_v13 = vrot.slane %v9252_v14, 1  ;;  %v9754_v58 = vmul.f32 %v8951_v51, %v194_v3  ;;  %v81_v42 = vld [vmem:[%s16014_s0 + $0x118] sm:$0xff] }
  0xd2   :  { %16631 = vst [vmem:[#allocation21_spill] sm:$0xff] %v9728_v8  ;;  %v16635_v52 = vrot.slane %v16634_v17, 2  ;;  %v16636_v27 = vrot.slane %v9595_v11, 2  ;;  %v109_v10 = vld [vmem:[%s16014_s0 + $0x1f8] sm:$0xff]  ;;  %v16637_v11 = vrot.slane %v9269_v4, 1  ;;  %288 = vperm.xlu2 %8646, %v81_v42   ;;  %v9786_v8 = vmul.f32 %v8988_v1, %v194_v3 }
  0xd3   :  { %16632 = vst [vmem:[#allocation54_spill] sm:$0xff] %v9748_v35  ;;  %v732_v7 = vsel %vm697_vm0, %v729_v37, %v16633_v13  ;;  %v95_v13 = vld [vmem:[%s16014_s0 + $0x188] sm:$0xff]  ;;  %428 = vperm.xlu1 %8645, %v109_v10   ;;  %v1421_v20 = vadd.f32 %v9663_v33, %v9657_v9  ;;  %v582_v42 = vmul.f32 %v8916_v41, %v9761_v26  ;;  %v16639_v35 = vld [vmem:[#allocation23_spill] sm:$0xff] }
  0xd4   :  { %v1116_v22 = vsel %vm1087_vm1, %v16636_v27, %v16635_v52  ;;  %v9773_v39 = vadd.f32 %v732_v7, %v448_v25  ;;  %v9778_v52 = vsel %vm697_vm0, %v1629_v0, %v16637_v11  ;;  %v9781_v27 = vmul.f32 %v8941_v49, %v194_v3  ;;  %358 = vperm.xlu0 %8644, %v95_v13  }
  0xd5   :  { %v1294_v25 = vadd.f32 %v1116_v22, %v9620_v43  ;;  %v2250_v11 = vmul.f32 %v8997_v5, %v194_v3  ;;  %v9796_v10 = vmul.f32 %v8969_v57, %v194_v3  ;;  %v972_v28 = vmul.f32 %v8930_v46, %v9761_v26 }
  0xd6   :  { %v1360_v43 = vmul.f32 %v8988_v1, %v9761_v26  ;;  %v1489_v22 = vmul.f32 %v8946_v50, %v9761_v26  ;;  %v727_v9 = vrot.slane %v582_v42, 1  ;;  %v1870_v41 = vmul.f32 %v8951_v51, %v9761_v26 }
  0xd7   :  { %v447_v33 = vmul.f32 %v8964_v56, %v9761_v26  ;;  %v1117_v3 = vrot.slane %v972_v28, 2  ;;  %v1802_v16 = vadd.f32 %v9677_v2, %v1421_v20  ;;  %v16638_v1 = vrot.slane %v16604_v36, 1 }
  0xd8   :  { %v1423_v7 = vadd.f32 %v1360_v43, %v1294_v25  ;;  %v1627_v46 = vrot.slane %v1489_v22, 1  ;;  %v730_v13 = vsel %vm697_vm0, %v727_v9, %v729_v37  ;;  %v2008_v40 = vrot.slane %v1870_v41, 2 }
  0xd9   :  { %v728_v50 = vsel %vm697_vm0, %v16638_v1, %v727_v9  ;;  %v906_v12 = vadd.f32 %v730_v13, %v447_v33  ;;  %v16640_v51 = vrot.slane %v16634_v17, 2  ;;  %v16641_v56 = vrot.slane %v9745_v48, 2  ;;  %v73_v9 = vld [vmem:[%s16014_s0 + $0xd8] sm:$0xff] }
  0xda   :  { %v905_v42 = vadd.f32 %v728_v50, %v16639_v35  ;;  %v16642_v2 = vrot.slane %v9192_v63, 1  ;;  %v1630_v20 = vsel %vm697_vm0, %v1627_v46, %v1629_v0  ;;  %v16643_v37 = vrot.slane %v9754_v58, 2  ;;  %v6018_v63 = vld [vmem:[%s16021_s7 + $0x8] sm:$0xff]  ;;  %v6017_v0 = vld [vmem:[%s16021_s7] sm:$0xff] }
  0xdb   :  { %v1118_v21 = vsel %vm1087_vm1, %v16640_v51, %v1117_v3  ;;  %v1120_v28 = vsel %vm1087_vm1, %v1117_v3, %v16641_v56  ;;  %v2376_v35 = vmul.f32 %v8941_v49, %v9761_v26  ;;  %v1804_v13 = vadd.f32 %v1630_v20, %v1423_v7  ;;  %6088 = vperm.xlu2 %8646, %v6018_v63   ;;  %v16657_v20 = vld [vmem:[#allocation38_spill] sm:$0xff]  ;;  %v16662_v63 = vld [vmem:[#allocation35_spill] sm:$0xff] }
  0xdc   :  { %v1628_v36 = vsel %vm697_vm0, %v16642_v2, %v1627_v46  ;;  %v2011_v25 = vsel %vm1087_vm1, %v2008_v40, %v16643_v37  ;;  %v9831_v17 = vadd.f32 %v1118_v21, %v905_v42  ;;  %v1296_v43 = vadd.f32 %v1120_v28, %v906_v12  ;;  %6083 = vperm.xlu1 %8645, %v6017_v0  }
  0xdd   :  { %v1803_v22 = vadd.f32 %v1628_v36, %v9669_v6  ;;  %v2881_v49 = vrot.slane %v9796_v10, 2  ;;  %v16644_v21 = vrot.slane %v9195_v23, 2  ;;  %v2747_v6 = vmul.f32 %v8969_v57, %v9761_v26  ;;  %248 = vperm.xlu0 %8644, %v73_v9   ;;  %v16647_v57 = vld [vmem:[#allocation26_spill] sm:$0xff] }
  0xde   :  { %v2175_v7 = vadd.f32 %v9385_v55, %v9380_v34  ;;  %v16646_v33 = vrot.slane %v9606_v31, 2  ;;  %v9857_v10 = vadd.f32 %v9265_v15, %v1296_v43  ;;  %v9859_v1 = vadd.f32 %v2011_v25, %v1804_v13  ;;  %v16650_v15 = vld [vmem:[#allocation5_spill] sm:$0xff]  ;;  %v9888_v25 = vld [vmem:[%s16016_s2] ss:$0 sm:$0xff] }
  0xdf   :  { %v2009_v12 = vsel %vm1087_vm1, %v16644_v21, %v2008_v40  ;;  %v16645_v41 = vmov %v16644_v21  ;;  %v2309_v50 = vadd.f32 %v16647_v57, %v9700_v24  ;;  %v2249_v34 = vmul.f32 %v8997_v5, %v9761_v26  ;;  %v16665_v21 = vld [vmem:[#allocation33_spill] sm:$0xff]  ;;  %v16671_v57 = vld [vmem:[#allocation36_spill] sm:$0xff] }
  0xe0   :  { %v2007_v3 = vsel %vm1087_vm1, %v16646_v33, %v16645_v41  ;;  %v2184_v46 = vadd.f32 %v2009_v12, %v1803_v22  ;;  %v2508_v55 = vrot.slane %v2376_v35, 1  ;;  %v2302_v31 = vadd.f32 %v9323_v54, %v2175_v7  ;;  %v16656_v54 = vld [vmem:[#allocation34_spill] sm:$0xff]  ;;  %v16668_v41 = vld [vmem:[#allocation12_spill] sm:$0xff] }
  0xe1   :  { %v2183_v40 = vadd.f32 %v2007_v3, %v1802_v16  ;;  %v16649_v42 = vrot.slane %v9360_v61, 1  ;;  %v16651_v51 = vrot.slane %v16650_v15, 1  ;;  %v16652_v28 = vrot.slane %v9332_v60, 1  ;;  %v16658_v61 = vld [vmem:[#allocation7_spill] sm:$0xff]  ;;  %v16660_v22 = vld [vmem:[#allocation6_spill] sm:$0xff] }
  0xe2   :  { %v9865_v23 = vadd.f32 %v2250_v11, %v2184_v46  ;;  %v2879_v2 = vrot.slane %v2747_v6, 2  ;;  %v16654_v5 = vrot.slane %v16575_v32, 1  ;;  %v16659_v43 = vrot.slane %v16658_v61, 2  ;;  %v9926_v61 = vpop.permute.xlu2 %208 }
  0xe3   :  { %v2491_v56 = vsel %vm697_vm0, %v16651_v51, %v16649_v42  ;;  %v16653_v16 = vmov %v16649_v42  ;;  %v16655_v26 = vmov %v16652_v28  ;;  %v16661_v13 = vrot.slane %v16660_v22, 2  ;;  %v16672_v51 = vld [vmem:[#allocation30_spill] sm:$0xff] }
  0xe4   :  { %16648 = vst [vmem:[#allocation24_spill] sm:$0xff] %v9865_v23  ;;  %v2493_v24 = vsel %vm697_vm0, %v16653_v16, %v16652_v28  ;;  %v2495_v11 = vsel %vm697_vm0, %v16655_v26, %v16654_v5  ;;  %v2671_v36 = vadd.f32 %v2491_v56, %v16656_v54  ;;  %v16663_v60 = vrot.slane %v16662_v63, 2 }
  0xe5   :  { %v2672_v37 = vadd.f32 %v2493_v24, %v16657_v20  ;;  %v2673_v35 = vadd.f32 %v2495_v11, %v2302_v31  ;;  %v2860_v32 = vsel %vm1087_vm1, %v16661_v13, %v16659_v43  ;;  %v16664_v0 = vmov %v16659_v43  ;;  %v16676_v24 = vld [vmem:[#allocation31_spill] sm:$0xff] }
  0xe6   :  { %v2862_v9 = vsel %vm1087_vm1, %v16664_v0, %v16663_v60  ;;  %v16666_v12 = vrot.slane %v16665_v21, 2  ;;  %v16667_v6 = vmov %v16663_v60  ;;  %v16669_v33 = vrot.slane %v16668_v41, 2  ;;  %v9981_v41 = vld [vmem:[%s16015_s1 + $0x7] ss:$0 sm:$0xff] }
  0xe7   :  { %v3041_v31 = vadd.f32 %v2860_v32, %v16671_v57  ;;  %v3042_v42 = vadd.f32 %v2862_v9, %v2671_v36  ;;  %v16673_v56 = vrot.slane %v16672_v51, 1  ;;  %v16674_v28 = vrot.slane %v9781_v27, 1  ;;  %v9948_v27 = vld [vmem:[%s16015_s1 + $0x1] ss:$0 sm:$0xff] }
  0xe8   :  { %v2864_v7 = vsel %vm1087_vm1, %v16667_v6, %v16666_v12  ;;  %v16670_v3 = vmov %v16666_v12  ;;  %v16677_v5 = vrot.slane %v16676_v24, 2  ;;  %v16679_v11 = vrot.slane %v9205_v45, 1  ;;  %v9972_v12 = vpop.permute.xlu1 %293 }
  0xe9   :  { %v2866_v46 = vsel %vm1087_vm1, %v16670_v3, %v16669_v33  ;;  %v3043_v15 = vadd.f32 %v2864_v7, %v2672_v37  ;;  %v9916_v16 = vsel %vm697_vm0, %v16674_v28, %v16673_v56  ;;  %v2310_v36 = vadd.f32 %v2249_v34, %v2183_v40 }
  0xea   :  { %16675 = vst [vmem:[#allocation23_spill] sm:$0xff] %v9916_v16  ;;  %v9921_v26 = vsel %vm1087_vm1, %v2881_v49, %v16677_v5  ;;  %v2509_v54 = vsel %vm697_vm0, %v16679_v11, %v2508_v55  ;;  %v3044_v20 = vadd.f32 %v2866_v46, %v2673_v35  ;;  %v3109_v37 = vadd.f32 %v9888_v25, %v3041_v31  ;;  %v9992_v46 = vld [vmem:[%s16015_s1] ss:$0 sm:$0xff]  ;;  %v10001_v31 = vld [vmem:[%s16015_s1 + $0x8] ss:$0 sm:$0xff] }
  0xeb   :  { %16678 = vst [vmem:[#allocation26_spill] sm:$0xff] %v9921_v26  ;;  %v3110_v43 = vadd.f32 %v9888_v25, %v3042_v42  ;;  %v3111_v22 = vadd.f32 %v9888_v25, %v3043_v15  ;;  %v16680_v13 = vmov %v16674_v28  ;;  %v16681_v63 = vrot.slane %v9215_v18, 2  ;;  %v10012_v28 = vld [vmem:[%s16015_s1 + $0x3] ss:$0 sm:$0xff] }
  0xec   :  { %v2511_v32 = vsel %vm697_vm0, %v2508_v55, %v16680_v13  ;;  %v9940_v35 = vsel %vm1087_vm1, %v2879_v2, %v2881_v49  ;;  %v3112_v40 = vadd.f32 %v9888_v25, %v3044_v20  ;;  %v9943_v34 = vadd.f32 %v2509_v54, %v2309_v50  ;;  %v9957_v49 = vld [vmem:[%s16015_s1 + $0x2] ss:$0 sm:$0xff] }
  0xed   :  { %v9937_v45 = vsel %vm1087_vm1, %v16681_v63, %v2879_v2  ;;  %16683 = vst [vmem:[#allocation34_spill] sm:$0xff] %v9940_v35  ;;  %v3173_v60 = vmax.f32 %v3109_v37, 0.0  ;;  %v3174_v0 = vmax.f32 %v3110_v43, 0.0  ;;  %v9952_v18 = vmul.f32 %v9948_v27, %v9926_v61  ;;  %v9966_v2 = vld [vmem:[%s16015_s1 + $0x4] ss:$0 sm:$0xff]  ;;  %v16707_v37 = vld [vmem:[#allocation43_spill] sm:$0xff] }
  0xee   :  { %16682 = vst [vmem:[#allocation5_spill] sm:$0xff] %v9937_v45  ;;  %v3175_v55 = vmax.f32 %v3111_v22, 0.0  ;;  %v3176_v9 = vmax.f32 %v3112_v40, 0.0  ;;  %v9961_v50 = vmul.f32 %v9957_v49, %v9926_v61  ;;  %v9970_v21 = vmul.f32 %v9966_v2, %v9926_v61 }
  0xef   :  { %16684 = vst [vmem:[#allocation38_spill] sm:$0xff] %v9943_v34  ;;  %v9974_v6 = vadd.f32 %v2511_v32, %v2310_v36  ;;  %v9976_v7 = vpack.c.bf16 %v3174_v0, %v3173_v60  ;;  %v9985_v33 = vmul.f32 %v9981_v41, %v9926_v61  ;;  %v9996_v57 = vmul.f32 %v9992_v46, %v9926_v61  ;;  %v10034_v32 = vld [vmem:[%s16015_s1 + $0x5] ss:$0 sm:$0xff]  ;;  %v16700_v60 = vld [vmem:[#allocation27_spill] sm:$0xff] }
  0xf0   :  { %16685 = vst [vmem:[#allocation7_spill] sm:$0xff] %v9952_v18  ;;  %v9987_v3 = vpack.c.bf16 %v3176_v9, %v3175_v55  ;;  %v10005_v42 = vmul.f32 %v10001_v31, %v9926_v61  ;;  %v10016_v5 = vmul.f32 %v10012_v28, %v9926_v61  ;;  %v10020_v11 = vmul.f32 %v9948_v27, %v9972_v12 }
  0xf1   :  { %16686 = vst [vmem:[#allocation6_spill] sm:$0xff] %v9961_v50  ;;  %v3279_v15 = vshll.u32 %v9976_v7, 16  ;;  %v3277_v54 = vshrl.u32 %v9976_v7, 16  ;;  %v10029_v13 = vmul.f32 %v9966_v2, %v9972_v12  ;;  %v10038_v63 = vmul.f32 %v10034_v32, %v9972_v12 }
  0xf2   :  { %16687 = vst [vmem:[#allocation35_spill] sm:$0xff] %v9970_v21  ;;  %v3284_v20 = vshll.u32 %v9987_v3, 16  ;;  %v10045_v0 = vmul.f32 %v9981_v41, %v9972_v12  ;;  %v10049_v55 = vmul.f32 %v10001_v31, %v9972_v12  ;;  %v16701_v56 = vrot.slane %v16700_v60, 2 }
  0xf3   :  { %16688 = vst [vmem:[#allocation33_spill] sm:$0xff] %v9974_v6  ;;  %v3281_v43 = vrot.slane %v3279_v15, 1  ;;  %v1424_v16 = vadd.f32 %v9786_v8, %v9831_v17  ;;  %v16703_v15 = vld [vmem:[#allocation40_spill] sm:$0xff]  ;;  %v16705_v22 = vrot.slane %v10029_v13, 1  ;;  %v16708_v23 = vrot.slane %v16707_v37, 2  ;;  %v16711_v17 = vld [vmem:[#allocation45_spill] sm:$0xff] }
  0xf4   :  { %16689 = vst [vmem:[#allocation12_spill] sm:$0xff] %v9976_v7  ;;  %v10040_v40 = vrot.slane %v3284_v20, 1  ;;  %v16702_v7 = vrot.slane %v9745_v48, 2  ;;  %v16704_v36 = vrot.slane %v16703_v15, 1  ;;  %v16709_v48 = vrot.slane %v10038_v63, 2 }
  0xf5   :  { %16690 = vst [vmem:[#allocation36_spill] sm:$0xff] %v9985_v33  ;;  %v3282_v9 = vor.u32 %v3281_v43, %v3277_v54  ;;  %v204_v54 = vpop.permute.xlu0 %203  ;;  %v16725_v35 = vrot.slane %v9252_v14, 1  ;;  %v16728_v34 = vrot.slane %v16700_v60, 2 }
  0xf6   :  { %16691 = vst [vmem:[#allocation30_spill] sm:$0xff] %v9987_v3  ;;  %v1122_v26 = vsel %vm1087_vm1, %v16702_v7, %v16701_v56  ;;  %v10070_v20 = vsel %vm697_vm0, %v16705_v22, %v16704_v36  ;;  %v10077_v7 = vsel %vm1087_vm1, %v16709_v48, %v16708_v23  ;;  %v16712_v56 = vrot.slane %v16711_v17, 1  ;;  %v16715_v36 = vld [vmem:[#allocation46_spill] sm:$0xff]  ;;  %v16719_v48 = vld [vmem:[#allocation29_spill] sm:$0xff] }
  0xf7   :  { %16692 = vst [vmem:[#allocation31_spill] sm:$0xff] %v9996_v57  ;;  %v3287_v43 = vsel %vm3275_vm2, %v3282_v9, %v10040_v40  ;;  %v1297_v8 = vadd.f32 %v1122_v26, %v9773_v39  ;;  %v16713_v9 = vrot.slane %v10045_v0, 1  ;;  %v16716_v22 = vrot.slane %v16715_v36, 2 }
  0xf8   :  { %16693 = vst [vmem:[#allocation55_spill] sm:$0xff] %v10005_v42  ;;  %8031 = vmatmul.msk.bf16.vlgmr.msra.gmra.mxu0 %vm3542_vm3, %v3287_v43  ;;  %v1805_v23 = vadd.f32 %v9778_v52, %v1424_v16  ;;  %v16720_v39 = vrot.slane %v16719_v48, 2  ;;  %v16721_v26 = vrot.slane %v9754_v58, 2  ;;  %v1492_v52 = vmul.f32 %v9966_v2, %v204_v54 }
  0xf9   :  { %16694 = vst [vmem:[#allocation56_spill] sm:$0xff] %v10016_v5  ;;  %v10111_v16 = vmul.f32 %v10034_v32, %v204_v54 }
  0xfa   :  { %16695 = vst [vmem:[#allocation57_spill] sm:$0xff] %v10020_v11  ;;  %v2013_v43 = vsel %vm1087_vm1, %v16721_v26, %v16720_v39  ;;  %v2379_v26 = vmul.f32 %v9981_v41, %v204_v54  ;;  %v16726_v39 = vrot.slane %v9952_v18, 1 }
  0xfb   :  { %16696 = vst [vmem:[#allocation58_spill] sm:$0xff] %v10029_v13  ;;  %v10086_v13 = vsel %vm697_vm0, %v16713_v9, %v16712_v56  ;;  %v450_v56 = vmul.f32 %v9992_v46, %v204_v54  ;;  %v585_v9 = vmul.f32 %v9948_v27, %v204_v54 }
  0xfc   :  { %16697 = vst [vmem:[#allocation59_spill] sm:$0xff] %v10038_v63  ;;  %v2514_v60 = vrot.slane %v2379_v26, 1 }
  0xfd   :  { %16698 = vst [vmem:[#allocation60_spill] sm:$0xff] %v10045_v0  ;;  %v733_v58 = vrot.slane %v585_v9, 1 }
  0xfe   :  { %16699 = vst [vmem:[#allocation61_spill] sm:$0xff] %v10049_v55 }
  0xff   :  { %16706 = vst [vmem:[#allocation27_spill] sm:$0xff] %v10070_v20  ;;  %v16717_v20 = vrot.slane %v10049_v55, 2  ;;  %v2750_v55 = vmul.f32 %v10001_v31, %v204_v54  ;;  %v734_v9 = vsel %vm697_vm0, %v16725_v35, %v733_v58  ;;  %v736_v6 = vsel %vm697_vm0, %v733_v58, %v16726_v39  ;;  %v324_v58 = vpop.permute.xlu2 %323 }
 0x100   :  { %16710 = vst [vmem:[#allocation40_spill] sm:$0xff] %v10077_v7  ;;  %v16722_v7 = vld [vmem:[#allocation32_spill] sm:$0xff]  ;;  %v16732_v35 = vrot.slane %v9970_v21, 1 }
 0x101   :  { %16714 = vst [vmem:[#allocation43_spill] sm:$0xff] %v10086_v13  ;;  %v10093_v63 = vsel %vm1087_vm1, %v16717_v20, %v16716_v22  ;;  %v2312_v0 = vadd.f32 %v16722_v7, %v9859_v1  ;;  %v10106_v13 = vmul.f32 %v9957_v49, %v204_v54  ;;  %v2186_v20 = vadd.f32 %v2013_v43, %v1805_v23  ;;  %v10117_v1 = vld [vmem:[%s16015_s1 + $0x6] ss:$0 sm:$0xff] }
 0x102   :  { %16718 = vst [vmem:[#allocation45_spill] sm:$0xff] %v10093_v63  ;;  %v1363_v22 = vmul.f32 %v10012_v28, %v204_v54  ;;  %v2252_v7 = vmul.f32 %v10117_v1, %v204_v54  ;;  %v1633_v43 = vrot.slane %v1492_v52, 1  ;;  %v10135_v63 = vadd.f32 %v736_v6, %v450_v56 }
 0x103   :  { %16723 = vst [vmem:[#allocation46_spill] sm:$0xff] %v10106_v13  ;;  %v16727_v45 = vrot.slane %v10106_v13, 2  ;;  %v16731_v54 = vrot.slane %v9269_v4, 1  ;;  %v10153_v4 = vmul.f32 %v10034_v32, %v9926_v61  ;;  %v10157_v56 = vmul.f32 %v9957_v49, %v9972_v12 }
 0x104   :  { %16724 = vst [vmem:[#allocation29_spill] sm:$0xff] %v10111_v16  ;;  %v1426_v23 = vadd.f32 %v1363_v22, %v1297_v8  ;;  %v2313_v8 = vadd.f32 %v2252_v7, %v2186_v20  ;;  %v16729_v22 = vld [vmem:[#allocation28_spill] sm:$0xff]  ;;  %v1636_v57 = vsel %vm697_vm0, %v1633_v43, %v16732_v35  ;;  %v6019_v7 = vld [vmem:[%s16021_s7 + $0x10] sm:$0xff] }
 0x105   :  { %v1124_v5 = vsel %vm1087_vm1, %v16728_v34, %v16727_v45  ;;  %v908_v52 = vadd.f32 %v734_v9, %v16729_v22  ;;  %16730 = vst [vmem:[#allocation32_spill] sm:$0xff] %v10135_v63  ;;  %v1634_v14 = vsel %vm697_vm0, %v16731_v54, %v1633_v43  ;;  %v16734_v45 = vrot.slane %v10111_v16, 2  ;;  %6093 = vperm.xlu0 %8644, %v6019_v7  }
 0x106   :  { %v1806_v39 = vadd.f32 %v1634_v14, %v9857_v10  ;;  %v10144_v18 = vadd.f32 %v1636_v57, %v1426_v23  ;;  %v16735_v34 = vrot.slane %v16719_v48, 2  ;;  %16736 = vst [vmem:[#allocation62_spill] sm:$0xff] %v10153_v4  ;;  %v2885_v10 = vrot.slane %v2750_v55, 2  ;;  %v6021_v57 = vld [vmem:[%s16021_s7 + $0x20] sm:$0xff]  ;;  %v6020_v48 = vld [vmem:[%s16021_s7 + $0x18] sm:$0xff] }
 0x107   :  { %16737 = vst [vmem:[#allocation63_spill] sm:$0xff] %v10157_v56  ;;  %v10159_v20 = vadd.f32 %v1124_v5, %v908_v52  ;;  %v16740_v23 = vrot.slane %v16672_v51, 1  ;;  %v16741_v55 = vrot.slane %v9985_v33, 1  ;;  %v10179_v9 = vmul.f32 %v9948_v27, %v324_v58  ;;  %6103 = vperm.xlu2 %8646, %v6021_v57   ;;  %6098 = vperm.xlu1 %8645, %v6020_v48  }
 0x108   :  { %16733 = vst [vmem:[#allocation28_spill] sm:$0xff] %v10144_v18  ;;  %v2015_v6 = vsel %vm1087_vm1, %v16735_v34, %v16734_v45  ;;  %v16744_v54 = vrot.slane %v16676_v24, 2  ;;  %v16746_v51 = vrot.slane %v10005_v42, 2  ;;  %v16749_v45 = vld [vmem:[#allocation37_spill] sm:$0xff]  ;;  %v10205_v24 = vmul.f32 %v9957_v49, %v324_v58 }
 0x109   :  { %16738 = vst [vmem:[#allocation64_spill] sm:$0xff] %v10159_v20  ;;  %v10170_v26 = vadd.f32 %v2015_v6, %v1806_v39  ;;  %v2515_v5 = vsel %vm697_vm0, %v16740_v23, %v2514_v60  ;;  %v2517_v43 = vsel %vm697_vm0, %v2514_v60, %v16741_v55  ;;  %v10197_v39 = vmul.f32 %v10117_v1, %v9926_v61  ;;  %v309_v60 = vpop.permute.xlu1 %308 }
 0x10a   :  { %v10181_v22 = vadd.f32 %v2515_v5, %v2312_v0  ;;  %v10183_v52 = vadd.f32 %v2517_v43, %v2313_v8  ;;  %v10188_v14 = vsel %vm1087_vm1, %v16744_v54, %v2885_v10  ;;  %v10193_v35 = vsel %vm1087_vm1, %v2885_v10, %v16746_v51 }
 0x10b   :  { %16739 = vst [vmem:[#allocation65_spill] sm:$0xff] %v10170_v26  ;;  %v16750_v0 = vrot.slane %v16749_v45, 1  ;;  %v16751_v8 = vrot.slane %v10020_v11, 1  ;;  %v10208_v6 = vmul.f32 %v9966_v2, %v324_v58  ;;  %v468_v61 = vmul.f32 %v9992_v46, %v9972_v12  ;;  %v6023_v11 = vld [vmem:[%s16021_s7 + $0x30] sm:$0xff]  ;;  %v16767_v26 = vld [vmem:[#allocation8_spill] sm:$0xff] }
 0x10c   :  { %16742 = vst [vmem:[#allocation66_spill] sm:$0xff] %v10181_v22  ;;  %v10216_v48 = vmul.f32 %v10012_v28, %v9972_v12  ;;  %v10220_v23 = vmul.f32 %v10117_v1, %v9972_v12  ;;  %v10223_v5 = vmul.f32 %v10034_v32, %v324_v58  ;;  %v10226_v7 = vmul.f32 %v9981_v41, %v324_v58 }
 0x10d   :  { %16743 = vst [vmem:[#allocation67_spill] sm:$0xff] %v10183_v52  ;;  %v772_v34 = vsel %vm697_vm0, %v16751_v8, %v16750_v0  ;;  %v10229_v55 = vmul.f32 %v10001_v31, %v324_v58  ;;  %v10232_v54 = vmul.f32 %v9992_v46, %v324_v58  ;;  %v606_v0 = vmul.f32 %v9948_v27, %v309_v60  ;;  %v16758_v52 = vld [vmem:[#allocation39_spill] sm:$0xff] }
 0x10e   :  { %16745 = vst [vmem:[#allocation68_spill] sm:$0xff] %v10188_v14  ;;  %v927_v43 = vadd.f32 %v772_v34, %v468_v61  ;;  %v10238_v8 = vmul.f32 %v10012_v28, %v324_v58  ;;  %v10242_v57 = vmul.f32 %v10117_v1, %v324_v58  ;;  %v10248_v34 = vmul.f32 %v9957_v49, %v309_v60  ;;  %v6022_v14 = vld [vmem:[%s16021_s7 + $0x28] sm:$0xff] }
 0x10f   :  { %16747 = vst [vmem:[#allocation69_spill] sm:$0xff] %v10193_v35  ;;  %v2400_v61 = vmul.f32 %v9981_v41, %v309_v60  ;;  %v2771_v51 = vmul.f32 %v10001_v31, %v309_v60  ;;  %v10252_v35 = vpop.permute.xlu0 %303  ;;  %v1513_v58 = vmul.f32 %v9966_v2, %v309_v60  ;;  %v775_v22 = vrot.slane %v606_v0, 1  ;;  %6113 = vperm.xlu1 %8645, %v6023_v11  }
 0x110   :  { %16748 = vst [vmem:[#allocation70_spill] sm:$0xff] %v10197_v39  ;;  %v16760_v10 = vrot.slane %v10157_v56, 2  ;;  %v605_v33 = vmul.f32 %v9948_v27, %v10252_v35  ;;  %v995_v21 = vmul.f32 %v9957_v49, %v10252_v35  ;;  %v1383_v0 = vmul.f32 %v10012_v28, %v10252_v35  ;;  %6108 = vperm.xlu0 %8644, %v6022_v14   ;;  %v16764_v56 = vld [vmem:[#allocation52_spill] sm:$0xff] }
 0x111   :  { %16752 = vst [vmem:[#allocation37_spill] sm:$0xff] %v10216_v48  ;;  %v6024_v48 = vld [vmem:[%s16021_s7 + $0x38] sm:$0xff]  ;;  %v2556_v12 = vrot.slane %v2400_v61, 1  ;;  %v2927_v20 = vrot.slane %v2771_v51, 2  ;;  %v16761_v51 = vld [vmem:[#allocation50_spill] sm:$0xff]  ;;  %v1675_v14 = vrot.slane %v1513_v58, 1 }
 0x112   :  { %16753 = vst [vmem:[#allocation71_spill] sm:$0xff] %v10220_v23  ;;  %v10245_v23 = vmul.f32 %v9992_v46, %v309_v60  ;;  %6118 = vperm.xlu2 %8646, %v6024_v48   ;;  %v16762_v61 = vrot.slane %v16761_v51, 1  ;;  %v1512_v48 = vmul.f32 %v9966_v2, %v10252_v35  ;;  %v470_v51 = vmul.f32 %v9992_v46, %v10252_v35 }
 0x113   :  { %16754 = vst [vmem:[#allocation72_spill] sm:$0xff] %v10223_v5  ;;  %v1163_v58 = vrot.slane %v995_v21, 2  ;;  %v16768_v16 = vrot.slane %v16767_v26, 1  ;;  %v16770_v4 = vrot.slane %v16703_v15, 1  ;;  %v16773_v21 = vrot.slane %v16707_v37, 2  ;;  %v16775_v15 = vld [vmem:[#allocation18_spill] sm:$0xff] }
 0x114   :  { %16755 = vst [vmem:[#allocation73_spill] sm:$0xff] %v10232_v54 }
 0x115   :  { %16756 = vst [vmem:[#allocation74_spill] sm:$0xff] %v10238_v8  ;;  %v16759_v8 = vrot.slane %v16758_v52, 2 }
 0x116   :  { %16757 = vst [vmem:[#allocation75_spill] sm:$0xff] %v10242_v57  ;;  %v10281_v57 = vsel %vm697_vm0, %v2556_v12, %v16762_v61  ;;  %v773_v61 = vrot.slane %v605_v33, 1  ;;  %v778_v33 = vsel %vm697_vm0, %v775_v22, %v16768_v16 }
 0x117   :  { %v1162_v54 = vsel %vm1087_vm1, %v16760_v10, %v16759_v8  ;;  %16763 = vst [vmem:[#allocation39_spill] sm:$0xff] %v10281_v57  ;;  %v16765_v10 = vrot.slane %v16764_v56, 2  ;;  %v10296_v8 = vmul.f32 %v10034_v32, %v309_v60  ;;  %v1673_v57 = vrot.slane %v1512_v48, 1 }
 0x118   :  { %v1317_v42 = vadd.f32 %v1162_v54, %v927_v43  ;;  %v1893_v43 = vmul.f32 %v10034_v32, %v10252_v35  ;;  %v10293_v54 = vmul.f32 %v10012_v28, %v309_v60  ;;  %v776_v39 = vsel %vm697_vm0, %v773_v61, %v775_v22 }
 0x119   :  { %v10286_v11 = vsel %vm1087_vm1, %v2927_v20, %v16765_v10  ;;  %v2399_v10 = vmul.f32 %v9981_v41, %v10252_v35  ;;  %v10310_v48 = vmul.f32 %v10117_v1, %v309_v60  ;;  %v10315_v63 = vsel %vm697_vm0, %v16770_v4, %v1673_v57 }
 0x11a   :  { %16766 = vst [vmem:[#allocation76_spill] sm:$0xff] %v10286_v11  ;;  %v2054_v18 = vrot.slane %v1893_v43, 2  ;;  %v2770_v11 = vmul.f32 %v10001_v31, %v10252_v35  ;;  %v1446_v43 = vadd.f32 %v1383_v0, %v1317_v42  ;;  %v16772_v56 = vrot.slane %v16749_v45, 1  ;;  %v16776_v0 = vld [vmem:[#allocation11_spill] sm:$0xff] }
 0x11b   :  { %16769 = vst [vmem:[#allocation8_spill] sm:$0xff] %v10310_v48  ;;  %v929_v50 = vadd.f32 %v776_v39, %v470_v51  ;;  %v2554_v16 = vrot.slane %v2399_v10, 1  ;;  %v1676_v42 = vsel %vm697_vm0, %v1673_v57, %v1675_v14  ;;  %v3045_v4 = vadd.f32 %v16776_v0, %v16775_v15  ;;  %v329_v48 = vpop.permute.xlu2 %328  ;;  %v16782_v10 = vld [vmem:[#allocation48_spill] sm:$0xff] }
 0x11c   :  { %16771 = vst [vmem:[#allocation77_spill] sm:$0xff] %v10315_v63  ;;  %v774_v13 = vsel %vm697_vm0, %v16772_v56, %v773_v61  ;;  %v10323_v5 = vsel %vm1087_vm1, %v16773_v21, %v2054_v18  ;;  %v2925_v60 = vrot.slane %v2770_v11, 2  ;;  %v16777_v45 = vrot.slane %v10248_v34, 2  ;;  %v16781_v61 = vld [vmem:[#allocation19_spill] sm:$0xff]  ;;  %v16783_v11 = vld [vmem:[#allocation41_spill] sm:$0xff] }
 0x11d   :  { %16774 = vst [vmem:[#allocation78_spill] sm:$0xff] %v10323_v5  ;;  %v16778_v39 = vrot.slane %v16711_v17, 1  ;;  %v10338_v51 = vsel %vm697_vm0, %v2554_v16, %v2556_v12  ;;  %v3046_v57 = vadd.f32 %v16782_v10, %v16781_v61  ;;  %v928_v21 = vadd.f32 %v774_v13, %v16783_v11  ;;  %v16788_v13 = vld [vmem:[#allocation47_spill] sm:$0xff]  ;;  %v10384_v11 = vpop.permute.xlu1 %368 }
 0x11e   :  { %v1166_v56 = vsel %vm1087_vm1, %v1163_v58, %v16777_v45  ;;  %16780 = vst [vmem:[#allocation11_spill] sm:$0xff] %v10338_v51  ;;  %v16784_v15 = vrot.slane %v16715_v36, 2  ;;  %v10349_v45 = vsel %vm1087_vm1, %v2925_v60, %v2927_v20  ;;  %v3113_v17 = vadd.f32 %v9888_v25, %v3045_v4 }
 0x11f   :  { %v10335_v37 = vsel %vm697_vm0, %v16778_v39, %v2554_v16  ;;  %16786 = vst [vmem:[#allocation48_spill] sm:$0xff] %v10349_v45  ;;  %v1319_v39 = vadd.f32 %v1166_v56, %v929_v50  ;;  %v1827_v22 = vadd.f32 %v1676_v42, %v1446_v43  ;;  %v3114_v12 = vadd.f32 %v9888_v25, %v3046_v57  ;;  %v364_v45 = vpop.permute.xlu0 %363 }
 0x120   :  { %16779 = vst [vmem:[#allocation18_spill] sm:$0xff] %v10335_v37  ;;  %v10346_v0 = vsel %vm1087_vm1, %v16784_v15, %v2925_v60  ;;  %v10354_v16 = vmul.f32 %v9948_v27, %v329_v48  ;;  %v10357_v61 = vadd.f32 %v778_v33, %v10245_v23  ;;  %v16789_v36 = vrot.slane %v16788_v13, 1 }
 0x121   :  { %16785 = vst [vmem:[#allocation19_spill] sm:$0xff] %v10346_v0  ;;  %v10366_v20 = vmul.f32 %v10117_v1, %v10252_v35  ;;  %v10369_v50 = vmul.f32 %v9966_v2, %v329_v48  ;;  %v16792_v43 = vrot.slane %v16758_v52, 2  ;;  %v3177_v60 = vmax.f32 %v3113_v17, 0.0  ;;  %v16795_v52 = vld [vmem:[#allocation51_spill] sm:$0xff] }
 0x122   :  { %16787 = vst [vmem:[#allocation41_spill] sm:$0xff] %v10354_v16  ;;  %v10362_v10 = vsel %vm697_vm0, %v1675_v14, %v16789_v36  ;;  %v3178_v4 = vmax.f32 %v3114_v12, 0.0  ;;  %v10375_v23 = vmul.f32 %v9957_v49, %v329_v48  ;;  %v16794_v14 = vrot.slane %v10296_v8, 2 }
 0x123   :  { %16790 = vst [vmem:[#allocation47_spill] sm:$0xff] %v10366_v20  ;;  %v1164_v42 = vsel %vm1087_vm1, %v16792_v43, %v1163_v58  ;;  %v3288_v35 = vshrl.u32 %v9987_v3, 16  ;;  %v16122_v57 = vrot.slane %v10354_v16, 1  ;;  %v10387_v15 = vadd.f32 %v16795_v52, %v1319_v39 }
 0x124   :  { %16791 = vst [vmem:[#allocation79_spill] sm:$0xff] %v10369_v50  ;;  %v10377_v33 = vadd.f32 %v1164_v42, %v928_v21  ;;  %v2057_v56 = vsel %vm1087_vm1, %v2054_v18, %v16794_v14  ;;  %v10391_v17 = vpack.c.bf16 %v3178_v4, %v3177_v60  ;;  %v16123_v21 = vrot.slane %v10369_v50, 1 }
 0x125   :  { %16793 = vst [vmem:[#allocation80_spill] sm:$0xff] %v10375_v23  ;;  %v10389_v58 = vadd.f32 %v2057_v56, %v1827_v22  ;;  %v3290_v12 = vor.u32 %v3288_v35, %v10040_v40  ;;  %v10396_v36 = vmul.f32 %v9992_v46, %v329_v48  ;;  %v10399_v18 = vmul.f32 %v10012_v28, %v329_v48 }
 0x126   :  { %16796 = vst [vmem:[#allocation51_spill] sm:$0xff] %v10387_v15  ;;  %v10402_v43 = vmul.f32 %v9981_v41, %v329_v48  ;;  %v3292_v39 = vshll.u32 %v10391_v17, 16  ;;  %v10407_v42 = vmul.f32 %v10034_v32, %v329_v48  ;;  %v618_v60 = vmul.f32 %v9948_v27, %v10384_v11 }
 0x127   :  { %16797 = vst [vmem:[#allocation81_spill] sm:$0xff] %v10389_v58  ;;  %v16803_v40 = vrot.slane %v10179_v9, 1  ;;  %v10419_v14 = vmul.f32 %v10117_v1, %v329_v48  ;;  %v1525_v56 = vmul.f32 %v9966_v2, %v10384_v11  ;;  %v1906_v35 = vmul.f32 %v10034_v32, %v10384_v11 }
 0x128   :  { %16798 = vst [vmem:[#allocation82_spill] sm:$0xff] %v10391_v17  ;;  %v10425_v52 = vrot.slane %v3292_v39, 1  ;;  %v16806_v22 = vrot.slane %v10208_v6, 1  ;;  %v2412_v0 = vmul.f32 %v9981_v41, %v10384_v11  ;;  %v16812_v51 = vrot.slane %v9732_v53, 2 }
 0x129   :  { %16799 = vst [vmem:[#allocation83_spill] sm:$0xff] %v10396_v36  ;;  %v10416_v4 = vsel %vm697_vm0, %v16803_v40, %v16122_v57  ;;  %v10435_v40 = vmul.f32 %v10001_v31, %v329_v48  ;;  %v10439_v57 = vmul.f32 %v9957_v49, %v10384_v11  ;;  %v1699_v20 = vrot.slane %v1525_v56, 1 }
 0x12a   :  { %16800 = vst [vmem:[#allocation84_spill] sm:$0xff] %v10399_v18  ;;  %v10432_v3 = vsel %vm697_vm0, %v16806_v22, %v16123_v21  ;;  %v2080_v39 = vrot.slane %v1906_v35, 2  ;;  %v10446_v37 = vsel %vm3275_vm2, %v3290_v12, %v10425_v52  ;;  %v483_v48 = vmul.f32 %v9992_v46, %v10384_v11 }
 0x12b   :  { %16801 = vst [vmem:[#allocation85_spill] sm:$0xff] %v10402_v43  ;;  %v799_v22 = vrot.slane %v618_v60, 1  ;;  %v2783_v21 = vmul.f32 %v10001_v31, %v10384_v11  ;;  %8032 = vmatmul.msk.bf16.gmra.mxu0 %vm3542_vm3, %v10446_v37  ;;  %v16810_v56 = vrot.slane %v9714_v19, 1  ;;  %v2580_v5 = vrot.slane %v2412_v0, 1 }
 0x12c   :  { %16802 = vst [vmem:[#allocation86_spill] sm:$0xff] %v10407_v42  ;;  %v10462_v12 = vsel %vm1087_vm1, %v2080_v39, %v16812_v51  ;;  %v10465_v63 = vmul.f32 %v9948_v27, %v364_v45  ;;  %v482_v51 = vmul.f32 %v9992_v46, %v364_v45  ;;  %v10504_v36 = vmul.f32 %v10012_v28, %v10384_v11 }
 0x12d   :  { %16804 = vst [vmem:[#allocation87_spill] sm:$0xff] %v10416_v4  ;;  %v10457_v35 = vsel %vm697_vm0, %v1699_v20, %v16810_v56  ;;  %v2951_v50 = vrot.slane %v2783_v21, 2  ;;  %v16817_v56 = vrot.slane %v9737_v29, 1  ;;  %v16820_v21 = vrot.slane %v9740_v62, 2 }
 0x12e   :  { %16805 = vst [vmem:[#allocation88_spill] sm:$0xff] %v10419_v14  ;;  %v10469_v14 = vmul.f32 %v9957_v49, %v364_v45  ;;  %v16129_v0 = vrot.slane %v10465_v63, 1  ;;  %v10500_v4 = vmul.f32 %v10001_v31, %v364_v45  ;;  %v16828_v23 = vrot.slane %v10226_v7, 1 }
 0x12f   :  { %16807 = vst [vmem:[#allocation89_spill] sm:$0xff] %v10432_v3  ;;  %v10487_v60 = vsel %vm1087_vm1, %v2951_v50, %v16820_v21  ;;  %v10492_v3 = vmul.f32 %v9981_v41, %v364_v45  ;;  %v404_v21 = vpop.permute.xlu2 %403  ;;  %v16830_v58 = vrot.slane %v9693_v44, 1 }
 0x130   :  { %16808 = vst [vmem:[#allocation90_spill] sm:$0xff] %v10435_v40 }
 0x131   :  { %16809 = vst [vmem:[#allocation91_spill] sm:$0xff] %v10446_v37  ;;  %v10472_v37 = vmul.f32 %v9966_v2, %v364_v45  ;;  %v802_v15 = vsel %vm697_vm0, %v799_v22, %v16830_v58  ;;  %v16833_v58 = vrot.slane %v10439_v57, 2 }
 0x132   :  { %16811 = vst [vmem:[#allocation92_spill] sm:$0xff] %v10457_v35  ;;  %v10477_v35 = vsel %vm697_vm0, %v2580_v5, %v16817_v56  ;;  %v16133_v56 = vrot.slane %v10492_v3, 1 }
 0x133   :  { %16813 = vst [vmem:[#allocation93_spill] sm:$0xff] %v10462_v12  ;;  %v10482_v12 = vmul.f32 %v10034_v32, %v364_v45 }
 0x134   :  { %16814 = vst [vmem:[#allocation94_spill] sm:$0xff] %v10465_v63 }
 0x135   :  { %16815 = vst [vmem:[#allocation95_spill] sm:$0xff] %v10469_v14 }
 0x136   :  { %16816 = vst [vmem:[#allocation96_spill] sm:$0xff] %v10472_v37 }
 0x137   :  { %16818 = vst [vmem:[#allocation97_spill] sm:$0xff] %v10477_v35  ;;  %v800_v35 = vsel %vm697_vm0, %v16129_v0, %v799_v22  ;;  %v16827_v0 = vrot.slane %v10402_v43, 1  ;;  %v16834_v22 = vrot.slane %v10469_v14, 2  ;;  %v16854_v14 = vrot.slane %v9704_v47, 2 }
 0x138   :  { %16819 = vst [vmem:[#allocation98_spill] sm:$0xff] %v10482_v12  ;;  %v941_v16 = vadd.f32 %v800_v35, %v482_v51  ;;  %v16831_v35 = vrot.slane %v10482_v12, 2  ;;  %v16838_v12 = vrot.slane %v10500_v4, 2  ;;  %v16859_v43 = vrot.slane %v9737_v29, 1 }
 0x139   :  { %16821 = vst [vmem:[#allocation99_spill] sm:$0xff] %v10487_v60  ;;  %v16825_v60 = vrot.slane %v10472_v37, 1  ;;  %v10517_v63 = vsel %vm697_vm0, %v16828_v23, %v16827_v0  ;;  %v6026_v23 = vld [vmem:[%s16021_s7 + $0x48] sm:$0xff]  ;;  %v6025_v0 = vld [vmem:[%s16021_s7 + $0x40] sm:$0xff] }
 0x13a   :  { %16822 = vst [vmem:[#allocation100_spill] sm:$0xff] %v10492_v3  ;;  %v10525_v51 = vsel %vm1087_vm1, %v16831_v35, %v2080_v39  ;;  %v1190_v39 = vsel %vm1087_vm1, %v16834_v22, %v16833_v58  ;;  %v10545_v35 = vsel %vm697_vm0, %v16133_v56, %v2580_v5  ;;  %v10557_v37 = vsel %vm1087_vm1, %v16838_v12, %v2951_v50  ;;  %v384_v5 = vpop.permute.xlu1 %383 }
 0x13b   :  { %16823 = vst [vmem:[#allocation101_spill] sm:$0xff] %v10500_v4  ;;  %v10509_v18 = vsel %vm697_vm0, %v16825_v60, %v1699_v20  ;;  %v6027_v60 = vld [vmem:[%s16021_s7 + $0x50] sm:$0xff]  ;;  %v10548_v20 = vmul.f32 %v9948_v27, %v404_v21  ;;  %v10560_v58 = vmul.f32 %v9966_v2, %v404_v21  ;;  %6128 = vperm.xlu1 %8645, %v6026_v23   ;;  %v16841_v22 = vrot.slane %v10435_v40, 2 }
 0x13c   :  { %16824 = vst [vmem:[#allocation102_spill] sm:$0xff] %v10504_v36  ;;  %6133 = vperm.xlu2 %8646, %v6027_v60   ;;  %v1331_v36 = vadd.f32 %v1190_v39, %v941_v16  ;;  %6123 = vperm.xlu0 %8644, %v6025_v0   ;;  %v16842_v56 = vrot.slane %v10229_v55, 2  ;;  %v10571_v16 = vmul.f32 %v10117_v1, %v10384_v11 }
 0x13d   :  { %16826 = vst [vmem:[#allocation103_spill] sm:$0xff] %v10509_v18  ;;  %v10574_v50 = vmul.f32 %v10034_v32, %v404_v21  ;;  %v10577_v12 = vmul.f32 %v9981_v41, %v404_v21  ;;  %v942_v39 = vadd.f32 %v802_v15, %v483_v48  ;;  %v10580_v23 = vmul.f32 %v10012_v28, %v364_v45  ;;  %v379_v15 = vpop.permute.xlu0 %378 }
 0x13e   :  { %16829 = vst [vmem:[#allocation104_spill] sm:$0xff] %v10517_v63  ;;  %v10567_v60 = vsel %vm1087_vm1, %v16842_v56, %v16841_v22  ;;  %v10583_v0 = vmul.f32 %v10117_v1, %v364_v45  ;;  %v10586_v56 = vmul.f32 %v9992_v46, %v404_v21  ;;  %v10590_v11 = vmul.f32 %v10012_v28, %v404_v21 }
 0x13f   :  { %16832 = vst [vmem:[#allocation105_spill] sm:$0xff] %v10525_v51  ;;  %v10551_v51 = vmul.f32 %v9957_v49, %v404_v21  ;;  %v10593_v18 = vmul.f32 %v10001_v31, %v404_v21  ;;  %v1460_v48 = vadd.f32 %v9724_v59, %v1331_v36  ;;  %v10602_v4 = vmul.f32 %v10117_v1, %v404_v21 }
 0x140   :  { %16835 = vst [vmem:[#allocation106_spill] sm:$0xff] %v10545_v35  ;;  %v10613_v3 = vmul.f32 %v10012_v28, %v384_v5  ;;  %v10616_v59 = vmul.f32 %v9981_v41, %v384_v5  ;;  %v10619_v36 = vmul.f32 %v10001_v31, %v384_v5  ;;  %v620_v21 = vmul.f32 %v9948_v27, %v379_v15 }
 0x141   :  { %16836 = vst [vmem:[#allocation107_spill] sm:$0xff] %v10548_v20  ;;  %v10628_v35 = vmul.f32 %v10034_v32, %v384_v5  ;;  %v1527_v22 = vmul.f32 %v9966_v2, %v379_v15  ;;  %v1398_v45 = vmul.f32 %v10012_v28, %v379_v15 }
 0x142   :  { %16837 = vst [vmem:[#allocation108_spill] sm:$0xff] %v10551_v51  ;;  %v2785_v51 = vmul.f32 %v10001_v31, %v379_v15  ;;  %v16861_v20 = vrot.slane %v10616_v59, 1 }
 0x143   :  { %16839 = vst [vmem:[#allocation109_spill] sm:$0xff] %v10557_v37  ;;  %v10596_v37 = vmul.f32 %v9948_v27, %v384_v5 }
 0x144   :  { %16840 = vst [vmem:[#allocation110_spill] sm:$0xff] %v10560_v58  ;;  %v2955_v42 = vrot.slane %v2785_v51, 2  ;;  %v16858_v51 = vrot.slane %v9714_v19, 1  ;;  %v16865_v19 = vrot.slane %v10619_v36, 2 }
 0x145   :  { %16843 = vst [vmem:[#allocation111_spill] sm:$0xff] %v10567_v60  ;;  %v16855_v60 = vrot.slane %v10439_v57, 2  ;;  %v16856_v57 = vrot.slane %v9693_v44, 1  ;;  %v6030_v44 = vld [vmem:[%s16021_s7 + $0x68] sm:$0xff] }
 0x146   :  { %16844 = vst [vmem:[#allocation112_spill] sm:$0xff] %v10571_v16  ;;  %v10625_v16 = vmul.f32 %v9966_v2, %v384_v5  ;;  %6148 = vperm.xlu2 %8646, %v6030_v44  }
 0x147   :  { %16845 = vst [vmem:[#allocation113_spill] sm:$0xff] %v10574_v50  ;;  %v1192_v63 = vsel %vm1087_vm1, %v16855_v60, %v16854_v14  ;;  %v1703_v60 = vrot.slane %v1527_v22, 1  ;;  %v6029_v22 = vld [vmem:[%s16021_s7 + $0x60] sm:$0xff] }
 0x148   :  { %16846 = vst [vmem:[#allocation114_spill] sm:$0xff] %v10577_v12  ;;  %v1332_v50 = vadd.f32 %v1192_v63, %v942_v39  ;;  %v10651_v39 = vmul.f32 %v10034_v32, %v379_v15  ;;  %v10654_v12 = vmul.f32 %v10117_v1, %v384_v5  ;;  %v16857_v63 = vrot.slane %v10596_v37, 1  ;;  %6143 = vperm.xlu1 %8645, %v6029_v22  }
 0x149   :  { %16847 = vst [vmem:[#allocation115_spill] sm:$0xff] %v10580_v23  ;;  %v10610_v23 = vmul.f32 %v9957_v49, %v384_v5  ;;  %v1704_v40 = vsel %vm697_vm0, %v16858_v51, %v1703_v60  ;;  %v16867_v29 = vrot.slane %v10625_v16, 1  ;;  %v485_v51 = vmul.f32 %v9992_v46, %v379_v15 }
 0x14a   :  { %16848 = vst [vmem:[#allocation116_spill] sm:$0xff] %v10583_v0  ;;  %v10607_v0 = vmul.f32 %v9992_v46, %v384_v5 }
 0x14b   :  { %16849 = vst [vmem:[#allocation117_spill] sm:$0xff] %v10586_v56  ;;  %v10636_v56 = vmul.f32 %v9957_v49, %v379_v15 }
 0x14c   :  { %16850 = vst [vmem:[#allocation118_spill] sm:$0xff] %v10590_v11  ;;  %v2414_v11 = vmul.f32 %v9981_v41, %v379_v15 }
 0x14d   :  { %16851 = vst [vmem:[#allocation119_spill] sm:$0xff] %v10593_v18 }
 0x14e   :  { %16852 = vst [vmem:[#allocation120_spill] sm:$0xff] %v10602_v4  ;;  %v803_v4 = vrot.slane %v620_v21, 1  ;;  %v2584_v18 = vrot.slane %v2414_v11, 1  ;;  %v1461_v11 = vadd.f32 %v1398_v45, %v1332_v50  ;;  %v10691_v50 = vsel %vm1087_vm1, %v2955_v42, %v16865_v19  ;;  %v339_v45 = vpop.permute.xlu2 %338 }
 0x14f   :  { %16853 = vst [vmem:[#allocation121_spill] sm:$0xff] %v10607_v0  ;;  %v1841_v19 = vadd.f32 %v1704_v40, %v1460_v48  ;;  %v10725_v40 = vmul.f32 %v9966_v2, %v339_v45  ;;  %v16879_v48 = vrot.slane %v9732_v53, 2 }
 0x150   :  { %v804_v14 = vsel %vm697_vm0, %v16856_v57, %v803_v4  ;;  %v6028_v57 = vld [vmem:[%s16021_s7 + $0x58] sm:$0xff]  ;;  %v806_v5 = vsel %vm697_vm0, %v803_v4, %v16857_v63  ;;  %v10676_v58 = vsel %vm697_vm0, %v16859_v43, %v2584_v18  ;;  %v10681_v0 = vsel %vm697_vm0, %v2584_v18, %v16861_v20  ;;  %16866 = vst [vmem:[#allocation125_spill] sm:$0xff] %v10691_v50  ;;  %v16868_v18 = vld [vmem:[#allocation9_spill] sm:$0xff] }
 0x151   :  { %v943_v21 = vadd.f32 %v804_v14, %v9711_v38  ;;  %16860 = vst [vmem:[#allocation122_spill] sm:$0xff] %v10676_v58  ;;  %v16863_v4 = vrot.slane %v9740_v62, 2  ;;  %v1706_v43 = vsel %vm697_vm0, %v1703_v60, %v16867_v29  ;;  %v16869_v20 = vld [vmem:[#allocation13_spill] sm:$0xff]  ;;  %6138 = vperm.xlu0 %8644, %v6028_v57   ;;  %v10708_v60 = vmul.f32 %v10117_v1, %v379_v15  ;;  %v16874_v29 = vld [vmem:[#allocation10_spill] sm:$0xff]  ;;  %v16886_v50 = vld [vmem:[#allocation20_spill] sm:$0xff] }
 0x152   :  { %16862 = vst [vmem:[#allocation123_spill] sm:$0xff] %v10681_v0  ;;  %v2676_v63 = vadd.f32 %v16869_v20, %v16868_v18  ;;  %v16870_v62 = vld [vmem:[#allocation25_spill] sm:$0xff]  ;;  %v10713_v20 = vmul.f32 %v9948_v27, %v339_v45  ;;  %v10718_v57 = vadd.f32 %v806_v5, %v485_v51  ;;  %v16878_v15 = vrot.slane %v10651_v39, 2  ;;  %v319_v5 = vpop.permute.xlu1 %318 }
 0x153   :  { %v10686_v38 = vsel %vm1087_vm1, %v16863_v4, %v2955_v42  ;;  %v3048_v44 = vadd.f32 %v16870_v62, %v9706_v30  ;;  %v16871_v42 = vrot.slane %v10636_v56, 2  ;;  %v16872_v4 = vrot.slane %v9704_v47, 2  ;;  %16873 = vst [vmem:[#allocation9_spill] sm:$0xff] %v10708_v60 }
 0x154   :  { %16864 = vst [vmem:[#allocation124_spill] sm:$0xff] %v10686_v38  ;;  %v3047_v14 = vadd.f32 %v16874_v29, %v2676_v63  ;;  %v10716_v30 = vmul.f32 %v9957_v49, %v339_v45  ;;  %v10722_v47 = vadd.f32 %v1706_v43, %v1461_v11  ;;  %v2085_v63 = vsel %vm1087_vm1, %v16879_v48, %v16878_v15 }
 0x155   :  { %v1194_v22 = vsel %vm1087_vm1, %v16872_v4, %v16871_v42  ;;  %v3116_v18 = vadd.f32 %v9888_v25, %v3048_v44  ;;  %16875 = vst [vmem:[#allocation13_spill] sm:$0xff] %v10713_v20  ;;  %v3296_v4 = vshrl.u32 %v10391_v17, 16  ;;  %v10734_v51 = vadd.f32 %v2085_v63, %v1841_v19 }
 0x156   :  { %16876 = vst [vmem:[#allocation25_spill] sm:$0xff] %v10716_v30  ;;  %v10720_v62 = vadd.f32 %v1194_v22, %v943_v21  ;;  %v3115_v44 = vadd.f32 %v9888_v25, %v3047_v14  ;;  %v10737_v21 = vmul.f32 %v9992_v46, %v339_v45  ;;  %v10740_v11 = vmul.f32 %v10012_v28, %v339_v45 }
 0x157   :  { %16877 = vst [vmem:[#allocation10_spill] sm:$0xff] %v10725_v40  ;;  %v3180_v42 = vmax.f32 %v3116_v18, 0.0  ;;  %v10743_v43 = vmul.f32 %v10034_v32, %v339_v45  ;;  %v3298_v22 = vor.u32 %v3296_v4, %v10425_v52  ;;  %v10750_v19 = vmul.f32 %v10117_v1, %v339_v45  ;;  %v16890_v4 = vld [vmem:[#allocation49_spill] sm:$0xff] }
 0x158   :  { %16880 = vst [vmem:[#allocation126_spill] sm:$0xff] %v10737_v21  ;;  %v3179_v53 = vmax.f32 %v3115_v44, 0.0  ;;  %v608_v18 = vmul.f32 %v9948_v27, %v319_v5  ;;  %v998_v15 = vmul.f32 %v9957_v49, %v319_v5  ;;  %v10757_v63 = vmul.f32 %v9981_v41, %v339_v45 }
 0x159   :  { %16881 = vst [vmem:[#allocation127_spill] sm:$0xff] %v10740_v11  ;;  %v1515_v52 = vmul.f32 %v9966_v2, %v319_v5  ;;  %v1896_v44 = vmul.f32 %v10034_v32, %v319_v5  ;;  %v1386_v29 = vmul.f32 %v10012_v28, %v319_v5  ;;  %v1447_v25 = vadd.f32 %v10293_v54, %v10377_v33 }
 0x15a   :  { %16882 = vst [vmem:[#allocation128_spill] sm:$0xff] %v10743_v43  ;;  %v10754_v48 = vpack.c.bf16 %v3180_v42, %v3179_v53  ;;  %v779_v14 = vrot.slane %v608_v18, 1  ;;  %v16887_v42 = vrot.slane %v16886_v50, 2  ;;  %v16888_v53 = vrot.slane %v10248_v34, 2 }
 0x15b   :  { %16883 = vst [vmem:[#allocation129_spill] sm:$0xff] %v10750_v19  ;;  %v1169_v0 = vrot.slane %v998_v15, 2  ;;  %v1679_v58 = vrot.slane %v1515_v52, 1  ;;  %v10772_v60 = vmul.f32 %v10001_v31, %v339_v45  ;;  %v16891_v19 = vrot.slane %v16890_v4, 2 }
 0x15c   :  { %16884 = vst [vmem:[#allocation130_spill] sm:$0xff] %v10754_v48  ;;  %v3300_v17 = vshll.u32 %v10754_v48, 16  ;;  %v1168_v38 = vsel %vm1087_vm1, %v16888_v53, %v16887_v42  ;;  %v16892_v43 = vrot.slane %v10296_v8, 2  ;;  %v16893_v33 = vrot.slane %v10179_v9, 1 }
 0x15d   :  { %16885 = vst [vmem:[#allocation131_spill] sm:$0xff] %v10757_v63  ;;  %v1320_v18 = vadd.f32 %v1168_v38, %v10357_v61  ;;  %v473_v15 = vmul.f32 %v9992_v46, %v319_v5  ;;  %v16894_v52 = vrot.slane %v16767_v26, 1  ;;  %v2060_v42 = vrot.slane %v1896_v44, 2  ;;  %v16907_v61 = vld [vmem:[#allocation46_spill] sm:$0xff]  ;;  %v16912_v63 = vld [vmem:[#allocation29_spill] sm:$0xff] }
 0x15e   :  { %16889 = vst [vmem:[#allocation20_spill] sm:$0xff] %v10772_v60  ;;  %v2059_v54 = vsel %vm1087_vm1, %v16892_v43, %v16891_v19  ;;  %v782_v21 = vsel %vm697_vm0, %v779_v14, %v16893_v33  ;;  %v10783_v34 = vrot.slane %v3300_v17, 1  ;;  %v16895_v8 = vrot.slane %v16788_v13, 1 }
 0x15f   :  { %v780_v45 = vsel %vm697_vm0, %v16894_v52, %v779_v14  ;;  %v1449_v38 = vadd.f32 %v1386_v29, %v1320_v18  ;;  %v1828_v9 = vadd.f32 %v10362_v10, %v1447_v25  ;;  %v932_v19 = vadd.f32 %v782_v21, %v473_v15  ;;  %v16898_v29 = vld [vmem:[#allocation15_spill] sm:$0xff]  ;;  %v16903_v52 = vld [vmem:[#allocation72_spill] sm:$0xff] }
 0x160   :  { %v1680_v43 = vsel %vm697_vm0, %v16895_v8, %v1679_v58  ;;  %v10796_v17 = vsel %vm3275_vm2, %v3298_v22, %v10783_v34  ;;  %v16897_v53 = vrot.slane %v16886_v50, 2  ;;  %v2275_v14 = vmul.f32 %v10117_v1, %v319_v5  ;;  %v16901_v50 = vld [vmem:[#allocation51_spill] sm:$0xff] }
 0x161   :  { %16896 = vst [vmem:[#allocation49_spill] sm:$0xff] %v10796_v17  ;;  %8033 = vmatmul.msk.bf16.gmra.mxu0 %vm3542_vm3, %v10796_v17  ;;  %v931_v13 = vadd.f32 %v780_v45, %v16898_v29  ;;  %v16899_v44 = vrot.slane %v10205_v24, 2  ;;  %v16900_v25 = vrot.slane %v10208_v6, 1  ;;  %v2402_v21 = vmul.f32 %v9981_v41, %v319_v5 }
 0x162   :  { %v1170_v26 = vsel %vm1087_vm1, %v16897_v53, %v1169_v0  ;;  %v1829_v18 = vadd.f32 %v1680_v43, %v16901_v50  ;;  %v16902_v33 = vrot.slane %v16890_v4, 2  ;;  %v16904_v8 = vrot.slane %v16903_v52, 2  ;;  %v16905_v53 = vld [vmem:[#allocation6_spill] sm:$0xff]  ;;  %v16909_v43 = vld [vmem:[#allocation32_spill] sm:$0xff] }
 0x163   :  { %v1172_v10 = vsel %vm1087_vm1, %v1169_v0, %v16899_v44  ;;  %v1682_v22 = vsel %vm697_vm0, %v1679_v58, %v16900_v25  ;;  %v16906_v29 = vrot.slane %v16905_v53, 2  ;;  %v16908_v0 = vrot.slane %v16907_v61, 2  ;;  %v214_v44 = vpop.permute.xlu0 %213  ;;  %v16915_v53 = vld [vmem:[#allocation70_spill] sm:$0xff] }
 0x164   :  { %v2061_v15 = vsel %vm1087_vm1, %v16902_v33, %v2060_v42  ;;  %v2063_v45 = vsel %vm1087_vm1, %v2060_v42, %v16904_v8  ;;  %v2209_v58 = vadd.f32 %v2059_v54, %v1828_v9  ;;  %v2560_v25 = vrot.slane %v2402_v21, 1  ;;  %v16910_v33 = vld [vmem:[#allocation62_spill] sm:$0xff]  ;;  %v16914_v8 = vld [vmem:[#allocation65_spill] sm:$0xff]  ;;  %v16918_v9 = vld [vmem:[#allocation28_spill] sm:$0xff] }
 0x165   :  { %v1126_v6 = vsel %vm1087_vm1, %v16908_v0, %v16906_v29  ;;  %v2773_v17 = vmul.f32 %v10001_v31, %v319_v5  ;;  %v1322_v4 = vadd.f32 %v1172_v10, %v932_v19  ;;  %v1830_v11 = vadd.f32 %v1682_v22, %v1449_v38  ;;  %v16916_v29 = vld [vmem:[#allocation50_spill] sm:$0xff]  ;;  %v16919_v10 = vld [vmem:[#allocation81_spill] sm:$0xff] }
 0x166   :  { %v1299_v50 = vadd.f32 %v1126_v6, %v16909_v43  ;;  %v16911_v30 = vrot.slane %v16910_v33, 2  ;;  %v16913_v40 = vrot.slane %v16912_v63, 2  ;;  %v2314_v61 = vadd.f32 %v16915_v53, %v16914_v8  ;;  %v16920_v63 = vld [vmem:[#allocation53_spill] sm:$0xff]  ;;  %v16922_v43 = vld [vmem:[#allocation84_spill] sm:$0xff] }
 0x167   :  { %v2336_v52 = vadd.f32 %v2275_v14, %v2209_v58  ;;  %v16917_v0 = vrot.slane %v16916_v29, 1  ;;  %v10838_v21 = vmul.f32 %v9948_v27, %v214_v44  ;;  %v10840_v38 = vadd.f32 %v1170_v26, %v931_v13 }
 0x168   :  { %v2017_v42 = vsel %vm1087_vm1, %v16913_v40, %v16911_v30  ;;  %v2210_v19 = vadd.f32 %v2061_v15, %v1829_v18  ;;  %v2335_v22 = vadd.f32 %v16920_v63, %v16919_v10  ;;  %v16921_v30 = vrot.slane %v10226_v7, 1  ;;  %v16923_v7 = vld [vmem:[#allocation7_spill] sm:$0xff] }
 0x169   :  { %v2561_v54 = vsel %vm697_vm0, %v16917_v0, %v2560_v25  ;;  %v2188_v5 = vadd.f32 %v2017_v42, %v16918_v9  ;;  %v2931_v14 = vrot.slane %v2773_v17, 2  ;;  %v16166_v53 = vrot.slane %v10838_v21, 1  ;;  %v16925_v0 = vld [vmem:[#allocation75_spill] sm:$0xff]  ;;  %v16927_v9 = vld [vmem:[#allocation52_spill] sm:$0xff] }
 0x16a   :  { %v2563_v40 = vsel %vm697_vm0, %v2560_v25, %v16921_v30  ;;  %v1365_v6 = vmul.f32 %v10012_v28, %v214_v44  ;;  %v10850_v58 = vmul.f32 %v9966_v2, %v214_v44  ;;  %v10853_v42 = vadd.f32 %v16922_v43, %v1322_v4 }
 0x16b   :  { %v10855_v26 = vadd.f32 %v2063_v45, %v1830_v11  ;;  %v2706_v13 = vadd.f32 %v2561_v54, %v2335_v22  ;;  %v2254_v18 = vmul.f32 %v10117_v1, %v214_v44  ;;  %v2707_v15 = vadd.f32 %v2563_v40, %v2336_v52  ;;  %v414_v54 = vpop.permute.xlu2 %413 }
 0x16c   :  { %v16924_v17 = vrot.slane %v16923_v7, 1  ;;  %v10865_v8 = vadd.f32 %v1365_v6, %v1299_v50  ;;  %v16165_v29 = vrot.slane %v10850_v58, 1  ;;  %v10869_v4 = vadd.f32 %v16925_v0, %v2210_v19  ;;  %v6032_v0 = vld [vmem:[%s16021_s7 + $0x78] sm:$0xff] }
 0x16d   :  { %v10871_v11 = vadd.f32 %v2254_v18, %v2188_v5  ;;  %v10874_v45 = vmul.f32 %v9981_v41, %v214_v44  ;;  %v10877_v52 = vmul.f32 %v10001_v31, %v214_v44  ;;  %v16928_v10 = vrot.slane %v16927_v9, 2  ;;  %v16929_v5 = vld [vmem:[#allocation35_spill] sm:$0xff]  ;;  %6158 = vperm.xlu1 %8645, %v6032_v0  }
 0x16e   :  { %v10863_v25 = vsel %vm697_vm0, %v16924_v17, %v16166_v53  ;;  %16926 = vst [vmem:[#allocation15_spill] sm:$0xff] %v10869_v4  ;;  %v10883_v50 = vmul.f32 %v9992_v46, %v214_v44  ;;  %v10886_v22 = vmul.f32 %v9957_v49, %v214_v44  ;;  %v16930_v19 = vrot.slane %v16929_v5, 1  ;;  %v6033_v17 = vld [vmem:[%s16021_s7 + $0x80] sm:$0xff]  ;;  %v394_v5 = vpop.permute.xlu1 %393  ;;  %v16937_v53 = vld [vmem:[#allocation55_spill] sm:$0xff] }
 0x16f   :  { %v2932_v63 = vsel %vm1087_vm1, %v16928_v10, %v2931_v14  ;;  %v16931_v40 = vrot.slane %v10229_v55, 2  ;;  %v10899_v43 = vmul.f32 %v10034_v32, %v214_v44  ;;  %v16168_v18 = vrot.slane %v10874_v45, 1  ;;  %v6031_v55 = vld [vmem:[%s16021_s7 + $0x70] sm:$0xff]  ;;  %6163 = vperm.xlu2 %8646, %v6033_v17  }
 0x170   :  { %v10893_v30 = vsel %vm697_vm0, %v16930_v19, %v16165_v29  ;;  %v16167_v7 = vrot.slane %v10877_v52, 2  ;;  %v10913_v44 = vadd.f32 %v2932_v63, %v2706_v13  ;;  %v10918_v10 = vmul.f32 %v9948_v27, %v414_v54  ;;  %v16935_v19 = vld [vmem:[#allocation36_spill] sm:$0xff]  ;;  %6153 = vperm.xlu0 %8644, %v6031_v55  }
 0x171   :  { %v2934_v6 = vsel %vm1087_vm1, %v2931_v14, %v16931_v40  ;;  %v16936_v40 = vrot.slane %v16935_v19, 1  ;;  %v16938_v14 = vrot.slane %v16937_v53, 2  ;;  %v10936_v63 = vmul.f32 %v9966_v2, %v414_v54 }
 0x172   :  { %16932 = vst [vmem:[#allocation51_spill] sm:$0xff] %v10913_v44  ;;  %v10915_v9 = vadd.f32 %v2934_v6, %v2707_v15  ;;  %v10933_v15 = vmul.f32 %v9957_v49, %v414_v54  ;;  %v10942_v0 = vmul.f32 %v10034_v32, %v414_v54  ;;  %v10945_v19 = vmul.f32 %v9981_v41, %v414_v54 }
 0x173   :  { %16934 = vst [vmem:[#allocation32_spill] sm:$0xff] %v10918_v10  ;;  %v2519_v29 = vsel %vm697_vm0, %v16936_v40, %v16168_v18  ;;  %v10930_v13 = vsel %vm1087_vm1, %v16938_v14, %v16167_v7  ;;  %v10949_v14 = vmul.f32 %v9992_v46, %v414_v54  ;;  %v10952_v40 = vmul.f32 %v10001_v31, %v414_v54 }
 0x174   :  { %16933 = vst [vmem:[#allocation46_spill] sm:$0xff] %v10915_v9  ;;  %v10939_v17 = vadd.f32 %v2519_v29, %v2314_v61  ;;  %v10955_v55 = vmul.f32 %v9948_v27, %v394_v5  ;;  %v10959_v29 = vmul.f32 %v10012_v28, %v414_v54  ;;  %v10962_v7 = vmul.f32 %v9957_v49, %v394_v5  ;;  %v389_v61 = vpop.permute.xlu0 %388 }
 0x175   :  { %16939 = vst [vmem:[#allocation62_spill] sm:$0xff] %v10930_v13  ;;  %v10965_v18 = vmul.f32 %v9966_v2, %v394_v5  ;;  %v10970_v13 = vmul.f32 %v10117_v1, %v414_v54  ;;  %v10978_v9 = vmul.f32 %v9992_v46, %v394_v5  ;;  %v10981_v44 = vmul.f32 %v10012_v28, %v394_v5 }
 0x176   :  { %16940 = vst [vmem:[#allocation29_spill] sm:$0xff] %v10933_v15  ;;  %v10986_v54 = vmul.f32 %v10117_v1, %v394_v5  ;;  %v622_v15 = vmul.f32 %v9948_v27, %v389_v61  ;;  %v16949_v53 = vrot.slane %v10610_v23, 2  ;;  %v16950_v6 = vrot.slane %v10636_v56, 2 }
 0x177   :  { %16941 = vst [vmem:[#allocation65_spill] sm:$0xff] %v10936_v63  ;;  %v2416_v27 = vmul.f32 %v9981_v41, %v389_v61  ;;  %v16951_v10 = vrot.slane %v10628_v35, 2  ;;  %v16952_v56 = vrot.slane %v10651_v39, 2  ;;  %v2349_v39 = vadd.f32 %v10654_v12, %v10734_v51  ;;  %v6035_v51 = vld [vmem:[%s16021_s7 + $0x90] sm:$0xff] }
 0x178   :  { %16942 = vst [vmem:[#allocation70_spill] sm:$0xff] %v10939_v17  ;;  %v10973_v17 = vmul.f32 %v10034_v32, %v394_v5  ;;  %v807_v63 = vrot.slane %v622_v15, 1  ;;  %v16957_v12 = vrot.slane %v10616_v59, 1  ;;  %6173 = vperm.xlu1 %8645, %v6035_v51   ;;  %v16969_v51 = vrot.slane %v10619_v36, 2 }
 0x179   :  { %16943 = vst [vmem:[#allocation50_spill] sm:$0xff] %v10942_v0  ;;  %v10994_v0 = vmul.f32 %v10001_v31, %v394_v5 }
 0x17a   :  { %16944 = vst [vmem:[#allocation28_spill] sm:$0xff] %v10945_v19  ;;  %v1462_v19 = vadd.f32 %v10613_v3, %v10720_v62  ;;  %v11018_v3 = vmul.f32 %v10034_v32, %v389_v61  ;;  %v2588_v62 = vrot.slane %v2416_v27, 1  ;;  %v2787_v32 = vmul.f32 %v10001_v31, %v389_v61 }
 0x17b   :  { %16945 = vst [vmem:[#allocation81_spill] sm:$0xff] %v10949_v14  ;;  %v1529_v14 = vmul.f32 %v9966_v2, %v389_v61  ;;  %v16182_v59 = vrot.slane %v10994_v0, 2 }
 0x17c   :  { %16946 = vst [vmem:[#allocation53_spill] sm:$0xff] %v10952_v40  ;;  %v1196_v40 = vsel %vm1087_vm1, %v16950_v6, %v16949_v53  ;;  %v2087_v6 = vsel %vm1087_vm1, %v16952_v56, %v16951_v10  ;;  %v16954_v10 = vrot.slane %v10625_v16, 1  ;;  %v2589_v16 = vsel %vm697_vm0, %v16957_v12, %v2588_v62  ;;  %v16961_v12 = vld [vmem:[#allocation17_spill] sm:$0xff] }
 0x17d   :  { %16947 = vst [vmem:[#allocation84_spill] sm:$0xff] %v10959_v29  ;;  %v11007_v29 = vmul.f32 %v9957_v49, %v389_v61  ;;  %v1707_v53 = vrot.slane %v1529_v14, 1  ;;  %v2223_v2 = vadd.f32 %v2087_v6, %v10722_v47  ;;  %v16953_v49 = vrot.slane %v10596_v37, 1  ;;  %v16956_v6 = vld [vmem:[#allocation121_spill] sm:$0xff] }
 0x17e   :  { %16948 = vst [vmem:[#allocation7_spill] sm:$0xff] %v10970_v13  ;;  %v10989_v13 = vmul.f32 %v9981_v41, %v394_v5  ;;  %v2289_v5 = vmul.f32 %v10117_v1, %v389_v61  ;;  %v1400_v41 = vmul.f32 %v10012_v28, %v389_v61  ;;  %v1334_v15 = vadd.f32 %v1196_v40, %v10718_v57 }
 0x17f   :  { %v808_v1 = vsel %vm697_vm0, %v16953_v49, %v807_v63  ;;  %v1708_v14 = vsel %vm697_vm0, %v16954_v10, %v1707_v53  ;;  %v487_v47 = vmul.f32 %v9992_v46, %v389_v61  ;;  %v16955_v37 = vrot.slane %v10955_v55, 1  ;;  %v6036_v46 = vld [vmem:[%s16021_s7 + $0x98] sm:$0xff] }
 0x180   :  { %v16181_v4 = vrot.slane %v10989_v13, 1  ;;  %v1197_v28 = vrot.slane %v11007_v29, 2  ;;  %v2350_v27 = vadd.f32 %v2289_v5, %v2223_v2  ;;  %v945_v57 = vadd.f32 %v808_v1, %v16956_v6  ;;  %v16958_v5 = vld [vmem:[#allocation16_spill] sm:$0xff]  ;;  %v16959_v2 = vld [vmem:[#allocation22_spill] sm:$0xff]  ;;  %v11057_v1 = vpop.permute.xlu2 %348  ;;  %6178 = vperm.xlu2 %8646, %v6036_v46  }
 0x181   :  { %v810_v56 = vsel %vm697_vm0, %v807_v63, %v16955_v37  ;;  %v6034_v63 = vld [vmem:[%s16021_s7 + $0x88] sm:$0xff]  ;;  %v1463_v61 = vadd.f32 %v1400_v41, %v1334_v15  ;;  %v1843_v29 = vadd.f32 %v1708_v14, %v1462_v19  ;;  %v2679_v49 = vadd.f32 %v16959_v2, %v16958_v5 }
 0x182   :  { %v2591_v31 = vsel %vm697_vm0, %v2588_v62, %v16181_v4  ;;  %v946_v62 = vadd.f32 %v810_v56, %v487_v47  ;;  %v16960_v10 = vrot.slane %v10965_v18, 1  ;;  %v2959_v6 = vrot.slane %v2787_v32, 2  ;;  %v16962_v4 = vld [vmem:[#allocation21_spill] sm:$0xff]  ;;  %6168 = vperm.xlu0 %8644, %v6034_v63   ;;  %v16964_v5 = vld [vmem:[#allocation14_spill] sm:$0xff] }
 0x183   :  { %v3049_v40 = vadd.f32 %v16962_v4, %v16961_v12  ;;  %v16963_v41 = vrot.slane %v10610_v23, 2  ;;  %v2720_v15 = vadd.f32 %v2589_v16, %v2349_v39  ;;  %v2721_v14 = vadd.f32 %v2591_v31, %v2350_v27  ;;  %v11076_v4 = vld [vmem:[%s16016_s2] ss:$0 sm:$0xff]  ;;  %v11082_v39 = vld [vmem:[%s16015_s1 + $0x1] ss:$0 sm:$0xff]  ;;  %v11100_v31 = vpop.permute.xlu1 %398 }
 0x184   :  { %v1710_v37 = vsel %vm697_vm0, %v1707_v53, %v16960_v10  ;;  %v3050_v2 = vadd.f32 %v16964_v5, %v2679_v49  ;;  %v16965_v47 = vrot.slane %v11018_v3, 2  ;;  %v16966_v56 = vrot.slane %v10628_v35, 2  ;;  %v11094_v16 = vld [vmem:[%s16015_s1 + $0x2] ss:$0 sm:$0xff]  ;;  %v11112_v49 = vld [vmem:[%s16015_s1] ss:$0 sm:$0xff] }
 0x185   :  { %v1198_v19 = vsel %vm1087_vm1, %v16963_v41, %v1197_v28  ;;  %v3117_v23 = vadd.f32 %v11076_v4, %v3049_v40  ;;  %v11086_v32 = vmul.f32 %v11082_v39, %v11057_v1  ;;  %v1844_v27 = vadd.f32 %v1710_v37, %v1463_v61 }
 0x186   :  { %v1335_v46 = vadd.f32 %v1198_v19, %v945_v57  ;;  %v2089_v53 = vsel %vm1087_vm1, %v16966_v56, %v16965_v47  ;;  %v3118_v57 = vadd.f32 %v11076_v4, %v3050_v2  ;;  %v11098_v40 = vmul.f32 %v11094_v16, %v11057_v1  ;;  %v11145_v56 = vld [vmem:[%s16015_s1 + $0x4] ss:$0 sm:$0xff] }
 0x187   :  { %16967 = vst [vmem:[#allocation75_spill] sm:$0xff] %v11086_v32  ;;  %v11088_v35 = vadd.f32 %v2089_v53, %v1843_v29  ;;  %v2960_v63 = vsel %vm1087_vm1, %v16969_v51, %v2959_v6  ;;  %v2962_v61 = vsel %vm1087_vm1, %v2959_v6, %v16182_v59  ;;  %v3304_v29 = vshrl.u32 %v10754_v48, 16 }
 0x188   :  { %16968 = vst [vmem:[#allocation52_spill] sm:$0xff] %v11098_v40  ;;  %v11116_v10 = vmul.f32 %v11112_v49, %v11057_v1  ;;  %v11118_v37 = vadd.f32 %v2960_v63, %v2720_v15  ;;  %v11120_v36 = vadd.f32 %v2962_v61, %v2721_v14  ;;  %v3181_v12 = vmax.f32 %v3117_v23, 0.0  ;;  %v11136_v14 = vld [vmem:[%s16015_s1 + $0x3] ss:$0 sm:$0xff]  ;;  %v11154_v23 = vld [vmem:[%s16015_s1 + $0x5] ss:$0 sm:$0xff] }
 0x189   :  { %v3182_v41 = vmax.f32 %v3118_v57, 0.0  ;;  %v3306_v19 = vor.u32 %v3304_v29, %v10783_v34  ;;  %v624_v5 = vmul.f32 %v11082_v39, %v11100_v31  ;;  %v11128_v2 = vmul.f32 %v11094_v16, %v11100_v31 }
 0x18a   :  { %16970 = vst [vmem:[#allocation35_spill] sm:$0xff] %v11116_v10  ;;  %v11140_v34 = vmul.f32 %v11136_v14, %v11057_v1  ;;  %v11149_v53 = vmul.f32 %v11145_v56, %v11057_v1  ;;  %v11158_v57 = vmul.f32 %v11154_v23, %v11057_v1  ;;  %v16977_v63 = vrot.slane %v10962_v7, 2 }
 0x18b   :  { %16971 = vst [vmem:[#allocation36_spill] sm:$0xff] %v11118_v37  ;;  %v11130_v47 = vpack.c.bf16 %v3182_v41, %v3181_v12  ;;  %v811_v51 = vrot.slane %v624_v5, 1  ;;  %v489_v41 = vmul.f32 %v11112_v49, %v11100_v31  ;;  %v1531_v6 = vmul.f32 %v11145_v56, %v11100_v31  ;;  %v16979_v5 = vld [vmem:[#allocation107_spill] sm:$0xff] }
 0x18c   :  { %16972 = vst [vmem:[#allocation55_spill] sm:$0xff] %v11120_v36  ;;  %v1200_v61 = vsel %vm1087_vm1, %v1197_v28, %v16977_v63  ;;  %v16978_v59 = vrot.slane %v10955_v55, 1  ;;  %v1402_v28 = vmul.f32 %v11136_v14, %v11100_v31  ;;  %v11179_v63 = vmul.f32 %v11154_v23, %v11100_v31 }
 0x18d   :  { %16973 = vst [vmem:[#allocation121_spill] sm:$0xff] %v11130_v47  ;;  %v3308_v12 = vshll.u32 %v11130_v47, 16  ;;  %v1336_v15 = vadd.f32 %v1200_v61, %v946_v62  ;;  %v1711_v55 = vrot.slane %v1531_v6, 1  ;;  %v16986_v6 = vrot.slane %v11128_v2, 2 }
 0x18e   :  { %16974 = vst [vmem:[#allocation16_spill] sm:$0xff] %v11140_v34  ;;  %v812_v48 = vsel %vm697_vm0, %v16978_v59, %v811_v51  ;;  %v16980_v34 = vrot.slane %v16979_v5, 1  ;;  %v11189_v59 = vld [vmem:[%s16015_s1 + $0x6] ss:$0 sm:$0xff]  ;;  %v1464_v36 = vadd.f32 %v10981_v44, %v1335_v46  ;;  %v16989_v37 = vrot.slane %v10965_v18, 1 }
 0x18f   :  { %16975 = vst [vmem:[#allocation22_spill] sm:$0xff] %v11149_v53  ;;  %v11181_v29 = vrot.slane %v3308_v12, 1  ;;  %v947_v62 = vadd.f32 %v812_v48, %v10978_v9  ;;  %v11207_v9 = vld [vmem:[%s16015_s1 + $0x8] ss:$0 sm:$0xff]  ;;  %v16987_v12 = vrot.slane %v10962_v7, 2  ;;  %v1465_v7 = vadd.f32 %v1402_v28, %v1336_v15  ;;  %v16996_v28 = vld [vmem:[#allocation80_spill] sm:$0xff] }
 0x190   :  { %16976 = vst [vmem:[#allocation17_spill] sm:$0xff] %v11158_v57  ;;  %v814_v10 = vsel %vm697_vm0, %v811_v51, %v16980_v34  ;;  %v11193_v34 = vmul.f32 %v11189_v59, %v11057_v1  ;;  %v11198_v51 = vld [vmem:[%s16015_s1 + $0x7] ss:$0 sm:$0xff]  ;;  %v1712_v32 = vsel %vm697_vm0, %v16989_v37, %v1711_v55  ;;  %v2291_v18 = vmul.f32 %v11189_v59, %v11100_v31  ;;  %v16993_v37 = vld [vmem:[#allocation87_spill] sm:$0xff] }
 0x191   :  { %16981 = vst [vmem:[#allocation21_spill] sm:$0xff] %v11179_v63  ;;  %v11184_v61 = vadd.f32 %v814_v10, %v489_v41  ;;  %v11202_v48 = vmul.f32 %v11198_v51, %v11057_v1  ;;  %v11211_v10 = vmul.f32 %v11207_v9, %v11057_v1  ;;  %v1202_v41 = vsel %vm1087_vm1, %v16987_v12, %v16986_v6  ;;  %v16992_v46 = vld [vmem:[#allocation73_spill] sm:$0xff] }
 0x192   :  { %16982 = vst [vmem:[#allocation14_spill] sm:$0xff] %v11181_v29  ;;  %v11222_v40 = vadd.f32 %v1202_v41, %v947_v62  ;;  %v16990_v6 = vrot.slane %v10973_v17, 2  ;;  %v16991_v12 = vrot.slane %v11018_v3, 2  ;;  %v1845_v41 = vadd.f32 %v1712_v32, %v1464_v36 }
 0x193   :  { %16983 = vst [vmem:[#allocation132_spill] sm:$0xff] %v11193_v34  ;;  %v11220_v34 = vsel %vm3275_vm2, %v3306_v19, %v11181_v29  ;;  %v933_v5 = vadd.f32 %v16993_v37, %v16992_v46  ;;  %v16994_v29 = vld [vmem:[#allocation110_spill] sm:$0xff]  ;;  %v2418_v3 = vmul.f32 %v11198_v51, %v11100_v31  ;;  %v17009_v57 = vrot.slane %v16996_v28, 2 }
 0x194   :  { %16984 = vst [vmem:[#allocation133_spill] sm:$0xff] %v11202_v48  ;;  %8034 = vmatmul.msk.bf16.gmra.mxu0 %vm3542_vm3, %v11220_v34  ;;  %v2091_v19 = vsel %vm1087_vm1, %v16991_v12, %v16990_v6  ;;  %v16995_v1 = vrot.slane %v16994_v29, 1  ;;  %v16997_v6 = vrot.slane %v16996_v28, 2  ;;  %v16998_v12 = vrot.slane %v10205_v24, 2  ;;  %v17010_v48 = vld [vmem:[#allocation86_spill] sm:$0xff] }
 0x195   :  { %16985 = vst [vmem:[#allocation134_spill] sm:$0xff] %v11211_v10  ;;  %v2225_v44 = vadd.f32 %v2091_v19, %v1844_v27  ;;  %v16999_v27 = vld [vmem:[#allocation74_spill] sm:$0xff]  ;;  %v2351_v24 = vadd.f32 %v10986_v54, %v11088_v35 }
 0x196   :  { %16988 = vst [vmem:[#allocation135_spill] sm:$0xff] %v11220_v34  ;;  %v334_v34 = vpop.permute.xlu0 %333  ;;  %v1714_v15 = vsel %vm697_vm0, %v1711_v55, %v16995_v1  ;;  %v1174_v32 = vsel %vm1087_vm1, %v16998_v12, %v16997_v6  ;;  %v1450_v36 = vadd.f32 %v16999_v27, %v10840_v38  ;;  %v17000_v55 = vrot.slane %v11179_v63, 2  ;;  %v424_v63 = vpop.permute.xlu2 %423 }
 0x197   :  { %v1323_v62 = vadd.f32 %v1174_v32, %v933_v5  ;;  %v17001_v1 = vrot.slane %v10973_v17, 2  ;;  %v611_v6 = vmul.f32 %v11082_v39, %v334_v34  ;;  %v11265_v38 = vmul.f32 %v11094_v16, %v334_v34  ;;  %v17004_v17 = vld [vmem:[#allocation89_spill] sm:$0xff] }
 0x198   :  { %v11267_v12 = vadd.f32 %v1714_v15, %v1465_v7  ;;  %v2352_v19 = vadd.f32 %v2291_v18, %v2225_v44  ;;  %v2789_v5 = vmul.f32 %v11207_v9, %v11100_v31  ;;  %v2592_v32 = vrot.slane %v2418_v3, 1 }
 0x199   :  { %v2093_v53 = vsel %vm1087_vm1, %v17001_v1, %v17000_v55  ;;  %v1831_v37 = vadd.f32 %v17004_v17, %v1450_v36  ;;  %v476_v55 = vmul.f32 %v11112_v49, %v334_v34  ;;  %v785_v1 = vrot.slane %v611_v6, 1  ;;  %v17008_v36 = vld [vmem:[#allocation83_spill] sm:$0xff] }
 0x19a   :  { %17002 = vst [vmem:[#allocation73_spill] sm:$0xff] %v11267_v12  ;;  %v11269_v27 = vadd.f32 %v2093_v53, %v1845_v41  ;;  %v16202_v54 = vrot.slane %v11265_v38, 2  ;;  %v1389_v35 = vmul.f32 %v11136_v14, %v334_v34  ;;  %v1518_v46 = vmul.f32 %v11145_v56, %v334_v34  ;;  %v17005_v53 = vld [vmem:[#allocation41_spill] sm:$0xff] }
 0x19b   :  { %v11279_v7 = vmul.f32 %v11154_v23, %v334_v34  ;;  %v17006_v41 = vrot.slane %v17005_v53, 1  ;;  %v17007_v31 = vrot.slane %v10713_v20, 1  ;;  %v2278_v15 = vmul.f32 %v11189_v59, %v334_v34 }
 0x19c   :  { %17003 = vst [vmem:[#allocation87_spill] sm:$0xff] %v11269_v27  ;;  %v2405_v3 = vmul.f32 %v11198_v51, %v334_v34  ;;  %v1176_v53 = vsel %vm1087_vm1, %v17009_v57, %v16202_v54  ;;  %v1452_v10 = vadd.f32 %v1389_v35, %v1323_v62  ;;  %v17011_v20 = vrot.slane %v17010_v48, 2  ;;  %v17012_v27 = vld [vmem:[#allocation72_spill] sm:$0xff] }
 0x19d   :  { %v786_v44 = vsel %vm697_vm0, %v17006_v41, %v785_v1  ;;  %v788_v18 = vsel %vm697_vm0, %v785_v1, %v17007_v31  ;;  %v2963_v41 = vrot.slane %v2789_v5, 2  ;;  %v17013_v1 = vrot.slane %v17012_v27, 2  ;;  %v17016_v5 = vld [vmem:[#allocation114_spill] sm:$0xff] }
 0x19e   :  { %v934_v6 = vadd.f32 %v786_v44, %v17008_v36  ;;  %v11290_v17 = vadd.f32 %v788_v18, %v476_v55  ;;  %v1685_v29 = vrot.slane %v1518_v46, 1  ;;  %v2566_v12 = vrot.slane %v2405_v3, 1  ;;  %v17014_v55 = vld [vmem:[#allocation88_spill] sm:$0xff] }
 0x19f   :  { %v2065_v31 = vsel %vm1087_vm1, %v17013_v1, %v17011_v20  ;;  %v2338_v18 = vadd.f32 %v17014_v55, %v10855_v26  ;;  %v2776_v28 = vmul.f32 %v11207_v9, %v334_v34  ;;  %v17015_v57 = vrot.slane %v10989_v13, 1  ;;  %v17018_v20 = vld [vmem:[#allocation79_spill] sm:$0xff]  ;;  %v17020_v1 = vld [vmem:[#allocation10_spill] sm:$0xff]  ;;  %v6037_v55 = vld [vmem:[%s16021_s7 + $0xa0] sm:$0xff] }
 0x1a0   :  { %v2212_v44 = vadd.f32 %v2065_v31, %v1831_v37  ;;  %v11304_v36 = vadd.f32 %v1176_v53, %v934_v6  ;;  %v17017_v35 = vrot.slane %v17016_v5, 1  ;;  %v17019_v46 = vrot.slane %v17018_v20, 1  ;;  %v6038_v31 = vld [vmem:[%s16021_s7 + $0xa8] sm:$0xff]  ;;  %v17031_v37 = vld [vmem:[#allocation119_spill] sm:$0xff]  ;;  %6183 = vperm.xlu0 %8644, %v6037_v55  }
 0x1a1   :  { %v2593_v62 = vsel %vm697_vm0, %v17015_v57, %v2592_v32  ;;  %v17021_v26 = vrot.slane %v17020_v1, 1  ;;  %v11322_v13 = vmul.f32 %v11082_v39, %v424_v63  ;;  %6188 = vperm.xlu1 %8645, %v6038_v31   ;;  %v11384_v55 = vmul.f32 %v11136_v14, %v424_v63 }
 0x1a2   :  { %v2595_v27 = vsel %vm697_vm0, %v2592_v32, %v17017_v35  ;;  %v1686_v3 = vsel %vm697_vm0, %v17019_v46, %v1685_v29  ;;  %v2339_v53 = vadd.f32 %v2278_v15, %v2212_v44  ;;  %v6039_v32 = vld [vmem:[%s16021_s7 + $0xb0] sm:$0xff]  ;;  %v17025_v15 = vld [vmem:[#allocation85_spill] sm:$0xff] }
 0x1a3   :  { %v1688_v6 = vsel %vm697_vm0, %v1685_v29, %v17021_v26  ;;  %v1832_v34 = vadd.f32 %v1686_v3, %v10853_v42  ;;  %17022 = vst [vmem:[#allocation80_spill] sm:$0xff] %v11322_v13  ;;  %v17023_v29 = vrot.slane %v10994_v0, 2  ;;  %v17026_v44 = vrot.slane %v17025_v15, 1  ;;  %v17027_v35 = vld [vmem:[#allocation131_spill] sm:$0xff]  ;;  %6193 = vperm.xlu2 %8646, %v6039_v32  }
 0x1a4   :  { %v17028_v20 = vrot.slane %v17027_v35, 1  ;;  %v2937_v3 = vrot.slane %v2776_v28, 2  ;;  %v11344_v26 = vadd.f32 %v2593_v62, %v2351_v24  ;;  %v11346_v54 = vadd.f32 %v2595_v27, %v2352_v19  ;;  %17044 = vst [vmem:[#allocation85_spill] sm:$0xff] %v11384_v55 }
 0x1a5   :  { %v11336_v42 = vsel %vm1087_vm1, %v17023_v29, %v2963_v41  ;;  %v2567_v57 = vsel %vm697_vm0, %v17026_v44, %v2566_v12  ;;  %v17032_v0 = vrot.slane %v17031_v37, 2  ;;  %v11354_v15 = vmul.f32 %v11094_v16, %v424_v63  ;;  %v11356_v44 = vpop.permute.xlu1 %223 }
 0x1a6   :  { %17024 = vst [vmem:[#allocation74_spill] sm:$0xff] %v11336_v42  ;;  %v2569_v46 = vsel %vm697_vm0, %v2566_v12, %v17028_v20  ;;  %v11358_v42 = vadd.f32 %v1688_v6, %v1452_v10  ;;  %v17035_v12 = vrot.slane %v11279_v7, 2  ;;  %v17036_v24 = vrot.slane %v17010_v48, 2  ;;  %v17041_v6 = vld [vmem:[#allocation90_spill] sm:$0xff] }
 0x1a7   :  { %17029 = vst [vmem:[#allocation89_spill] sm:$0xff] %v11344_v26  ;;  %v11351_v29 = vsel %vm1087_vm1, %v2963_v41, %v17032_v0  ;;  %v11366_v28 = vmul.f32 %v11112_v49, %v424_v63  ;;  %v11369_v41 = vmul.f32 %v11145_v56, %v424_v63  ;;  %v11373_v27 = vadd.f32 %v2567_v57, %v2338_v18 }
 0x1a8   :  { %17030 = vst [vmem:[#allocation41_spill] sm:$0xff] %v11346_v54  ;;  %v2067_v19 = vsel %vm1087_vm1, %v17036_v24, %v17035_v12  ;;  %v11375_v32 = vadd.f32 %v2569_v46, %v2339_v53  ;;  %v17042_v31 = vrot.slane %v17041_v6, 2  ;;  %v11387_v20 = vmul.f32 %v11154_v23, %v424_v63  ;;  %v219_v6 = vpop.permute.xlu0 %218  ;;  %v17052_v12 = vld [vmem:[#allocation31_spill] sm:$0xff] }
 0x1a9   :  { %17033 = vst [vmem:[#allocation83_spill] sm:$0xff] %v11351_v29  ;;  %v11371_v62 = vadd.f32 %v2067_v19, %v1832_v34  ;;  %v11391_v34 = vmul.f32 %v11082_v39, %v11356_v44  ;;  %v17046_v18 = vrot.slane %v10772_v60, 2  ;;  %v11400_v46 = vmul.f32 %v11189_v59, %v424_v63 }
 0x1aa   :  { %17034 = vst [vmem:[#allocation86_spill] sm:$0xff] %v11354_v15  ;;  %v11381_v48 = vsel %vm1087_vm1, %v17042_v31, %v2937_v3  ;;  %v11404_v0 = vmul.f32 %v11145_v56, %v11356_v44  ;;  %v11408_v24 = vmul.f32 %v11198_v51, %v424_v63  ;;  %v11411_v19 = vmul.f32 %v11207_v9, %v424_v63 }
 0x1ab   :  { %17037 = vst [vmem:[#allocation72_spill] sm:$0xff] %v11366_v28  ;;  %v11396_v53 = vsel %vm1087_vm1, %v2937_v3, %v17046_v18  ;;  %v11415_v3 = vmul.f32 %v11198_v51, %v11356_v44  ;;  %v11421_v57 = vmul.f32 %v11207_v9, %v11356_v44  ;;  %v910_v10 = vadd.f32 %v10863_v25, %v17052_v12 }
 0x1ac   :  { %17038 = vst [vmem:[#allocation88_spill] sm:$0xff] %v11369_v41  ;;  %v17053_v63 = vrot.slane %v10886_v22, 2  ;;  %v17058_v18 = vrot.slane %v10899_v43, 2  ;;  %v17059_v41 = vrot.slane %v16910_v33, 2  ;;  %v453_v12 = vmul.f32 %v11112_v49, %v219_v6 }
 0x1ad   :  { %17039 = vst [vmem:[#allocation114_spill] sm:$0xff] %v11373_v27  ;;  %v588_v28 = vmul.f32 %v11082_v39, %v219_v6  ;;  %v11448_v33 = vmul.f32 %v11154_v23, %v219_v6  ;;  %v17061_v54 = vrot.slane %v11391_v34, 1 }
 0x1ae   :  { %17040 = vst [vmem:[#allocation79_spill] sm:$0xff] %v11375_v32  ;;  %v17057_v32 = vld [vmem:[#allocation56_spill] sm:$0xff]  ;;  %v2019_v13 = vsel %vm1087_vm1, %v17059_v41, %v17058_v18  ;;  %v2255_v41 = vmul.f32 %v11189_v59, %v219_v6 }
 0x1af   :  { %17043 = vst [vmem:[#allocation10_spill] sm:$0xff] %v11381_v48  ;;  %v16210_v26 = vrot.slane %v11448_v33, 2 }
 0x1b0   :  { %17045 = vst [vmem:[#allocation119_spill] sm:$0xff] %v11387_v20 }
 0x1b1   :  { %17047 = vst [vmem:[#allocation90_spill] sm:$0xff] %v11396_v53  ;;  %v17056_v53 = vld [vmem:[#allocation64_spill] sm:$0xff] }
 0x1b2   :  { %17048 = vst [vmem:[#allocation136_spill] sm:$0xff] %v11400_v46  ;;  %v17054_v46 = vld [vmem:[#allocation6_spill] sm:$0xff]  ;;  %v1427_v31 = vadd.f32 %v17057_v32, %v17056_v53  ;;  %v1366_v32 = vmul.f32 %v11136_v14, %v219_v6  ;;  %v1495_v53 = vmul.f32 %v11145_v56, %v219_v6 }
 0x1b3   :  { %17049 = vst [vmem:[#allocation137_spill] sm:$0xff] %v11408_v24  ;;  %v17055_v55 = vrot.slane %v17054_v46, 2 }
 0x1b4   :  { %17050 = vst [vmem:[#allocation138_spill] sm:$0xff] %v11411_v19  ;;  %v1808_v46 = vadd.f32 %v10893_v30, %v1427_v31  ;;  %v1639_v30 = vrot.slane %v1495_v53, 1  ;;  %v17060_v31 = vrot.slane %v10838_v21, 1  ;;  %v17063_v21 = vrot.slane %v10850_v58, 1 }
 0x1b5   :  { %17051 = vst [vmem:[#allocation139_spill] sm:$0xff] %v11421_v57  ;;  %v1128_v15 = vsel %vm1087_vm1, %v17055_v55, %v17053_v63  ;;  %v11443_v55 = vmul.f32 %v11094_v16, %v219_v6  ;;  %v739_v63 = vrot.slane %v588_v28, 1  ;;  %v17066_v58 = vrot.slane %v10874_v45, 1 }
 0x1b6   :  { %v1300_v25 = vadd.f32 %v1128_v15, %v910_v10  ;;  %v2382_v15 = vmul.f32 %v11198_v51, %v219_v6  ;;  %v2189_v10 = vadd.f32 %v2019_v13, %v1808_v46  ;;  %v17062_v13 = vrot.slane %v10886_v22, 2 }
 0x1b7   :  { %v16211_v18 = vrot.slane %v11443_v55, 2  ;;  %v740_v29 = vsel %vm697_vm0, %v17060_v31, %v739_v63  ;;  %v742_v28 = vsel %vm697_vm0, %v739_v63, %v17061_v54  ;;  %v1640_v46 = vsel %vm697_vm0, %v17063_v21, %v1639_v30 }
 0x1b8   :  { %v1429_v60 = vadd.f32 %v1366_v32, %v1300_v25  ;;  %v2520_v48 = vrot.slane %v2382_v15, 1  ;;  %v911_v27 = vadd.f32 %v740_v29, %v10883_v50  ;;  %v11461_v35 = vadd.f32 %v742_v28, %v453_v12 }
 0x1b9   :  { %v1130_v25 = vsel %vm1087_vm1, %v17062_v13, %v16211_v18  ;;  %v17064_v32 = vrot.slane %v11404_v0, 1  ;;  %v1809_v53 = vadd.f32 %v1640_v46, %v10865_v8  ;;  %v17065_v50 = vrot.slane %v10899_v43, 2  ;;  %v11507_v46 = vpop.permute.xlu2 %263  ;;  %v17088_v18 = vld [vmem:[#allocation14_spill] sm:$0xff] }
 0x1ba   :  { %v2316_v12 = vadd.f32 %v2255_v41, %v2189_v10  ;;  %v11480_v22 = vadd.f32 %v1130_v25, %v911_v27  ;;  %v2521_v15 = vsel %vm697_vm0, %v17066_v58, %v2520_v48  ;;  %v17067_v31 = vrot.slane %v11415_v3, 1  ;;  %v17070_v41 = vld [vmem:[#allocation38_spill] sm:$0xff]  ;;  %v17071_v10 = vld [vmem:[#allocation5_spill] sm:$0xff]  ;;  %17074 = vst [vmem:[#allocation64_spill] sm:$0xff] %v11507_v46 }
 0x1bb   :  { %v1642_v54 = vsel %vm697_vm0, %v1639_v30, %v17064_v32  ;;  %v2021_v29 = vsel %vm1087_vm1, %v17065_v50, %v16210_v26  ;;  %v11493_v28 = vadd.f32 %v2521_v15, %v10871_v11  ;;  %v2753_v27 = vmul.f32 %v11207_v9, %v219_v6  ;;  %v17072_v25 = vld [vmem:[#allocation33_spill] sm:$0xff] }
 0x1bc   :  { %v11482_v63 = vadd.f32 %v1642_v54, %v1429_v60  ;;  %v2523_v30 = vsel %vm697_vm0, %v2520_v48, %v17067_v31  ;;  %v11490_v8 = vadd.f32 %v2021_v29, %v1809_v53  ;;  %v11501_v45 = vmul.f32 %v11094_v16, %v11356_v44  ;;  %v17073_v48 = vld [vmem:[#allocation34_spill] sm:$0xff] }
 0x1bd   :  { %17068 = vst [vmem:[#allocation31_spill] sm:$0xff] %v11493_v28  ;;  %v11495_v43 = vadd.f32 %v2523_v30, %v2316_v12  ;;  %v3051_v13 = vadd.f32 %v17071_v10, %v17070_v41  ;;  %v3052_v21 = vadd.f32 %v17073_v48, %v17072_v25  ;;  %v11511_v11 = vmul.f32 %v11112_v49, %v11356_v44 }
 0x1be   :  { %v11515_v6 = vmul.f32 %v11136_v14, %v11356_v44  ;;  %v11519_v32 = vmul.f32 %v11154_v23, %v11356_v44  ;;  %v2891_v54 = vrot.slane %v2753_v27, 2  ;;  %v17075_v58 = vrot.slane %v10877_v52, 2 }
 0x1bf   :  { %17069 = vst [vmem:[#allocation6_spill] sm:$0xff] %v11495_v43  ;;  %v3119_v29 = vadd.f32 %v11076_v4, %v3051_v13  ;;  %v3120_v12 = vadd.f32 %v11076_v4, %v3052_v21  ;;  %v17077_v31 = vrot.slane %v11421_v57, 2  ;;  %v11537_v27 = vmul.f32 %v11082_v39, %v11507_v46 }
 0x1c0   :  { %v11528_v15 = vsel %vm1087_vm1, %v17075_v58, %v2891_v54  ;;  %v11541_v41 = vmul.f32 %v11094_v16, %v11507_v46  ;;  %v11546_v25 = vmul.f32 %v11145_v56, %v11507_v46  ;;  %v11551_v21 = vmul.f32 %v11189_v59, %v11356_v44  ;;  %v17082_v58 = vld [vmem:[#allocation108_spill] sm:$0xff]  ;;  %v17087_v44 = vld [vmem:[#allocation118_spill] sm:$0xff] }
 0x1c1   :  { %17076 = vst [vmem:[#allocation56_spill] sm:$0xff] %v11528_v15  ;;  %v11533_v30 = vsel %vm1087_vm1, %v2891_v54, %v17077_v31  ;;  %v3183_v13 = vmax.f32 %v3119_v29, 0.0  ;;  %v3184_v52 = vmax.f32 %v3120_v12, 0.0  ;;  %v3312_v54 = vshrl.u32 %v11130_v47, 16  ;;  %v409_v29 = vpop.permute.xlu1 %408  ;;  %v17098_v15 = vld [vmem:[#allocation21_spill] sm:$0xff] }
 0x1c2   :  { %17078 = vst [vmem:[#allocation38_spill] sm:$0xff] %v11533_v30  ;;  %v17083_v31 = vrot.slane %v17082_v58, 2  ;;  %v17084_v60 = vrot.slane %v11128_v2, 2  ;;  %v11563_v53 = vmul.f32 %v11112_v49, %v11507_v46  ;;  %v1466_v48 = vadd.f32 %v17087_v44, %v11222_v40  ;;  %v17096_v30 = vld [vmem:[#allocation113_spill] sm:$0xff] }
 0x1c3   :  { %17079 = vst [vmem:[#allocation5_spill] sm:$0xff] %v11537_v27  ;;  %v11559_v12 = vpack.c.bf16 %v3184_v52, %v3183_v13  ;;  %v3314_v10 = vor.u32 %v3312_v54, %v17088_v18  ;;  %v11583_v40 = vmul.f32 %v11154_v23, %v11507_v46  ;;  %v11587_v18 = vmul.f32 %v11198_v51, %v11507_v46  ;;  %v6041_v52 = vld [vmem:[%s16021_s7 + $0xc0] sm:$0xff] }
 0x1c4   :  { %17080 = vst [vmem:[#allocation33_spill] sm:$0xff] %v11541_v41  ;;  %v1204_v50 = vsel %vm1087_vm1, %v17084_v60, %v17083_v31  ;;  %v11573_v60 = vmul.f32 %v11136_v14, %v11507_v46  ;;  %v626_v31 = vmul.f32 %v11082_v39, %v409_v29  ;;  %v1533_v54 = vmul.f32 %v11145_v56, %v409_v29 }
 0x1c5   :  { %17081 = vst [vmem:[#allocation34_spill] sm:$0xff] %v11546_v25  ;;  %v1338_v26 = vadd.f32 %v1204_v50, %v11184_v61  ;;  %v3316_v13 = vshll.u32 %v11559_v12, 16  ;;  %v11579_v61 = vmul.f32 %v11094_v16, %v409_v29  ;;  %v1404_v50 = vmul.f32 %v11136_v14, %v409_v29  ;;  %6203 = vperm.xlu1 %8645, %v6041_v52  }
 0x1c6   :  { %17085 = vst [vmem:[#allocation108_spill] sm:$0xff] %v11559_v12  ;;  %v815_v2 = vrot.slane %v626_v31, 1  ;;  %v11595_v47 = vmul.f32 %v11154_v23, %v409_v29  ;;  %v11599_v20 = vmul.f32 %v11207_v9, %v11507_v46  ;;  %v17097_v43 = vrot.slane %v17096_v30, 2  ;;  %v6042_v31 = vld [vmem:[%s16021_s7 + $0xc8] sm:$0xff] }
 0x1c7   :  { %17086 = vst [vmem:[#allocation140_spill] sm:$0xff] %v11563_v53  ;;  %v11591_v44 = vrot.slane %v3316_v13, 1  ;;  %v17099_v28 = vrot.slane %v17098_v15, 2  ;;  %v491_v41 = vmul.f32 %v11112_v49, %v409_v29  ;;  %v1715_v13 = vrot.slane %v1533_v54, 1  ;;  %6208 = vperm.xlu2 %8646, %v6042_v31  }
 0x1c8   :  { %17089 = vst [vmem:[#allocation118_spill] sm:$0xff] %v11573_v60  ;;  %v17101_v60 = vld [vmem:[#allocation107_spill] sm:$0xff]  ;;  %v17105_v27 = vrot.slane %v11579_v61, 2  ;;  %v17106_v19 = vrot.slane %v17082_v58, 2  ;;  %v17110_v58 = vld [vmem:[#allocation110_spill] sm:$0xff]  ;;  %v2420_v31 = vmul.f32 %v11198_v51, %v409_v29 }
 0x1c9   :  { %17090 = vst [vmem:[#allocation14_spill] sm:$0xff] %v11579_v61  ;;  %v2095_v53 = vsel %vm1087_vm1, %v17099_v28, %v17097_v43  ;;  %v11615_v46 = vsel %vm3275_vm2, %v3314_v10, %v11591_v44  ;;  %v17102_v25 = vrot.slane %v17101_v60, 1  ;;  %v17103_v28 = vld [vmem:[#allocation32_spill] sm:$0xff]  ;;  %v17107_v60 = vld [vmem:[#allocation117_spill] sm:$0xff]  ;;  %v1467_v61 = vadd.f32 %v1404_v50, %v1338_v26 }
 0x1ca   :  { %17091 = vst [vmem:[#allocation141_spill] sm:$0xff] %v11583_v40  ;;  %v17104_v43 = vrot.slane %v17103_v28, 1  ;;  %v1206_v24 = vsel %vm1087_vm1, %v17106_v19, %v17105_v27  ;;  %v6040_v10 = vld [vmem:[%s16021_s7 + $0xb8] sm:$0xff]  ;;  %8035 = vmatmul.msk.bf16.gmra.mxu0 %vm3542_vm3, %v11615_v46  ;;  %v17109_v28 = vld [vmem:[#allocation73_spill] sm:$0xff]  ;;  %v17111_v12 = vrot.slane %v17110_v58, 1  ;;  %v17117_v50 = vrot.slane %v11265_v38, 2 }
 0x1cb   :  { %17092 = vst [vmem:[#allocation142_spill] sm:$0xff] %v11587_v18  ;;  %v816_v15 = vsel %vm697_vm0, %v17102_v25, %v815_v2  ;;  %6198 = vperm.xlu0 %8644, %v6040_v10   ;;  %v2596_v52 = vrot.slane %v2420_v31, 1  ;;  %v17121_v38 = vrot.slane %v11595_v47, 2  ;;  %v17122_v10 = vrot.slane %v17096_v30, 2 }
 0x1cc   :  { %17093 = vst [vmem:[#allocation143_spill] sm:$0xff] %v11591_v44  ;;  %v818_v54 = vsel %vm697_vm0, %v815_v2, %v17104_v43  ;;  %v949_v25 = vadd.f32 %v816_v15, %v17107_v60  ;;  %v2227_v2 = vadd.f32 %v2095_v53, %v17109_v28  ;;  %v2293_v43 = vmul.f32 %v11189_v59, %v409_v29  ;;  %v17115_v28 = vld [vmem:[#allocation25_spill] sm:$0xff]  ;;  %v17130_v60 = vld [vmem:[#allocation75_spill] sm:$0xff] }
 0x1cd   :  { %17094 = vst [vmem:[#allocation144_spill] sm:$0xff] %v11595_v47  ;;  %v11634_v44 = vadd.f32 %v818_v54, %v491_v41  ;;  %v1716_v19 = vsel %vm697_vm0, %v17111_v12, %v1715_v13  ;;  %v11649_v53 = vmul.f32 %v11207_v9, %v409_v29  ;;  %v17116_v26 = vrot.slane %v17115_v28, 2  ;;  %v344_v54 = vpop.permute.xlu0 %343  ;;  %v17118_v29 = vld [vmem:[#allocation87_spill] sm:$0xff] }
 0x1ce   :  { %17095 = vst [vmem:[#allocation145_spill] sm:$0xff] %v11599_v20  ;;  %v11643_v57 = vadd.f32 %v1206_v24, %v949_v25  ;;  %v1847_v58 = vadd.f32 %v1716_v19, %v1466_v48  ;;  %v11671_v31 = vmul.f32 %v11094_v16, %v344_v54  ;;  %v17132_v40 = vrot.slane %v17115_v28, 2  ;;  %v17133_v20 = vld [vmem:[#allocation126_spill] sm:$0xff]  ;;  %v17137_v28 = vld [vmem:[#allocation15_spill] sm:$0xff] }
 0x1cf   :  { %17100 = vst [vmem:[#allocation113_spill] sm:$0xff] %v11615_v46  ;;  %v17113_v46 = vld [vmem:[#allocation65_spill] sm:$0xff]  ;;  %v1178_v12 = vsel %vm1087_vm1, %v17117_v50, %v17116_v26  ;;  %v2097_v26 = vsel %vm1087_vm1, %v17122_v10, %v17121_v38  ;;  %v613_v50 = vmul.f32 %v11082_v39, %v344_v54  ;;  %v2967_v19 = vrot.slane %v11649_v53, 2 }
 0x1d0   :  { %17108 = vst [vmem:[#allocation21_spill] sm:$0xff] %v11634_v44  ;;  %v17114_v15 = vrot.slane %v17113_v46, 1  ;;  %v1325_v25 = vadd.f32 %v1178_v12, %v11290_v17  ;;  %v2354_v46 = vadd.f32 %v2293_v43, %v2227_v2  ;;  %v17124_v17 = vrot.slane %v17016_v5, 1  ;;  %v17138_v44 = vld [vmem:[#allocation104_spill] sm:$0xff] }
 0x1d1   :  { %17112 = vst [vmem:[#allocation107_spill] sm:$0xff] %v11643_v57  ;;  %v478_v43 = vmul.f32 %v11112_v49, %v344_v54  ;;  %v16242_v30 = vrot.slane %v11671_v31, 2  ;;  %v1391_v12 = vmul.f32 %v11136_v14, %v344_v54  ;;  %v11687_v10 = vmul.f32 %v11154_v23, %v344_v54 }
 0x1d2   :  { %v1718_v41 = vsel %vm697_vm0, %v1715_v13, %v17114_v15  ;;  %v17119_v15 = vld [vmem:[#allocation120_spill] sm:$0xff]  ;;  %17123 = vst [vmem:[#allocation73_spill] sm:$0xff] %v11671_v31  ;;  %v2597_v48 = vsel %vm697_vm0, %v17124_v17, %v2596_v52  ;;  %v2280_v53 = vmul.f32 %v11189_v59, %v344_v54  ;;  %v17128_v17 = vld [vmem:[#allocation13_spill] sm:$0xff]  ;;  %v17131_v13 = vrot.slane %v17130_v60, 1 }
 0x1d3   :  { %v2353_v27 = vadd.f32 %v17119_v15, %v17118_v29  ;;  %v11662_v57 = vadd.f32 %v1718_v41, %v1467_v61  ;;  %v17125_v61 = vld [vmem:[#allocation127_spill] sm:$0xff]  ;;  %v789_v41 = vrot.slane %v613_v50, 1  ;;  %v1520_v29 = vmul.f32 %v11145_v56, %v344_v54  ;;  %v17126_v15 = vld [vmem:[#allocation28_spill] sm:$0xff] }
 0x1d4   :  { %v1453_v2 = vadd.f32 %v17125_v61, %v11304_v36  ;;  %v17127_v38 = vrot.slane %v17126_v15, 1  ;;  %v2407_v36 = vmul.f32 %v11198_v51, %v344_v54  ;;  %v17129_v61 = vrot.slane %v17128_v17, 1 }
 0x1d5   :  { %17120 = vst [vmem:[#allocation117_spill] sm:$0xff] %v11662_v57  ;;  %v792_v24 = vsel %vm697_vm0, %v789_v41, %v17131_v13  ;;  %v1689_v57 = vrot.slane %v1520_v29, 1  ;;  %v2778_v17 = vmul.f32 %v11207_v9, %v344_v54  ;;  %v11706_v47 = vadd.f32 %v2097_v26, %v1847_v58  ;;  %v17141_v54 = vld [vmem:[#allocation22_spill] sm:$0xff] }
 0x1d6   :  { %v2599_v5 = vsel %vm697_vm0, %v2596_v52, %v17127_v38  ;;  %v790_v50 = vsel %vm697_vm0, %v17129_v61, %v789_v41  ;;  %v1180_v52 = vsel %vm1087_vm1, %v17132_v40, %v16242_v30  ;;  %v1454_v38 = vadd.f32 %v1391_v12, %v1325_v25  ;;  %v17134_v61 = vld [vmem:[#allocation128_spill] sm:$0xff] }
 0x1d7   :  { %v936_v18 = vadd.f32 %v790_v50, %v17133_v20  ;;  %v11703_v15 = vadd.f32 %v792_v24, %v478_v43  ;;  %v17135_v60 = vrot.slane %v17134_v61, 2  ;;  %v17136_v13 = vrot.slane %v11279_v7, 2  ;;  %v17139_v20 = vld [vmem:[#allocation129_spill] sm:$0xff] }
 0x1d8   :  { %v2570_v31 = vrot.slane %v2407_v36, 1  ;;  %v2708_v40 = vadd.f32 %v17138_v44, %v17137_v28  ;;  %v2340_v24 = vadd.f32 %v17139_v20, %v11371_v62  ;;  %v17142_v58 = vrot.slane %v17141_v54, 1  ;;  %v17152_v28 = vld [vmem:[#allocation51_spill] sm:$0xff]  ;;  %v17153_v20 = vld [vmem:[#allocation46_spill] sm:$0xff] }
 0x1d9   :  { %v2069_v41 = vsel %vm1087_vm1, %v17136_v13, %v17135_v60  ;;  %v11718_v43 = vadd.f32 %v1180_v52, %v936_v18  ;;  %v11723_v12 = vadd.f32 %v2597_v48, %v2353_v27  ;;  %v11725_v7 = vadd.f32 %v2599_v5, %v2354_v46  ;;  %v17147_v52 = vld [vmem:[#allocation131_spill] sm:$0xff]  ;;  %v17151_v13 = vld [vmem:[#allocation10_spill] sm:$0xff] }
 0x1da   :  { %v2214_v25 = vadd.f32 %v2069_v41, %v11358_v42  ;;  %v1692_v26 = vsel %vm697_vm0, %v1689_v57, %v17142_v58  ;;  %v17144_v60 = vrot.slane %v17031_v37, 2  ;;  %v17146_v42 = vrot.slane %v17020_v1, 1  ;;  %v17149_v48 = vld [vmem:[#allocation111_spill] sm:$0xff]  ;;  %v17150_v37 = vld [vmem:[#allocation114_spill] sm:$0xff] }
 0x1db   :  { %17140 = vst [vmem:[#allocation110_spill] sm:$0xff] %v11718_v43  ;;  %v11732_v44 = vadd.f32 %v1692_v26, %v1454_v38  ;;  %v2941_v50 = vrot.slane %v2778_v17, 2  ;;  %v17148_v27 = vrot.slane %v17147_v52, 1  ;;  %v3079_v5 = vadd.f32 %v17149_v48, %v2708_v40  ;;  %v17155_v58 = vld [vmem:[#allocation74_spill] sm:$0xff]  ;;  %v17157_v17 = vld [vmem:[#allocation83_spill] sm:$0xff] }
 0x1dc   :  { %17143 = vst [vmem:[#allocation25_spill] sm:$0xff] %v11725_v7  ;;  %v11730_v29 = vsel %vm1087_vm1, %v17144_v60, %v2967_v19  ;;  %v1690_v62 = vsel %vm697_vm0, %v17146_v42, %v1689_v57  ;;  %v2341_v36 = vadd.f32 %v2280_v53, %v2214_v25  ;;  %v3080_v41 = vadd.f32 %v17151_v13, %v17150_v37  ;;  %v17154_v57 = vld [vmem:[#allocation89_spill] sm:$0xff]  ;;  %v17158_v60 = vld [vmem:[#allocation36_spill] sm:$0xff]  ;;  %v17159_v48 = vld [vmem:[#allocation55_spill] sm:$0xff] }
 0x1dd   :  { %17145 = vst [vmem:[#allocation87_spill] sm:$0xff] %v11730_v29  ;;  %v2571_v46 = vsel %vm697_vm0, %v17148_v27, %v2570_v31  ;;  %v3145_v38 = vadd.f32 %v11076_v4, %v17152_v28  ;;  %v3146_v1 = vadd.f32 %v11076_v4, %v17153_v20  ;;  %v3093_v26 = vadd.f32 %v17155_v58, %v17154_v57  ;;  %v17156_v53 = vld [vmem:[#allocation41_spill] sm:$0xff] }
 0x1de   :  { %v3094_v25 = vadd.f32 %v17157_v17, %v17156_v53  ;;  %v3159_v42 = vadd.f32 %v11076_v4, %v17158_v60  ;;  %v3147_v40 = vadd.f32 %v11076_v4, %v3079_v5  ;;  %v3148_v52 = vadd.f32 %v11076_v4, %v3080_v41  ;;  %v17160_v58 = vld [vmem:[#allocation133_spill] sm:$0xff] }
 0x1df   :  { %v3209_v27 = vmax.f32 %v3145_v38, 0.0  ;;  %v3160_v37 = vadd.f32 %v11076_v4, %v17159_v48  ;;  %v3210_v13 = vmax.f32 %v3146_v1, 0.0  ;;  %v3161_v28 = vadd.f32 %v11076_v4, %v3093_v26  ;;  %v17162_v5 = vld [vmem:[#allocation53_spill] sm:$0xff] }
 0x1e0   :  { %v3162_v20 = vadd.f32 %v11076_v4, %v3094_v25  ;;  %v3223_v57 = vmax.f32 %v3159_v42, 0.0  ;;  %v17161_v30 = vrot.slane %v17160_v58, 1  ;;  %v3211_v17 = vmax.f32 %v3147_v40, 0.0  ;;  %v239_v40 = vpop.permute.xlu2 %238 }
 0x1e1   :  { %v3212_v60 = vmax.f32 %v3148_v52, 0.0  ;;  %v3224_v18 = vmax.f32 %v3160_v37, 0.0  ;;  %v17163_v43 = vrot.slane %v17162_v5, 2  ;;  %v11768_v38 = vpack.c.bf16 %v3210_v13, %v3209_v27 }
 0x1e2   :  { %v2573_v53 = vsel %vm697_vm0, %v2570_v31, %v17161_v30  ;;  %v3225_v1 = vmax.f32 %v3161_v28, 0.0  ;;  %v3226_v48 = vmax.f32 %v3162_v20, 0.0  ;;  %v1834_v26 = vadd.f32 %v1690_v62, %v1453_v2  ;;  %v17172_v2 = vld [vmem:[#allocation20_spill] sm:$0xff] }
 0x1e3   :  { %v11766_v41 = vsel %vm1087_vm1, %v2967_v19, %v17163_v43  ;;  %17165 = vst [vmem:[#allocation127_spill] sm:$0xff] %v11768_v38  ;;  %v17166_v25 = vrot.slane %v11687_v10, 2  ;;  %v17167_v42 = vrot.slane %v17134_v61, 2  ;;  %v11775_v31 = vpack.c.bf16 %v3212_v60, %v3211_v17  ;;  %v17174_v61 = vld [vmem:[#allocation134_spill] sm:$0xff] }
 0x1e4   :  { %17164 = vst [vmem:[#allocation120_spill] sm:$0xff] %v11766_v41  ;;  %v11777_v30 = vpack.c.bf16 %v3224_v18, %v3223_v57  ;;  %v11779_v52 = vadd.f32 %v2571_v46, %v2340_v24  ;;  %v11781_v19 = vadd.f32 %v2573_v53, %v2341_v36  ;;  %v3420_v43 = vshll.u32 %v11768_v38, 16 }
 0x1e5   :  { %v2071_v58 = vsel %vm1087_vm1, %v17167_v42, %v17166_v25  ;;  %17168 = vst [vmem:[#allocation13_spill] sm:$0xff] %v11775_v31  ;;  %v11784_v27 = vpack.c.bf16 %v3226_v48, %v3225_v1  ;;  %v17173_v62 = vrot.slane %v17172_v2, 2  ;;  %v17175_v13 = vrot.slane %v17174_v61, 2  ;;  %v11813_v1 = vpop.permute.xlu1 %233 }
 0x1e6   :  { %17169 = vst [vmem:[#allocation126_spill] sm:$0xff] %v11777_v30  ;;  %v3428_v18 = vshll.u32 %v11775_v31, 16  ;;  %v3476_v24 = vshll.u32 %v11777_v30, 16  ;;  %v11798_v36 = vrot.slane %v3420_v43, 1  ;;  %v3424_v46 = vshrl.u32 %v11768_v38, 16 }
 0x1e7   :  { %17170 = vst [vmem:[#allocation128_spill] sm:$0xff] %v11781_v19  ;;  %v11789_v37 = vsel %vm1087_vm1, %v17173_v62, %v2941_v50  ;;  %v11794_v28 = vsel %vm1087_vm1, %v2941_v50, %v17175_v13  ;;  %v3484_v20 = vshll.u32 %v11784_v27, 16  ;;  %v11803_v57 = vmul.f32 %v11082_v39, %v239_v40 }
 0x1e8   :  { %17171 = vst [vmem:[#allocation15_spill] sm:$0xff] %v11784_v27  ;;  %v11805_v53 = vrot.slane %v3428_v18, 1  ;;  %v11807_v17 = vrot.slane %v3476_v24, 1  ;;  %v3480_v50 = vshrl.u32 %v11777_v30, 16  ;;  %v11811_v60 = vmul.f32 %v11094_v16, %v239_v40  ;;  %v6043_v24 = vld [vmem:[%s16021_s7 + $0xd0] sm:$0xff] }
 0x1e9   :  { %17176 = vst [vmem:[#allocation104_spill] sm:$0xff] %v11794_v28  ;;  %v11815_v48 = vadd.f32 %v2071_v58, %v1834_v26  ;;  %v3426_v25 = vor.u32 %v3424_v46, %v11798_v36  ;;  %v11818_v42 = vrot.slane %v3484_v20, 1  ;;  %v11821_v43 = vmul.f32 %v11145_v56, %v239_v40  ;;  %v6045_v58 = vld [vmem:[%s16021_s7 + $0xe0] sm:$0xff]  ;;  %v6044_v26 = vld [vmem:[%s16021_s7 + $0xd8] sm:$0xff]  ;;  %6213 = vperm.xlu0 %8644, %v6043_v24  }
 0x1ea   :  { %17177 = vst [vmem:[#allocation129_spill] sm:$0xff] %v11798_v36  ;;  %v3482_v2 = vor.u32 %v3480_v50, %v11807_v17  ;;  %v11825_v62 = vmul.f32 %v11112_v49, %v239_v40  ;;  %v11828_v13 = vmul.f32 %v11136_v14, %v239_v40  ;;  %v11831_v18 = vmul.f32 %v11154_v23, %v239_v40  ;;  %v229_v36 = vpop.permute.xlu0 %228 }
 0x1eb   :  { %17178 = vst [vmem:[#allocation22_spill] sm:$0xff] %v11803_v57  ;;  %v11844_v46 = vsel %vm3275_vm2, %v3426_v25, %v11805_v53  ;;  %v11849_v50 = vmul.f32 %v11082_v39, %v11813_v1  ;;  %v11853_v30 = vmul.f32 %v11094_v16, %v11813_v1  ;;  %6223 = vperm.xlu2 %8646, %v6045_v58   ;;  %v17193_v58 = vrot.slane %v11501_v45, 2 }
 0x1ec   :  { %17179 = vst [vmem:[#allocation131_spill] sm:$0xff] %v11805_v53  ;;  %8049 = vmatmul.msk.bf16.vlgmr.msra.gmra.mxu2 %vm3542_vm3, %v11844_v46  ;;  %v11859_v38 = vsel %vm3275_vm2, %v3482_v2, %v11818_v42  ;;  %v11864_v20 = vmul.f32 %v11145_v56, %v11813_v1  ;;  %6218 = vperm.xlu1 %8645, %v6044_v26   ;;  %v17197_v31 = vrot.slane %v11391_v34, 1  ;;  %v17198_v7 = vrot.slane %v11501_v45, 2 }
 0x1ed   :  { %17180 = vst [vmem:[#allocation111_spill] sm:$0xff] %v11807_v17  ;;  %v11868_v17 = vmul.f32 %v11154_v23, %v11813_v1  ;;  %8056 = vmatmul.msk.bf16.vlgmr.msra.gmra.mxu3 %vm3542_vm3, %v11859_v38  ;;  %v11877_v2 = vmul.f32 %v11198_v51, %v239_v40  ;;  %v11881_v25 = vmul.f32 %v11198_v51, %v11813_v1 }
 0x1ee   :  { %17181 = vst [vmem:[#allocation114_spill] sm:$0xff] %v11811_v60  ;;  %v11885_v26 = vmul.f32 %v11207_v9, %v239_v40  ;;  %v745_v60 = vrot.slane %v11849_v50, 1  ;;  %v2258_v61 = vmul.f32 %v11189_v59, %v11813_v1  ;;  %v980_v19 = vmul.f32 %v11094_v16, %v229_v36 }
 0x1ef   :  { %17182 = vst [vmem:[#allocation10_spill] sm:$0xff] %v11818_v42  ;;  %v1368_v28 = vmul.f32 %v11136_v14, %v229_v36 }
 0x1f0   :  { %17183 = vst [vmem:[#allocation51_spill] sm:$0xff] %v11821_v43 }
 0x1f1   :  { %17184 = vst [vmem:[#allocation46_spill] sm:$0xff] %v11825_v62  ;;  %v17194_v62 = vrot.slane %v11443_v55, 2  ;;  %v17195_v55 = vrot.slane %v11519_v32, 2 }
 0x1f2   :  { %17185 = vst [vmem:[#allocation89_spill] sm:$0xff] %v11831_v18  ;;  %v1645_v18 = vrot.slane %v11864_v20, 1  ;;  %v590_v20 = vmul.f32 %v11082_v39, %v229_v36 }
 0x1f3   :  { %17186 = vst [vmem:[#allocation74_spill] sm:$0xff] %v11844_v46  ;;  %v11874_v46 = vmul.f32 %v11189_v59, %v239_v40  ;;  %v1430_v40 = vadd.f32 %v11515_v6, %v11480_v22  ;;  %v2317_v6 = vadd.f32 %v11551_v21, %v11490_v8  ;;  %v2755_v8 = vmul.f32 %v11207_v9, %v229_v36 }
 0x1f4   :  { %17187 = vst [vmem:[#allocation41_spill] sm:$0xff] %v11853_v30 }
 0x1f5   :  { %17188 = vst [vmem:[#allocation83_spill] sm:$0xff] %v11859_v38  ;;  %v11889_v38 = vmul.f32 %v11207_v9, %v11813_v1 }
 0x1f6   :  { %17189 = vst [vmem:[#allocation36_spill] sm:$0xff] %v11868_v17 }
 0x1f7   :  { %17190 = vst [vmem:[#allocation55_spill] sm:$0xff] %v11874_v46  ;;  %v1132_v46 = vsel %vm1087_vm1, %v17194_v62, %v17193_v58  ;;  %v17196_v62 = vrot.slane %v11448_v33, 2  ;;  %v2526_v58 = vrot.slane %v11881_v25, 1  ;;  %v1497_v33 = vmul.f32 %v11145_v56, %v229_v36 }
 0x1f8   :  { %17191 = vst [vmem:[#allocation20_spill] sm:$0xff] %v11877_v2  ;;  %v1302_v24 = vadd.f32 %v1132_v46, %v11461_v35  ;;  %v2897_v35 = vrot.slane %v11889_v38, 2  ;;  %v455_v46 = vmul.f32 %v11112_v49, %v229_v36  ;;  %v2257_v25 = vmul.f32 %v11189_v59, %v229_v36 }
 0x1f9   :  { %17192 = vst [vmem:[#allocation146_spill] sm:$0xff] %v11885_v26  ;;  %v2023_v50 = vsel %vm1087_vm1, %v17196_v62, %v17195_v55  ;;  %v1878_v55 = vmul.f32 %v11154_v23, %v229_v36  ;;  %v2384_v38 = vmul.f32 %v11198_v51, %v229_v36  ;;  %v1133_v62 = vrot.slane %v980_v19, 2 }
 0x1fa   :  { %v2191_v22 = vadd.f32 %v2023_v50, %v11482_v63  ;;  %v743_v63 = vrot.slane %v590_v20, 1  ;;  %v1431_v50 = vadd.f32 %v1368_v28, %v1302_v24  ;;  %v1643_v21 = vrot.slane %v1497_v33, 1 }
 0x1fb   :  { %v2024_v42 = vrot.slane %v1878_v55, 2  ;;  %v2524_v53 = vrot.slane %v2384_v38, 1  ;;  %v1134_v29 = vsel %vm1087_vm1, %v17198_v7, %v1133_v62  ;;  %v17199_v20 = vrot.slane %v11853_v30, 2 }
 0x1fc   :  { %v2318_v27 = vadd.f32 %v2257_v25, %v2191_v22  ;;  %v744_v5 = vsel %vm697_vm0, %v17197_v31, %v743_v63  ;;  %v746_v41 = vsel %vm697_vm0, %v743_v63, %v745_v60  ;;  %v17200_v24 = vrot.slane %v11404_v0, 1 }
 0x1fd   :  { %v1136_v19 = vsel %vm1087_vm1, %v1133_v62, %v17199_v20  ;;  %v913_v28 = vadd.f32 %v744_v5, %v11511_v11  ;;  %v914_v36 = vadd.f32 %v746_v41, %v455_v46  ;;  %v1646_v34 = vsel %vm697_vm0, %v1643_v21, %v1645_v18 }
 0x1fe   :  { %v1644_v22 = vsel %vm697_vm0, %v17200_v24, %v1643_v21  ;;  %v1812_v33 = vadd.f32 %v1646_v34, %v1431_v50  ;;  %v17201_v55 = vrot.slane %v11519_v32, 2  ;;  %v17202_v7 = vrot.slane %v11868_v17, 2  ;;  %v17209_v50 = vld [vmem:[#allocation24_spill] sm:$0xff]  ;;  %v17210_v21 = vld [vmem:[#allocation23_spill] sm:$0xff] }
 0x1ff   :  { %v1811_v31 = vadd.f32 %v1644_v22, %v1430_v40  ;;  %v11945_v38 = vadd.f32 %v1134_v29, %v913_v28  ;;  %v1304_v11 = vadd.f32 %v1136_v19, %v914_v36  ;;  %v17204_v5 = vrot.slane %v11415_v3, 1  ;;  %v17211_v3 = vld [vmem:[#allocation66_spill] sm:$0xff]  ;;  %v17212_v19 = vld [vmem:[#allocation68_spill] sm:$0xff]  ;;  %v11964_v36 = vpop.permute.xlu2 %283  ;;  %v17214_v22 = vld [vmem:[#allocation139_spill] sm:$0xff] }
 0x200   :  { %v2025_v45 = vsel %vm1087_vm1, %v17201_v55, %v2024_v42  ;;  %v2027_v25 = vsel %vm1087_vm1, %v2024_v42, %v17202_v7  ;;  %v2527_v41 = vsel %vm697_vm0, %v2524_v53, %v2526_v58  ;;  %v17208_v62 = vrot.slane %v11803_v57, 1 }
 0x201   :  { %17203 = vst [vmem:[#allocation147_spill] sm:$0xff] %v11945_v38  ;;  %v2525_v0 = vsel %vm697_vm0, %v17204_v5, %v2524_v53  ;;  %v2192_v46 = vadd.f32 %v2025_v45, %v1811_v31  ;;  %v11951_v40 = vadd.f32 %v2027_v25, %v1812_v33  ;;  %v11955_v32 = vadd.f32 %v2527_v41, %v2318_v27  ;;  %v17218_v31 = vld [vmem:[#allocation26_spill] sm:$0xff] }
 0x202   :  { %v11953_v63 = vadd.f32 %v2525_v0, %v2317_v6  ;;  %v748_v42 = vsel %vm697_vm0, %v745_v60, %v17208_v62  ;;  %v2895_v29 = vrot.slane %v2755_v8, 2  ;;  %v2682_v20 = vadd.f32 %v17210_v21, %v17209_v50  ;;  %v17227_v21 = vld [vmem:[#allocation143_spill] sm:$0xff] }
 0x203   :  { %17205 = vst [vmem:[#allocation148_spill] sm:$0xff] %v11951_v40  ;;  %v3054_v28 = vadd.f32 %v17212_v19, %v17211_v3  ;;  %v16264_v53 = vrot.slane %v11877_v2, 1  ;;  %v16263_v6 = vrot.slane %v11885_v26, 2  ;;  %v456_v27 = vmul.f32 %v11112_v49, %v11813_v1 }
 0x204   :  { %17206 = vst [vmem:[#allocation149_spill] sm:$0xff] %v11953_v63  ;;  %v11970_v24 = vadd.f32 %v2258_v61, %v2192_v46  ;;  %v17215_v60 = vrot.slane %v17214_v22, 2  ;;  %v11978_v34 = vsel %vm1087_vm1, %v2895_v29, %v2897_v35  ;;  %v3053_v33 = vadd.f32 %v17218_v31, %v2682_v20  ;;  %v17223_v46 = vld [vmem:[#allocation108_spill] sm:$0xff]  ;;  %v419_v22 = vpop.permute.xlu1 %418 }
 0x205   :  { %17207 = vst [vmem:[#allocation150_spill] sm:$0xff] %v11955_v32  ;;  %v3122_v55 = vadd.f32 %v11076_v4, %v3054_v28  ;;  %v11982_v45 = vadd.f32 %v748_v42, %v456_v27  ;;  %v11986_v7 = vmul.f32 %v11136_v14, %v11813_v1  ;;  %v17221_v61 = vrot.slane %v11821_v43, 1  ;;  %v17230_v28 = vld [vmem:[#allocation14_spill] sm:$0xff] }
 0x206   :  { %17213 = vst [vmem:[#allocation24_spill] sm:$0xff] %v11970_v24  ;;  %v11975_v8 = vsel %vm1087_vm1, %v17215_v60, %v2895_v29  ;;  %v11995_v5 = vmul.f32 %v11082_v39, %v11964_v36  ;;  %v3121_v0 = vadd.f32 %v11076_v4, %v3053_v33  ;;  %v3320_v62 = vshrl.u32 %v17223_v46, 16  ;;  %v6046_v60 = vld [vmem:[%s16021_s7 + $0xe8] sm:$0xff] }
 0x207   :  { %17216 = vst [vmem:[#allocation23_spill] sm:$0xff] %v11975_v8  ;;  %v11991_v25 = vsel %vm697_vm0, %v1645_v18, %v17221_v61  ;;  %v3186_v41 = vmax.f32 %v3122_v55, 0.0  ;;  %v12001_v42 = vmul.f32 %v11094_v16, %v11964_v36  ;;  %v12006_v1 = vsel %vm697_vm0, %v2526_v58, %v16264_v53  ;;  %v17228_v58 = vld [vmem:[#allocation29_spill] sm:$0xff]  ;;  %6228 = vperm.xlu0 %8644, %v6046_v60  }
 0x208   :  { %17217 = vst [vmem:[#allocation66_spill] sm:$0xff] %v11978_v34  ;;  %v12011_v18 = vsel %vm1087_vm1, %v2897_v35, %v16263_v6  ;;  %v12014_v29 = vadd.f32 %v11828_v13, %v1304_v11  ;;  %v12018_v4 = vmul.f32 %v11112_v49, %v11964_v36  ;;  %v3185_v50 = vmax.f32 %v3121_v0, 0.0  ;;  %v6048_v13 = vld [vmem:[%s16021_s7 + $0xf8] sm:$0xff]  ;;  %v6047_v11 = vld [vmem:[%s16021_s7 + $0xf0] sm:$0xff]  ;;  %v17232_v55 = vld [vmem:[#allocation21_spill] sm:$0xff] }
 0x209   :  { %17219 = vst [vmem:[#allocation68_spill] sm:$0xff] %v11982_v45  ;;  %v3322_v20 = vor.u32 %v3320_v62, %v17227_v21  ;;  %v12023_v3 = vmul.f32 %v11136_v14, %v11964_v36  ;;  %v17229_v19 = vrot.slane %v17228_v58, 2  ;;  %v17231_v27 = vrot.slane %v17230_v28, 2  ;;  %v17233_v0 = vld [vmem:[#allocation107_spill] sm:$0xff]  ;;  %v17234_v62 = vld [vmem:[#allocation84_spill] sm:$0xff]  ;;  %6238 = vperm.xlu2 %8646, %v6048_v13   ;;  %6233 = vperm.xlu1 %8645, %v6047_v11   ;;  %v17247_v46 = vld [vmem:[#allocation81_spill] sm:$0xff] }
 0x20a   :  { %17220 = vst [vmem:[#allocation139_spill] sm:$0xff] %v11986_v7  ;;  %v12042_v33 = vmul.f32 %v11145_v56, %v11964_v36  ;;  %v1468_v21 = vadd.f32 %v17234_v62, %v17233_v0  ;;  %v12056_v6 = vmul.f32 %v11189_v59, %v11964_v36  ;;  %v628_v13 = vmul.f32 %v11082_v39, %v419_v22  ;;  %v17243_v34 = vld [vmem:[#allocation80_spill] sm:$0xff] }
 0x20b   :  { %17222 = vst [vmem:[#allocation26_spill] sm:$0xff] %v11991_v25  ;;  %v1208_v35 = vsel %vm1087_vm1, %v17231_v27, %v17229_v19  ;;  %v12047_v19 = vpack.c.bf16 %v3186_v41, %v3185_v50  ;;  %v12052_v27 = vmul.f32 %v11154_v23, %v11964_v36  ;;  %v12064_v41 = vmul.f32 %v11094_v16, %v419_v22 }
 0x20c   :  { %17224 = vst [vmem:[#allocation151_spill] sm:$0xff] %v12006_v1  ;;  %v1340_v61 = vadd.f32 %v1208_v35, %v17232_v55  ;;  %v12060_v35 = vmul.f32 %v11198_v51, %v11964_v36  ;;  %v1406_v50 = vmul.f32 %v11136_v14, %v419_v22  ;;  %v493_v55 = vmul.f32 %v11112_v49, %v419_v22  ;;  %v17241_v1 = vld [vmem:[#allocation32_spill] sm:$0xff] }
 0x20d   :  { %17225 = vst [vmem:[#allocation152_spill] sm:$0xff] %v12011_v18  ;;  %v3324_v11 = vshll.u32 %v12047_v19, 16  ;;  %v1535_v0 = vmul.f32 %v11145_v56, %v419_v22  ;;  %v12071_v62 = vmul.f32 %v11154_v23, %v419_v22  ;;  %v819_v60 = vrot.slane %v628_v13, 1 }
 0x20e   :  { %17226 = vst [vmem:[#allocation153_spill] sm:$0xff] %v12014_v29  ;;  %v16265_v53 = vrot.slane %v12064_v41, 2  ;;  %v1469_v28 = vadd.f32 %v1406_v50, %v1340_v61  ;;  %v2422_v39 = vmul.f32 %v11198_v51, %v419_v22  ;;  %v2295_v18 = vmul.f32 %v11189_v59, %v419_v22 }
 0x20f   :  { %17235 = vst [vmem:[#allocation143_spill] sm:$0xff] %v12047_v19  ;;  %v12075_v31 = vrot.slane %v3324_v11, 1  ;;  %v1719_v16 = vrot.slane %v1535_v0, 1  ;;  %v17242_v49 = vrot.slane %v17241_v1, 1  ;;  %v17244_v23 = vrot.slane %v17243_v34, 1 }
 0x210   :  { %17236 = vst [vmem:[#allocation29_spill] sm:$0xff] %v12052_v27  ;;  %v17245_v61 = vrot.slane %v17228_v58, 2  ;;  %v2600_v11 = vrot.slane %v2422_v39, 1 }
 0x211   :  { %17237 = vst [vmem:[#allocation14_spill] sm:$0xff] %v12056_v6  ;;  %v820_v24 = vsel %vm697_vm0, %v17242_v49, %v819_v60  ;;  %v822_v13 = vsel %vm697_vm0, %v819_v60, %v17244_v23  ;;  %v12092_v0 = vsel %vm3275_vm2, %v3322_v20, %v12075_v31  ;;  %v17249_v49 = vld [vmem:[#allocation65_spill] sm:$0xff]  ;;  %v17251_v60 = vld [vmem:[#allocation50_spill] sm:$0xff]  ;;  %v17253_v23 = vld [vmem:[#allocation144_spill] sm:$0xff] }
 0x212   :  { %17238 = vst [vmem:[#allocation21_spill] sm:$0xff] %v12060_v35  ;;  %v1210_v50 = vsel %vm1087_vm1, %v17245_v61, %v16265_v53  ;;  %v951_v32 = vadd.f32 %v820_v24, %v17247_v46  ;;  %v12095_v1 = vadd.f32 %v822_v13, %v493_v55  ;;  %v17250_v8 = vrot.slane %v17249_v49, 1  ;;  %8036 = vmatmul.msk.bf16.gmra.mxu0 %vm3542_vm3, %v12092_v0  ;;  %v17255_v53 = vld [vmem:[#allocation88_spill] sm:$0xff]  ;;  %v17260_v49 = vld [vmem:[#allocation117_spill] sm:$0xff] }
 0x213   :  { %17239 = vst [vmem:[#allocation107_spill] sm:$0xff] %v12064_v41  ;;  %v17252_v58 = vrot.slane %v17251_v60, 2  ;;  %v17254_v61 = vrot.slane %v17253_v23, 2  ;;  %v17256_v20 = vrot.slane %v17255_v53, 1  ;;  %v17257_v46 = vrot.slane %v12071_v62, 2  ;;  %v17265_v60 = vld [vmem:[#allocation52_spill] sm:$0xff] }
 0x214   :  { %17240 = vst [vmem:[#allocation84_spill] sm:$0xff] %v12071_v62  ;;  %v1720_v63 = vsel %vm697_vm0, %v17250_v8, %v1719_v16  ;;  %v12117_v13 = vmul.f32 %v11207_v9, %v11964_v36  ;;  %v12120_v23 = vadd.f32 %v1210_v50, %v951_v32  ;;  %v17271_v50 = vld [vmem:[#allocation17_spill] sm:$0xff] }
 0x215   :  { %17246 = vst [vmem:[#allocation32_spill] sm:$0xff] %v12092_v0  ;;  %v2099_v39 = vsel %vm1087_vm1, %v17254_v61, %v17252_v58  ;;  %v1722_v29 = vsel %vm697_vm0, %v1719_v16, %v17256_v20  ;;  %v1849_v24 = vadd.f32 %v1720_v63, %v1468_v21  ;;  %v17258_v55 = vmov %v17252_v58  ;;  %v354_v61 = vpop.permute.xlu0 %353  ;;  %v17263_v63 = vld [vmem:[#allocation7_spill] sm:$0xff] }
 0x216   :  { %17248 = vst [vmem:[#allocation81_spill] sm:$0xff] %v12095_v1  ;;  %v2101_v8 = vsel %vm1087_vm1, %v17258_v55, %v17257_v46  ;;  %v2229_v0 = vadd.f32 %v2099_v39, %v17260_v49  ;;  %v12122_v58 = vadd.f32 %v1722_v29, %v1469_v28  ;;  %v2355_v21 = vadd.f32 %v17263_v63, %v11706_v47  ;;  %v17267_v55 = vld [vmem:[#allocation73_spill] sm:$0xff]  ;;  %v17269_v39 = vld [vmem:[#allocation28_spill] sm:$0xff]  ;;  %v17350_v1 = vld [vmem:[#allocation142_spill] sm:$0xff] }
 0x217   :  { %17259 = vst [vmem:[#allocation65_spill] sm:$0xff] %v12117_v13  ;;  %v12127_v20 = vadd.f32 %v2101_v8, %v1849_v24  ;;  %v17266_v46 = vrot.slane %v17265_v60, 2  ;;  %v17268_v26 = vrot.slane %v17267_v55, 2  ;;  %v17270_v32 = vrot.slane %v17269_v39, 1  ;;  %v17274_v24 = vld [vmem:[#allocation137_spill] sm:$0xff] }
 0x218   :  { %17261 = vst [vmem:[#allocation50_spill] sm:$0xff] %v12120_v23  ;;  %v2356_v43 = vadd.f32 %v2295_v18, %v2229_v0  ;;  %v17272_v49 = vrot.slane %v17271_v50, 2  ;;  %v17273_v16 = vrot.slane %v11687_v10, 2  ;;  %v17275_v8 = vrot.slane %v17274_v24, 1  ;;  %v12151_v18 = vld [vmem:[%s16015_s1 + $0x1] ss:$0 sm:$0xff] }
 0x219   :  { %17262 = vst [vmem:[#allocation144_spill] sm:$0xff] %v12122_v58  ;;  %v1182_v36 = vsel %vm1087_vm1, %v17268_v26, %v17266_v46  ;;  %v2601_v29 = vsel %vm697_vm0, %v17270_v32, %v2600_v11  ;;  %v2793_v55 = vmul.f32 %v11207_v9, %v419_v22  ;;  %v1393_v0 = vmul.f32 %v11136_v14, %v354_v61  ;;  %v12238_v22 = vpop.permute.xlu2 %288  ;;  %v17308_v24 = vld [vmem:[#allocation10_spill] sm:$0xff] }
 0x21a   :  { %17264 = vst [vmem:[#allocation117_spill] sm:$0xff] %v12127_v20  ;;  %v1327_v28 = vadd.f32 %v1182_v36, %v11703_v15  ;;  %v2073_v47 = vsel %vm1087_vm1, %v17273_v16, %v17272_v49  ;;  %v2603_v63 = vsel %vm697_vm0, %v2600_v11, %v17275_v8  ;;  %v12154_v15 = vmul.f32 %v12151_v18, %v354_v61  ;;  %v17281_v8 = vld [vmem:[#allocation75_spill] sm:$0xff] }
 0x21b   :  { %v2216_v26 = vadd.f32 %v2073_v47, %v11732_v44  ;;  %v12159_v16 = vmul.f32 %v11145_v56, %v354_v61  ;;  %v2282_v11 = vmul.f32 %v11189_v59, %v354_v61  ;;  %v12164_v46 = vadd.f32 %v2601_v29, %v2355_v21  ;;  %v17280_v47 = vld [vmem:[#allocation132_spill] sm:$0xff]  ;;  %v17313_v20 = vld [vmem:[#allocation63_spill] sm:$0xff] }
 0x21c   :  { %17276 = vst [vmem:[#allocation7_spill] sm:$0xff] %v12154_v15  ;;  %v16271_v36 = vrot.slane %v12154_v15, 1  ;;  %v12167_v39 = vadd.f32 %v2603_v63, %v2356_v43  ;;  %v12169_v32 = vadd.f32 %v1393_v0, %v1327_v28  ;;  %v2971_v56 = vrot.slane %v2793_v55, 2  ;;  %v17284_v43 = vld [vmem:[#allocation79_spill] sm:$0xff]  ;;  %v17285_v63 = vld [vmem:[#allocation90_spill] sm:$0xff] }
 0x21d   :  { %17277 = vst [vmem:[#allocation73_spill] sm:$0xff] %v12159_v16  ;;  %v16270_v49 = vrot.slane %v12159_v16, 1  ;;  %v12172_v14 = vadd.f32 %v2282_v11, %v2216_v26  ;;  %v12176_v59 = vadd.f32 %v17280_v47, %v11815_v48  ;;  %v17282_v21 = vrot.slane %v17281_v8, 1  ;;  %v17289_v11 = vld [vmem:[#allocation87_spill] sm:$0xff]  ;;  %v12204_v8 = vld [vmem:[%s16015_s1] ss:$0 sm:$0xff] }
 0x21e   :  { %17278 = vst [vmem:[#allocation28_spill] sm:$0xff] %v12169_v32  ;;  %v3081_v28 = vadd.f32 %v17285_v63, %v17284_v43  ;;  %v17286_v26 = vrot.slane %v17141_v54, 1  ;;  %v12195_v48 = vmul.f32 %v11198_v51, %v354_v61  ;;  %v3082_v0 = vadd.f32 %v11789_v37, %v11779_v52  ;;  %v12212_v54 = vld [vmem:[%s16015_s1 + $0x2] ss:$0 sm:$0xff]  ;;  %v17293_v43 = vld [vmem:[#allocation120_spill] sm:$0xff] }
 0x21f   :  { %17279 = vst [vmem:[#allocation154_spill] sm:$0xff] %v12172_v14  ;;  %v12183_v29 = vsel %vm697_vm0, %v17282_v21, %v16271_v36  ;;  %v3095_v47 = vadd.f32 %v17289_v11, %v11723_v12  ;;  %v12207_v21 = vmul.f32 %v12204_v8, %v354_v61  ;;  %v12215_v51 = vmul.f32 %v12212_v54, %v354_v61  ;;  %v12220_v12 = vld [vmem:[%s16016_s2] ss:$0 sm:$0xff]  ;;  %v17292_v37 = vld [vmem:[#allocation25_spill] sm:$0xff] }
 0x220   :  { %17283 = vst [vmem:[#allocation132_spill] sm:$0xff] %v12183_v29  ;;  %v12192_v55 = vsel %vm697_vm0, %v17286_v26, %v16270_v49  ;;  %v3149_v52 = vadd.f32 %v12220_v12, %v3081_v28  ;;  %v3096_v63 = vadd.f32 %v17293_v43, %v17292_v37  ;;  %v12228_v26 = vld [vmem:[%s16015_s1 + $0x5] ss:$0 sm:$0xff]  ;;  %v12234_v49 = vmul.f32 %v11207_v9, %v354_v61  ;;  %v17298_v43 = vld [vmem:[#allocation138_spill] sm:$0xff] }
 0x221   :  { %17287 = vst [vmem:[#allocation75_spill] sm:$0xff] %v12192_v55  ;;  %v12231_v11 = vmul.f32 %v12228_v26, %v354_v61  ;;  %v3150_v36 = vadd.f32 %v12220_v12, %v3082_v0  ;;  %v3163_v44 = vadd.f32 %v12220_v12, %v3095_v47  ;;  %v17296_v28 = vld [vmem:[#allocation53_spill] sm:$0xff]  ;;  %v17299_v14 = vrot.slane %v17298_v43, 2 }
 0x222   :  { %17288 = vst [vmem:[#allocation79_spill] sm:$0xff] %v12195_v48  ;;  %v17297_v10 = vrot.slane %v17296_v28, 2  ;;  %v17300_v16 = vld [vmem:[#allocation13_spill] sm:$0xff]  ;;  %v3164_v9 = vadd.f32 %v12220_v12, %v3096_v63  ;;  %v3213_v0 = vmax.f32 %v3149_v52, 0.0  ;;  %v992_v43 = vmul.f32 %v12212_v54, %v12238_v22 }
 0x223   :  { %17290 = vst [vmem:[#allocation90_spill] sm:$0xff] %v12207_v21  ;;  %v12248_v32 = vsel %vm1087_vm1, %v2971_v56, %v17299_v14  ;;  %v3432_v21 = vshrl.u32 %v17300_v16, 16  ;;  %v3214_v47 = vmax.f32 %v3150_v36, 0.0  ;;  %v3227_v15 = vmax.f32 %v3163_v44, 0.0  ;;  %v17302_v16 = vld [vmem:[#allocation131_spill] sm:$0xff]  ;;  %v17310_v29 = vld [vmem:[#allocation57_spill] sm:$0xff] }
 0x224   :  { %17291 = vst [vmem:[#allocation87_spill] sm:$0xff] %v12215_v51  ;;  %v12243_v37 = vsel %vm1087_vm1, %v17297_v10, %v2971_v56  ;;  %v3228_v28 = vmax.f32 %v3164_v9, 0.0  ;;  %v602_v10 = vmul.f32 %v12151_v18, %v12238_v22  ;;  %v12265_v36 = vld [vmem:[%s16015_s1 + $0x4] ss:$0 sm:$0xff]  ;;  %v17304_v9 = vld [vmem:[#allocation15_spill] sm:$0xff]  ;;  %v1157_v55 = vrot.slane %v992_v43, 2 }
 0x225   :  { %17294 = vst [vmem:[#allocation25_spill] sm:$0xff] %v12231_v11  ;;  %v12259_v56 = vpack.c.bf16 %v3214_v47, %v3213_v0  ;;  %v3434_v63 = vor.u32 %v3432_v21, %v17302_v16  ;;  %v1509_v44 = vmul.f32 %v12265_v36, %v12238_v22  ;;  %v3488_v50 = vshrl.u32 %v17304_v9, 16  ;;  %v6051_v0 = vld [vmem:[%s16021_s7 + $0x110] sm:$0xff]  ;;  %v6050_v16 = vld [vmem:[%s16021_s7 + $0x108] sm:$0xff]  ;;  %v6049_v21 = vld [vmem:[%s16021_s7 + $0x100] sm:$0xff] }
 0x226   :  { %17295 = vst [vmem:[#allocation120_spill] sm:$0xff] %v12234_v49  ;;  %v12269_v52 = vpack.c.bf16 %v3228_v28, %v3227_v15  ;;  %v767_v61 = vrot.slane %v602_v10, 1  ;;  %v17305_v47 = vrot.slane %v12195_v48, 1  ;;  %v17306_v15 = vld [vmem:[#allocation133_spill] sm:$0xff]  ;;  %v467_v10 = vmul.f32 %v12204_v8, %v12238_v22  ;;  %6253 = vperm.xlu2 %8646, %v6051_v0   ;;  %6248 = vperm.xlu1 %8645, %v6050_v16  }
 0x227   :  { %17301 = vst [vmem:[#allocation53_spill] sm:$0xff] %v12259_v56  ;;  %v17307_v28 = vrot.slane %v17306_v15, 1  ;;  %v3436_v43 = vshll.u32 %v12259_v56, 16  ;;  %v1890_v9 = vmul.f32 %v12228_v26, %v12238_v22  ;;  %v3490_v60 = vor.u32 %v3488_v50, %v17308_v24  ;;  %6243 = vperm.xlu0 %8644, %v6049_v21  }
 0x228   :  { %17303 = vst [vmem:[#allocation131_spill] sm:$0xff] %v12269_v52  ;;  %v3492_v51 = vshll.u32 %v12269_v52, 16  ;;  %v17309_v48 = vrot.slane %v11995_v5, 1  ;;  %v1667_v0 = vrot.slane %v1509_v44, 1  ;;  %v17312_v50 = vrot.slane %v12001_v42, 2 }
 0x229   :  { %v2575_v14 = vsel %vm697_vm0, %v17307_v28, %v17305_v47  ;;  %v17311_v47 = vrot.slane %v17310_v29, 1  ;;  %v12299_v53 = vrot.slane %v3436_v43, 1  ;;  %v17314_v62 = vrot.slane %v17313_v20, 2  ;;  %v12313_v29 = vld [vmem:[%s16015_s1 + $0x7] ss:$0 sm:$0xff] }
 0x22a   :  { %v768_v15 = vsel %vm697_vm0, %v17309_v48, %v767_v61  ;;  %v12302_v16 = vrot.slane %v3492_v51, 1  ;;  %v1158_v24 = vsel %vm1087_vm1, %v17312_v50, %v1157_v55  ;;  %17315 = vst [vmem:[#allocation133_spill] sm:$0xff] %v12313_v29  ;;  %v2048_v43 = vrot.slane %v1890_v9, 2 }
 0x22b   :  { %v770_v28 = vsel %vm697_vm0, %v767_v61, %v17311_v47  ;;  %v925_v34 = vadd.f32 %v768_v15, %v12018_v4  ;;  %v1160_v48 = vsel %vm1087_vm1, %v1157_v55, %v17314_v62  ;;  %v2396_v4 = vmul.f32 %v12313_v29, %v12238_v22  ;;  %v259_v61 = vpop.permute.xlu1 %258  ;;  %v17318_v55 = vld [vmem:[#allocation134_spill] sm:$0xff] }
 0x22c   :  { %v926_v58 = vadd.f32 %v770_v28, %v467_v10  ;;  %v12319_v51 = vsel %vm3275_vm2, %v3434_v63, %v12299_v53  ;;  %v12322_v20 = vadd.f32 %v2575_v14, %v12176_v59  ;;  %v17317_v62 = vrot.slane %v12234_v49, 2  ;;  %v12349_v59 = vld [vmem:[%s16015_s1 + $0x3] ss:$0 sm:$0xff]  ;;  %v17322_v47 = vld [vmem:[#allocation42_spill] sm:$0xff]  ;;  %v17333_v49 = vld [vmem:[#allocation59_spill] sm:$0xff] }
 0x22d   :  { %17316 = vst [vmem:[#allocation10_spill] sm:$0xff] %v12319_v51  ;;  %v1315_v44 = vadd.f32 %v1158_v24, %v925_v34  ;;  %v17319_v10 = vrot.slane %v17318_v55, 2  ;;  %8050 = vmatmul.msk.bf16.gmra.mxu2 %vm3542_vm3, %v12319_v51  ;;  %v12335_v63 = vsel %vm3275_vm2, %v3490_v60, %v12302_v16  ;;  %v12340_v34 = vld [vmem:[%s16015_s1 + $0x8] ss:$0 sm:$0xff]  ;;  %v12353_v60 = vmul.f32 %v12349_v59, %v12238_v22 }
 0x22e   :  { %v1316_v21 = vadd.f32 %v1160_v48, %v926_v58  ;;  %17320 = vst [vmem:[#allocation57_spill] sm:$0xff] %v12335_v63  ;;  %v2767_v58 = vmul.f32 %v12340_v34, %v12238_v22  ;;  %8057 = vmatmul.msk.bf16.gmra.mxu3 %vm3542_vm3, %v12335_v63  ;;  %v17321_v14 = vld [vmem:[#allocation37_spill] sm:$0xff]  ;;  %v596_v50 = vmul.f32 %v12151_v18, %v259_v61  ;;  %v17323_v24 = vrot.slane %v12042_v33, 1 }
 0x22f   :  { %v12329_v15 = vsel %vm1087_vm1, %v17319_v10, %v17317_v62  ;;  %v1444_v9 = vadd.f32 %v17321_v14, %v1315_v44  ;;  %v17325_v62 = vld [vmem:[#allocation58_spill] sm:$0xff]  ;;  %v12371_v63 = vld [vmem:[%s16015_s1 + $0x6] ss:$0 sm:$0xff]  ;;  %v17328_v14 = vld [vmem:[#allocation27_spill] sm:$0xff]  ;;  %v17334_v23 = vrot.slane %v17333_v49, 2  ;;  %v17338_v49 = vrot.slane %v12060_v35, 1 }
 0x230   :  { %v1445_v28 = vadd.f32 %v17322_v47, %v1316_v21  ;;  %v12361_v48 = vsel %vm697_vm0, %v17323_v24, %v1667_v0  ;;  %v17326_v55 = vrot.slane %v17325_v62, 1  ;;  %v12375_v44 = vmul.f32 %v12371_v63, %v12238_v22  ;;  %v17330_v24 = vld [vmem:[#allocation77_spill] sm:$0xff] }
 0x231   :  { %17324 = vst [vmem:[#allocation63_spill] sm:$0xff] %v12361_v48  ;;  %v2548_v21 = vrot.slane %v2396_v4, 1  ;;  %v12378_v47 = vadd.f32 %v17328_v14, %v1444_v9  ;;  %v17331_v62 = vrot.slane %v12052_v27, 2  ;;  %v12392_v2 = vsel %vm1087_vm1, %v2048_v43, %v17334_v23  ;;  %v254_v14 = vpop.permute.xlu0 %253  ;;  %v17394_v27 = vld [vmem:[#allocation140_spill] sm:$0xff] }
 0x232   :  { %v12366_v10 = vsel %vm697_vm0, %v1667_v0, %v17326_v55  ;;  %17327 = vst [vmem:[#allocation134_spill] sm:$0xff] %v12375_v44  ;;  %v1826_v51 = vadd.f32 %v17330_v24, %v1445_v28  ;;  %v12387_v55 = vmul.f32 %v12212_v54, %v259_v61  ;;  %v2919_v22 = vrot.slane %v2767_v58, 2 }
 0x233   :  { %17329 = vst [vmem:[#allocation37_spill] sm:$0xff] %v12378_v47  ;;  %v12384_v0 = vsel %vm1087_vm1, %v17331_v62, %v2048_v43  ;;  %v755_v4 = vrot.slane %v596_v50, 1  ;;  %v1503_v9 = vmul.f32 %v12265_v36, %v259_v61  ;;  %v17336_v47 = vld [vmem:[#allocation78_spill] sm:$0xff]  ;;  %v461_v24 = vmul.f32 %v12204_v8, %v259_v61  ;;  %v17340_v43 = vld [vmem:[#allocation60_spill] sm:$0xff] }
 0x234   :  { %17332 = vst [vmem:[#allocation42_spill] sm:$0xff] %v12384_v0  ;;  %v12396_v28 = vadd.f32 %v17336_v47, %v1826_v51  ;;  %v1884_v62 = vmul.f32 %v12228_v26, %v259_v61  ;;  %v12401_v0 = vmul.f32 %v12313_v29, %v259_v61  ;;  %v12406_v23 = vsel %vm697_vm0, %v17338_v49, %v2548_v21 }
 0x235   :  { %17335 = vst [vmem:[#allocation58_spill] sm:$0xff] %v12392_v2  ;;  %v17341_v58 = vrot.slane %v17340_v43, 1  ;;  %v12414_v51 = vmul.f32 %v12349_v59, %v259_v61  ;;  %v12417_v47 = vmul.f32 %v12340_v34, %v259_v61  ;;  %v12422_v57 = vmul.f32 %v12151_v18, %v254_v14  ;;  %v12498_v2 = vpop.permute.xlu1 %273 }
 0x236   :  { %17337 = vst [vmem:[#allocation27_spill] sm:$0xff] %v12396_v28  ;;  %v12425_v49 = vmul.f32 %v12212_v54, %v254_v14  ;;  %v17346_v43 = vrot.slane %v12117_v13, 2  ;;  %v2036_v41 = vrot.slane %v1884_v62, 2  ;;  %v17351_v40 = vrot.slane %v17350_v1, 1 }
 0x237   :  { %17339 = vst [vmem:[#allocation77_spill] sm:$0xff] %v12406_v23  ;;  %v12411_v50 = vsel %vm697_vm0, %v2548_v21, %v17341_v58  ;;  %v17348_v58 = vld [vmem:[#allocation5_spill] sm:$0xff]  ;;  %v16290_v28 = vrot.slane %v12417_v47, 2  ;;  %v17352_v45 = vrot.slane %v12401_v0, 1  ;;  %v460_v62 = vmul.f32 %v12204_v8, %v254_v14 }
 0x238   :  { %17342 = vst [vmem:[#allocation59_spill] sm:$0xff] %v12411_v50  ;;  %v12430_v21 = vsel %vm1087_vm1, %v17346_v43, %v2919_v22  ;;  %v17349_v50 = vrot.slane %v17348_v58, 1  ;;  %v12445_v43 = vmul.f32 %v12265_v36, %v254_v14  ;;  %v12457_v30 = vmul.f32 %v12228_v26, %v254_v14 }
 0x239   :  { %17343 = vst [vmem:[#allocation78_spill] sm:$0xff] %v12414_v51  ;;  %v1655_v51 = vrot.slane %v1503_v9, 1  ;;  %v12441_v44 = vsel %vm697_vm0, %v17352_v45, %v17351_v40  ;;  %v17359_v40 = vld [vmem:[#allocation61_spill] sm:$0xff]  ;;  %v12465_v35 = vmul.f32 %v12371_v63, %v259_v61  ;;  %v17363_v25 = vrot.slane %v12422_v57, 1 }
 0x23a   :  { %17344 = vst [vmem:[#allocation60_spill] sm:$0xff] %v12422_v57  ;;  %v758_v23 = vsel %vm697_vm0, %v755_v4, %v17349_v50  ;;  %v17360_v45 = vrot.slane %v17359_v40, 2  ;;  %v6053_v50 = vld [vmem:[%s16021_s7 + $0x120] sm:$0xff]  ;;  %v17364_v40 = vld [vmem:[#allocation67_spill] sm:$0xff] }
 0x23b   :  { %17345 = vst [vmem:[#allocation155_spill] sm:$0xff] %v12425_v49  ;;  %6263 = vperm.xlu1 %8645, %v6053_v50   ;;  %v17375_v50 = vrot.slane %v12425_v49, 2 }
 0x23c   :  { %17347 = vst [vmem:[#allocation156_spill] sm:$0xff] %v12430_v21  ;;  %v17355_v21 = vld [vmem:[#allocation145_spill] sm:$0xff]  ;;  %v12462_v13 = vsel %vm1087_vm1, %v2919_v22, %v17360_v45  ;;  %v6052_v22 = vld [vmem:[%s16021_s7 + $0x118] sm:$0xff]  ;;  %v17366_v45 = vld [vmem:[#allocation34_spill] sm:$0xff] }
 0x23d   :  { %17353 = vst [vmem:[#allocation5_spill] sm:$0xff] %v12441_v44  ;;  %v17356_v17 = vrot.slane %v17355_v21, 2  ;;  %v920_v44 = vadd.f32 %v758_v23, %v461_v24  ;;  %v12481_v23 = vmul.f32 %v12313_v29, %v254_v14  ;;  %v17373_v24 = vld [vmem:[#allocation62_spill] sm:$0xff]  ;;  %6258 = vperm.xlu0 %8644, %v6052_v22  }
 0x23e   :  { %17354 = vst [vmem:[#allocation142_spill] sm:$0xff] %v12445_v43 }
 0x23f   :  { %v12452_v9 = vsel %vm1087_vm1, %v16290_v28, %v17356_v17  ;;  %17358 = vst [vmem:[#allocation157_spill] sm:$0xff] %v12457_v30  ;;  %v756_v17 = vsel %vm697_vm0, %v17363_v25, %v755_v4  ;;  %v6054_v28 = vld [vmem:[%s16021_s7 + $0x128] sm:$0xff] }
 0x240   :  { %17357 = vst [vmem:[#allocation145_spill] sm:$0xff] %v12452_v9  ;;  %v919_v61 = vadd.f32 %v756_v17, %v460_v62  ;;  %v17365_v25 = vld [vmem:[#allocation69_spill] sm:$0xff]  ;;  %6268 = vperm.xlu2 %8646, %v6054_v28   ;;  %v17367_v9 = vrot.slane %v17366_v45, 1  ;;  %v17372_v17 = vld [vmem:[#allocation70_spill] sm:$0xff]  ;;  %v17374_v28 = vrot.slane %v12387_v55, 2 }
 0x241   :  { %17361 = vst [vmem:[#allocation61_spill] sm:$0xff] %v12462_v13  ;;  %v3055_v4 = vadd.f32 %v17365_v25, %v17364_v40  ;;  %v3056_v11 = vadd.f32 %v17373_v24, %v17372_v17  ;;  %v12507_v25 = vmul.f32 %v12340_v34, %v254_v14  ;;  %v12514_v24 = vmul.f32 %v12371_v63, %v254_v14  ;;  %v12536_v17 = vpop.permute.xlu0 %268 }
 0x242   :  { %17362 = vst [vmem:[#allocation158_spill] sm:$0xff] %v12465_v35  ;;  %v12488_v13 = vsel %vm697_vm0, %v1655_v51, %v17367_v9  ;;  %v17369_v35 = vld [vmem:[#allocation141_spill] sm:$0xff]  ;;  %v1146_v9 = vsel %vm1087_vm1, %v17375_v50, %v17374_v28  ;;  %v3328_v28 = vshrl.u32 %v12047_v19, 16  ;;  %v12521_v50 = vmul.f32 %v12151_v18, %v12498_v2 }
 0x243   :  { %17368 = vst [vmem:[#allocation67_spill] sm:$0xff] %v12488_v13  ;;  %v17370_v57 = vrot.slane %v17369_v35, 2  ;;  %v1309_v62 = vadd.f32 %v1146_v9, %v919_v61  ;;  %v3124_v22 = vadd.f32 %v12220_v12, %v3056_v11  ;;  %v17378_v61 = vrot.slane %v12445_v43, 1 }
 0x244   :  { %17377 = vst [vmem:[#allocation141_spill] sm:$0xff] %v12514_v24  ;;  %v12534_v11 = vmul.f32 %v12265_v36, %v12498_v2  ;;  %v17381_v19 = vrot.slane %v12457_v30, 2  ;;  %v988_v43 = vmul.f32 %v12212_v54, %v12536_v17  ;;  %v463_v49 = vmul.f32 %v12204_v8, %v12536_v17 }
 0x245   :  { %v12493_v6 = vsel %vm1087_vm1, %v2036_v41, %v17370_v57  ;;  %v3123_v57 = vadd.f32 %v12220_v12, %v3055_v4  ;;  %v12525_v4 = vmul.f32 %v12212_v54, %v12498_v2  ;;  %v12530_v9 = vsel %vm697_vm0, %v17378_v61, %v1655_v51  ;;  %17380 = vst [vmem:[#allocation62_spill] sm:$0xff] %v12536_v17 }
 0x246   :  { %17371 = vst [vmem:[#allocation69_spill] sm:$0xff] %v12493_v6  ;;  %v12511_v6 = vmul.f32 %v12349_v59, %v254_v14  ;;  %v3188_v40 = vmax.f32 %v3124_v22, 0.0  ;;  %v12541_v13 = vsel %vm1087_vm1, %v17381_v19, %v2036_v41  ;;  %v12547_v51 = vmul.f32 %v12204_v8, %v12498_v2 }
 0x247   :  { %17379 = vst [vmem:[#allocation70_spill] sm:$0xff] %v12530_v9  ;;  %v3187_v14 = vmax.f32 %v3123_v57, 0.0  ;;  %v17383_v57 = vld [vmem:[#allocation118_spill] sm:$0xff]  ;;  %v12554_v9 = vmul.f32 %v12349_v59, %v12498_v2  ;;  %v12558_v19 = vmul.f32 %v12228_v26, %v12498_v2 }
 0x248   :  { %17376 = vst [vmem:[#allocation34_spill] sm:$0xff] %v12511_v6  ;;  %v3330_v6 = vor.u32 %v3328_v28, %v12075_v31  ;;  %v1438_v22 = vadd.f32 %v17383_v57, %v1309_v62  ;;  %v17385_v28 = vld [vmem:[#allocation33_spill] sm:$0xff]  ;;  %v1376_v31 = vmul.f32 %v12349_v59, %v12536_v17  ;;  %v12585_v57 = vmul.f32 %v12313_v29, %v12498_v2 }
 0x249   :  { %17382 = vst [vmem:[#allocation159_spill] sm:$0xff] %v12541_v13  ;;  %v12550_v61 = vpack.c.bf16 %v3188_v40, %v3187_v14  ;;  %v17386_v24 = vrot.slane %v17385_v28, 2  ;;  %v17387_v13 = vrot.slane %v12387_v55, 2  ;;  %v598_v40 = vmul.f32 %v12151_v18, %v12536_v17 }
 0x24a   :  { %v1505_v55 = vmul.f32 %v12265_v36, %v12536_v17  ;;  %17389 = vst [vmem:[#allocation160_spill] sm:$0xff] %v12585_v57 }
 0x24b   :  { %17384 = vst [vmem:[#allocation118_spill] sm:$0xff] %v12550_v61  ;;  %v1148_v62 = vsel %vm1087_vm1, %v17387_v13, %v17386_v24  ;;  %v3332_v14 = vshll.u32 %v12550_v61, 16  ;;  %v759_v41 = vrot.slane %v598_v40, 1  ;;  %v12579_v13 = vmul.f32 %v12228_v26, %v12536_v17 }
 0x24c   :  { %v1310_v30 = vadd.f32 %v1148_v62, %v920_v44  ;;  %v1149_v44 = vrot.slane %v988_v43, 2  ;;  %v12589_v62 = vmul.f32 %v12313_v29, %v12536_v17  ;;  %v17391_v61 = vrot.slane %v17348_v58, 1 }
 0x24d   :  { %v12581_v24 = vrot.slane %v3332_v14, 1  ;;  %v1659_v14 = vrot.slane %v1505_v55, 1  ;;  %v17393_v43 = vrot.slane %v12521_v50, 1  ;;  %v17395_v40 = vrot.slane %v17366_v45, 1 }
 0x24e   :  { %17390 = vst [vmem:[#allocation161_spill] sm:$0xff] %v12589_v62  ;;  %v760_v48 = vsel %vm697_vm0, %v17391_v61, %v759_v41  ;;  %v1439_v57 = vadd.f32 %v1376_v31, %v1310_v30  ;;  %v17396_v61 = vrot.slane %v12534_v11, 1  ;;  %v17398_v30 = vrot.slane %v17385_v28, 2 }
 0x24f   :  { %17388 = vst [vmem:[#allocation33_spill] sm:$0xff] %v12581_v24  ;;  %v12599_v7 = vsel %vm3275_vm2, %v3330_v6, %v12581_v24  ;;  %v762_v38 = vsel %vm697_vm0, %v759_v41, %v17393_v43  ;;  %v921_v29 = vadd.f32 %v760_v48, %v17394_v27  ;;  %v1660_v58 = vsel %vm697_vm0, %v17395_v40, %v1659_v14  ;;  %v17403_v6 = vld [vmem:[#allocation104_spill] sm:$0xff] }
 0x250   :  { %17392 = vst [vmem:[#allocation162_spill] sm:$0xff] %v12599_v7  ;;  %8037 = vmatmul.msk.bf16.gmra.mxu0 %vm3542_vm3, %v12599_v7  ;;  %v1662_v55 = vsel %vm697_vm0, %v1659_v14, %v17396_v61  ;;  %v16309_v24 = vrot.slane %v12589_v62, 1  ;;  %v12617_v41 = vmul.f32 %v12340_v34, %v12498_v2  ;;  %v1150_v27 = vsel %vm1087_vm1, %v17398_v30, %v1149_v44  ;;  %v17402_v61 = vld [vmem:[#allocation128_spill] sm:$0xff] }
 0x251   :  { %v1819_v48 = vadd.f32 %v1660_v58, %v1438_v22  ;;  %v12624_v45 = vmul.f32 %v12340_v34, %v12536_v17  ;;  %v922_v31 = vadd.f32 %v762_v38, %v463_v49  ;;  %v1311_v40 = vadd.f32 %v1150_v27, %v921_v29  ;;  %v17487_v62 = vld [vmem:[#allocation144_spill] sm:$0xff] }
 0x252   :  { %17397 = vst [vmem:[#allocation140_spill] sm:$0xff] %v12617_v41  ;;  %v17400_v14 = vrot.slane %v17350_v1, 1  ;;  %v3083_v7 = vadd.f32 %v17403_v6, %v17402_v61  ;;  %v12635_v28 = vadd.f32 %v1662_v55, %v1439_v57  ;;  %v17404_v22 = vrot.slane %v12579_v13, 2  ;;  %v12651_v55 = vpop.permute.xlu1 %278 }
 0x253   :  { %17399 = vst [vmem:[#allocation163_spill] sm:$0xff] %v12624_v45  ;;  %v17405_v58 = vrot.slane %v17369_v35, 2  ;;  %v16308_v38 = vrot.slane %v12624_v45, 2  ;;  %v3084_v29 = vadd.f32 %v12329_v15, %v12322_v20  ;;  %v3440_v49 = vshrl.u32 %v12259_v56, 16 }
 0x254   :  { %v12631_v43 = vsel %vm697_vm0, %v17400_v14, %v16309_v24  ;;  %v3151_v1 = vadd.f32 %v12220_v12, %v3083_v7  ;;  %v3097_v6 = vadd.f32 %v12243_v37, %v12164_v46  ;;  %v3098_v57 = vadd.f32 %v12248_v32, %v12167_v39 }
 0x255   :  { %17401 = vst [vmem:[#allocation164_spill] sm:$0xff] %v12631_v43  ;;  %v2041_v30 = vsel %vm1087_vm1, %v17405_v58, %v17404_v22  ;;  %v17406_v27 = vrot.slane %v17355_v21, 2  ;;  %v3152_v7 = vadd.f32 %v12220_v12, %v3084_v29  ;;  %v3496_v15 = vshrl.u32 %v12269_v52, 16  ;;  %v17476_v52 = vld [vmem:[#allocation20_spill] sm:$0xff]  ;;  %v17485_v43 = vld [vmem:[#allocation117_spill] sm:$0xff] }
 0x256   :  { %v12653_v35 = vadd.f32 %v2041_v30, %v1819_v48  ;;  %v3215_v14 = vmax.f32 %v3151_v1, 0.0  ;;  %v3442_v46 = vor.u32 %v3440_v49, %v12299_v53  ;;  %v3165_v39 = vadd.f32 %v12220_v12, %v3097_v6 }
 0x257   :  { %v12660_v20 = vsel %vm1087_vm1, %v17406_v27, %v16308_v38  ;;  %v3166_v32 = vadd.f32 %v12220_v12, %v3098_v57  ;;  %v3216_v37 = vmax.f32 %v3152_v7, 0.0  ;;  %v3498_v48 = vor.u32 %v3496_v15, %v12302_v16 }
 0x258   :  { %17407 = vst [vmem:[#allocation128_spill] sm:$0xff] %v12660_v20  ;;  %v600_v21 = vmul.f32 %v12151_v18, %v12651_v55  ;;  %v990_v61 = vmul.f32 %v12212_v54, %v12651_v55  ;;  %v3229_v22 = vmax.f32 %v3165_v39, 0.0  ;;  %v17408_v30 = vrot.slane %v12525_v4, 2  ;;  %v17479_v20 = vld [vmem:[#allocation85_spill] sm:$0xff] }
 0x259   :  { %v3230_v58 = vmax.f32 %v3166_v32, 0.0  ;;  %v1378_v53 = vmul.f32 %v12349_v59, %v12651_v55  ;;  %v12677_v1 = vpack.c.bf16 %v3216_v37, %v3215_v14  ;;  %v465_v27 = vmul.f32 %v12204_v8, %v12651_v55  ;;  %v6056_v14 = vld [vmem:[%s16021_s7 + $0x138] sm:$0xff] }
 0x25a   :  { %v1152_v29 = vsel %vm1087_vm1, %v1149_v44, %v17408_v30  ;;  %v763_v49 = vrot.slane %v600_v21, 1  ;;  %v1153_v6 = vrot.slane %v990_v61, 2  ;;  %v1507_v7 = vmul.f32 %v12265_v36, %v12651_v55  ;;  %v6057_v44 = vld [vmem:[%s16021_s7 + $0x140] sm:$0xff]  ;;  %6278 = vperm.xlu1 %8645, %v6056_v14  }
 0x25b   :  { %17409 = vst [vmem:[#allocation104_spill] sm:$0xff] %v12677_v1  ;;  %v1312_v16 = vadd.f32 %v1152_v29, %v922_v31  ;;  %v12679_v57 = vpack.c.bf16 %v3230_v58, %v3229_v22  ;;  %v1888_v15 = vmul.f32 %v12228_v26, %v12651_v55  ;;  %v6055_v31 = vld [vmem:[%s16021_s7 + $0x130] sm:$0xff]  ;;  %v3444_v39 = vshll.u32 %v12677_v1, 16  ;;  %6283 = vperm.xlu2 %8646, %v6057_v44  }
 0x25c   :  { %v17411_v32 = vrot.slane %v12521_v50, 1  ;;  %v17412_v21 = vrot.slane %v11995_v5, 1  ;;  %v1440_v22 = vadd.f32 %v12554_v9, %v1311_v40  ;;  %v17413_v38 = vrot.slane %v12525_v4, 2  ;;  %6273 = vperm.xlu0 %8644, %v6055_v31  }
 0x25d   :  { %17410 = vst [vmem:[#allocation165_spill] sm:$0xff] %v12679_v57  ;;  %v3500_v58 = vshll.u32 %v12679_v57, 16  ;;  %v12709_v50 = vrot.slane %v3444_v39, 1  ;;  %v17415_v5 = vrot.slane %v12001_v42, 2  ;;  %v1663_v9 = vrot.slane %v1507_v7, 1 }
 0x25e   :  { %v764_v37 = vsel %vm697_vm0, %v17411_v32, %v763_v49  ;;  %v766_v61 = vsel %vm697_vm0, %v763_v49, %v17412_v21  ;;  %v1154_v24 = vsel %vm1087_vm1, %v17413_v38, %v1153_v6  ;;  %v1441_v32 = vadd.f32 %v1378_v53, %v1312_v16 }
 0x25f   :  { %v923_v30 = vadd.f32 %v764_v37, %v12547_v51  ;;  %v924_v29 = vadd.f32 %v766_v61, %v465_v27  ;;  %17414 = vst [vmem:[#allocation166_spill] sm:$0xff] %v12709_v50  ;;  %v1156_v49 = vsel %vm1087_vm1, %v1153_v6, %v17415_v5  ;;  %v12714_v40 = vrot.slane %v3500_v58, 1 }
 0x260   :  { %v2044_v21 = vrot.slane %v1888_v15, 2  ;;  %v12718_v51 = vsel %vm3275_vm2, %v3442_v46, %v12709_v50  ;;  %v17418_v4 = vrot.slane %v12534_v11, 1  ;;  %v17419_v27 = vrot.slane %v12042_v33, 1 }
 0x261   :  { %17416 = vst [vmem:[#allocation167_spill] sm:$0xff] %v12714_v40  ;;  %v1313_v44 = vadd.f32 %v1154_v24, %v923_v30  ;;  %v1314_v14 = vadd.f32 %v1156_v49, %v924_v29  ;;  %v17420_v53 = vrot.slane %v12558_v19, 2  ;;  %v17421_v6 = vrot.slane %v12579_v13, 2  ;;  %8051 = vmatmul.msk.bf16.gmra.mxu2 %vm3542_vm3, %v12718_v51  ;;  %v17430_v30 = vld [vmem:[#allocation160_spill] sm:$0xff]  ;;  %v17431_v29 = vld [vmem:[#allocation133_spill] sm:$0xff] }
 0x262   :  { %17417 = vst [vmem:[#allocation168_spill] sm:$0xff] %v12718_v51  ;;  %v1664_v38 = vsel %vm697_vm0, %v17418_v4, %v1663_v9  ;;  %v1666_v42 = vsel %vm697_vm0, %v1663_v9, %v17419_v27  ;;  %v12735_v46 = vsel %vm3275_vm2, %v3498_v48, %v12714_v40  ;;  %v2267_v39 = vmul.f32 %v12371_v63, %v12651_v55  ;;  %v17435_v4 = vld [vmem:[#allocation139_spill] sm:$0xff] }
 0x263   :  { %v2043_v24 = vsel %vm1087_vm1, %v17421_v6, %v17420_v53  ;;  %17422 = vst [vmem:[#allocation169_spill] sm:$0xff] %v12735_v46  ;;  %v1443_v11 = vadd.f32 %v12353_v60, %v1314_v14  ;;  %v1821_v16 = vadd.f32 %v1664_v38, %v1440_v22  ;;  %8058 = vmatmul.msk.bf16.gmra.mxu3 %vm3542_vm3, %v12735_v46  ;;  %v17424_v48 = vrot.slane %v12401_v0, 1  ;;  %v17436_v27 = vld [vmem:[#allocation63_spill] sm:$0xff] }
 0x264   :  { %v2201_v33 = vadd.f32 %v2043_v24, %v12635_v28  ;;  %v1442_v7 = vadd.f32 %v12023_v3, %v1313_v44  ;;  %v1822_v13 = vadd.f32 %v1666_v42, %v1441_v32  ;;  %v17423_v15 = vmov %v17420_v53  ;;  %v17432_v32 = vld [vmem:[#allocation29_spill] sm:$0xff]  ;;  %v244_v24 = vpop.permute.xlu0 %243 }
 0x265   :  { %v2045_v31 = vsel %vm1087_vm1, %v17423_v15, %v2044_v21  ;;  %v17425_v60 = vrot.slane %v12481_v23, 1  ;;  %v17427_v28 = vrot.slane %v12417_v47, 2  ;;  %v17428_v61 = vrot.slane %v12507_v25, 2 }
 0x266   :  { %v1824_v19 = vadd.f32 %v12366_v10, %v1443_v11  ;;  %v2202_v22 = vadd.f32 %v2045_v31, %v1821_v16  ;;  %v2266_v58 = vmul.f32 %v12371_v63, %v12498_v2  ;;  %v16311_v0 = vrot.slane %v17430_v30, 1  ;;  %v17434_v10 = vld [vmem:[#allocation147_spill] sm:$0xff]  ;;  %v17438_v11 = vld [vmem:[#allocation58_spill] sm:$0xff] }
 0x267   :  { %v12752_v37 = vsel %vm697_vm0, %v17425_v60, %v17424_v48  ;;  %v12759_v3 = vsel %vm1087_vm1, %v17428_v61, %v17427_v28  ;;  %v2394_v5 = vmul.f32 %v17431_v29, %v12651_v55  ;;  %v2765_v49 = vmul.f32 %v12340_v34, %v12651_v55  ;;  %v17440_v16 = vld [vmem:[#allocation14_spill] sm:$0xff]  ;;  %v17446_v28 = vld [vmem:[#allocation41_spill] sm:$0xff] }
 0x268   :  { %17426 = vst [vmem:[#allocation170_spill] sm:$0xff] %v12752_v37  ;;  %v16310_v47 = vrot.slane %v12617_v41, 2  ;;  %v17433_v9 = vrot.slane %v17432_v32, 2  ;;  %v2328_v14 = vadd.f32 %v2267_v39, %v2201_v33  ;;  %v1432_v38 = vadd.f32 %v17435_v4, %v17434_v10 }
 0x269   :  { %17429 = vst [vmem:[#allocation171_spill] sm:$0xff] %v12759_v3  ;;  %v12776_v2 = vadd.f32 %v17436_v27, %v1442_v7  ;;  %v2327_v53 = vadd.f32 %v2266_v58, %v12653_v35  ;;  %v2544_v6 = vrot.slane %v2394_v5, 1  ;;  %v12780_v55 = vadd.f32 %v17438_v11, %v1824_v19  ;;  %v17442_v7 = vld [vmem:[#allocation21_spill] sm:$0xff]  ;;  %v17444_v35 = vld [vmem:[#allocation114_spill] sm:$0xff]  ;;  %v17450_v5 = vld [vmem:[#allocation36_spill] sm:$0xff] }
 0x26a   :  { %v2047_v44 = vsel %vm1087_vm1, %v2044_v21, %v17433_v9  ;;  %v12783_v15 = vadd.f32 %v17440_v16, %v2202_v22  ;;  %v2915_v31 = vrot.slane %v2765_v49, 2  ;;  %v17441_v21 = vld [vmem:[#allocation26_spill] sm:$0xff]  ;;  %v17443_v48 = vrot.slane %v17442_v7, 1  ;;  %v17448_v58 = vld [vmem:[#allocation89_spill] sm:$0xff] }
 0x26b   :  { %17437 = vst [vmem:[#allocation133_spill] sm:$0xff] %v12776_v2  ;;  %v2203_v42 = vadd.f32 %v2047_v44, %v1822_v13  ;;  %v1813_v33 = vadd.f32 %v17441_v21, %v1432_v38  ;;  %v2545_v39 = vsel %vm697_vm0, %v16311_v0, %v2544_v6  ;;  %v17445_v60 = vrot.slane %v17444_v35, 2  ;;  %v17452_v38 = vld [vmem:[#allocation134_spill] sm:$0xff] }
 0x26c   :  { %17439 = vst [vmem:[#allocation29_spill] sm:$0xff] %v12780_v55  ;;  %v2547_v13 = vsel %vm697_vm0, %v2544_v6, %v17443_v48  ;;  %v17447_v61 = vrot.slane %v17446_v28, 2  ;;  %v17449_v22 = vrot.slane %v17448_v58, 2  ;;  %v17451_v49 = vrot.slane %v17450_v5, 2  ;;  %v17453_v6 = vld [vmem:[#allocation68_spill] sm:$0xff]  ;;  %v17459_v28 = vld [vmem:[#allocation55_spill] sm:$0xff] }
 0x26d   :  { %v2698_v9 = vadd.f32 %v2545_v39, %v2327_v53  ;;  %v2699_v44 = vadd.f32 %v2547_v13, %v2328_v14  ;;  %v12803_v4 = vmul.f32 %v12151_v18, %v244_v24  ;;  %v12806_v27 = vadd.f32 %v17452_v38, %v2203_v42  ;;  %v17454_v53 = vld [vmem:[#allocation65_spill] sm:$0xff]  ;;  %v17461_v38 = vld [vmem:[#allocation56_spill] sm:$0xff] }
 0x26e   :  { %v1138_v19 = vsel %vm1087_vm1, %v17447_v61, %v17445_v60  ;;  %v2029_v32 = vsel %vm1087_vm1, %v17451_v49, %v17449_v22  ;;  %v12810_v16 = vmul.f32 %v12212_v54, %v244_v24  ;;  %v1371_v21 = vmul.f32 %v12349_v59, %v244_v24  ;;  %v17458_v60 = vld [vmem:[#allocation148_spill] sm:$0xff] }
 0x26f   :  { %v2194_v10 = vadd.f32 %v2029_v32, %v1813_v33  ;;  %v1305_v11 = vadd.f32 %v1138_v19, %v17453_v6  ;;  %v2916_v7 = vsel %vm1087_vm1, %v16310_v47, %v2915_v31  ;;  %v17455_v14 = vrot.slane %v17454_v53, 2  ;;  %v17463_v53 = vld [vmem:[#allocation38_spill] sm:$0xff]  ;;  %v17491_v55 = vld [vmem:[#allocation80_spill] sm:$0xff] }
 0x270   :  { %v12820_v39 = vmul.f32 %v12265_v36, %v244_v24  ;;  %v12823_v42 = vmul.f32 %v12228_v26, %v244_v24  ;;  %v12825_v48 = vadd.f32 %v2916_v7, %v2698_v9  ;;  %v12831_v61 = vadd.f32 %v17459_v28, %v17458_v60  ;;  %v17462_v7 = vld [vmem:[#allocation6_spill] sm:$0xff] }
 0x271   :  { %v2918_v33 = vsel %vm1087_vm1, %v2915_v31, %v17455_v14  ;;  %v12834_v19 = vmul.f32 %v12204_v8, %v244_v24  ;;  %v2260_v31 = vmul.f32 %v12371_v63, %v244_v24  ;;  %v12839_v5 = vmul.f32 %v17431_v29, %v244_v24  ;;  %v17464_v47 = vld [vmem:[#allocation118_spill] sm:$0xff] }
 0x272   :  { %17456 = vst [vmem:[#allocation147_spill] sm:$0xff] %v12825_v48  ;;  %v12827_v13 = vadd.f32 %v2918_v33, %v2699_v44  ;;  %v12842_v49 = vmul.f32 %v12340_v34, %v244_v24  ;;  %v12845_v9 = vadd.f32 %v1371_v21, %v1305_v11  ;;  %v17460_v44 = vld [vmem:[#allocation31_spill] sm:$0xff]  ;;  %v3058_v14 = vadd.f32 %v17463_v53, %v17462_v7  ;;  %v17465_v21 = vld [vmem:[#allocation86_spill] sm:$0xff]  ;;  %v17539_v48 = vld [vmem:[#allocation96_spill] sm:$0xff] }
 0x273   :  { %v3057_v6 = vadd.f32 %v17461_v38, %v17460_v44  ;;  %v3336_v0 = vshrl.u32 %v17464_v47, 16  ;;  %v631_v11 = vmul.f32 0.0, %v12151_v18  ;;  %v17466_v22 = vrot.slane %v17465_v21, 2  ;;  %v17467_v44 = vld [vmem:[#allocation107_spill] sm:$0xff]  ;;  %v17470_v33 = vld [vmem:[#allocation22_spill] sm:$0xff] }
 0x274   :  { %17457 = vst [vmem:[#allocation139_spill] sm:$0xff] %v12827_v13  ;;  %v3126_v32 = vadd.f32 %v12220_v12, %v3058_v14  ;;  %v17468_v38 = vrot.slane %v17467_v44, 2  ;;  %v17469_v53 = vrot.slane %v12803_v4, 1  ;;  %v17471_v60 = vrot.slane %v17470_v33, 1  ;;  %v6060_v14 = vld [vmem:[%s16021_s7 + $0x158] sm:$0xff]  ;;  %v6058_v33 = vld [vmem:[%s16021_s7 + $0x148] sm:$0xff] }
 0x275   :  { %v3125_v24 = vadd.f32 %v12220_v12, %v3057_v6  ;;  %v12870_v46 = vadd.f32 %v2260_v31, %v2194_v10  ;;  %v1021_v12 = vmul.f32 0.0, %v12212_v54  ;;  %v17473_v10 = vld [vmem:[#allocation33_spill] sm:$0xff]  ;;  %6298 = vperm.xlu2 %8646, %v6060_v14   ;;  %v17475_v6 = vrot.slane %v12839_v5, 1  ;;  %v17478_v47 = vld [vmem:[#allocation50_spill] sm:$0xff]  ;;  %6288 = vperm.xlu0 %8644, %v6058_v33   ;;  %v17481_v14 = vld [vmem:[#allocation119_spill] sm:$0xff] }
 0x276   :  { %v1212_v7 = vsel %vm1087_vm1, %v17468_v38, %v17466_v22  ;;  %v12868_v28 = vsel %vm697_vm0, %v17471_v60, %v17469_v53  ;;  %v6059_v22 = vld [vmem:[%s16021_s7 + $0x150] sm:$0xff]  ;;  %v3190_v44 = vmax.f32 %v3126_v32, 0.0  ;;  %v3338_v31 = vor.u32 %v3336_v0, %v17473_v10  ;;  %v17474_v38 = vld [vmem:[#allocation81_spill] sm:$0xff]  ;;  %v429_v32 = vpop.permute.xlu1 %428  ;;  %v17483_v10 = vld [vmem:[#allocation84_spill] sm:$0xff] }
 0x277   :  { %17472 = vst [vmem:[#allocation63_spill] sm:$0xff] %v12870_v46  ;;  %v3189_v60 = vmax.f32 %v3125_v24, 0.0  ;;  %v1342_v53 = vadd.f32 %v1212_v7, %v17474_v38  ;;  %6293 = vperm.xlu1 %8645, %v6059_v22   ;;  %v17477_v51 = vrot.slane %v17476_v52, 1  ;;  %v1470_v45 = vadd.f32 %v17479_v20, %v17478_v47 }
 0x278   :  { %v1538_v41 = vmul.f32 0.0, %v12265_v36  ;;  %v1919_v24 = vmul.f32 0.0, %v12228_v26  ;;  %v825_v7 = vrot.slane %v631_v11, 1  ;;  %v17482_v22 = vrot.slane %v17481_v14, 2 }
 0x279   :  { %v2531_v56 = vsel %vm697_vm0, %v17477_v51, %v17475_v6  ;;  %v12894_v0 = vpack.c.bf16 %v3190_v44, %v3189_v60  ;;  %v17484_v38 = vrot.slane %v17483_v10, 2  ;;  %v17486_v51 = vld [vmem:[#allocation136_spill] sm:$0xff]  ;;  %v1215_v20 = vrot.slane %v1021_v12, 2 }
 0x27a   :  { %v12903_v6 = vadd.f32 %v17486_v51, %v17485_v43  ;;  %v1409_v47 = vmul.f32 0.0, %v12349_v59  ;;  %v12908_v33 = vmul.f32 0.0, %v12371_v63  ;;  %v1725_v60 = vrot.slane %v1538_v41, 1 }
 0x27b   :  { %17480 = vst [vmem:[#allocation58_spill] sm:$0xff] %v12894_v0  ;;  %v2103_v52 = vsel %vm1087_vm1, %v17484_v38, %v17482_v22  ;;  %v3340_v11 = vshll.u32 %v12894_v0, 16  ;;  %v12911_v44 = vrot.slane %v1919_v24, 2  ;;  %v630_v10 = vmul.f32 %v12151_v18, %v429_v32  ;;  %v17508_v0 = vld [vmem:[#allocation51_spill] sm:$0xff] }
 0x27c   :  { %v2231_v30 = vadd.f32 %v2103_v52, %v17487_v62  ;;  %17488 = vst [vmem:[#allocation14_spill] sm:$0xff] %v12908_v33  ;;  %v2425_v22 = vmul.f32 0.0, %v17431_v29  ;;  %v1020_v43 = vmul.f32 %v12212_v54, %v429_v32  ;;  %v1408_v12 = vmul.f32 %v12349_v59, %v429_v32 }
 0x27d   :  { %v1537_v38 = vmul.f32 %v12265_v36, %v429_v32  ;;  %v12918_v51 = vrot.slane %v3340_v11, 1  ;;  %v2796_v62 = vmul.f32 0.0, %v12340_v34  ;;  %v823_v52 = vrot.slane %v630_v10, 1  ;;  %v17493_v10 = vld [vmem:[#allocation72_spill] sm:$0xff] }
 0x27e   :  { %v1918_v17 = vmul.f32 %v12228_v26, %v429_v32  ;;  %v495_v41 = vmul.f32 %v12204_v8, %v429_v32  ;;  %v1213_v24 = vrot.slane %v1020_v43, 2  ;;  %v1471_v3 = vadd.f32 %v1408_v12, %v1342_v53 }
 0x27f   :  { %17489 = vst [vmem:[#allocation26_spill] sm:$0xff] %v12918_v51  ;;  %v1723_v37 = vrot.slane %v1537_v38, 1  ;;  %v12925_v40 = vsel %vm3275_vm2, %v3338_v31, %v12918_v51  ;;  %v17492_v57 = vrot.slane %v17491_v55, 1  ;;  %v826_v11 = vsel %vm697_vm0, %v823_v52, %v825_v7  ;;  %v17495_v55 = vld [vmem:[#allocation88_spill] sm:$0xff] }
 0x280   :  { %17490 = vst [vmem:[#allocation21_spill] sm:$0xff] %v12925_v40  ;;  %v2104_v50 = vrot.slane %v1918_v17, 2  ;;  %8038 = vmatmul.msk.bf16.gmra.mxu0 %vm3542_vm3, %v12925_v40  ;;  %v954_v46 = vadd.f32 %v826_v11, %v495_v41  ;;  %v17494_v53 = vrot.slane %v17465_v21, 2  ;;  %v2297_v31 = vmul.f32 %v12371_v63, %v429_v32 }
 0x281   :  { %v824_v2 = vsel %vm697_vm0, %v17492_v57, %v823_v52  ;;  %v1216_v12 = vsel %vm1087_vm1, %v1213_v24, %v1215_v20  ;;  %v17496_v38 = vrot.slane %v17495_v55, 1  ;;  %v1726_v17 = vsel %vm697_vm0, %v1723_v37, %v1725_v60  ;;  %v17499_v55 = vld [vmem:[#allocation132_spill] sm:$0xff] }
 0x282   :  { %v953_v1 = vadd.f32 %v824_v2, %v17493_v10  ;;  %v1214_v43 = vsel %vm1087_vm1, %v17494_v53, %v1213_v24  ;;  %v17497_v7 = vrot.slane %v17481_v14, 2  ;;  %v1344_v41 = vadd.f32 %v1216_v12, %v954_v46  ;;  %v17498_v24 = vld [vmem:[#allocation35_spill] sm:$0xff]  ;;  %v17505_v12 = vld [vmem:[#allocation110_spill] sm:$0xff] }
 0x283   :  { %v1724_v57 = vsel %vm697_vm0, %v17496_v38, %v1723_v37  ;;  %v1852_v21 = vadd.f32 %v1726_v17, %v1471_v3  ;;  %v2107_v10 = vsel %vm1087_vm1, %v2104_v50, %v12911_v44  ;;  %v2424_v53 = vmul.f32 %v17431_v29, %v429_v32  ;;  %v17503_v3 = vld [vmem:[#allocation52_spill] sm:$0xff] }
 0x284   :  { %v2105_v52 = vsel %vm1087_vm1, %v17497_v7, %v2104_v50  ;;  %v1343_v2 = vadd.f32 %v1214_v43, %v953_v1  ;;  %v1851_v11 = vadd.f32 %v1724_v57, %v1470_v45  ;;  %v12950_v20 = vmul.f32 %v12340_v34, %v429_v32  ;;  %v17501_v45 = vld [vmem:[#allocation87_spill] sm:$0xff]  ;;  %v17506_v57 = vld [vmem:[#allocation16_spill] sm:$0xff] }
 0x285   :  { %v938_v38 = vadd.f32 %v17499_v55, %v17498_v24  ;;  %v1473_v40 = vadd.f32 %v1409_v47, %v1344_v41  ;;  %v2233_v51 = vadd.f32 %v2107_v10, %v1852_v21  ;;  %v12954_v7 = vrot.slane %v2425_v22, 1  ;;  %v359_v10 = vpop.permute.xlu0 %358 }
 0x286   :  { %v1472_v37 = vadd.f32 %v1409_v47, %v1343_v2  ;;  %v2232_v14 = vadd.f32 %v2105_v52, %v1851_v11  ;;  %v2604_v1 = vrot.slane %v2424_v53, 1  ;;  %v17502_v46 = vrot.slane %v17501_v45, 2  ;;  %v17512_v2 = vld [vmem:[#allocation146_spill] sm:$0xff] }
 0x287   :  { %17500 = vst [vmem:[#allocation114_spill] sm:$0xff] %v12954_v7  ;;  %v17504_v43 = vrot.slane %v17503_v3, 2  ;;  %v1455_v32 = vadd.f32 %v17506_v57, %v17505_v12  ;;  %v17507_v17 = vrot.slane %v12820_v39, 1  ;;  %v17509_v24 = vrot.slane %v17508_v0, 1  ;;  %v17518_v3 = vld [vmem:[#allocation137_spill] sm:$0xff]  ;;  %v17520_v57 = vld [vmem:[#allocation75_spill] sm:$0xff] }
 0x288   :  { %v12971_v22 = vadd.f32 %v2531_v56, %v12831_v61  ;;  %v17511_v52 = vrot.slane %v12842_v49, 2  ;;  %v17513_v41 = vrot.slane %v17512_v2, 2  ;;  %v12980_v21 = vrot.slane %v2796_v62, 2 }
 0x289   :  { %v1184_v50 = vsel %vm1087_vm1, %v17504_v43, %v17502_v46  ;;  %v12968_v47 = vsel %vm697_vm0, %v17509_v24, %v17507_v17  ;;  %v12982_v53 = vadd.f32 %v1725_v60, %v1472_v37  ;;  %v1854_v55 = vadd.f32 %v1725_v60, %v1473_v40 }
 0x28a   :  { %17510 = vst [vmem:[#allocation41_spill] sm:$0xff] %v12971_v22  ;;  %v12978_v11 = vsel %vm1087_vm1, %v17513_v41, %v17511_v52  ;;  %v12984_v0 = vadd.f32 %v2297_v31, %v2231_v30  ;;  %v2975_v46 = vrot.slane %v12950_v20, 2  ;;  %v12988_v56 = vadd.f32 %v12908_v33, %v2232_v14  ;;  %v17521_v30 = vld [vmem:[#allocation25_spill] sm:$0xff] }
 0x28b   :  { %17514 = vst [vmem:[#allocation89_spill] sm:$0xff] %v12978_v11  ;;  %v12991_v61 = vadd.f32 %v12908_v33, %v2233_v51  ;;  %v17519_v43 = vrot.slane %v17518_v3, 1  ;;  %v1328_v62 = vadd.f32 %v1184_v50, %v938_v38  ;;  %v2607_v37 = vsel %vm697_vm0, %v2604_v1, %v12954_v7  ;;  %v17523_v31 = vld [vmem:[#allocation17_spill] sm:$0xff]  ;;  %v13009_v50 = vpop.f32.mrf.mxu0 }
 0x28c   :  { %17515 = vst [vmem:[#allocation36_spill] sm:$0xff] %v12982_v53  ;;  %v1836_v40 = vadd.f32 %v17520_v57, %v1455_v32  ;;  %v17522_v60 = vrot.slane %v17521_v30, 2  ;;  %v17524_v20 = vrot.slane %v17523_v31, 2  ;;  %v616_v17 = vmul.f32 %v12151_v18, %v359_v10  ;;  %v17526_v31 = vld [vmem:[#allocation7_spill] sm:$0xff]  ;;  %v17528_v53 = vld [vmem:[#allocation94_spill] sm:$0xff]  ;;  %v17537_v22 = vld [vmem:[#allocation73_spill] sm:$0xff] }
 0x28d   :  { %17516 = vst [vmem:[#allocation134_spill] sm:$0xff] %v12988_v56  ;;  %v2605_v12 = vsel %vm697_vm0, %v17519_v43, %v2604_v1  ;;  %v1006_v51 = vmul.f32 %v12212_v54, %v359_v10  ;;  %v1394_v24 = vmul.f32 %v12349_v59, %v359_v10  ;;  %v1523_v52 = vmul.f32 %v12265_v36, %v359_v10 }
 0x28e   :  { %17517 = vst [vmem:[#allocation68_spill] sm:$0xff] %v12991_v61  ;;  %v2075_v14 = vsel %vm1087_vm1, %v17524_v20, %v17522_v60  ;;  %v1904_v38 = vmul.f32 %v12228_v26, %v359_v10  ;;  %v795_v32 = vrot.slane %v616_v17, 1  ;;  %v2283_v2 = vmul.f32 %v12371_v63, %v359_v10  ;;  %v6062_v17 = vld [vmem:[%s16021_s7 + $0x168] sm:$0xff] }
 0x28f   :  { %17525 = vst [vmem:[#allocation65_spill] sm:$0xff] %v13009_v50  ;;  %v2217_v1 = vadd.f32 %v2075_v14, %v1836_v40  ;;  %v2410_v41 = vmul.f32 %v17431_v29, %v359_v10  ;;  %v481_v3 = vmul.f32 %v12204_v8, %v359_v10  ;;  %v1185_v43 = vrot.slane %v1006_v51, 2  ;;  %v6063_v14 = vld [vmem:[%s16021_s7 + $0x170] sm:$0xff]  ;;  %6308 = vperm.xlu1 %8645, %v6062_v17  }
 0x290   :  { %v1457_v57 = vadd.f32 %v1394_v24, %v1328_v62  ;;  %v1695_v60 = vrot.slane %v1523_v52, 1  ;;  %v17527_v20 = vrot.slane %v17526_v31, 1  ;;  %v17529_v61 = vrot.slane %v17528_v53, 1  ;;  %v6061_v62 = vld [vmem:[%s16021_s7 + $0x160] sm:$0xff]  ;;  %v17530_v51 = vld [vmem:[#allocation138_spill] sm:$0xff]  ;;  %6313 = vperm.xlu2 %8646, %v6063_v14  }
 0x291   :  { %v2076_v50 = vrot.slane %v1904_v38, 2  ;;  %v2576_v40 = vrot.slane %v2410_v41, 1  ;;  %v17531_v24 = vrot.slane %v17530_v51, 2  ;;  %v17534_v41 = vrot.slane %v17501_v45, 2  ;;  %6303 = vperm.xlu0 %8644, %v6061_v62  }
 0x292   :  { %v796_v33 = vsel %vm697_vm0, %v17527_v20, %v795_v32  ;;  %v798_v7 = vsel %vm697_vm0, %v795_v32, %v17529_v61  ;;  %v17533_v61 = vld [vmem:[#allocation90_spill] sm:$0xff]  ;;  %v2344_v32 = vadd.f32 %v2283_v2, %v2217_v1  ;;  %v17535_v20 = vld [vmem:[#allocation95_spill] sm:$0xff]  ;;  %v17538_v13 = vrot.slane %v17537_v22, 1  ;;  %v17541_v1 = vld [vmem:[#allocation28_spill] sm:$0xff] }
 0x293   :  { %v13032_v53 = vsel %vm1087_vm1, %v17531_v24, %v2975_v46  ;;  %v939_v52 = vadd.f32 %v796_v33, %v17533_v61  ;;  %v940_v38 = vadd.f32 %v798_v7, %v481_v3  ;;  %v1186_v31 = vsel %vm1087_vm1, %v17534_v41, %v1185_v43  ;;  %v17549_v41 = vld [vmem:[#allocation46_spill] sm:$0xff] }
 0x294   :  { %17532 = vst [vmem:[#allocation148_spill] sm:$0xff] %v13032_v53  ;;  %v17536_v56 = vrot.slane %v17535_v20, 2  ;;  %v1696_v51 = vsel %vm697_vm0, %v17538_v13, %v1695_v60  ;;  %v17540_v24 = vrot.slane %v17539_v48, 1  ;;  %v17542_v3 = vrot.slane %v17521_v30, 2  ;;  %v17545_v13 = vld [vmem:[#allocation100_spill] sm:$0xff]  ;;  %v17550_v20 = vld [vmem:[#allocation103_spill] sm:$0xff] }
 0x295   :  { %v1329_v33 = vadd.f32 %v1186_v31, %v939_v52  ;;  %v1837_v2 = vadd.f32 %v1696_v51, %v17541_v1  ;;  %v17546_v61 = vrot.slane %v17545_v13, 1  ;;  %v17548_v52 = vld [vmem:[#allocation102_spill] sm:$0xff]  ;;  %v13063_v30 = vadd.f32 %v12911_v44, %v1854_v55  ;;  %v17553_v55 = vld [vmem:[#allocation112_spill] sm:$0xff] }
 0x296   :  { %v1188_v11 = vsel %vm1087_vm1, %v1185_v43, %v17536_v56  ;;  %v1698_v53 = vsel %vm697_vm0, %v1695_v60, %v17540_v24  ;;  %v2077_v14 = vsel %vm1087_vm1, %v17542_v3, %v2076_v50  ;;  %v17543_v56 = vld [vmem:[#allocation98_spill] sm:$0xff]  ;;  %v13058_v60 = vmul.f32 %v12340_v34, %v359_v10  ;;  %v249_v10 = vpop.permute.xlu0 %248  ;;  %v17551_v24 = vld [vmem:[#allocation92_spill] sm:$0xff] }
 0x297   :  { %v1330_v7 = vadd.f32 %v1188_v11, %v940_v38  ;;  %v1838_v45 = vadd.f32 %v1698_v53, %v1457_v57  ;;  %v17544_v43 = vrot.slane %v17543_v56, 2  ;;  %v2579_v48 = vsel %vm697_vm0, %v2576_v40, %v17546_v61  ;;  %v17547_v11 = vld [vmem:[#allocation115_spill] sm:$0xff]  ;;  %v17556_v56 = vld [vmem:[#allocation153_spill] sm:$0xff] }
 0x298   :  { %v1458_v17 = vadd.f32 %v17547_v11, %v1329_v33  ;;  %v2218_v62 = vadd.f32 %v2077_v14, %v1837_v2  ;;  %v13067_v38 = vsel %vm1087_vm1, %v2975_v46, %v12980_v21  ;;  %v916_v31 = vadd.f32 %v12868_v28, %v17549_v41  ;;  %v17554_v28 = vld [vmem:[#allocation79_spill] sm:$0xff] }
 0x299   :  { %v2079_v22 = vsel %vm1087_vm1, %v2076_v50, %v17544_v43  ;;  %v1459_v57 = vadd.f32 %v17548_v52, %v1330_v7  ;;  %v13069_v50 = vadd.f32 %v2579_v48, %v2344_v32  ;;  %v17552_v7 = vld [vmem:[#allocation116_spill] sm:$0xff]  ;;  %v13086_v46 = vadd.f32 %v2605_v12, %v12903_v6 }
 0x29a   :  { %v2219_v53 = vadd.f32 %v2079_v22, %v1838_v45  ;;  %v13074_v51 = vadd.f32 %v17550_v20, %v1458_v17  ;;  %v13078_v1 = vadd.f32 %v17552_v7, %v2218_v62  ;;  %v13083_v45 = vpop.f32.mrf.mxu0  ;;  %v13089_v32 = vadd.f32 %v2607_v37, %v12984_v0  ;;  %v17557_v22 = vld [vmem:[#allocation93_spill] sm:$0xff] }
 0x29b   :  { %v1840_v33 = vadd.f32 %v17551_v24, %v1459_v57  ;;  %v17555_v3 = vrot.slane %v17554_v28, 1  ;;  %v1814_v43 = vadd.f32 %v12968_v47, %v17556_v56  ;;  %v2947_v61 = vrot.slane %v13058_v60, 2  ;;  %v6066_v17 = vld [vmem:[%s16021_s7 + $0x188] sm:$0xff]  ;;  %v6065_v60 = vld [vmem:[%s16021_s7 + $0x180] sm:$0xff] }
 0x29c   :  { %v13081_v2 = vadd.f32 %v17553_v55, %v2219_v53  ;;  %v17558_v48 = vrot.slane %v12810_v16, 2  ;;  %v17559_v6 = vrot.slane %v17444_v35, 2  ;;  %v594_v0 = vmul.f32 %v12151_v18, %v249_v10  ;;  %v6064_v35 = vld [vmem:[%s16021_s7 + $0x178] sm:$0xff]  ;;  %6328 = vperm.xlu2 %8646, %v6066_v17   ;;  %6323 = vperm.xlu1 %8645, %v6065_v60   ;;  %v6069_v16 = vld [vmem:[%s16021_s7 + $0x1a0] sm:$0xff] }
 0x29d   :  { %v2577_v14 = vsel %vm697_vm0, %v17555_v3, %v2576_v40  ;;  %v13097_v13 = vadd.f32 %v17557_v22, %v1840_v33  ;;  %v984_v11 = vmul.f32 %v12212_v54, %v249_v10  ;;  %v1372_v40 = vmul.f32 %v12349_v59, %v249_v10  ;;  %6318 = vperm.xlu0 %8644, %v6064_v35   ;;  %v17563_v33 = vld [vmem:[#allocation60_spill] sm:$0xff]  ;;  %v17566_v22 = vld [vmem:[#allocation155_spill] sm:$0xff]  ;;  %v17572_v17 = vld [vmem:[#allocation149_spill] sm:$0xff] }
 0x29e   :  { %v1140_v12 = vsel %vm1087_vm1, %v17559_v6, %v17558_v48  ;;  %v1501_v47 = vmul.f32 %v12265_v36, %v249_v10  ;;  %v17560_v18 = vrot.slane %v12823_v42, 2  ;;  %v17561_v54 = vrot.slane %v17448_v58, 2  ;;  %v17573_v60 = vld [vmem:[#allocation23_spill] sm:$0xff] }
 0x29f   :  { %v1306_v37 = vadd.f32 %v1140_v12, %v916_v31  ;;  %v459_v36 = vmul.f32 %v12204_v8, %v249_v10  ;;  %v751_v52 = vrot.slane %v594_v0, 1  ;;  %v1882_v57 = vmul.f32 %v12228_v26, %v249_v10 }
 0x2a0   :  { %v2031_v59 = vsel %vm1087_vm1, %v17561_v54, %v17560_v18  ;;  %v1141_v53 = vrot.slane %v984_v11, 2  ;;  %v1651_v31 = vrot.slane %v1501_v47, 1  ;;  %v17562_v20 = vrot.slane %v12803_v4, 1  ;;  %v17575_v54 = vld [vmem:[#allocation66_spill] sm:$0xff] }
 0x2a1   :  { %v2195_v62 = vadd.f32 %v2031_v59, %v1814_v43  ;;  %v1435_v41 = vadd.f32 %v1372_v40, %v1306_v37  ;;  %v17564_v58 = vrot.slane %v17563_v33, 1  ;;  %v2032_v55 = vrot.slane %v1882_v57, 2 }
 0x2a2   :  { %v752_v24 = vsel %vm697_vm0, %v17562_v20, %v751_v52  ;;  %v2388_v8 = vmul.f32 %v17431_v29, %v249_v10  ;;  %v2261_v3 = vmul.f32 %v12371_v63, %v249_v10  ;;  %v2759_v56 = vmul.f32 %v12340_v34, %v249_v10  ;;  %v17569_v29 = vld [vmem:[#allocation142_spill] sm:$0xff] }
 0x2a3   :  { %v754_v7 = vsel %vm697_vm0, %v751_v52, %v17564_v58  ;;  %v917_v26 = vadd.f32 %v752_v24, %v12834_v19  ;;  %v17565_v43 = vmov %v17558_v48  ;;  %v17567_v48 = vrot.slane %v17566_v22, 2  ;;  %v17576_v52 = vld [vmem:[#allocation154_spill] sm:$0xff]  ;;  %v17578_v24 = vld [vmem:[#allocation120_spill] sm:$0xff] }
 0x2a4   :  { %v918_v28 = vadd.f32 %v754_v7, %v459_v36  ;;  %v1142_v4 = vsel %vm1087_vm1, %v17565_v43, %v1141_v53  ;;  %v17568_v12 = vrot.slane %v12820_v39, 1  ;;  %v17570_v37 = vrot.slane %v17569_v29, 1  ;;  %v13158_v36 = vpop.f32.mrf.mxu0  ;;  %v6067_v20 = vld [vmem:[%s16021_s7 + $0x190] sm:$0xff]  ;;  %v17580_v7 = vld [vmem:[#allocation101_spill] sm:$0xff]  ;;  %6343 = vperm.xlu2 %8646, %v6069_v16  }
 0x2a5   :  { %v1144_v6 = vsel %vm1087_vm1, %v1141_v53, %v17567_v48  ;;  %v1307_v11 = vadd.f32 %v1142_v4, %v917_v26  ;;  %v17571_v40 = vmov %v17560_v18  ;;  %v2532_v39 = vrot.slane %v2388_v8, 1  ;;  %v17574_v18 = vld [vmem:[#allocation150_spill] sm:$0xff]  ;;  %6333 = vperm.xlu0 %8644, %v6067_v20  }
 0x2a6   :  { %v1652_v0 = vsel %vm697_vm0, %v17568_v12, %v1651_v31  ;;  %v1654_v19 = vsel %vm697_vm0, %v1651_v31, %v17570_v37  ;;  %v1308_v63 = vadd.f32 %v1144_v6, %v918_v28  ;;  %v2033_v47 = vsel %vm1087_vm1, %v17571_v40, %v2032_v55  ;;  %v17577_v53 = vld [vmem:[#allocation34_spill] sm:$0xff]  ;;  %v17582_v28 = vld [vmem:[#allocation157_spill] sm:$0xff] }
 0x2a7   :  { %v1815_v34 = vadd.f32 %v1652_v0, %v12845_v9  ;;  %v1816_v10 = vadd.f32 %v1654_v19, %v1435_v41  ;;  %v3059_v35 = vadd.f32 %v17573_v60, %v17572_v17  ;;  %v3060_v59 = vadd.f32 %v17575_v54, %v17574_v18  ;;  %v6068_v9 = vld [vmem:[%s16021_s7 + $0x198] sm:$0xff]  ;;  %v17585_v48 = vld [vmem:[#allocation70_spill] sm:$0xff]  ;;  %v17586_v0 = vld [vmem:[#allocation141_spill] sm:$0xff] }
 0x2a8   :  { %v2714_v57 = vadd.f32 %v2577_v14, %v17576_v52  ;;  %v1436_v41 = vadd.f32 %v17577_v53, %v1307_v11  ;;  %v2903_v31 = vrot.slane %v2759_v56, 2  ;;  %v17579_v33 = vrot.slane %v17578_v24, 2  ;;  %v17584_v56 = vld [vmem:[#allocation78_spill] sm:$0xff]  ;;  %6338 = vperm.xlu1 %8645, %v6068_v9   ;;  %v17592_v40 = vld [vmem:[#allocation77_spill] sm:$0xff]  ;;  %v17593_v60 = vld [vmem:[#allocation59_spill] sm:$0xff] }
 0x2a9   :  { %v2196_v42 = vadd.f32 %v2033_v47, %v1815_v34  ;;  %v17581_v8 = vrot.slane %v17580_v7, 2  ;;  %v17583_v43 = vrot.slane %v17582_v28, 2  ;;  %v13177_v4 = vadd.f32 %v2261_v3, %v2195_v62  ;;  %v17594_v18 = vld [vmem:[#allocation147_spill] sm:$0xff]  ;;  %v17596_v9 = vld [vmem:[#allocation156_spill] sm:$0xff] }
 0x2aa   :  { %v2948_v58 = vsel %vm1087_vm1, %v17579_v33, %v2947_v61  ;;  %v13180_v22 = vadd.f32 %v17584_v56, %v1308_v63  ;;  %v1817_v6 = vadd.f32 %v17585_v48, %v1436_v41  ;;  %v17587_v37 = vrot.slane %v12839_v5, 1  ;;  %v17589_v63 = vld [vmem:[#allocation159_spill] sm:$0xff]  ;;  %v17601_v56 = vld [vmem:[#allocation148_spill] sm:$0xff] }
 0x2ab   :  { %v2950_v26 = vsel %vm1087_vm1, %v2947_v61, %v17581_v8  ;;  %v2035_v14 = vsel %vm1087_vm1, %v2032_v55, %v17583_v43  ;;  %v13184_v29 = vadd.f32 %v17586_v0, %v2196_v42  ;;  %v17588_v19 = vrot.slane %v12481_v23, 1  ;;  %v13197_v55 = vld [vmem:[%s16016_s2] ss:$0 sm:$0xff]  ;;  %v6072_v43 = vld [vmem:[%s16021_s7 + $0x1b8] sm:$0xff] }
 0x2ac   :  { %v2197_v12 = vadd.f32 %v2035_v14, %v1816_v10  ;;  %v2533_v61 = vsel %vm697_vm0, %v17587_v37, %v2532_v39  ;;  %v3127_v3 = vadd.f32 %v13197_v55, %v3059_v35  ;;  %v3128_v11 = vadd.f32 %v13197_v55, %v3060_v59  ;;  %6358 = vperm.xlu2 %8646, %v6072_v43  }
 0x2ad   :  { %v13192_v62 = vsel %vm697_vm0, %v2532_v39, %v17588_v19  ;;  %v13202_v34 = vadd.f32 %v17589_v63, %v1817_v6  ;;  %v17590_v5 = vrot.slane %v12842_v49, 2  ;;  %v17591_v10 = vrot.slane %v12507_v25, 2  ;;  %v17595_v49 = vld [vmem:[#allocation158_spill] sm:$0xff]  ;;  %v17597_v25 = vld [vmem:[#allocation139_spill] sm:$0xff]  ;;  %v13247_v6 = vpop.f32.mrf.mxu0 }
 0x2ae   :  { %v2700_v47 = vadd.f32 %v17592_v40, %v12783_v15  ;;  %v3191_v39 = vmax.f32 %v3127_v3, 0.0  ;;  %v3192_v17 = vmax.f32 %v3128_v11, 0.0  ;;  %v2701_v35 = vadd.f32 %v17593_v60, %v12806_v27  ;;  %v17599_v15 = vld [vmem:[#allocation61_spill] sm:$0xff]  ;;  %v17600_v27 = vld [vmem:[#allocation58_spill] sm:$0xff]  ;;  %v17603_v40 = vld [vmem:[#allocation63_spill] sm:$0xff] }
 0x2af   :  { %v13207_v23 = vsel %vm1087_vm1, %v17590_v5, %v2903_v31  ;;  %v13212_v16 = vsel %vm1087_vm1, %v2903_v31, %v17591_v10  ;;  %v3137_v54 = vadd.f32 %v13197_v55, %v17594_v18  ;;  %v13221_v59 = vadd.f32 %v17595_v49, %v2197_v12  ;;  %v17602_v12 = vld [vmem:[#allocation26_spill] sm:$0xff] }
 0x2b0   :  { %v3071_v52 = vadd.f32 %v17596_v9, %v2700_v47  ;;  %v3138_v53 = vadd.f32 %v13197_v55, %v17597_v25  ;;  %v3085_v41 = vadd.f32 %v2948_v58, %v2714_v57  ;;  %v13226_v42 = vpack.c.bf16 %v3192_v17, %v3191_v39  ;;  %v6071_v57 = vld [vmem:[%s16021_s7 + $0x1b0] sm:$0xff]  ;;  %v6070_v58 = vld [vmem:[%s16021_s7 + $0x1a8] sm:$0xff]  ;;  %v17604_v39 = vld [vmem:[#allocation104_spill] sm:$0xff] }
 0x2b1   :  { %v3072_v31 = vadd.f32 %v17599_v15, %v2701_v35  ;;  %v3201_v20 = vmax.f32 %v3137_v54, 0.0  ;;  %v3086_v24 = vadd.f32 %v2950_v26, %v13069_v50  ;;  %v3344_v33 = vshrl.u32 %v17600_v27, 16  ;;  %6353 = vperm.xlu1 %8645, %v6071_v57   ;;  %6348 = vperm.xlu0 %8644, %v6070_v58   ;;  %v17607_v9 = vld [vmem:[#allocation24_spill] sm:$0xff] }
 0x2b2   :  { %17598 = vst [vmem:[#allocation55_spill] sm:$0xff] %v13226_v42  ;;  %v3139_v7 = vadd.f32 %v13197_v55, %v3071_v52  ;;  %v3202_v8 = vmax.f32 %v3138_v53, 0.0  ;;  %v3153_v28 = vadd.f32 %v13197_v55, %v3085_v41  ;;  %v3348_v50 = vshll.u32 %v13226_v42, 16  ;;  %v17608_v52 = vld [vmem:[#allocation151_spill] sm:$0xff]  ;;  %v17612_v57 = vld [vmem:[#allocation152_spill] sm:$0xff] }
 0x2b3   :  { %v3140_v26 = vadd.f32 %v13197_v55, %v3072_v31  ;;  %v3154_v14 = vadd.f32 %v13197_v55, %v3086_v24  ;;  %v3099_v48 = vadd.f32 %v17601_v56, %v13086_v46  ;;  %v3346_v0 = vor.u32 %v3344_v33, %v17602_v12  ;;  %v6075_v53 = vld [vmem:[%s16021_s7 + $0x1d0] sm:$0xff]  ;;  %v17610_v24 = vld [vmem:[#allocation89_spill] sm:$0xff] }
 0x2b4   :  { %v3203_v37 = vmax.f32 %v3139_v7, 0.0  ;;  %v13250_v19 = vpack.c.bf16 %v3202_v8, %v3201_v20  ;;  %v3217_v3 = vmax.f32 %v3153_v28, 0.0  ;;  %v3350_v11 = vrot.slane %v3348_v50, 1  ;;  %v17609_v20 = vld [vmem:[#allocation41_spill] sm:$0xff]  ;;  %v17611_v28 = vld [vmem:[#allocation166_spill] sm:$0xff]  ;;  %6373 = vperm.xlu2 %8646, %v6075_v53  }
 0x2b5   :  { %v3204_v63 = vmax.f32 %v3140_v26, 0.0  ;;  %v3218_v5 = vmax.f32 %v3154_v14, 0.0  ;;  %v3100_v10 = vadd.f32 %v13067_v38, %v13089_v32  ;;  %v13255_v47 = vadd.f32 %v2533_v61, %v17603_v40  ;;  %v6074_v7 = vld [vmem:[%s16021_s7 + $0x1c8] sm:$0xff]  ;;  %v6073_v56 = vld [vmem:[%s16021_s7 + $0x1c0] sm:$0xff] }
 0x2b6   :  { %v3388_v46 = vshll.u32 %v13250_v19, 16  ;;  %v3448_v17 = vshrl.u32 %v17604_v39, 16  ;;  %v3167_v60 = vadd.f32 %v13197_v55, %v3099_v48  ;;  %v13261_v35 = vsel %vm3275_vm2, %v3346_v0, %v3350_v11  ;;  %v17613_v50 = vld [vmem:[#allocation133_spill] sm:$0xff]  ;;  %v17614_v26 = vld [vmem:[#allocation42_spill] sm:$0xff] }
 0x2b7   :  { %17605 = vst [vmem:[#allocation31_spill] sm:$0xff] %v13261_v35  ;;  %v13263_v18 = vpack.c.bf16 %v3204_v63, %v3203_v37  ;;  %v13265_v54 = vpack.c.bf16 %v3218_v5, %v3217_v3  ;;  %v3168_v49 = vadd.f32 %v13197_v55, %v3100_v10  ;;  %8039 = vmatmul.msk.bf16.gmra.mxu0 %vm3542_vm3, %v13261_v35  ;;  %v3392_v32 = vshrl.u32 %v13250_v19, 16  ;;  %v17616_v3 = vld [vmem:[#allocation165_spill] sm:$0xff]  ;;  %v17617_v10 = vld [vmem:[#allocation71_spill] sm:$0xff] }
 0x2b8   :  { %v13270_v38 = vrot.slane %v3388_v46, 1  ;;  %v3231_v61 = vmax.f32 %v3167_v60, 0.0  ;;  %v2690_v25 = vadd.f32 %v17608_v52, %v17607_v9  ;;  %v3062_v33 = vadd.f32 %v17610_v24, %v17609_v20  ;;  %v17618_v46 = vld [vmem:[#allocation29_spill] sm:$0xff]  ;;  %v13311_v52 = vpop.f32.mrf.mxu0  ;;  %v17623_v20 = vld [vmem:[#allocation18_spill] sm:$0xff] }
 0x2b9   :  { %17606 = vst [vmem:[#allocation56_spill] sm:$0xff] %v13265_v54  ;;  %v3396_v41 = vshll.u32 %v13263_v18, 16  ;;  %v3452_v15 = vshll.u32 %v13265_v54, 16  ;;  %v3232_v31 = vmax.f32 %v3168_v49, 0.0  ;;  %v3450_v43 = vor.u32 %v3448_v17, %v17611_v28  ;;  %v17619_v17 = vld [vmem:[#allocation44_spill] sm:$0xff]  ;;  %6368 = vperm.xlu1 %8645, %v6074_v7   ;;  %6363 = vperm.xlu0 %8644, %v6073_v56   ;;  %v17627_v56 = vld [vmem:[#allocation19_spill] sm:$0xff] }
 0x2ba   :  { %v3394_v8 = vor.u32 %v3392_v32, %v13270_v38  ;;  %v3061_v58 = vadd.f32 %v17612_v57, %v2690_v25  ;;  %v2204_v14 = vadd.f32 %v17614_v26, %v17613_v50  ;;  %v3130_v37 = vadd.f32 %v13197_v55, %v3062_v33  ;;  %v17621_v25 = vld [vmem:[#allocation167_spill] sm:$0xff]  ;;  %v17626_v26 = vld [vmem:[#allocation45_spill] sm:$0xff] }
 0x2bb   :  { %v3398_v48 = vrot.slane %v3396_v41, 1  ;;  %v13293_v12 = vrot.slane %v3452_v15, 1  ;;  %v13295_v0 = vpack.c.bf16 %v3232_v31, %v3231_v61  ;;  %v3504_v63 = vshrl.u32 %v17616_v3, 16  ;;  %v17622_v15 = vld [vmem:[#allocation43_spill] sm:$0xff] }
 0x2bc   :  { %v3129_v5 = vadd.f32 %v13197_v55, %v3061_v58  ;;  %v2331_v40 = vadd.f32 %v17617_v10, %v2204_v14  ;;  %v2332_v60 = vadd.f32 %v17619_v17, %v17618_v46  ;;  %v3194_v9 = vmax.f32 %v3130_v37, 0.0  ;;  %v17629_v10 = vld [vmem:[#allocation109_spill] sm:$0xff]  ;;  %v17631_v17 = vld [vmem:[#allocation134_spill] sm:$0xff] }
 0x2bd   :  { %17615 = vst [vmem:[#allocation6_spill] sm:$0xff] %v13295_v0  ;;  %v13304_v49 = vsel %vm3275_vm2, %v3394_v8, %v3398_v48  ;;  %v13308_v32 = vsel %vm3275_vm2, %v3450_v43, %v13293_v12  ;;  %v3508_v61 = vshll.u32 %v13295_v0, 16  ;;  %v3506_v53 = vor.u32 %v3504_v63, %v17621_v25  ;;  %v17624_v8 = vld [vmem:[#allocation106_spill] sm:$0xff]  ;;  %v17625_v43 = vld [vmem:[#allocation97_spill] sm:$0xff] }
 0x2be   :  { %17620 = vst [vmem:[#allocation38_spill] sm:$0xff] %v13308_v32  ;;  %8045 = vmatmul.msk.bf16.vlgmr.msra.gmra.mxu1 %vm3542_vm3, %v13304_v49  ;;  %8052 = vmatmul.msk.bf16.gmra.mxu2 %vm3542_vm3, %v13308_v32  ;;  %v3193_v41 = vmax.f32 %v3129_v5, 0.0  ;;  %v2702_v31 = vadd.f32 %v17622_v15, %v2331_v40  ;;  %v2703_v24 = vadd.f32 %v17623_v20, %v2332_v60  ;;  %v3352_v7 = vshrl.u32 %v13226_v42, 16  ;;  %v17632_v60 = vld [vmem:[#allocation114_spill] sm:$0xff]  ;;  %v6076_v20 = vld [vmem:[%s16021_s7 + $0x1d8] sm:$0xff] }
 0x2bf   :  { %v13320_v33 = vrot.slane %v3508_v61, 1  ;;  %v2716_v28 = vadd.f32 %v17624_v8, %v13078_v1  ;;  %v2717_v57 = vadd.f32 %v17625_v43, %v13081_v2  ;;  %v2693_v58 = vadd.f32 %v13192_v62, %v13177_v4  ;;  %v17630_v1 = vld [vmem:[#allocation99_spill] sm:$0xff]  ;;  %v6078_v15 = vld [vmem:[%s16021_s7 + $0x1e8] sm:$0xff] }
 0x2c0   :  { %v13329_v50 = vpack.c.bf16 %v3194_v9, %v3193_v41  ;;  %v3073_v14 = vadd.f32 %v17626_v26, %v2702_v31  ;;  %v3074_v37 = vadd.f32 %v17627_v56, %v2703_v24  ;;  %v3354_v5 = vor.u32 %v3352_v7, %v3350_v11  ;;  %v6077_v31 = vld [vmem:[%s16021_s7 + $0x1e0] sm:$0xff]  ;;  %6388 = vperm.xlu2 %8646, %v6078_v15   ;;  %v17637_v15 = vld [vmem:[#allocation47_spill] sm:$0xff] }
 0x2c1   :  { %v13335_v63 = vsel %vm3275_vm2, %v3506_v53, %v13320_v33  ;;  %v3087_v40 = vadd.f32 %v17629_v10, %v2716_v28  ;;  %v3088_v46 = vadd.f32 %v17630_v1, %v2717_v57  ;;  %v2730_v61 = vadd.f32 %v17632_v60, %v17631_v17  ;;  %v17633_v53 = vld [vmem:[#allocation68_spill] sm:$0xff]  ;;  %6383 = vperm.xlu1 %8645, %v6077_v31  }
 0x2c2   :  { %17628 = vst [vmem:[#allocation86_spill] sm:$0xff] %v13335_v63  ;;  %8059 = vmatmul.msk.bf16.gmra.mxu3 %vm3542_vm3, %v13335_v63  ;;  %v3356_v2 = vshll.u32 %v13329_v50, 16  ;;  %v3141_v4 = vadd.f32 %v13197_v55, %v3073_v14  ;;  %v3142_v62 = vadd.f32 %v13197_v55, %v3074_v37  ;;  %v3400_v9 = vshrl.u32 %v13263_v18, 16  ;;  %6378 = vperm.xlu0 %8644, %v6076_v20   ;;  %v17638_v20 = vld [vmem:[#allocation27_spill] sm:$0xff] }
 0x2c3   :  { %v3155_v11 = vadd.f32 %v13197_v55, %v3087_v40  ;;  %v3156_v25 = vadd.f32 %v13197_v55, %v3088_v46  ;;  %v2731_v41 = vadd.f32 %v17632_v60, %v17633_v53  ;;  %v3101_v28 = vadd.f32 %v12980_v21, %v2730_v61  ;;  %v17636_v61 = vld [vmem:[#allocation40_spill] sm:$0xff]  ;;  %v17716_v63 = vld [vmem:[#allocation143_spill] sm:$0xff] }
 0x2c4   :  { %v13360_v24 = vrot.slane %v3356_v2, 1  ;;  %v3205_v7 = vmax.f32 %v3141_v4, 0.0  ;;  %v3206_v8 = vmax.f32 %v3142_v62, 0.0  ;;  %v3456_v26 = vshrl.u32 %v13265_v54, 16  ;;  %v13378_v62 = vpop.f32.mrf.mxu0 }
 0x2c5   :  { %v3219_v43 = vmax.f32 %v3155_v11, 0.0  ;;  %v3220_v57 = vmax.f32 %v3156_v25, 0.0  ;;  %v3102_v14 = vadd.f32 %v12980_v21, %v2731_v41  ;;  %v3402_v37 = vor.u32 %v3400_v9, %v3398_v48 }
 0x2c6   :  { %v13365_v56 = vpack.c.bf16 %v3206_v8, %v3205_v7  ;;  %v3169_v10 = vadd.f32 %v13197_v55, %v3101_v28  ;;  %v3063_v40 = vadd.f32 %v13207_v23, %v13255_v47  ;;  %v13372_v1 = vsel %vm3275_vm2, %v3354_v5, %v13360_v24  ;;  %v17635_v47 = vld [vmem:[#allocation37_spill] sm:$0xff]  ;;  %v17639_v7 = vld [vmem:[#allocation8_spill] sm:$0xff]  ;;  %v6079_v28 = vld [vmem:[%s16021_s7 + $0x1f0] sm:$0xff] }
 0x2c7   :  { %v13374_v46 = vpack.c.bf16 %v3220_v57, %v3219_v43  ;;  %v3170_v2 = vadd.f32 %v13197_v55, %v3102_v14  ;;  %v3064_v4 = vadd.f32 %v13212_v16, %v2693_v58  ;;  %8040 = vmatmul.msk.bf16.gmra.mxu0 %vm3542_vm3, %v13372_v1  ;;  %v2206_v5 = vadd.f32 %v17636_v61, %v17635_v47  ;;  %v6080_v58 = vld [vmem:[%s16021_s7 + $0x1f8] sm:$0xff]  ;;  %v17643_v47 = vld [vmem:[#allocation105_spill] sm:$0xff] }
 0x2c8   :  { %v3404_v48 = vshll.u32 %v13365_v56, 16  ;;  %v3233_v17 = vmax.f32 %v3169_v10, 0.0  ;;  %v3131_v23 = vadd.f32 %v13197_v55, %v3063_v40  ;;  %v3512_v25 = vshrl.u32 %v13295_v0, 16 }
 0x2c9   :  { %17634 = vst [vmem:[#allocation107_spill] sm:$0xff] %v13374_v46  ;;  %v3460_v9 = vshll.u32 %v13374_v46, 16  ;;  %v3234_v11 = vmax.f32 %v3170_v2, 0.0  ;;  %v3132_v16 = vadd.f32 %v13197_v55, %v3064_v4  ;;  %v2333_v31 = vadd.f32 %v17637_v15, %v2206_v5  ;;  %v17641_v2 = vld [vmem:[#allocation11_spill] sm:$0xff]  ;;  %6398 = vperm.xlu1 %8645, %v6080_v58  }
 0x2ca   :  { %v13392_v53 = vrot.slane %v3404_v48, 1  ;;  %v3195_v41 = vmax.f32 %v3131_v23, 0.0  ;;  %v2334_v8 = vadd.f32 %v17639_v7, %v17638_v20  ;;  %v3458_v43 = vor.u32 %v3456_v26, %v13293_v12  ;;  %v17642_v48 = vld [vmem:[#allocation39_spill] sm:$0xff]  ;;  %6393 = vperm.xlu0 %8644, %v6079_v28  }
 0x2cb   :  { %v13401_v57 = vrot.slane %v3460_v9, 1  ;;  %v13403_v14 = vpack.c.bf16 %v3234_v11, %v3233_v17  ;;  %v3196_v10 = vmax.f32 %v3132_v16, 0.0  ;;  %v3514_v40 = vor.u32 %v3512_v25, %v13320_v33  ;;  %v17646_v9 = vld [vmem:[#allocation76_spill] sm:$0xff]  ;;  %v17647_v11 = vld [vmem:[#allocation54_spill] sm:$0xff] }
 0x2cc   :  { %v2704_v4 = vadd.f32 %v17641_v2, %v2333_v31  ;;  %v2705_v23 = vadd.f32 %v17642_v48, %v2334_v8  ;;  %v2220_v61 = vadd.f32 %v17643_v47, %v13074_v51  ;;  %v13412_v5 = vsel %vm3275_vm2, %v3402_v37, %v13392_v53  ;;  %v17645_v51 = vld [vmem:[#allocation48_spill] sm:$0xff]  ;;  %v17652_v48 = vld [vmem:[#allocation123_spill] sm:$0xff] }
 0x2cd   :  { %17640 = vst [vmem:[#allocation22_spill] sm:$0xff] %v13403_v14  ;;  %v13416_v12 = vsel %vm3275_vm2, %v3458_v43, %v13401_v57  ;;  %v3516_v26 = vshll.u32 %v13403_v14, 16  ;;  %v13419_v17 = vpack.c.bf16 %v3196_v10, %v3195_v41  ;;  %v17648_v41 = vld [vmem:[#allocation9_spill] sm:$0xff]  ;;  %v17649_v31 = vld [vmem:[#allocation36_spill] sm:$0xff]  ;;  %v3360_v7 = vshrl.u32 %v13329_v50, 16  ;;  %v17650_v43 = vld [vmem:[#allocation122_spill] sm:$0xff] }
 0x2ce   :  { %17644 = vst [vmem:[#allocation33_spill] sm:$0xff] %v13416_v12  ;;  %8046 = vmatmul.msk.bf16.gmra.mxu1 %vm3542_vm3, %v13412_v5  ;;  %8053 = vmatmul.msk.bf16.gmra.mxu2 %vm3542_vm3, %v13416_v12  ;;  %v3075_v33 = vadd.f32 %v17645_v51, %v2704_v4  ;;  %v3076_v37 = vadd.f32 %v17646_v9, %v2705_v23  ;;  %v17654_v51 = vld [vmem:[#allocation124_spill] sm:$0xff] }
 0x2cf   :  { %v2347_v25 = vadd.f32 %v17647_v11, %v2220_v61  ;;  %v13428_v16 = vrot.slane %v3516_v26, 1  ;;  %v3364_v58 = vshll.u32 %v13419_v17, 16  ;;  %v2348_v15 = vadd.f32 %v17648_v41, %v13097_v13  ;;  %v17653_v13 = vld [vmem:[#allocation14_spill] sm:$0xff]  ;;  %v13447_v61 = vpop.f32.mrf.mxu0 }
 0x2d0   :  { %v2234_v20 = vadd.f32 %v12911_v44, %v17649_v31  ;;  %v3143_v8 = vadd.f32 %v13197_v55, %v3075_v33  ;;  %v3144_v28 = vadd.f32 %v13197_v55, %v3076_v37  ;;  %v2362_v9 = vadd.f32 %v17653_v13, %v13063_v30 }
 0x2d1   :  { %v2718_v10 = vadd.f32 %v17650_v43, %v2347_v25  ;;  %v13441_v2 = vsel %vm3275_vm2, %v3514_v40, %v13428_v16  ;;  %v13443_v4 = vrot.slane %v3364_v58, 1  ;;  %v2719_v23 = vadd.f32 %v17652_v48, %v2348_v15  ;;  %v17655_v40 = vld [vmem:[#allocation67_spill] sm:$0xff]  ;;  %v17656_v25 = vld [vmem:[#allocation125_spill] sm:$0xff] }
 0x2d2   :  { %17651 = vst [vmem:[#allocation81_spill] sm:$0xff] %v13441_v2  ;;  %v2361_v47 = vadd.f32 %v17653_v13, %v2234_v20  ;;  %8060 = vmatmul.msk.bf16.gmra.mxu3 %vm3542_vm3, %v13441_v2  ;;  %v3207_v44 = vmax.f32 %v3143_v8, 0.0  ;;  %v3208_v26 = vmax.f32 %v3144_v28, 0.0  ;;  %v1818_v37 = vadd.f32 %v17655_v40, %v13180_v22  ;;  %v17657_v8 = vld [vmem:[#allocation170_spill] sm:$0xff]  ;;  %v17662_v40 = vld [vmem:[#allocation69_spill] sm:$0xff] }
 0x2d3   :  { %v3089_v33 = vadd.f32 %v17654_v51, %v2718_v10  ;;  %v3362_v11 = vor.u32 %v3360_v7, %v13360_v24  ;;  %v3090_v58 = vadd.f32 %v17656_v25, %v2719_v23  ;;  %v2733_v20 = vadd.f32 %v17632_v60, %v2362_v9  ;;  %v17658_v24 = vld [vmem:[#allocation5_spill] sm:$0xff] }
 0x2d4   :  { %v2732_v41 = vadd.f32 %v17632_v60, %v2361_v47  ;;  %v13459_v15 = vpack.c.bf16 %v3208_v26, %v3207_v44  ;;  %v2694_v28 = vadd.f32 %v17657_v8, %v13184_v29  ;;  %v3408_v30 = vshrl.u32 %v13365_v56, 16  ;;  %v17659_v60 = vld [vmem:[#allocation171_spill] sm:$0xff]  ;;  %v17660_v26 = vld [vmem:[#allocation145_spill] sm:$0xff] }
 0x2d5   :  { %v3157_v31 = vadd.f32 %v13197_v55, %v3089_v33  ;;  %v3158_v43 = vadd.f32 %v13197_v55, %v3090_v58  ;;  %v2695_v7 = vadd.f32 %v17658_v24, %v13221_v59  ;;  %v13472_v10 = vsel %vm3275_vm2, %v3362_v11, %v13443_v4  ;;  %v8692_v59 = vld [vmem:[%s16015_s1 + $0x6] ss:$0 sm:$0xff]  ;;  %v17661_v33 = vld [vmem:[#allocation64_spill] sm:$0xff] }
 0x2d6   :  { %v3103_v22 = vadd.f32 %v12980_v21, %v2732_v41  ;;  %v3104_v23 = vadd.f32 %v12980_v21, %v2733_v20  ;;  %v3065_v13 = vadd.f32 %v17659_v60, %v2694_v28  ;;  %v3412_v29 = vshll.u32 %v13459_v15, 16  ;;  %v8591_v58 = vld [vmem:[%s16017_s3] sm:$0xff]  ;;  %v8593_v41 = vld [vmem:[%s16017_s3 + $0x10] sm:$0xff] }
 0x2d7   :  { %v3221_v48 = vmax.f32 %v3157_v31, 0.0  ;;  %v3222_v47 = vmax.f32 %v3158_v43, 0.0  ;;  %v3066_v51 = vadd.f32 %v17660_v26, %v2695_v7  ;;  %v2264_v9 = vmul.f32 %v8692_v59, %v17661_v33  ;;  %8041 = vmatmul.msk.bf16.gmra.mxu0 %vm3542_vm3, %v13472_v10  ;;  %v8594_v31 = vld [vmem:[%s16017_s3 + $0x18] sm:$0xff]  ;;  %v17664_v43 = vld [vmem:[#allocation62_spill] sm:$0xff]  ;;  %3885 = vmatpush.bf16.msrb.mxu1 %v8591_v58  ;;  %v13504_v33 = vpop.f32.mrf.mxu0 }
 0x2d8   :  { %v3171_v44 = vadd.f32 %v13197_v55, %v3103_v22  ;;  %v2199_v11 = vadd.f32 %v17662_v40, %v1818_v37  ;;  %v3172_v21 = vadd.f32 %v13197_v55, %v3104_v23  ;;  %v3133_v25 = vadd.f32 %v13197_v55, %v3065_v13  ;;  %4258 = vmatpush.bf16.msrb.mxu2 %v8593_v41  ;;  %v17670_v41 = vld [vmem:[#allocation164_spill] sm:$0xff] }
 0x2d9   :  { %v3410_v37 = vor.u32 %v3408_v30, %v13392_v53  ;;  %v13498_v20 = vpack.c.bf16 %v3222_v47, %v3221_v48  ;;  %v3134_v28 = vadd.f32 %v13197_v55, %v3066_v51  ;;  %v2265_v22 = vmul.f32 %v8692_v59, %v17664_v43  ;;  %4502 = vmatpush.bf16.msrb.mxu3 %v8594_v31  ;;  %v17665_v30 = vld [vmem:[#allocation160_spill] sm:$0xff]  ;;  %v17667_v47 = vld [vmem:[#allocation161_spill] sm:$0xff]  ;;  %v17673_v43 = vld [vmem:[#allocation163_spill] sm:$0xff] }
 0x2da   :  { %v3235_v8 = vmax.f32 %v3171_v44, 0.0  ;;  %v3464_v24 = vshrl.u32 %v13374_v46, 16  ;;  %v3236_v7 = vmax.f32 %v3172_v21, 0.0  ;;  %v3197_v23 = vmax.f32 %v3133_v25, 0.0 }
 0x2db   :  { %17663 = vst [vmem:[#allocation20_spill] sm:$0xff] %v13498_v20  ;;  %v3414_v60 = vrot.slane %v3412_v29, 1  ;;  %v3468_v13 = vshll.u32 %v13498_v20, 16  ;;  %v3198_v26 = vmax.f32 %v3134_v28, 0.0  ;;  %v2325_v53 = vadd.f32 %v2264_v9, %v13202_v34 }
 0x2dc   :  { %v17666_v48 = vrot.slane %v17665_v30, 1  ;;  %v17668_v44 = vrot.slane %v17667_v47, 1  ;;  %v3466_v59 = vor.u32 %v3464_v24, %v13401_v57  ;;  %v13513_v40 = vpack.c.bf16 %v3236_v7, %v3235_v8  ;;  %v17671_v57 = vld [vmem:[#allocation140_spill] sm:$0xff] }
 0x2dd   :  { %v2326_v21 = vadd.f32 %v2265_v22, %v2199_v11  ;;  %v13516_v29 = vsel %vm3275_vm2, %v3410_v37, %v3414_v60  ;;  %v3470_v25 = vrot.slane %v3468_v13, 1  ;;  %v13518_v58 = vpack.c.bf16 %v3198_v26, %v3197_v23  ;;  %v17676_v7 = vld [vmem:[#allocation128_spill] sm:$0xff] }
 0x2de   :  { %v2543_v51 = vsel %vm697_vm0, %v17668_v44, %v17666_v48  ;;  %17669 = vst [vmem:[#allocation50_spill] sm:$0xff] %v13513_v40  ;;  %v2696_v34 = vadd.f32 %v17670_v41, %v2325_v53  ;;  %8047 = vmatmul.msk.bf16.gmra.mxu1 %vm3542_vm3, %v13516_v29  ;;  %v3520_v9 = vshrl.u32 %v13403_v14, 16  ;;  %v3524_v31 = vshll.u32 %v13513_v40, 16 }
 0x2df   :  { %v2697_v28 = vadd.f32 %v2543_v51, %v2326_v21  ;;  %v17672_v8 = vrot.slane %v17671_v57, 2  ;;  %v17674_v11 = vrot.slane %v17673_v43, 2  ;;  %v13531_v22 = vsel %vm3275_vm2, %v3466_v59, %v3470_v25  ;;  %v17678_v43 = vld [vmem:[#allocation129_spill] sm:$0xff] }
 0x2e0   :  { %17675 = vst [vmem:[#allocation85_spill] sm:$0xff] %v13531_v22  ;;  %v3372_v24 = vshll.u32 %v13518_v58, 16  ;;  %v3067_v23 = vadd.f32 %v17676_v7, %v2696_v34  ;;  %8054 = vmatmul.msk.bf16.gmra.mxu2 %vm3542_vm3, %v13531_v22  ;;  %v3522_v13 = vor.u32 %v3520_v9, %v13428_v16  ;;  %v3526_v26 = vrot.slane %v3524_v31, 1  ;;  %v13547_v16 = vpop.f32.mrf.mxu0  ;;  %v17681_v7 = vld [vmem:[#allocation111_spill] sm:$0xff] }
 0x2e1   :  { %v2914_v37 = vsel %vm1087_vm1, %v17674_v11, %v17672_v8  ;;  %v3368_v44 = vshrl.u32 %v13419_v17, 16  ;;  %v3416_v31 = vshrl.u32 %v13459_v15, 16  ;;  %v3528_v8 = vshrl.u32 %v13513_v40, 16 }
 0x2e2   :  { %v3068_v53 = vadd.f32 %v2914_v37, %v2697_v28  ;;  %v3135_v30 = vadd.f32 %v13197_v55, %v3067_v23  ;;  %v13540_v48 = vsel %vm3275_vm2, %v3522_v13, %v3526_v26  ;;  %v3374_v51 = vrot.slane %v3372_v24, 1 }
 0x2e3   :  { %17677 = vst [vmem:[#allocation119_spill] sm:$0xff] %v13540_v48  ;;  %8061 = vmatmul.msk.bf16.gmra.mxu3 %vm3542_vm3, %v13540_v48  ;;  %v3370_v41 = vor.u32 %v3368_v44, %v13443_v4  ;;  %v3472_v28 = vshrl.u32 %v13498_v20, 16  ;;  %v17679_v11 = vmov 0   ;;  %v3530_v24 = vor.u32 %v3528_v8, %v3526_v26  ;;  %v17707_v48 = vld [vmem:[#allocation108_spill] sm:$0xff] }
 0x2e4   :  { %v3136_v47 = vadd.f32 %v13197_v55, %v3068_v53  ;;  %v3199_v59 = vmax.f32 %v3135_v30, 0.0  ;;  %v3418_v55 = vor.u32 %v3416_v31, %v3414_v60  ;;  %v13564_v37 = vrot.slane %v17679_v11, 1  ;;  %v8595_v30 = vld [vmem:[%s16017_s3 + $0x20] sm:$0xff] }
 0x2e5   :  { %v13552_v9 = vsel %vm3275_vm2, %v3370_v41, %v3374_v51  ;;  %v3474_v57 = vor.u32 %v3472_v28, %v3470_v25  ;;  %v3376_v26 = vshrl.u32 %v13518_v58, 16  ;;  %4751 = vmatpush.bf16.msrb.mxu0 %v8595_v30  ;;  %v17685_v31 = vld [vmem:[#allocation12_spill] sm:$0xff] }
 0x2e6   :  { %v3200_v21 = vmax.f32 %v3136_v47, 0.0  ;;  %v13561_v4 = vsel %vm3275_vm2, %v3418_v55, %v17678_v43  ;;  %17680 = vst [vmem:[#allocation84_spill] sm:$0xff] %v13564_v37  ;;  %v13579_v13 = vsel %vm3275_vm2, %v3530_v24, %v13564_v37  ;;  %v4084_v55 = vrot.slane %v17685_v31, 1  ;;  %v13605_v43 = vpop.f32.mrf.mxu2  ;;  %v13613_v24 = vpop.f32.mrf.mxu3 }
 0x2e7   :  { %8042 = vmatmul.msk.bf16.gmra.mxu0 %vm3542_vm3, %v13552_v9  ;;  %v13570_v23 = vsel %vm3275_vm2, %v3474_v57, %v17681_v7  ;;  %17683 = vst [vmem:[#allocation136_spill] sm:$0xff] %v13579_v13  ;;  %v3378_v47 = vor.u32 %v3376_v26, %v3374_v51  ;;  %v17688_v7 = vld [vmem:[#allocation82_spill] sm:$0xff] }
 0x2e8   :  { %v13549_v34 = vpack.c.bf16 %v3200_v21, %v3199_v59  ;;  %17682 = vst [vmem:[#allocation117_spill] sm:$0xff] %v13570_v23  ;;  %v13573_v25 = vpop.f32.mrf.mxu0  ;;  %v17684_v21 = vld [vmem:[#allocation30_spill] sm:$0xff] }
 0x2e9   :  { %v4085_v41 = vrot.slane %v17684_v21, 1  ;;  %17686 = vst [vmem:[#allocation144_spill] sm:$0xff] %v13605_v43 }
 0x2ea   :  { %v3380_v60 = vshll.u32 %v13549_v34, 16  ;;  %v3384_v51 = vshrl.u32 %v13549_v34, 16  ;;  %17687 = vst [vmem:[#allocation80_spill] sm:$0xff] %v13613_v24 }
 0x2eb   :  { %v4086_v28 = vsel %vm697_vm0, %v4084_v55, %v4085_v41 }
 0x2ec   :  { %v3382_v53 = vrot.slane %v3380_v60, 1  ;;  %v4087_v60 = vrot.slane %v17688_v7, 1 }
 0x2ee   :  { %8048 = vmatmul.msk.bf16.gmra.mxu1 %vm3542_vm3, %v13561_v4  ;;  %v13588_v44 = vsel %vm3275_vm2, %v3378_v47, %v3382_v53  ;;  %v3386_v57 = vor.u32 %v3384_v51, %v3382_v53  ;;  %v13621_v53 = vsel %vm697_vm0, %v4085_v41, %v4087_v60  ;;  %v13629_v30 = vpop.f32.mrf.mxu3 }
 0x2ef   :  { %17689 = vst [vmem:[#allocation72_spill] sm:$0xff] %v13621_v53 }
 0x2f0   :  { %8055 = vmatmul.msk.bf16.gmra.mxu2 %vm3542_vm3, %v13570_v23  ;;  %v13592_v59 = vpop.f32.mrf.mxu0  ;;  %v13609_v11 = vsel %vm3275_vm2, %v3386_v57, %v13270_v38  ;;  %v13625_v38 = vpop.f32.mrf.mxu2  ;;  %17691 = vst [vmem:[#allocation35_spill] sm:$0xff] %v13629_v30  ;;  %v17698_v30 = vld [vmem:[#allocation49_spill] sm:$0xff] }
 0x2f1   :  { %17690 = vst [vmem:[#allocation88_spill] sm:$0xff] %v13625_v38 }
 0x2f3   :  { %8062 = vmatmul.msk.bf16.gmra.mxu3 %vm3542_vm3, %v13579_v13 }
 0x2f7   :  { %8043 = vmatmul.msk.bf16.gmra.mxu0 %vm3542_vm3, %v13588_v44 }
 0x2f8   :  { %v13603_v8 = vpop.f32.mrf.mxu0  ;;  %v13635_v55 = vpop.f32.mrf.mxu2 }
 0x2f9   :  { %17693 = vst [vmem:[#allocation132_spill] sm:$0xff] %v13635_v55  ;;  %v17725_v55 = vld [vmem:[#allocation118_spill] sm:$0xff] }
 0x2fe   :  { %8067 = vmatmul.msk.bf16.vlgmr.msrb.gmra.mxu1 %vm3542_vm3, %v17685_v31  ;;  %v17692_v31 = vld [vmem:[#allocation91_spill] sm:$0xff] }
 0x300   :  { %8105 = vmatmul.msk.bf16.vlgmr.msrb.gmra.mxu2 %vm3542_vm3, %v4086_v28  ;;  %v13616_v26 = vpop.f32.mrf.mxu0  ;;  %v13640_v28 = vpop.f32.mrf.mxu3 }
 0x301   :  { %17695 = vst [vmem:[#allocation87_spill] sm:$0xff] %v13640_v28  ;;  %v17700_v28 = vld [vmem:[#allocation121_spill] sm:$0xff] }
 0x303   :  { %8143 = vmatmul.msk.bf16.vlgmr.msrb.gmra.mxu3 %vm3542_vm3, %v17684_v21 }
 0x307   :  { %8044 = vmatmul.msk.bf16.gmra.mxu0 %vm3542_vm3, %v13609_v11 }
 0x308   :  { %v13631_v47 = vpop.f32.mrf.mxu0  ;;  %v13655_v24 = vpop.f32.mrf.mxu3 }
 0x309   :  { %17699 = vst [vmem:[#allocation16_spill] sm:$0xff] %v13655_v24 }
 0x30e   :  { %8068 = vmatmul.msk.bf16.gmra.mxu1 %vm3542_vm3, %v17684_v21  ;;  %v17694_v21 = vld [vmem:[#allocation130_spill] sm:$0xff] }
 0x30f   :  { %v4089_v41 = vrot.slane %v17694_v21, 1 }
 0x310   :  { %8106 = vmatmul.msk.bf16.gmra.mxu2 %vm3542_vm3, %v13621_v53  ;;  %v13647_v57 = vpop.f32.mrf.mxu0  ;;  %v13669_v53 = vpop.f32.mrf.mxu3 }
 0x311   :  { %v13643_v51 = vsel %vm697_vm0, %v4087_v60, %v4089_v41  ;;  %v4091_v60 = vrot.slane %v17700_v28, 1  ;;  %17703 = vst [vmem:[#allocation137_spill] sm:$0xff] %v13669_v53 }
 0x312   :  { %17696 = vst [vmem:[#allocation52_spill] sm:$0xff] %v13643_v51 }
 0x313   :  { %8144 = vmatmul.msk.bf16.gmra.mxu3 %vm3542_vm3, %v17688_v7 }
 0x317   :  { %8180 = vmatmul.msk.bf16.vlgmr.msrb.gmra.mxu0 %vm3542_vm3, %v17692_v31  ;;  %v13651_v31 = vpop.f32.mrf.mxu2 }
 0x318   :  { %17697 = vst [vmem:[#allocation110_spill] sm:$0xff] %v13651_v31  ;;  %v13657_v37 = vpop.f32.mrf.mxu0  ;;  %v13682_v40 = vpop.f32.mrf.mxu3 }
 0x319   :  { %17708 = vst [vmem:[#allocation17_spill] sm:$0xff] %v13682_v40 }
 0x31e   :  { %8069 = vmatmul.msk.bf16.gmra.mxu1 %vm3542_vm3, %v17688_v7  ;;  %v13665_v7 = vsel %vm697_vm0, %v4089_v41, %v4091_v60  ;;  %v4093_v41 = vrot.slane %v17707_v48, 1 }
 0x31f   :  { %17702 = vst [vmem:[#allocation146_spill] sm:$0xff] %v13665_v7 }
 0x320   :  { %8107 = vmatmul.msk.bf16.gmra.mxu2 %vm3542_vm3, %v13643_v51  ;;  %v13662_v51 = vpop.f32.mrf.mxu2  ;;  %v13689_v53 = vsel %vm697_vm0, %v4091_v60, %v4093_v41 }
 0x321   :  { %17701 = vst [vmem:[#allocation51_spill] sm:$0xff] %v13662_v51 }
 0x322   :  { %17709 = vst [vmem:[#allocation7_spill] sm:$0xff] %v13689_v53 }
 0x323   :  { %8145 = vmatmul.msk.bf16.gmra.mxu3 %vm3542_vm3, %v17694_v21 }
 0x327   :  { %8181 = vmatmul.msk.bf16.gmra.mxu0 %vm3542_vm3, %v17698_v30  ;;  %v17704_v30 = vld [vmem:[#allocation135_spill] sm:$0xff] }
 0x328   :  { %v13677_v13 = vpop.f32.mrf.mxu2 }
 0x329   :  { %17705 = vst [vmem:[#allocation75_spill] sm:$0xff] %v13677_v13  ;;  %v17713_v13 = vld [vmem:[#allocation113_spill] sm:$0xff] }
 0x32e   :  { %8070 = vmatmul.msk.bf16.gmra.mxu1 %vm3542_vm3, %v17694_v21 }
 0x330   :  { %8108 = vmatmul.msk.bf16.gmra.mxu2 %vm3542_vm3, %v13665_v7 }
 0x333   :  { %8146 = vmatmul.msk.bf16.gmra.mxu3 %vm3542_vm3, %v17700_v28 }
 0x334   :  { %v13673_v24 = vpop.f32.mrf.mxu0 }
 0x337   :  { %8182 = vmatmul.msk.bf16.gmra.mxu0 %vm3542_vm3, %v17704_v30 }
 0x33b   :  { %v13679_v21 = vpop.f32.mrf.mxu1 }
 0x33c   :  { %17706 = vst [vmem:[#allocation25_spill] sm:$0xff] %v13679_v21  ;;  %v13684_v2 = vpop.f32.mrf.mxu0 }
 0x33e   :  { %8071 = vmatmul.msk.bf16.gmra.mxu1 %vm3542_vm3, %v17700_v28 }
 0x340   :  { %8109 = vmatmul.msk.bf16.gmra.mxu2 %vm3542_vm3, %v13689_v53  ;;  %v4095_v53 = vrot.slane %v17716_v63, 1 }
 0x341   :  { %v13693_v7 = vpop.f32.mrf.mxu2 }
 0x342   :  { %17710 = vst [vmem:[#allocation94_spill] sm:$0xff] %v13693_v7  ;;  %v13717_v0 = vsel %vm697_vm0, %v4093_v41, %v4095_v53 }
 0x343   :  { %8147 = vmatmul.msk.bf16.gmra.mxu3 %vm3542_vm3, %v17707_v48  ;;  %v13697_v30 = vpop.f32.mrf.mxu1  ;;  %17718 = vst [vmem:[#allocation28_spill] sm:$0xff] %v13717_v0 }
 0x344   :  { %17711 = vst [vmem:[#allocation138_spill] sm:$0xff] %v13697_v30  ;;  %v13699_v14 = vpop.f32.mrf.mxu0 }
 0x345   :  { %v13701_v40 = vpop.f32.mrf.mxu3 }
 0x346   :  { %17712 = vst [vmem:[#allocation90_spill] sm:$0xff] %v13701_v40 }
 0x347   :  { %8183 = vmatmul.msk.bf16.gmra.mxu0 %vm3542_vm3, %v17713_v13 }
 0x349   :  { %v13705_v28 = vpop.f32.mrf.mxu2 }
 0x34a   :  { %17714 = vst [vmem:[#allocation95_spill] sm:$0xff] %v13705_v28 }
 0x34b   :  { %v13707_v60 = vpop.f32.mrf.mxu1 }
 0x34c   :  { %17715 = vst [vmem:[#allocation73_spill] sm:$0xff] %v13707_v60  ;;  %v13710_v51 = vpop.f32.mrf.mxu0 }
 0x34d   :  { %v13712_v7 = vpop.f32.mrf.mxu3 }
 0x34e   :  { %17717 = vst [vmem:[#allocation96_spill] sm:$0xff] %v13712_v7  ;;  %8072 = vmatmul.msk.bf16.gmra.mxu1 %vm3542_vm3, %v17707_v48  ;;  %v17722_v7 = vld [vmem:[#allocation32_spill] sm:$0xff] }
 0x350   :  { %8110 = vmatmul.msk.bf16.gmra.mxu2 %vm3542_vm3, %v13717_v0  ;;  %v4097_v0 = vrot.slane %v17725_v55, 1 }
 0x351   :  { %v13721_v40 = vpop.f32.mrf.mxu2 }
 0x352   :  { %17719 = vst [vmem:[#allocation98_spill] sm:$0xff] %v13721_v40  ;;  %v13745_v38 = vsel %vm697_vm0, %v4095_v53, %v4097_v0 }
 0x353   :  { %8148 = vmatmul.msk.bf16.gmra.mxu3 %vm3542_vm3, %v17716_v63  ;;  %v13725_v13 = vpop.f32.mrf.mxu1  ;;  %17727 = vst [vmem:[#allocation92_spill] sm:$0xff] %v13745_v38 }
 0x354   :  { %17720 = vst [vmem:[#allocation100_spill] sm:$0xff] %v13725_v13  ;;  %v13727_v28 = vpop.f32.mrf.mxu0 }
 0x355   :  { %v13729_v31 = vpop.f32.mrf.mxu3 }
 0x356   :  { %17721 = vst [vmem:[#allocation115_spill] sm:$0xff] %v13729_v31 }
 0x357   :  { %8184 = vmatmul.msk.bf16.gmra.mxu0 %vm3542_vm3, %v17722_v7 }
 0x359   :  { %v13733_v48 = vpop.f32.mrf.mxu2 }
 0x35a   :  { %17723 = vst [vmem:[#allocation102_spill] sm:$0xff] %v13733_v48 }
 0x35b   :  { %v13735_v41 = vpop.f32.mrf.mxu1 }
 0x35c   :  { %17724 = vst [vmem:[#allocation46_spill] sm:$0xff] %v13735_v41  ;;  %v13738_v3 = vpop.f32.mrf.mxu0 }
 0x35d   :  { %v13740_v40 = vpop.f32.mrf.mxu3 }
 0x35e   :  { %17726 = vst [vmem:[#allocation103_spill] sm:$0xff] %v13740_v40  ;;  %8073 = vmatmul.msk.bf16.gmra.mxu1 %vm3542_vm3, %v17716_v63  ;;  %v17731_v40 = vld [vmem:[#allocation162_spill] sm:$0xff] }
 0x360   :  { %8111 = vmatmul.msk.bf16.gmra.mxu2 %vm3542_vm3, %v13745_v38  ;;  %v4099_v38 = vrot.slane %v17600_v27, 1 }
 0x363   :  { %8149 = vmatmul.msk.bf16.gmra.mxu3 %vm3542_vm3, %v17725_v55  ;;  %v13751_v31 = vpop.f32.mrf.mxu1  ;;  %v13753_v7 = vpop.f32.mrf.mxu2 }
 0x364   :  { %17728 = vst [vmem:[#allocation116_spill] sm:$0xff] %v13751_v31  ;;  %v13755_v48 = vpop.f32.mrf.mxu0  ;;  %v4101_v31 = vrot.slane %v13226_v42, 1 }
 0x365   :  { %17729 = vst [vmem:[#allocation112_spill] sm:$0xff] %v13753_v7  ;;  %v13773_v7 = vsel %vm697_vm0, %v4097_v0, %v4099_v38 }
 0x366   :  { %v13757_v43 = vpop.f32.mrf.mxu3  ;;  %17735 = vst [vmem:[#allocation155_spill] sm:$0xff] %v13773_v7 }
 0x367   :  { %17730 = vst [vmem:[#allocation79_spill] sm:$0xff] %v13757_v43  ;;  %8185 = vmatmul.msk.bf16.gmra.mxu0 %vm3542_vm3, %v17731_v40 }
 0x36b   :  { %v13761_v63 = vpop.f32.mrf.mxu1  ;;  %v13763_v53 = vpop.f32.mrf.mxu2 }
 0x36c   :  { %17732 = vst [vmem:[#allocation153_spill] sm:$0xff] %v13761_v63  ;;  %v13766_v23 = vpop.f32.mrf.mxu0 }
 0x36d   :  { %17733 = vst [vmem:[#allocation93_spill] sm:$0xff] %v13763_v53 }
 0x36e   :  { %v13768_v41 = vpop.f32.mrf.mxu3  ;;  %8074 = vmatmul.msk.bf16.gmra.mxu1 %vm3542_vm3, %v17725_v55 }
 0x36f   :  { %17734 = vst [vmem:[#allocation60_spill] sm:$0xff] %v13768_v41  ;;  %v17739_v41 = vld [vmem:[#allocation21_spill] sm:$0xff] }
 0x370   :  { %8112 = vmatmul.msk.bf16.gmra.mxu2 %vm3542_vm3, %v13773_v7 }
 0x373   :  { %8150 = vmatmul.msk.bf16.gmra.mxu3 %vm3542_vm3, %v17600_v27  ;;  %v13779_v43 = vpop.f32.mrf.mxu1  ;;  %v13781_v40 = vpop.f32.mrf.mxu2 }
 0x374   :  { %17736 = vst [vmem:[#allocation142_spill] sm:$0xff] %v13779_v43  ;;  %v13783_v53 = vpop.f32.mrf.mxu0 }
 0x375   :  { %17737 = vst [vmem:[#allocation149_spill] sm:$0xff] %v13781_v40  ;;  %v13799_v40 = vsel %vm697_vm0, %v4099_v38, %v4101_v31 }
 0x376   :  { %v13785_v63 = vpop.f32.mrf.mxu3  ;;  %17742 = vst [vmem:[#allocation154_spill] sm:$0xff] %v13799_v40 }
 0x377   :  { %17738 = vst [vmem:[#allocation23_spill] sm:$0xff] %v13785_v63  ;;  %8186 = vmatmul.msk.bf16.gmra.mxu0 %vm3542_vm3, %v17739_v41  ;;  %v17743_v63 = vld [vmem:[#allocation65_spill] sm:$0xff] }
 0x37b   :  { %v13789_v55 = vpop.f32.mrf.mxu2  ;;  %v3887_v0 = vpop.f32.mrf.mxu1 }
 0x37c   :  { %17740 = vst [vmem:[#allocation150_spill] sm:$0xff] %v13789_v55  ;;  %v13792_v7 = vpop.f32.mrf.mxu0  ;;  %v3888_v41 = vadd.f32 %v3887_v0, %v17743_v63 }
 0x37e   :  { %v13794_v13 = vpop.f32.mrf.mxu3  ;;  %8075 = vmatmul.msk.bf16.gmra.mxu1 %vm3542_vm3, %v17600_v27 }
 0x37f   :  { %17741 = vst [vmem:[#allocation66_spill] sm:$0xff] %v13794_v13 }
 0x380   :  { %8113 = vmatmul.msk.bf16.gmra.mxu2 %vm3542_vm3, %v13799_v40  ;;  %v4103_v40 = vrot.slane %v13329_v50, 1 }
 0x383   :  { %8151 = vmatmul.msk.bf16.gmra.mxu3 %vm3542_vm3, %v13226_v42  ;;  %v3889_v55 = vpop.f32.mrf.mxu1  ;;  %v4260_v43 = vpop.f32.mrf.mxu2 }
 0x384   :  { %v4420_v22 = vadd.f32 %v4260_v43, %v3888_v41  ;;  %v13806_v60 = vpop.f32.mrf.mxu0  ;;  %v3890_v38 = vadd.f32 %v3889_v55, %v13083_v45  ;;  %v13817_v41 = vsel %vm697_vm0, %v4101_v31, %v4103_v40 }
 0x385   :  { %17744 = vst [vmem:[#allocation34_spill] sm:$0xff] %v13817_v41 }
 0x386   :  { %v4504_v13 = vpop.f32.mrf.mxu3 }
 0x387   :  { %v4664_v20 = vadd.f32 %v4504_v13, %v4420_v22  ;;  %8187 = vmatmul.msk.bf16.gmra.mxu0 %vm3542_vm3, %v13261_v35 }
 0x38b   :  { %v3892_v27 = vpop.f32.mrf.mxu1  ;;  %v4262_v30 = vpop.f32.mrf.mxu2 }
 0x38c   :  { %v4421_v63 = vadd.f32 %v4262_v30, %v3890_v38  ;;  %v13812_v0 = vpop.f32.mrf.mxu0  ;;  %v3893_v45 = vadd.f32 %v3892_v27, %v13158_v36  ;;  %v4105_v36 = vrot.slane %v13419_v17, 1 }
 0x38e   :  { %v4506_v12 = vpop.f32.mrf.mxu3  ;;  %8076 = vmatmul.msk.bf16.gmra.mxu1 %vm3542_vm3, %v13226_v42 }
 0x38f   :  { %v4665_v43 = vadd.f32 %v4506_v12, %v4421_v63 }
 0x390   :  { %8114 = vmatmul.msk.bf16.gmra.mxu2 %vm3542_vm3, %v13817_v41 }
 0x393   :  { %8152 = vmatmul.msk.bf16.gmra.mxu3 %vm3542_vm3, %v13329_v50  ;;  %v3894_v22 = vpop.f32.mrf.mxu1  ;;  %v4265_v13 = vpop.f32.mrf.mxu2 }
 0x394   :  { %v4422_v30 = vadd.f32 %v4265_v13, %v3893_v45  ;;  %v4753_v55 = vpop.f32.mrf.mxu0  ;;  %v3895_v12 = vadd.f32 %v3894_v22, %v13247_v6  ;;  %v13835_v45 = vsel %vm697_vm0, %v4103_v40, %v4105_v36 }
 0x395   :  { %v13824_v35 = vadd.f32 %v4753_v55, %v4664_v20  ;;  %17745 = vst [vmem:[#allocation120_spill] sm:$0xff] %v13835_v45 }
 0x396   :  { %v4509_v38 = vpop.f32.mrf.mxu3 }
 0x397   :  { %v4666_v42 = vadd.f32 %v4509_v38, %v4422_v30  ;;  %8188 = vmatmul.msk.bf16.gmra.mxu0 %vm3542_vm3, %v13372_v1 }
 0x39b   :  { %v3897_v31 = vpop.f32.mrf.mxu1  ;;  %v4267_v63 = vpop.f32.mrf.mxu2 }
 0x39c   :  { %v4423_v27 = vadd.f32 %v4267_v63, %v3895_v12  ;;  %v4755_v41 = vpop.f32.mrf.mxu0  ;;  %v3898_v6 = vadd.f32 %v3897_v31, %v13311_v52  ;;  %v4107_v52 = vrot.slane %v13518_v58, 1 }
 0x39d   :  { %v13830_v46 = vadd.f32 %v4755_v41, %v4665_v43 }
 0x39e   :  { %v4511_v21 = vpop.f32.mrf.mxu3  ;;  %8077 = vmatmul.msk.bf16.gmra.mxu1 %vm3542_vm3, %v13329_v50 }
 0x39f   :  { %v4667_v20 = vadd.f32 %v4511_v21, %v4423_v27 }
 0x3a0   :  { %8115 = vmatmul.msk.bf16.gmra.mxu2 %vm3542_vm3, %v13835_v45 }
 0x3a3   :  { %8153 = vmatmul.msk.bf16.gmra.mxu3 %vm3542_vm3, %v13419_v17  ;;  %v3899_v22 = vpop.f32.mrf.mxu1  ;;  %v4270_v13 = vpop.f32.mrf.mxu2 }
 0x3a4   :  { %v4424_v30 = vadd.f32 %v4270_v13, %v3898_v6  ;;  %v4758_v43 = vpop.f32.mrf.mxu0  ;;  %v3900_v40 = vadd.f32 %v3899_v22, %v13378_v62  ;;  %v13853_v6 = vsel %vm697_vm0, %v4105_v36, %v4107_v52 }
 0x3a5   :  { %v13842_v55 = vadd.f32 %v4758_v43, %v4666_v42  ;;  %17746 = vst [vmem:[#allocation101_spill] sm:$0xff] %v13853_v6 }
 0x3a6   :  { %v4514_v41 = vpop.f32.mrf.mxu3 }
 0x3a7   :  { %v4668_v38 = vadd.f32 %v4514_v41, %v4424_v30  ;;  %8189 = vmatmul.msk.bf16.gmra.mxu0 %vm3542_vm3, %v13472_v10 }
 0x3ab   :  { %v3902_v21 = vpop.f32.mrf.mxu1  ;;  %v4272_v12 = vpop.f32.mrf.mxu2 }
 0x3ac   :  { %v4425_v31 = vadd.f32 %v4272_v12, %v3900_v40  ;;  %v4760_v63 = vpop.f32.mrf.mxu0  ;;  %v3903_v62 = vadd.f32 %v3902_v21, %v13447_v61  ;;  %v4109_v61 = vrot.slane %v13549_v34, 1 }
 0x3ad   :  { %v13848_v45 = vadd.f32 %v4760_v63, %v4667_v20 }
 0x3ae   :  { %v4516_v27 = vpop.f32.mrf.mxu3  ;;  %8078 = vmatmul.msk.bf16.gmra.mxu1 %vm3542_vm3, %v13419_v17 }
 0x3af   :  { %v4669_v42 = vadd.f32 %v4516_v27, %v4425_v31 }
 0x3b0   :  { %8116 = vmatmul.msk.bf16.gmra.mxu2 %vm3542_vm3, %v13853_v6 }
 0x3b3   :  { %8154 = vmatmul.msk.bf16.gmra.mxu3 %vm3542_vm3, %v13518_v58  ;;  %v3904_v22 = vpop.f32.mrf.mxu1  ;;  %v4275_v13 = vpop.f32.mrf.mxu2 }
 0x3b4   :  { %v4426_v30 = vadd.f32 %v4275_v13, %v3903_v62  ;;  %v4763_v20 = vpop.f32.mrf.mxu0  ;;  %v3905_v36 = vadd.f32 %v3904_v22, %v13504_v33  ;;  %v13871_v62 = vsel %vm697_vm0, %v4107_v52, %v4109_v61 }
 0x3b5   :  { %v13860_v41 = vadd.f32 %v4763_v20, %v4668_v38  ;;  %17747 = vst [vmem:[#allocation157_spill] sm:$0xff] %v13871_v62 }
 0x3b6   :  { %v4519_v43 = vpop.f32.mrf.mxu3 }
 0x3b7   :  { %v4670_v40 = vadd.f32 %v4519_v43, %v4426_v30  ;;  %8190 = vmatmul.msk.bf16.gmra.mxu0 %vm3542_vm3, %v13552_v9 }
 0x3bb   :  { %v3907_v12 = vpop.f32.mrf.mxu1  ;;  %v4277_v31 = vpop.f32.mrf.mxu2 }
 0x3bc   :  { %v4427_v21 = vadd.f32 %v4277_v31, %v3905_v36  ;;  %v4765_v63 = vpop.f32.mrf.mxu0  ;;  %v3908_v33 = vadd.f32 %v3907_v12, %v13547_v16  ;;  %v4111_v12 = vrot.slane %v13250_v19, 1 }
 0x3bd   :  { %v13866_v6 = vadd.f32 %v4765_v63, %v4669_v42 }
 0x3be   :  { %v4521_v27 = vpop.f32.mrf.mxu3  ;;  %8079 = vmatmul.msk.bf16.gmra.mxu1 %vm3542_vm3, %v13518_v58 }
 0x3bf   :  { %v4671_v38 = vadd.f32 %v4521_v27, %v4427_v21 }
 0x3c0   :  { %8117 = vmatmul.msk.bf16.gmra.mxu2 %vm3542_vm3, %v13871_v62 }
 0x3c3   :  { %8155 = vmatmul.msk.bf16.gmra.mxu3 %vm3542_vm3, %v13549_v34  ;;  %v3909_v22 = vpop.f32.mrf.mxu1  ;;  %v4280_v13 = vpop.f32.mrf.mxu2 }
 0x3c4   :  { %v4428_v30 = vadd.f32 %v4280_v13, %v3908_v33  ;;  %v4768_v42 = vpop.f32.mrf.mxu0  ;;  %v3910_v52 = vadd.f32 %v3909_v22, %v13573_v25  ;;  %v13889_v33 = vsel %vm697_vm0, %v4109_v61, %v4111_v12 }
 0x3c5   :  { %v13878_v43 = vadd.f32 %v4768_v42, %v4670_v40  ;;  %17748 = vst [vmem:[#allocation78_spill] sm:$0xff] %v13889_v33 }
 0x3c6   :  { %v4524_v20 = vpop.f32.mrf.mxu3 }
 0x3c7   :  { %v4672_v36 = vadd.f32 %v4524_v20, %v4428_v30  ;;  %8191 = vmatmul.msk.bf16.gmra.mxu0 %vm3542_vm3, %v13588_v44 }
 0x3cb   :  { %v3912_v31 = vpop.f32.mrf.mxu1  ;;  %v4282_v21 = vpop.f32.mrf.mxu2 }
 0x3cc   :  { %v4429_v63 = vadd.f32 %v4282_v21, %v3910_v52  ;;  %v4770_v16 = vpop.f32.mrf.mxu0  ;;  %v3913_v25 = vadd.f32 %v3912_v31, %v13592_v59  ;;  %v4113_v59 = vrot.slane %v13263_v18, 1 }
 0x3cd   :  { %v13884_v62 = vadd.f32 %v4770_v16, %v4671_v38 }
 0x3ce   :  { %v4526_v27 = vpop.f32.mrf.mxu3  ;;  %8080 = vmatmul.msk.bf16.gmra.mxu1 %vm3542_vm3, %v13549_v34 }
 0x3cf   :  { %v4673_v40 = vadd.f32 %v4526_v27, %v4429_v63 }
 0x3d0   :  { %8118 = vmatmul.msk.bf16.gmra.mxu2 %vm3542_vm3, %v13889_v33 }
 0x3d3   :  { %8156 = vmatmul.msk.bf16.gmra.mxu3 %vm3542_vm3, %v13250_v19  ;;  %v3914_v22 = vpop.f32.mrf.mxu1  ;;  %v4285_v13 = vpop.f32.mrf.mxu2 }
 0x3d4   :  { %v4430_v30 = vadd.f32 %v4285_v13, %v3913_v25  ;;  %v4773_v38 = vpop.f32.mrf.mxu0  ;;  %v3915_v61 = vadd.f32 %v3914_v22, %v13603_v8  ;;  %v13907_v25 = vsel %vm697_vm0, %v4111_v12, %v4113_v59 }
 0x3d5   :  { %v13896_v20 = vadd.f32 %v4773_v38, %v4672_v36  ;;  %17749 = vst [vmem:[#allocation70_spill] sm:$0xff] %v13907_v25 }
 0x3d6   :  { %v4529_v42 = vpop.f32.mrf.mxu3 }
 0x3d7   :  { %v4674_v52 = vadd.f32 %v4529_v42, %v4430_v30  ;;  %8192 = vmatmul.msk.bf16.gmra.mxu0 %vm3542_vm3, %v13609_v11 }
 0x3db   :  { %v3917_v21 = vpop.f32.mrf.mxu1  ;;  %v4287_v63 = vpop.f32.mrf.mxu2 }
 0x3dc   :  { %v4431_v31 = vadd.f32 %v4287_v63, %v3915_v61  ;;  %v4775_v16 = vpop.f32.mrf.mxu0  ;;  %v3918_v8 = vadd.f32 %v3917_v21, %v13616_v26  ;;  %v4115_v26 = vrot.slane %v13365_v56, 1 }
 0x3dd   :  { %v13902_v33 = vadd.f32 %v4775_v16, %v4673_v40 }
 0x3de   :  { %v4531_v27 = vpop.f32.mrf.mxu3  ;;  %8081 = vmatmul.msk.bf16.gmra.mxu1 %vm3542_vm3, %v13250_v19 }
 0x3df   :  { %v4675_v36 = vadd.f32 %v4531_v27, %v4431_v31 }
 0x3e0   :  { %8119 = vmatmul.msk.bf16.gmra.mxu2 %vm3542_vm3, %v13907_v25 }
 0x3e3   :  { %8157 = vmatmul.msk.bf16.gmra.mxu3 %vm3542_vm3, %v13263_v18  ;;  %v3919_v22 = vpop.f32.mrf.mxu1  ;;  %v4290_v13 = vpop.f32.mrf.mxu2 }
 0x3e4   :  { %v4432_v30 = vadd.f32 %v4290_v13, %v3918_v8  ;;  %v4778_v40 = vpop.f32.mrf.mxu0  ;;  %v3920_v12 = vadd.f32 %v3919_v22, %v13631_v47  ;;  %v13925_v8 = vsel %vm697_vm0, %v4113_v59, %v4115_v26 }
 0x3e5   :  { %v13914_v42 = vadd.f32 %v4778_v40, %v4674_v52  ;;  %17750 = vst [vmem:[#allocation141_spill] sm:$0xff] %v13925_v8 }
 0x3e6   :  { %v4534_v38 = vpop.f32.mrf.mxu3 }
 0x3e7   :  { %v4676_v61 = vadd.f32 %v4534_v38, %v4432_v30  ;;  %8193 = vmatmul.msk.bf16.gmra.mxu0 %vm3542_vm3, %v13304_v49 }
 0x3eb   :  { %v3922_v63 = vpop.f32.mrf.mxu1  ;;  %v4292_v31 = vpop.f32.mrf.mxu2 }
 0x3ec   :  { %v4433_v21 = vadd.f32 %v4292_v31, %v3920_v12  ;;  %v4780_v16 = vpop.f32.mrf.mxu0  ;;  %v3923_v47 = vadd.f32 %v3922_v63, %v13647_v57  ;;  %v4117_v63 = vrot.slane %v13459_v15, 1 }
 0x3ed   :  { %v13920_v25 = vadd.f32 %v4780_v16, %v4675_v36 }
 0x3ee   :  { %v4536_v27 = vpop.f32.mrf.mxu3  ;;  %8082 = vmatmul.msk.bf16.gmra.mxu1 %vm3542_vm3, %v13263_v18 }
 0x3ef   :  { %v4677_v52 = vadd.f32 %v4536_v27, %v4433_v21 }
 0x3f0   :  { %8120 = vmatmul.msk.bf16.gmra.mxu2 %vm3542_vm3, %v13925_v8 }
 0x3f3   :  { %8158 = vmatmul.msk.bf16.gmra.mxu3 %vm3542_vm3, %v13365_v56  ;;  %v3924_v22 = vpop.f32.mrf.mxu1  ;;  %v4295_v13 = vpop.f32.mrf.mxu2 }
 0x3f4   :  { %v4434_v30 = vadd.f32 %v4295_v13, %v3923_v47  ;;  %v4783_v36 = vpop.f32.mrf.mxu0  ;;  %v3925_v59 = vadd.f32 %v3924_v22, %v13657_v37  ;;  %v13943_v47 = vsel %vm697_vm0, %v4115_v26, %v4117_v63 }
 0x3f5   :  { %v13932_v38 = vadd.f32 %v4783_v36, %v4676_v61  ;;  %17752 = vst [vmem:[#allocation77_spill] sm:$0xff] %v13943_v47 }
 0x3f6   :  { %v4539_v40 = vpop.f32.mrf.mxu3 }
 0x3f7   :  { %v4678_v12 = vadd.f32 %v4539_v40, %v4434_v30  ;;  %8194 = vmatmul.msk.bf16.gmra.mxu0 %vm3542_vm3, %v13412_v5 }
 0x3fb   :  { %v3927_v31 = vpop.f32.mrf.mxu1  ;;  %v4297_v21 = vpop.f32.mrf.mxu2 }
 0x3fc   :  { %v4435_v16 = vadd.f32 %v4297_v21, %v3925_v59  ;;  %v4785_v57 = vpop.f32.mrf.mxu0  ;;  %v3928_v37 = vadd.f32 %v3927_v31, %v13673_v24  ;;  %v17753_v31 = vld [vmem:[#allocation127_spill] sm:$0xff] }
 0x3fd   :  { %v13938_v8 = vadd.f32 %v4785_v57, %v4677_v52 }
 0x3fe   :  { %v4541_v27 = vpop.f32.mrf.mxu3  ;;  %8083 = vmatmul.msk.bf16.gmra.mxu1 %vm3542_vm3, %v13365_v56 }
 0x3ff   :  { %17751 = vst [vmem:[#allocation159_spill] sm:$0xff] %v13938_v8  ;;  %v4679_v61 = vadd.f32 %v4541_v27, %v4435_v16  ;;  %v4119_v27 = vrot.slane %v17753_v31, 1 }
 0x400   :  { %8121 = vmatmul.msk.bf16.gmra.mxu2 %vm3542_vm3, %v13943_v47 }
 0x403   :  { %8159 = vmatmul.msk.bf16.gmra.mxu3 %vm3542_vm3, %v13459_v15  ;;  %v3929_v22 = vpop.f32.mrf.mxu1  ;;  %v4300_v13 = vpop.f32.mrf.mxu2 }
 0x404   :  { %v4436_v30 = vadd.f32 %v4300_v13, %v3928_v37  ;;  %v4788_v52 = vpop.f32.mrf.mxu0  ;;  %v3930_v26 = vadd.f32 %v3929_v22, %v13684_v2  ;;  %v13961_v37 = vsel %vm697_vm0, %v4117_v63, %v4119_v27 }
 0x405   :  { %v13950_v40 = vadd.f32 %v4788_v52, %v4678_v12  ;;  %17755 = vst [vmem:[#allocation147_spill] sm:$0xff] %v13961_v37 }
 0x406   :  { %v4544_v36 = vpop.f32.mrf.mxu3 }
 0x407   :  { %v4680_v59 = vadd.f32 %v4544_v36, %v4436_v30  ;;  %8195 = vmatmul.msk.bf16.gmra.mxu0 %vm3542_vm3, %v13516_v29 }
 0x40b   :  { %v3932_v21 = vpop.f32.mrf.mxu1  ;;  %v4302_v16 = vpop.f32.mrf.mxu2 }
 0x40c   :  { %v4437_v57 = vadd.f32 %v4302_v16, %v3930_v26  ;;  %v4790_v24 = vpop.f32.mrf.mxu0  ;;  %v3933_v2 = vadd.f32 %v3932_v21, %v13699_v14 }
 0x40d   :  { %v13956_v8 = vadd.f32 %v4790_v24, %v4679_v61 }
 0x40e   :  { %v4546_v47 = vpop.f32.mrf.mxu3  ;;  %8084 = vmatmul.msk.bf16.gmra.mxu1 %vm3542_vm3, %v13459_v15 }
 0x40f   :  { %17754 = vst [vmem:[#allocation59_spill] sm:$0xff] %v13956_v8  ;;  %v4681_v12 = vadd.f32 %v4546_v47, %v4437_v57  ;;  %v17756_v57 = vld [vmem:[#allocation13_spill] sm:$0xff] }
 0x410   :  { %8122 = vmatmul.msk.bf16.gmra.mxu2 %vm3542_vm3, %v13961_v37  ;;  %v4121_v14 = vrot.slane %v17756_v57, 1 }
 0x413   :  { %8160 = vmatmul.msk.bf16.gmra.mxu3 %vm3542_vm3, %v17753_v31  ;;  %v3934_v22 = vpop.f32.mrf.mxu1  ;;  %v4305_v13 = vpop.f32.mrf.mxu2 }
 0x414   :  { %v4438_v30 = vadd.f32 %v4305_v13, %v3933_v2  ;;  %v4793_v61 = vpop.f32.mrf.mxu0  ;;  %v3935_v63 = vadd.f32 %v3934_v22, %v13710_v51  ;;  %v13979_v2 = vsel %vm697_vm0, %v4119_v27, %v4121_v14 }
 0x415   :  { %v13968_v36 = vadd.f32 %v4793_v61, %v4680_v59  ;;  %17758 = vst [vmem:[#allocation156_spill] sm:$0xff] %v13979_v2 }
 0x416   :  { %v4549_v52 = vpop.f32.mrf.mxu3 }
 0x417   :  { %v4682_v26 = vadd.f32 %v4549_v52, %v4438_v30  ;;  %8196 = vmatmul.msk.bf16.gmra.mxu0 %vm3542_vm3, %v13561_v4 }
 0x41b   :  { %v3937_v47 = vpop.f32.mrf.mxu1  ;;  %v4307_v16 = vpop.f32.mrf.mxu2 }
 0x41c   :  { %v4439_v21 = vadd.f32 %v4307_v16, %v3935_v63  ;;  %v4795_v24 = vpop.f32.mrf.mxu0  ;;  %v3938_v51 = vadd.f32 %v3937_v47, %v13727_v28 }
 0x41d   :  { %v13974_v8 = vadd.f32 %v4795_v24, %v4681_v12  ;;  %v17760_v24 = vld [vmem:[#allocation53_spill] sm:$0xff] }
 0x41e   :  { %v4551_v37 = vpop.f32.mrf.mxu3  ;;  %8085 = vmatmul.msk.bf16.gmra.mxu1 %vm3542_vm3, %v17753_v31  ;;  %v4123_v28 = vrot.slane %v17760_v24, 1 }
 0x41f   :  { %17757 = vst [vmem:[#allocation158_spill] sm:$0xff] %v13974_v8  ;;  %v4683_v59 = vadd.f32 %v4551_v37, %v4439_v21  ;;  %v17759_v37 = vld [vmem:[#allocation74_spill] sm:$0xff] }
 0x420   :  { %8123 = vmatmul.msk.bf16.gmra.mxu2 %vm3542_vm3, %v13979_v2 }
 0x423   :  { %8161 = vmatmul.msk.bf16.gmra.mxu3 %vm3542_vm3, %v17756_v57  ;;  %v3939_v22 = vpop.f32.mrf.mxu1  ;;  %v4310_v13 = vpop.f32.mrf.mxu2 }
 0x424   :  { %v4440_v30 = vadd.f32 %v4310_v13, %v3938_v51  ;;  %v4798_v12 = vpop.f32.mrf.mxu0  ;;  %v3940_v27 = vadd.f32 %v3939_v22, %v13738_v3  ;;  %v13997_v51 = vsel %vm697_vm0, %v4121_v14, %v4123_v28 }
 0x425   :  { %v13986_v52 = vadd.f32 %v4798_v12, %v4682_v26  ;;  %17762 = vst [vmem:[#allocation61_spill] sm:$0xff] %v13997_v51 }
 0x426   :  { %v4554_v61 = vpop.f32.mrf.mxu3 }
 0x427   :  { %v4684_v63 = vadd.f32 %v4554_v61, %v4440_v30  ;;  %8197 = vmatmul.msk.bf16.gmra.mxu0 %vm3542_vm3, %v17759_v37 }
 0x42b   :  { %v3942_v16 = vpop.f32.mrf.mxu1  ;;  %v4312_v21 = vpop.f32.mrf.mxu2 }
 0x42c   :  { %v4441_v47 = vadd.f32 %v4312_v21, %v3940_v27  ;;  %v4800_v2 = vpop.f32.mrf.mxu0  ;;  %v3943_v3 = vadd.f32 %v3942_v16, %v13755_v48  ;;  %v4125_v48 = vrot.slane %v17604_v39, 1 }
 0x42d   :  { %v13992_v31 = vadd.f32 %v4800_v2, %v4683_v59 }
 0x42e   :  { %v4556_v8 = vpop.f32.mrf.mxu3  ;;  %8086 = vmatmul.msk.bf16.gmra.mxu1 %vm3542_vm3, %v17756_v57 }
 0x42f   :  { %17761 = vst [vmem:[#allocation139_spill] sm:$0xff] %v13992_v31  ;;  %v4685_v26 = vadd.f32 %v4556_v8, %v4441_v47  ;;  %v17763_v8 = vld [vmem:[#allocation10_spill] sm:$0xff] }
 0x430   :  { %8124 = vmatmul.msk.bf16.gmra.mxu2 %vm3542_vm3, %v13997_v51 }
 0x433   :  { %8162 = vmatmul.msk.bf16.gmra.mxu3 %vm3542_vm3, %v17760_v24  ;;  %v3944_v22 = vpop.f32.mrf.mxu1  ;;  %v4315_v13 = vpop.f32.mrf.mxu2 }
 0x434   :  { %v4442_v30 = vadd.f32 %v4315_v13, %v3943_v3  ;;  %v4803_v59 = vpop.f32.mrf.mxu0  ;;  %v3945_v14 = vadd.f32 %v3944_v22, %v13766_v23  ;;  %v14015_v3 = vsel %vm697_vm0, %v4123_v28, %v4125_v48 }
 0x435   :  { %v14004_v12 = vadd.f32 %v4803_v59, %v4684_v63  ;;  %17765 = vst [vmem:[#allocation26_spill] sm:$0xff] %v14015_v3 }
 0x436   :  { %v4559_v2 = vpop.f32.mrf.mxu3 }
 0x437   :  { %v4686_v61 = vadd.f32 %v4559_v2, %v4442_v30  ;;  %8198 = vmatmul.msk.bf16.gmra.mxu0 %vm3542_vm3, %v17763_v8 }
 0x43b   :  { %v3947_v27 = vpop.f32.mrf.mxu1  ;;  %v4317_v21 = vpop.f32.mrf.mxu2 }
 0x43c   :  { %v4443_v16 = vadd.f32 %v4317_v21, %v3945_v14  ;;  %v4805_v47 = vpop.f32.mrf.mxu0  ;;  %v3948_v23 = vadd.f32 %v3947_v27, %v13783_v53  ;;  %v4127_v53 = vrot.slane %v13265_v54, 1 }
 0x43d   :  { %v14010_v31 = vadd.f32 %v4805_v47, %v4685_v26 }
 0x43e   :  { %v4561_v51 = vpop.f32.mrf.mxu3  ;;  %8087 = vmatmul.msk.bf16.gmra.mxu1 %vm3542_vm3, %v17760_v24 }
 0x43f   :  { %17764 = vst [vmem:[#allocation148_spill] sm:$0xff] %v14010_v31  ;;  %v4687_v63 = vadd.f32 %v4561_v51, %v4443_v16  ;;  %v17766_v51 = vld [vmem:[#allocation168_spill] sm:$0xff] }
 0x440   :  { %8125 = vmatmul.msk.bf16.gmra.mxu2 %vm3542_vm3, %v14015_v3 }
 0x443   :  { %8163 = vmatmul.msk.bf16.gmra.mxu3 %vm3542_vm3, %v17604_v39  ;;  %v3949_v22 = vpop.f32.mrf.mxu1  ;;  %v4320_v13 = vpop.f32.mrf.mxu2 }
 0x444   :  { %v4444_v30 = vadd.f32 %v4320_v13, %v3948_v23  ;;  %v4808_v26 = vpop.f32.mrf.mxu0  ;;  %v3950_v28 = vadd.f32 %v3949_v22, %v13792_v7  ;;  %v14033_v23 = vsel %vm697_vm0, %v4125_v48, %v4127_v53 }
 0x445   :  { %v14022_v2 = vadd.f32 %v4808_v26, %v4686_v61  ;;  %17768 = vst [vmem:[#allocation104_spill] sm:$0xff] %v14033_v23 }
 0x446   :  { %v4564_v59 = vpop.f32.mrf.mxu3 }
 0x447   :  { %v4688_v14 = vadd.f32 %v4564_v59, %v4444_v30  ;;  %8199 = vmatmul.msk.bf16.gmra.mxu0 %vm3542_vm3, %v17766_v51 }
 0x44b   :  { %v3952_v21 = vpop.f32.mrf.mxu1  ;;  %v4322_v16 = vpop.f32.mrf.mxu2 }
 0x44c   :  { %v4445_v27 = vadd.f32 %v4322_v16, %v3950_v28  ;;  %v4810_v47 = vpop.f32.mrf.mxu0  ;;  %v3953_v7 = vadd.f32 %v3952_v21, %v13806_v60 }
 0x44d   :  { %v14028_v31 = vadd.f32 %v4810_v47, %v4687_v63 }
 0x44e   :  { %v4566_v3 = vpop.f32.mrf.mxu3  ;;  %8088 = vmatmul.msk.bf16.gmra.mxu1 %vm3542_vm3, %v17604_v39 }
 0x44f   :  { %17767 = vst [vmem:[#allocation63_spill] sm:$0xff] %v14028_v31  ;;  %v4689_v61 = vadd.f32 %v4566_v3, %v4445_v27  ;;  %v17770_v27 = vld [vmem:[#allocation107_spill] sm:$0xff] }
 0x450   :  { %8126 = vmatmul.msk.bf16.gmra.mxu2 %vm3542_vm3, %v14033_v23  ;;  %v4129_v60 = vrot.slane %v17770_v27, 1 }
 0x453   :  { %8164 = vmatmul.msk.bf16.gmra.mxu3 %vm3542_vm3, %v13265_v54  ;;  %v3954_v22 = vpop.f32.mrf.mxu1  ;;  %v4325_v13 = vpop.f32.mrf.mxu2 }
 0x454   :  { %v4446_v30 = vadd.f32 %v4325_v13, %v3953_v7  ;;  %v4813_v63 = vpop.f32.mrf.mxu0  ;;  %v3955_v48 = vadd.f32 %v3954_v22, %v13812_v0  ;;  %v14051_v7 = vsel %vm697_vm0, %v4127_v53, %v4129_v60  ;;  %v17773_v0 = vld [vmem:[#allocation25_spill] sm:$0xff]  ;;  %v17776_v53 = vld [vmem:[#allocation138_spill] sm:$0xff] }
 0x455   :  { %v14040_v59 = vadd.f32 %v4813_v63, %v4688_v14  ;;  %17772 = vst [vmem:[#allocation41_spill] sm:$0xff] %v14051_v7 }
 0x456   :  { %v4569_v26 = vpop.f32.mrf.mxu3 }
 0x457   :  { %17769 = vst [vmem:[#allocation24_spill] sm:$0xff] %v14040_v59  ;;  %v4690_v28 = vadd.f32 %v4569_v26, %v4446_v30  ;;  %8200 = vmatmul.msk.bf16.gmra.mxu0 %vm3542_vm3, %v13308_v32 }
 0x45b   :  { %v3957_v3 = vpop.f32.mrf.mxu1  ;;  %v4327_v16 = vpop.f32.mrf.mxu2 }
 0x45c   :  { %v4447_v21 = vadd.f32 %v4327_v16, %v3955_v48  ;;  %v4815_v47 = vpop.f32.mrf.mxu0  ;;  %v3958_v22 = vadd.f32 %v3957_v3, %v17773_v0 }
 0x45d   :  { %v14046_v31 = vadd.f32 %v4815_v47, %v4689_v61 }
 0x45e   :  { %v4571_v23 = vpop.f32.mrf.mxu3  ;;  %8089 = vmatmul.msk.bf16.gmra.mxu1 %vm3542_vm3, %v13265_v54 }
 0x45f   :  { %17771 = vst [vmem:[#allocation151_spill] sm:$0xff] %v14046_v31  ;;  %v4691_v14 = vadd.f32 %v4571_v23, %v4447_v21  ;;  %v17775_v23 = vld [vmem:[#allocation33_spill] sm:$0xff]  ;;  %v17777_v31 = vld [vmem:[#allocation20_spill] sm:$0xff] }
 0x460   :  { %8127 = vmatmul.msk.bf16.gmra.mxu2 %vm3542_vm3, %v14051_v7  ;;  %v4131_v3 = vrot.slane %v17777_v31, 1 }
 0x463   :  { %8165 = vmatmul.msk.bf16.gmra.mxu3 %vm3542_vm3, %v17770_v27  ;;  %v3959_v13 = vpop.f32.mrf.mxu1  ;;  %v4330_v30 = vpop.f32.mrf.mxu2 }
 0x464   :  { %v4448_v63 = vadd.f32 %v4330_v30, %v3958_v22  ;;  %v4818_v61 = vpop.f32.mrf.mxu0  ;;  %v3960_v21 = vadd.f32 %v3959_v13, %v17776_v53  ;;  %v14069_v22 = vsel %vm697_vm0, %v4129_v60, %v4131_v3  ;;  %v17780_v13 = vld [vmem:[#allocation73_spill] sm:$0xff]  ;;  %v17783_v60 = vld [vmem:[#allocation100_spill] sm:$0xff] }
 0x465   :  { %v14058_v48 = vadd.f32 %v4818_v61, %v4690_v28  ;;  %17779 = vst [vmem:[#allocation152_spill] sm:$0xff] %v14069_v22 }
 0x466   :  { %v4574_v26 = vpop.f32.mrf.mxu3 }
 0x467   :  { %17774 = vst [vmem:[#allocation89_spill] sm:$0xff] %v14058_v48  ;;  %v4692_v16 = vadd.f32 %v4574_v26, %v4448_v63  ;;  %8201 = vmatmul.msk.bf16.gmra.mxu0 %vm3542_vm3, %v17775_v23 }
 0x46b   :  { %v3962_v47 = vpop.f32.mrf.mxu1  ;;  %v4332_v7 = vpop.f32.mrf.mxu2 }
 0x46c   :  { %v4449_v0 = vadd.f32 %v4332_v7, %v3960_v21  ;;  %v4820_v54 = vpop.f32.mrf.mxu0  ;;  %v3963_v30 = vadd.f32 %v3962_v47, %v17780_v13  ;;  %v17784_v13 = vld [vmem:[#allocation126_spill] sm:$0xff] }
 0x46d   :  { %v14064_v32 = vadd.f32 %v4820_v54, %v4691_v14 }
 0x46e   :  { %v4576_v59 = vpop.f32.mrf.mxu3  ;;  %8090 = vmatmul.msk.bf16.gmra.mxu1 %vm3542_vm3, %v17770_v27  ;;  %v4133_v27 = vrot.slane %v17784_v13, 1 }
 0x46f   :  { %17778 = vst [vmem:[#allocation166_spill] sm:$0xff] %v14064_v32  ;;  %v4693_v28 = vadd.f32 %v4576_v59, %v4449_v0  ;;  %v17782_v59 = vld [vmem:[#allocation85_spill] sm:$0xff] }
 0x470   :  { %8128 = vmatmul.msk.bf16.gmra.mxu2 %vm3542_vm3, %v14069_v22 }
 0x473   :  { %8166 = vmatmul.msk.bf16.gmra.mxu3 %vm3542_vm3, %v17777_v31  ;;  %v3964_v7 = vpop.f32.mrf.mxu1  ;;  %v4335_v63 = vpop.f32.mrf.mxu2 }
 0x474   :  { %v4450_v61 = vadd.f32 %v4335_v63, %v3963_v30  ;;  %v4823_v54 = vpop.f32.mrf.mxu0  ;;  %v3965_v21 = vadd.f32 %v3964_v7, %v17783_v60  ;;  %v14087_v30 = vsel %vm697_vm0, %v4131_v3, %v4133_v27  ;;  %v17787_v7 = vld [vmem:[#allocation46_spill] sm:$0xff] }
 0x475   :  { %v14076_v26 = vadd.f32 %v4823_v54, %v4692_v16  ;;  %17786 = vst [vmem:[#allocation71_spill] sm:$0xff] %v14087_v30 }
 0x476   :  { %v4579_v14 = vpop.f32.mrf.mxu3 }
 0x477   :  { %17781 = vst [vmem:[#allocation133_spill] sm:$0xff] %v14076_v26  ;;  %v4694_v53 = vadd.f32 %v4579_v14, %v4450_v61  ;;  %8202 = vmatmul.msk.bf16.gmra.mxu0 %vm3542_vm3, %v17782_v59 }
 0x47b   :  { %v3967_v0 = vpop.f32.mrf.mxu1  ;;  %v4337_v22 = vpop.f32.mrf.mxu2 }
 0x47c   :  { %v4451_v32 = vadd.f32 %v4337_v22, %v3965_v21  ;;  %v4825_v47 = vpop.f32.mrf.mxu0  ;;  %v3968_v63 = vadd.f32 %v3967_v0, %v17787_v7 }
 0x47d   :  { %v14082_v23 = vadd.f32 %v4825_v47, %v4693_v28 }
 0x47e   :  { %v4581_v48 = vpop.f32.mrf.mxu3  ;;  %8091 = vmatmul.msk.bf16.gmra.mxu1 %vm3542_vm3, %v17777_v31 }
 0x47f   :  { %17785 = vst [vmem:[#allocation42_spill] sm:$0xff] %v14082_v23  ;;  %v4695_v16 = vadd.f32 %v4581_v48, %v4451_v32  ;;  %v17789_v32 = vld [vmem:[#allocation117_spill] sm:$0xff]  ;;  %v17790_v48 = vld [vmem:[#allocation116_spill] sm:$0xff]  ;;  %v17791_v23 = vld [vmem:[#allocation15_spill] sm:$0xff] }
 0x480   :  { %8129 = vmatmul.msk.bf16.gmra.mxu2 %vm3542_vm3, %v14087_v30  ;;  %v4135_v0 = vrot.slane %v17791_v23, 1 }
 0x483   :  { %8167 = vmatmul.msk.bf16.gmra.mxu3 %vm3542_vm3, %v17784_v13  ;;  %v3969_v22 = vpop.f32.mrf.mxu1  ;;  %v4340_v61 = vpop.f32.mrf.mxu2 }
 0x484   :  { %v4452_v54 = vadd.f32 %v4340_v61, %v3968_v63  ;;  %v4828_v28 = vpop.f32.mrf.mxu0  ;;  %v3970_v3 = vadd.f32 %v3969_v22, %v17790_v48  ;;  %v14105_v63 = vsel %vm697_vm0, %v4133_v27, %v4135_v0  ;;  %v17794_v22 = vld [vmem:[#allocation153_spill] sm:$0xff]  ;;  %v17797_v27 = vld [vmem:[#allocation142_spill] sm:$0xff] }
 0x485   :  { %v14094_v60 = vadd.f32 %v4828_v28, %v4694_v53  ;;  %17793 = vst [vmem:[#allocation167_spill] sm:$0xff] %v14105_v63 }
 0x486   :  { %v4584_v14 = vpop.f32.mrf.mxu3 }
 0x487   :  { %17788 = vst [vmem:[#allocation29_spill] sm:$0xff] %v14094_v60  ;;  %v4696_v21 = vadd.f32 %v4584_v14, %v4452_v54  ;;  %8203 = vmatmul.msk.bf16.gmra.mxu0 %vm3542_vm3, %v17789_v32 }
 0x48b   :  { %v3972_v47 = vpop.f32.mrf.mxu1  ;;  %v4342_v30 = vpop.f32.mrf.mxu2 }
 0x48c   :  { %v4453_v7 = vadd.f32 %v4342_v30, %v3970_v3  ;;  %v4830_v31 = vpop.f32.mrf.mxu0  ;;  %v3973_v61 = vadd.f32 %v3972_v47, %v17794_v22 }
 0x48d   :  { %v14100_v59 = vadd.f32 %v4830_v31, %v4695_v16 }
 0x48e   :  { %v4586_v26 = vpop.f32.mrf.mxu3  ;;  %8092 = vmatmul.msk.bf16.gmra.mxu1 %vm3542_vm3, %v17784_v13 }
 0x48f   :  { %17792 = vst [vmem:[#allocation44_spill] sm:$0xff] %v14100_v59  ;;  %v4697_v53 = vadd.f32 %v4586_v26, %v4453_v7  ;;  %v17796_v26 = vld [vmem:[#allocation83_spill] sm:$0xff] }
 0x490   :  { %8130 = vmatmul.msk.bf16.gmra.mxu2 %vm3542_vm3, %v14105_v63  ;;  %v17798_v59 = vld [vmem:[#allocation131_spill] sm:$0xff] }
 0x491   :  { %v4137_v47 = vrot.slane %v17798_v59, 1 }
 0x493   :  { %8168 = vmatmul.msk.bf16.gmra.mxu3 %vm3542_vm3, %v17791_v23  ;;  %v3974_v30 = vpop.f32.mrf.mxu1  ;;  %v4345_v54 = vpop.f32.mrf.mxu2 }
 0x494   :  { %v4454_v28 = vadd.f32 %v4345_v54, %v3973_v61  ;;  %v4833_v31 = vpop.f32.mrf.mxu0  ;;  %v3975_v3 = vadd.f32 %v3974_v30, %v17797_v27  ;;  %v14123_v61 = vsel %vm697_vm0, %v4135_v0, %v4137_v47  ;;  %v17801_v30 = vld [vmem:[#allocation144_spill] sm:$0xff] }
 0x495   :  { %v14112_v14 = vadd.f32 %v4833_v31, %v4696_v21  ;;  %17800 = vst [vmem:[#allocation106_spill] sm:$0xff] %v14123_v61  ;;  %v17804_v0 = vld [vmem:[#allocation88_spill] sm:$0xff] }
 0x496   :  { %v4589_v16 = vpop.f32.mrf.mxu3 }
 0x497   :  { %17795 = vst [vmem:[#allocation43_spill] sm:$0xff] %v14112_v14  ;;  %v4698_v48 = vadd.f32 %v4589_v16, %v4454_v28  ;;  %8204 = vmatmul.msk.bf16.gmra.mxu0 %vm3542_vm3, %v17796_v26 }
 0x49b   :  { %v3977_v7 = vpop.f32.mrf.mxu1  ;;  %v4347_v63 = vpop.f32.mrf.mxu2 }
 0x49c   :  { %v4455_v22 = vadd.f32 %v4347_v63, %v3975_v3  ;;  %v4835_v13 = vpop.f32.mrf.mxu0  ;;  %v3978_v54 = vadd.f32 %v3977_v7, %v17801_v30 }
 0x49d   :  { %v14118_v32 = vadd.f32 %v4835_v13, %v4697_v53 }
 0x49e   :  { %v4591_v60 = vpop.f32.mrf.mxu3  ;;  %8093 = vmatmul.msk.bf16.gmra.mxu1 %vm3542_vm3, %v17791_v23 }
 0x49f   :  { %17799 = vst [vmem:[#allocation18_spill] sm:$0xff] %v14118_v32  ;;  %v4699_v21 = vadd.f32 %v4591_v60, %v4455_v22  ;;  %v17803_v60 = vld [vmem:[#allocation57_spill] sm:$0xff] }
 0x4a0   :  { %8131 = vmatmul.msk.bf16.gmra.mxu2 %vm3542_vm3, %v14123_v61  ;;  %v17805_v32 = vld [vmem:[#allocation165_spill] sm:$0xff] }
 0x4a1   :  { %v4139_v7 = vrot.slane %v17805_v32, 1 }
 0x4a3   :  { %8169 = vmatmul.msk.bf16.gmra.mxu3 %vm3542_vm3, %v17798_v59  ;;  %v3979_v63 = vpop.f32.mrf.mxu1  ;;  %v4350_v28 = vpop.f32.mrf.mxu2 }
 0x4a4   :  { %v4456_v31 = vadd.f32 %v4350_v28, %v3978_v54  ;;  %v4838_v13 = vpop.f32.mrf.mxu0  ;;  %v3980_v3 = vadd.f32 %v3979_v63, %v17804_v0  ;;  %v14141_v54 = vsel %vm697_vm0, %v4137_v47, %v4139_v7  ;;  %v17808_v63 = vld [vmem:[#allocation132_spill] sm:$0xff]  ;;  %v17811_v47 = vld [vmem:[#allocation110_spill] sm:$0xff] }
 0x4a5   :  { %v14130_v16 = vadd.f32 %v4838_v13, %v4698_v48  ;;  %17807 = vst [vmem:[#allocation19_spill] sm:$0xff] %v14141_v54 }
 0x4a6   :  { %v4594_v53 = vpop.f32.mrf.mxu3 }
 0x4a7   :  { %17802 = vst [vmem:[#allocation97_spill] sm:$0xff] %v14130_v16  ;;  %v4700_v27 = vadd.f32 %v4594_v53, %v4456_v31  ;;  %8205 = vmatmul.msk.bf16.gmra.mxu0 %vm3542_vm3, %v17803_v60 }
 0x4ab   :  { %v3982_v22 = vpop.f32.mrf.mxu1  ;;  %v4352_v61 = vpop.f32.mrf.mxu2 }
 0x4ac   :  { %v4457_v30 = vadd.f32 %v4352_v61, %v3980_v3  ;;  %v4840_v23 = vpop.f32.mrf.mxu0  ;;  %v3983_v28 = vadd.f32 %v3982_v22, %v17808_v63 }
 0x4ad   :  { %v14136_v26 = vadd.f32 %v4840_v23, %v4699_v21 }
 0x4ae   :  { %v4596_v14 = vpop.f32.mrf.mxu3  ;;  %8094 = vmatmul.msk.bf16.gmra.mxu1 %vm3542_vm3, %v17798_v59 }
 0x4af   :  { %17806 = vst [vmem:[#allocation45_spill] sm:$0xff] %v14136_v26  ;;  %v4701_v48 = vadd.f32 %v4596_v14, %v4457_v30  ;;  %v17810_v14 = vld [vmem:[#allocation169_spill] sm:$0xff]  ;;  %v17812_v26 = vld [vmem:[#allocation6_spill] sm:$0xff] }
 0x4b0   :  { %8132 = vmatmul.msk.bf16.gmra.mxu2 %vm3542_vm3, %v14141_v54  ;;  %v4141_v22 = vrot.slane %v17812_v26, 1 }
 0x4b3   :  { %8170 = vmatmul.msk.bf16.gmra.mxu3 %vm3542_vm3, %v17805_v32  ;;  %v3984_v61 = vpop.f32.mrf.mxu1  ;;  %v4355_v31 = vpop.f32.mrf.mxu2 }
 0x4b4   :  { %v4458_v13 = vadd.f32 %v4355_v31, %v3983_v28  ;;  %v4843_v23 = vpop.f32.mrf.mxu0  ;;  %v3985_v3 = vadd.f32 %v3984_v61, %v17811_v47  ;;  %v14159_v28 = vsel %vm697_vm0, %v4139_v7, %v4141_v22  ;;  %v17815_v61 = vld [vmem:[#allocation51_spill] sm:$0xff] }
 0x4b5   :  { %v14148_v53 = vadd.f32 %v4843_v23, %v4700_v27  ;;  %17814 = vst [vmem:[#allocation134_spill] sm:$0xff] %v14159_v28  ;;  %v17818_v7 = vld [vmem:[#allocation75_spill] sm:$0xff] }
 0x4b6   :  { %v4599_v21 = vpop.f32.mrf.mxu3 }
 0x4b7   :  { %17809 = vst [vmem:[#allocation109_spill] sm:$0xff] %v14148_v53  ;;  %v4702_v0 = vadd.f32 %v4599_v21, %v4458_v13  ;;  %8206 = vmatmul.msk.bf16.gmra.mxu0 %vm3542_vm3, %v17810_v14 }
 0x4bb   :  { %v3987_v30 = vpop.f32.mrf.mxu1  ;;  %v4357_v54 = vpop.f32.mrf.mxu2 }
 0x4bc   :  { %v4459_v63 = vadd.f32 %v4357_v54, %v3985_v3  ;;  %v4845_v59 = vpop.f32.mrf.mxu0  ;;  %v3988_v31 = vadd.f32 %v3987_v30, %v17815_v61 }
 0x4bd   :  { %v14154_v60 = vadd.f32 %v4845_v59, %v4701_v48 }
 0x4be   :  { %v4601_v16 = vpop.f32.mrf.mxu3  ;;  %8095 = vmatmul.msk.bf16.gmra.mxu1 %vm3542_vm3, %v17805_v32 }
 0x4bf   :  { %17813 = vst [vmem:[#allocation99_spill] sm:$0xff] %v14154_v60  ;;  %v4703_v27 = vadd.f32 %v4601_v16, %v4459_v63  ;;  %v17817_v16 = vld [vmem:[#allocation86_spill] sm:$0xff] }
 0x4c0   :  { %8133 = vmatmul.msk.bf16.gmra.mxu2 %vm3542_vm3, %v14159_v28  ;;  %v17819_v60 = vld [vmem:[#allocation22_spill] sm:$0xff] }
 0x4c1   :  { %v4143_v30 = vrot.slane %v17819_v60, 1 }
 0x4c3   :  { %8171 = vmatmul.msk.bf16.gmra.mxu3 %vm3542_vm3, %v17812_v26  ;;  %v3989_v54 = vpop.f32.mrf.mxu1  ;;  %v4360_v13 = vpop.f32.mrf.mxu2 }
 0x4c4   :  { %v4460_v23 = vadd.f32 %v4360_v13, %v3988_v31  ;;  %v4848_v59 = vpop.f32.mrf.mxu0  ;;  %v3990_v3 = vadd.f32 %v3989_v54, %v17818_v7  ;;  %v14177_v31 = vsel %vm697_vm0, %v4141_v22, %v4143_v30  ;;  %v8597_v54 = vld [vmem:[%s16017_s3 + $0x30] sm:$0xff]  ;;  %v8598_v13 = vld [vmem:[%s16017_s3 + $0x38] sm:$0xff] }
 0x4c5   :  { %v14166_v21 = vadd.f32 %v4848_v59, %v4702_v0  ;;  %17821 = vst [vmem:[#allocation37_spill] sm:$0xff] %v14177_v31  ;;  %5239 = vmatpush.bf16.msra.mxu2 %v8597_v54  ;;  %5481 = vmatpush.bf16.msra.mxu3 %v8598_v13  ;;  %v17825_v54 = vld [vmem:[#allocation95_spill] sm:$0xff] }
 0x4c6   :  { %v4604_v48 = vpop.f32.mrf.mxu3 }
 0x4c7   :  { %17816 = vst [vmem:[#allocation114_spill] sm:$0xff] %v14166_v21  ;;  %v4704_v47 = vadd.f32 %v4604_v48, %v4460_v23  ;;  %8207 = vmatmul.msk.bf16.gmra.mxu0 %vm3542_vm3, %v17817_v16 }
 0x4cb   :  { %v3992_v63 = vpop.f32.mrf.mxu1  ;;  %v4362_v28 = vpop.f32.mrf.mxu2 }
 0x4cc   :  { %v4461_v61 = vadd.f32 %v4362_v28, %v3990_v3  ;;  %v4850_v32 = vpop.f32.mrf.mxu0  ;;  %v8596_v28 = vld [vmem:[%s16017_s3 + $0x28] sm:$0xff] }
 0x4cd   :  { %v14172_v14 = vadd.f32 %v4850_v32, %v4703_v27  ;;  %v17822_v32 = vld [vmem:[#allocation94_spill] sm:$0xff]  ;;  %4997 = vmatpush.bf16.msra.mxu1 %v8596_v28 }
 0x4ce   :  { %v4606_v53 = vpop.f32.mrf.mxu3  ;;  %8096 = vmatmul.msk.bf16.gmra.mxu1 %vm3542_vm3, %v17812_v26  ;;  %v3993_v27 = vadd.f32 %v3992_v63, %v17822_v32  ;;  %v8599_v63 = vld [vmem:[%s16017_s3 + $0x40] sm:$0xff] }
 0x4cf   :  { %17820 = vst [vmem:[#allocation68_spill] sm:$0xff] %v14172_v14  ;;  %v4705_v0 = vadd.f32 %v4606_v53, %v4461_v61  ;;  %v17824_v61 = vld [vmem:[#allocation81_spill] sm:$0xff]  ;;  %5723 = vmatpush.bf16.msra.mxu0 %v8599_v63  ;;  %v17826_v14 = vld [vmem:[#allocation50_spill] sm:$0xff] }
 0x4d0   :  { %8134 = vmatmul.msk.bf16.gmra.mxu2 %vm3542_vm3, %v14177_v31 }
 0x4d3   :  { %8172 = vmatmul.msk.bf16.gmra.mxu3 %vm3542_vm3, %v17819_v60  ;;  %v3994_v53 = vpop.f32.mrf.mxu1  ;;  %v4365_v22 = vpop.f32.mrf.mxu2 }
 0x4d4   :  { %v4462_v23 = vadd.f32 %v4365_v22, %v3993_v27  ;;  %v4853_v59 = vpop.f32.mrf.mxu0  ;;  %v3995_v13 = vadd.f32 %v3994_v53, %v17825_v54  ;;  %v4145_v27 = vrot.slane %v17826_v14, 1  ;;  %v17829_v53 = vld [vmem:[#allocation98_spill] sm:$0xff] }
 0x4d5   :  { %v14193_v7 = vadd.f32 %v4853_v59, %v4704_v47 }
 0x4d6   :  { %v4609_v48 = vpop.f32.mrf.mxu3  ;;  %v14207_v59 = vsel %vm697_vm0, %v4143_v30, %v4145_v27  ;;  %v17831_v30 = vld [vmem:[#allocation102_spill] sm:$0xff] }
 0x4d7   :  { %17823 = vst [vmem:[#allocation40_spill] sm:$0xff] %v14193_v7  ;;  %v4706_v3 = vadd.f32 %v4609_v48, %v4462_v23  ;;  %8208 = vmatmul.msk.bf16.gmra.mxu0 %vm3542_vm3, %v17824_v61  ;;  %v16450_v7 = vmov 0.0|0.0  }
 0x4d8   :  { %17828 = vst [vmem:[#allocation27_spill] sm:$0xff] %v14207_v59 }
 0x4db   :  { %v3997_v32 = vpop.f32.mrf.mxu1  ;;  %v4367_v31 = vpop.f32.mrf.mxu2 }
 0x4dc   :  { %v4463_v22 = vadd.f32 %v4367_v31, %v3995_v13  ;;  %v4855_v28 = vpop.f32.mrf.mxu0  ;;  %v3998_v48 = vadd.f32 %v3997_v32, %v17829_v53  ;;  %v14220_v32 = vrot.slane %v16450_v7, 1 }
 0x4dd   :  { %v14202_v47 = vadd.f32 %v4855_v28, %v4705_v0 }
 0x4de   :  { %v4611_v26 = vpop.f32.mrf.mxu3  ;;  %8097 = vmatmul.msk.bf16.gmra.mxu1 %vm3542_vm3, %v17819_v60  ;;  %17832 = vst [vmem:[#allocation8_spill] sm:$0xff] %v14220_v32 }
 0x4df   :  { %17827 = vst [vmem:[#allocation47_spill] sm:$0xff] %v14202_v47  ;;  %v4707_v23 = vadd.f32 %v4611_v26, %v4463_v22  ;;  %v17830_v26 = vld [vmem:[#allocation119_spill] sm:$0xff] }
 0x4e0   :  { %8135 = vmatmul.msk.bf16.gmra.mxu2 %vm3542_vm3, %v14207_v59 }
 0x4e3   :  { %8173 = vmatmul.msk.bf16.gmra.mxu3 %vm3542_vm3, %v17826_v14  ;;  %v3999_v31 = vpop.f32.mrf.mxu1  ;;  %v4370_v63 = vpop.f32.mrf.mxu2 }
 0x4e4   :  { %v4464_v54 = vadd.f32 %v4370_v63, %v3998_v48  ;;  %v4858_v0 = vpop.f32.mrf.mxu0  ;;  %v4000_v22 = vadd.f32 %v3999_v31, %v17831_v30  ;;  %v14228_v63 = vsel %vm697_vm0, %v4145_v27, %v14220_v32  ;;  %v17835_v31 = vld [vmem:[#allocation112_spill] sm:$0xff]  ;;  %v17838_v27 = vld [vmem:[#allocation93_spill] sm:$0xff] }
 0x4e5   :  { %v14214_v28 = vadd.f32 %v4858_v0, %v4706_v3  ;;  %17834 = vst [vmem:[#allocation39_spill] sm:$0xff] %v14228_v63 }
 0x4e6   :  { %v4614_v13 = vpop.f32.mrf.mxu3 }
 0x4e7   :  { %v4708_v47 = vadd.f32 %v4614_v13, %v4464_v54  ;;  %8209 = vmatmul.msk.bf16.gmra.mxu0 %vm3542_vm3, %v17830_v26 }
 0x4eb   :  { %v4002_v60 = vpop.f32.mrf.mxu1  ;;  %v4372_v59 = vpop.f32.mrf.mxu2 }
 0x4ec   :  { %v4465_v53 = vadd.f32 %v4372_v59, %v4000_v22  ;;  %v4860_v61 = vpop.f32.mrf.mxu0  ;;  %v4003_v54 = vadd.f32 %v4002_v60, %v17835_v31 }
 0x4ed   :  { %v14222_v48 = vadd.f32 %v4860_v61, %v4707_v23 }
 0x4ee   :  { %v4616_v21 = vpop.f32.mrf.mxu3  ;;  %8098 = vmatmul.msk.bf16.gmra.mxu1 %vm3542_vm3, %v17826_v14 }
 0x4ef   :  { %17833 = vst [vmem:[#allocation11_spill] sm:$0xff] %v14222_v48  ;;  %v4709_v3 = vadd.f32 %v4616_v21, %v4465_v53  ;;  %v17837_v21 = vld [vmem:[#allocation136_spill] sm:$0xff] }
 0x4f0   :  { %8136 = vmatmul.msk.bf16.gmra.mxu2 %vm3542_vm3, %v14228_v63 }
 0x4f3   :  { %4658 = vmatmul.bf16.gmra.mxu3 %v16450_v7  ;;  %v4004_v59 = vpop.f32.mrf.mxu1  ;;  %v4375_v0 = vpop.f32.mrf.mxu2  ;;  %v17840_v7 = vld [vmem:[#allocation72_spill] sm:$0xff] }
 0x4f4   :  { %v4466_v13 = vadd.f32 %v4375_v0, %v4003_v54  ;;  %v4863_v61 = vpop.f32.mrf.mxu0  ;;  %v4005_v53 = vadd.f32 %v4004_v59, %v17838_v27  ;;  %v17841_v0 = vld [vmem:[#allocation82_spill] sm:$0xff] }
 0x4f5   :  { %v14234_v30 = vadd.f32 %v4863_v61, %v4708_v47  ;;  %v17842_v47 = vld [vmem:[#allocation149_spill] sm:$0xff] }
 0x4f6   :  { %v4619_v23 = vpop.f32.mrf.mxu3  ;;  %v17843_v61 = vld [vmem:[#allocation49_spill] sm:$0xff] }
 0x4f7   :  { %17836 = vst [vmem:[#allocation105_spill] sm:$0xff] %v14234_v30  ;;  %v4710_v22 = vadd.f32 %v4619_v23, %v4466_v13  ;;  %8210 = vmatmul.msk.bf16.gmra.mxu0 %vm3542_vm3, %v17837_v21 }
 0x4fb   :  { %v4007_v32 = vpop.f32.mrf.mxu1  ;;  %v4377_v48 = vpop.f32.mrf.mxu2 }
 0x4fc   :  { %v4467_v63 = vadd.f32 %v4377_v48, %v4005_v53  ;;  %v4865_v14 = vpop.f32.mrf.mxu0  ;;  %v4008_v13 = vadd.f32 %v4007_v32, %v17842_v47 }
 0x4fd   :  { %v14239_v31 = vadd.f32 %v4865_v14, %v4709_v3  ;;  %v17845_v3 = vld [vmem:[#allocation84_spill] sm:$0xff] }
 0x4fe   :  { %v4621_v60 = vpop.f32.mrf.mxu3  ;;  %8218 = vmatmul.msk.bf16.vlgmr.msra.gmra.mxu1 %vm3542_vm3, %v17840_v7  ;;  %v17846_v7 = vld [vmem:[#allocation150_spill] sm:$0xff] }
 0x4ff   :  { %17839 = vst [vmem:[#allocation48_spill] sm:$0xff] %v14239_v31  ;;  %v4711_v54 = vadd.f32 %v4621_v60, %v4467_v63 }
 0x500   :  { %8256 = vmatmul.msk.bf16.vlgmr.msra.gmra.mxu2 %vm3542_vm3, %v17841_v0 }
 0x503   :  { %8292 = vmatmul.msk.bf16.vlgmr.msra.gmra.mxu3 %vm3542_vm3, %v17843_v61  ;;  %v4009_v59 = vpop.f32.mrf.mxu1  ;;  %v4380_v23 = vpop.f32.mrf.mxu2  ;;  %v17848_v61 = vld [vmem:[#allocation52_spill] sm:$0xff] }
 0x504   :  { %v4468_v27 = vadd.f32 %v4380_v23, %v4008_v13  ;;  %v4868_v48 = vpop.f32.mrf.mxu0  ;;  %v4010_v63 = vadd.f32 %v4009_v59, %v17846_v7  ;;  %v17849_v23 = vld [vmem:[#allocation130_spill] sm:$0xff] }
 0x505   :  { %v14248_v30 = vadd.f32 %v4868_v48, %v4710_v22  ;;  %v17850_v22 = vld [vmem:[#allocation80_spill] sm:$0xff]  ;;  %v17851_v48 = vld [vmem:[#allocation135_spill] sm:$0xff] }
 0x506   :  { %v4624_v53 = vpop.f32.mrf.mxu3 }
 0x507   :  { %17844 = vst [vmem:[#allocation76_spill] sm:$0xff] %v14248_v30  ;;  %v4712_v14 = vadd.f32 %v4624_v53, %v4468_v27  ;;  %8211 = vmatmul.msk.bf16.gmra.mxu0 %vm3542_vm3, %v17845_v3 }
 0x50b   :  { %v4012_v60 = vpop.f32.mrf.mxu1  ;;  %v4382_v0 = vpop.f32.mrf.mxu2 }
 0x50c   :  { %v4469_v31 = vadd.f32 %v4382_v0, %v4010_v63  ;;  %v4870_v32 = vpop.f32.mrf.mxu0  ;;  %v4013_v27 = vadd.f32 %v4012_v60, %v17850_v22 }
 0x50d   :  { %v14253_v21 = vadd.f32 %v4870_v32, %v4711_v54 }
 0x50e   :  { %v4626_v47 = vpop.f32.mrf.mxu3  ;;  %8219 = vmatmul.msk.bf16.gmra.mxu1 %vm3542_vm3, %v17848_v61 }
 0x50f   :  { %17847 = vst [vmem:[#allocation54_spill] sm:$0xff] %v14253_v21  ;;  %v4713_v13 = vadd.f32 %v4626_v47, %v4469_v31  ;;  %v17853_v31 = vld [vmem:[#allocation35_spill] sm:$0xff] }
 0x510   :  { %8257 = vmatmul.msk.bf16.gmra.mxu2 %vm3542_vm3, %v17849_v23 }
 0x513   :  { %8293 = vmatmul.msk.bf16.gmra.mxu3 %vm3542_vm3, %v17851_v48  ;;  %v4014_v59 = vpop.f32.mrf.mxu1  ;;  %v4385_v53 = vpop.f32.mrf.mxu2  ;;  %v17855_v48 = vld [vmem:[#allocation146_spill] sm:$0xff] }
 0x514   :  { %v4470_v7 = vadd.f32 %v4385_v53, %v4013_v27  ;;  %v4873_v63 = vpop.f32.mrf.mxu0  ;;  %v4015_v32 = vadd.f32 %v4014_v59, %v17853_v31  ;;  %v17856_v53 = vld [vmem:[#allocation121_spill] sm:$0xff] }
 0x515   :  { %v14262_v30 = vadd.f32 %v4873_v63, %v4712_v14  ;;  %v17857_v14 = vld [vmem:[#allocation87_spill] sm:$0xff]  ;;  %v17858_v63 = vld [vmem:[#allocation113_spill] sm:$0xff] }
 0x516   :  { %v4629_v0 = vpop.f32.mrf.mxu3 }
 0x517   :  { %17852 = vst [vmem:[#allocation9_spill] sm:$0xff] %v14262_v30  ;;  %v4714_v54 = vadd.f32 %v4629_v0, %v4470_v7  ;;  %8330 = vmatmul.msk.bf16.vlgmr.msra.gmra.mxu0 %vm3542_vm3, %v17848_v61 }
 0x51b   :  { %v4017_v47 = vpop.f32.mrf.mxu1  ;;  %v4387_v23 = vpop.f32.mrf.mxu2 }
 0x51c   :  { %v4471_v21 = vadd.f32 %v4387_v23, %v4015_v32  ;;  %v4875_v60 = vpop.f32.mrf.mxu0  ;;  %v4018_v7 = vadd.f32 %v4017_v47, %v17857_v14 }
 0x51d   :  { %v14267_v3 = vadd.f32 %v4875_v60, %v4713_v13 }
 0x51e   :  { %v4631_v22 = vpop.f32.mrf.mxu3  ;;  %8220 = vmatmul.msk.bf16.gmra.mxu1 %vm3542_vm3, %v17855_v48 }
 0x51f   :  { %17854 = vst [vmem:[#allocation36_spill] sm:$0xff] %v14267_v3  ;;  %v4715_v27 = vadd.f32 %v4631_v22, %v4471_v21  ;;  %v17860_v21 = vld [vmem:[#allocation16_spill] sm:$0xff] }
 0x520   :  { %8258 = vmatmul.msk.bf16.gmra.mxu2 %vm3542_vm3, %v17856_v53 }
 0x523   :  { %8294 = vmatmul.msk.bf16.gmra.mxu3 %vm3542_vm3, %v17858_v63  ;;  %v4019_v61 = vpop.f32.mrf.mxu1  ;;  %v4390_v59 = vpop.f32.mrf.mxu2  ;;  %v17862_v63 = vld [vmem:[#allocation7_spill] sm:$0xff] }
 0x524   :  { %v4472_v0 = vadd.f32 %v4390_v59, %v4018_v7  ;;  %v4878_v31 = vpop.f32.mrf.mxu0  ;;  %v4020_v60 = vadd.f32 %v4019_v61, %v17860_v21  ;;  %v17863_v59 = vld [vmem:[#allocation108_spill] sm:$0xff] }
 0x525   :  { %v14276_v23 = vadd.f32 %v4878_v31, %v4714_v54  ;;  %v17864_v54 = vld [vmem:[#allocation137_spill] sm:$0xff]  ;;  %v17865_v31 = vld [vmem:[#allocation32_spill] sm:$0xff] }
 0x526   :  { %v4634_v32 = vpop.f32.mrf.mxu3 }
 0x527   :  { %17859 = vst [vmem:[#allocation122_spill] sm:$0xff] %v14276_v23  ;;  %v4716_v13 = vadd.f32 %v4634_v32, %v4472_v0  ;;  %8331 = vmatmul.msk.bf16.gmra.mxu0 %vm3542_vm3, %v17855_v48 }
 0x52b   :  { %v4022_v22 = vpop.f32.mrf.mxu1  ;;  %v4392_v53 = vpop.f32.mrf.mxu2 }
 0x52c   :  { %v4473_v3 = vadd.f32 %v4392_v53, %v4020_v60  ;;  %v4880_v47 = vpop.f32.mrf.mxu0  ;;  %v4023_v0 = vadd.f32 %v4022_v22, %v17864_v54 }
 0x52d   :  { %v14281_v30 = vadd.f32 %v4880_v47, %v4715_v27 }
 0x52e   :  { %v4636_v14 = vpop.f32.mrf.mxu3  ;;  %8221 = vmatmul.msk.bf16.gmra.mxu1 %vm3542_vm3, %v17862_v63 }
 0x52f   :  { %17861 = vst [vmem:[#allocation123_spill] sm:$0xff] %v14281_v30  ;;  %v4717_v7 = vadd.f32 %v4636_v14, %v4473_v3  ;;  %v17867_v3 = vld [vmem:[#allocation17_spill] sm:$0xff] }
 0x530   :  { %8259 = vmatmul.msk.bf16.gmra.mxu2 %vm3542_vm3, %v17863_v59 }
 0x533   :  { %8295 = vmatmul.msk.bf16.gmra.mxu3 %vm3542_vm3, %v17865_v31  ;;  %v4024_v48 = vpop.f32.mrf.mxu1  ;;  %v4395_v61 = vpop.f32.mrf.mxu2  ;;  %v17869_v31 = vld [vmem:[#allocation28_spill] sm:$0xff] }
 0x534   :  { %v4474_v32 = vadd.f32 %v4395_v61, %v4023_v0  ;;  %v4883_v21 = vpop.f32.mrf.mxu0  ;;  %v4025_v47 = vadd.f32 %v4024_v48, %v17867_v3  ;;  %v17870_v61 = vld [vmem:[#allocation143_spill] sm:$0xff] }
 0x535   :  { %v14290_v53 = vadd.f32 %v4883_v21, %v4716_v13  ;;  %v17871_v13 = vld [vmem:[#allocation90_spill] sm:$0xff] }
 0x536   :  { %v4639_v60 = vpop.f32.mrf.mxu3  ;;  %v17872_v21 = vld [vmem:[#allocation162_spill] sm:$0xff] }
 0x537   :  { %17866 = vst [vmem:[#allocation14_spill] sm:$0xff] %v14290_v53  ;;  %v4718_v27 = vadd.f32 %v4639_v60, %v4474_v32  ;;  %8332 = vmatmul.msk.bf16.gmra.mxu0 %vm3542_vm3, %v17862_v63 }
 0x53b   :  { %v4027_v14 = vpop.f32.mrf.mxu1  ;;  %v4397_v59 = vpop.f32.mrf.mxu2 }
 0x53c   :  { %v4475_v30 = vadd.f32 %v4397_v59, %v4025_v47  ;;  %v4885_v22 = vpop.f32.mrf.mxu0  ;;  %v4028_v32 = vadd.f32 %v4027_v14, %v17871_v13 }
 0x53d   :  { %v14295_v23 = vadd.f32 %v4885_v22, %v4717_v7 }
 0x53e   :  { %v4641_v54 = vpop.f32.mrf.mxu3  ;;  %8222 = vmatmul.msk.bf16.gmra.mxu1 %vm3542_vm3, %v17869_v31 }
 0x53f   :  { %17868 = vst [vmem:[#allocation124_spill] sm:$0xff] %v14295_v23  ;;  %v4719_v0 = vadd.f32 %v4641_v54, %v4475_v30  ;;  %v17874_v30 = vld [vmem:[#allocation96_spill] sm:$0xff] }
 0x540   :  { %8260 = vmatmul.msk.bf16.gmra.mxu2 %vm3542_vm3, %v17870_v61 }
 0x543   :  { %8296 = vmatmul.msk.bf16.gmra.mxu3 %vm3542_vm3, %v17872_v21  ;;  %v4029_v63 = vpop.f32.mrf.mxu1  ;;  %v4400_v48 = vpop.f32.mrf.mxu2  ;;  %v17876_v21 = vld [vmem:[#allocation92_spill] sm:$0xff] }
 0x544   :  { %v4476_v60 = vadd.f32 %v4400_v48, %v4028_v32  ;;  %v4888_v3 = vpop.f32.mrf.mxu0  ;;  %v4030_v22 = vadd.f32 %v4029_v63, %v17874_v30  ;;  %v17877_v48 = vld [vmem:[#allocation118_spill] sm:$0xff] }
 0x545   :  { %v14304_v59 = vadd.f32 %v4888_v3, %v4718_v27  ;;  %v17878_v27 = vld [vmem:[#allocation115_spill] sm:$0xff]  ;;  %v17879_v3 = vld [vmem:[#allocation21_spill] sm:$0xff] }
 0x546   :  { %v4644_v47 = vpop.f32.mrf.mxu3 }
 0x547   :  { %17873 = vst [vmem:[#allocation67_spill] sm:$0xff] %v14304_v59  ;;  %v4720_v7 = vadd.f32 %v4644_v47, %v4476_v60  ;;  %8333 = vmatmul.msk.bf16.gmra.mxu0 %vm3542_vm3, %v17869_v31 }
 0x54b   :  { %v4032_v54 = vpop.f32.mrf.mxu1  ;;  %v4402_v61 = vpop.f32.mrf.mxu2 }
 0x54c   :  { %v4477_v23 = vadd.f32 %v4402_v61, %v4030_v22  ;;  %v4890_v14 = vpop.f32.mrf.mxu0  ;;  %v4033_v60 = vadd.f32 %v4032_v54, %v17878_v27 }
 0x54d   :  { %v14309_v53 = vadd.f32 %v4890_v14, %v4719_v0 }
 0x54e   :  { %v4646_v13 = vpop.f32.mrf.mxu3  ;;  %8223 = vmatmul.msk.bf16.gmra.mxu1 %vm3542_vm3, %v17876_v21 }
 0x54f   :  { %17875 = vst [vmem:[#allocation125_spill] sm:$0xff] %v14309_v53  ;;  %v4721_v32 = vadd.f32 %v4646_v13, %v4477_v23  ;;  %v17881_v23 = vld [vmem:[#allocation103_spill] sm:$0xff] }
 0x550   :  { %8261 = vmatmul.msk.bf16.gmra.mxu2 %vm3542_vm3, %v17877_v48 }
 0x553   :  { %8297 = vmatmul.msk.bf16.gmra.mxu3 %vm3542_vm3, %v17879_v3  ;;  %v4034_v31 = vpop.f32.mrf.mxu1  ;;  %v4405_v63 = vpop.f32.mrf.mxu2  ;;  %v17883_v3 = vld [vmem:[#allocation155_spill] sm:$0xff] }
 0x554   :  { %v4478_v47 = vadd.f32 %v4405_v63, %v4033_v60  ;;  %v4893_v30 = vpop.f32.mrf.mxu0  ;;  %v4035_v14 = vadd.f32 %v4034_v31, %v17881_v23  ;;  %v17884_v63 = vld [vmem:[#allocation58_spill] sm:$0xff] }
 0x555   :  { %v14318_v61 = vadd.f32 %v4893_v30, %v4720_v7  ;;  %v17885_v7 = vld [vmem:[#allocation79_spill] sm:$0xff] }
 0x556   :  { %v4649_v22 = vpop.f32.mrf.mxu3  ;;  %v17886_v30 = vld [vmem:[#allocation31_spill] sm:$0xff] }
 0x557   :  { %17880 = vst [vmem:[#allocation170_spill] sm:$0xff] %v14318_v61  ;;  %v4722_v0 = vadd.f32 %v4649_v22, %v4478_v47  ;;  %8334 = vmatmul.msk.bf16.gmra.mxu0 %vm3542_vm3, %v17876_v21 }
 0x55b   :  { %v4037_v13 = vpop.f32.mrf.mxu1  ;;  %v4407_v48 = vpop.f32.mrf.mxu2 }
 0x55c   :  { %v4479_v53 = vadd.f32 %v4407_v48, %v4035_v14  ;;  %v4895_v54 = vpop.f32.mrf.mxu0  ;;  %v4038_v47 = vadd.f32 %v4037_v13, %v17885_v7 }
 0x55d   :  { %v14323_v59 = vadd.f32 %v4895_v54, %v4721_v32 }
 0x55e   :  { %v4651_v27 = vpop.f32.mrf.mxu3  ;;  %8224 = vmatmul.msk.bf16.gmra.mxu1 %vm3542_vm3, %v17883_v3 }
 0x55f   :  { %17882 = vst [vmem:[#allocation5_spill] sm:$0xff] %v14323_v59  ;;  %v4723_v60 = vadd.f32 %v4651_v27, %v4479_v53  ;;  %v17888_v53 = vld [vmem:[#allocation60_spill] sm:$0xff] }
 0x560   :  { %8262 = vmatmul.msk.bf16.gmra.mxu2 %vm3542_vm3, %v17884_v63 }
 0x563   :  { %8298 = vmatmul.msk.bf16.gmra.mxu3 %vm3542_vm3, %v17886_v30  ;;  %v4039_v21 = vpop.f32.mrf.mxu1  ;;  %v4410_v31 = vpop.f32.mrf.mxu2  ;;  %v17890_v30 = vld [vmem:[#allocation154_spill] sm:$0xff] }
 0x564   :  { %v4480_v22 = vadd.f32 %v4410_v31, %v4038_v47  ;;  %v4898_v23 = vpop.f32.mrf.mxu0  ;;  %v4040_v54 = vadd.f32 %v4039_v21, %v17888_v53  ;;  %v17891_v31 = vld [vmem:[#allocation55_spill] sm:$0xff] }
 0x565   :  { %v14332_v48 = vadd.f32 %v4898_v23, %v4722_v0  ;;  %v17892_v0 = vld [vmem:[#allocation23_spill] sm:$0xff] }
 0x566   :  { %v4654_v14 = vpop.f32.mrf.mxu3 }
 0x567   :  { %17887 = vst [vmem:[#allocation171_spill] sm:$0xff] %v14332_v48  ;;  %v4724_v32 = vadd.f32 %v4654_v14, %v4480_v22  ;;  %8335 = vmatmul.msk.bf16.gmra.mxu0 %vm3542_vm3, %v17883_v3 }
 0x56b   :  { %v4042_v27 = vpop.f32.mrf.mxu1  ;;  %v4412_v63 = vpop.f32.mrf.mxu2 }
 0x56c   :  { %v4481_v59 = vadd.f32 %v4412_v63, %v4040_v54  ;;  %v4900_v13 = vpop.f32.mrf.mxu0  ;;  %v4043_v22 = vadd.f32 %v4042_v27, %v17892_v0 }
 0x56d   :  { %v14337_v61 = vadd.f32 %v4900_v13, %v4723_v60 }
 0x56e   :  { %v4656_v7 = vpop.f32.mrf.mxu3  ;;  %8225 = vmatmul.msk.bf16.gmra.mxu1 %vm3542_vm3, %v17890_v30 }
 0x56f   :  { %17889 = vst [vmem:[#allocation145_spill] sm:$0xff] %v14337_v61  ;;  %v4725_v47 = vadd.f32 %v4656_v7, %v4481_v59  ;;  %v17894_v59 = vld [vmem:[#allocation66_spill] sm:$0xff] }
 0x570   :  { %8263 = vmatmul.msk.bf16.gmra.mxu2 %vm3542_vm3, %v17891_v31 }
 0x573   :  { %8299 = vmatmul.msk.bf16.gmra.mxu3 %vm3542_vm3, %v13372_v1  ;;  %v4044_v3 = vpop.f32.mrf.mxu1  ;;  %v4415_v21 = vpop.f32.mrf.mxu2 }
 0x574   :  { %v4482_v23 = vadd.f32 %v4415_v21, %v4043_v22  ;;  %v4903_v14 = vpop.f32.mrf.mxu0  ;;  %v4045_v63 = vadd.f32 %v4044_v3, %v17894_v59  ;;  %v17896_v22 = vld [vmem:[#allocation34_spill] sm:$0xff] }
 0x575   :  { %v14346_v54 = vadd.f32 %v4903_v14, %v4724_v32 }
 0x576   :  { %v4659_v53 = vpop.f32.mrf.mxu3 }
 0x577   :  { %17893 = vst [vmem:[#allocation64_spill] sm:$0xff] %v14346_v54  ;;  %v4726_v60 = vadd.f32 %v4659_v53, %v4482_v23  ;;  %8336 = vmatmul.msk.bf16.gmra.mxu0 %vm3542_vm3, %v17890_v30 }
 0x57b   :  { %v4417_v13 = vpop.f32.mrf.mxu2  ;;  %v4999_v7 = vpop.f32.mrf.mxu1 }
 0x57c   :  { %v4483_v31 = vadd.f32 %v4417_v13, %v4045_v63  ;;  %v5159_v27 = vadd.f32 %v4999_v7, %v13824_v35  ;;  %v4905_v0 = vpop.f32.mrf.mxu0 }
 0x57d   :  { %v14352_v61 = vadd.f32 %v4905_v0, %v4725_v47  ;;  %v17899_v0 = vld [vmem:[#allocation120_spill] sm:$0xff] }
 0x57e   :  { %v4661_v1 = vpop.f32.mrf.mxu3  ;;  %8226 = vmatmul.msk.bf16.gmra.mxu1 %vm3542_vm3, %v17896_v22 }
 0x57f   :  { %17895 = vst [vmem:[#allocation69_spill] sm:$0xff] %v14352_v61  ;;  %v4727_v32 = vadd.f32 %v4661_v1, %v4483_v31 }
 0x580   :  { %8264 = vmatmul.msk.bf16.gmra.mxu2 %vm3542_vm3, %v13329_v50 }
 0x583   :  { %8300 = vmatmul.msk.bf16.gmra.mxu3 %vm3542_vm3, %v13472_v10  ;;  %v5001_v30 = vpop.f32.mrf.mxu1  ;;  %v5241_v3 = vpop.f32.mrf.mxu2 }
 0x584   :  { %v5160_v21 = vadd.f32 %v5001_v30, %v13830_v46  ;;  %v5401_v23 = vadd.f32 %v5241_v3, %v5159_v27  ;;  %v4908_v35 = vpop.f32.mrf.mxu0 }
 0x585   :  { %v14361_v14 = vadd.f32 %v4908_v35, %v4726_v60 }
 0x586   :  { %v5483_v47 = vpop.f32.mrf.mxu3 }
 0x587   :  { %17897 = vst [vmem:[#allocation62_spill] sm:$0xff] %v14361_v14  ;;  %v5643_v53 = vadd.f32 %v5483_v47, %v5401_v23  ;;  %8337 = vmatmul.msk.bf16.gmra.mxu0 %vm3542_vm3, %v17896_v22  ;;  %v17977_v14 = vld [vmem:[#allocation27_spill] sm:$0xff] }
 0x58b   :  { %v5004_v59 = vpop.f32.mrf.mxu1  ;;  %v5243_v63 = vpop.f32.mrf.mxu2 }
 0x58c   :  { %v5161_v50 = vadd.f32 %v5004_v59, %v13842_v55  ;;  %v5402_v13 = vadd.f32 %v5243_v63, %v5160_v21  ;;  %v4910_v7 = vpop.f32.mrf.mxu0  ;;  %v17900_v63 = vld [vmem:[#allocation101_spill] sm:$0xff] }
 0x58d   :  { %v14366_v10 = vadd.f32 %v4910_v7, %v4727_v32 }
 0x58e   :  { %v5485_v31 = vpop.f32.mrf.mxu3  ;;  %8227 = vmatmul.msk.bf16.gmra.mxu1 %vm3542_vm3, %v17899_v0 }
 0x58f   :  { %17898 = vst [vmem:[#allocation160_spill] sm:$0xff] %v14366_v10  ;;  %v5644_v46 = vadd.f32 %v5485_v31, %v5402_v13 }
 0x590   :  { %8265 = vmatmul.msk.bf16.gmra.mxu2 %vm3542_vm3, %v13419_v17 }
 0x593   :  { %8301 = vmatmul.msk.bf16.gmra.mxu3 %vm3542_vm3, %v13552_v9  ;;  %v5006_v60 = vpop.f32.mrf.mxu1  ;;  %v5246_v27 = vpop.f32.mrf.mxu2 }
 0x594   :  { %v5162_v1 = vadd.f32 %v5006_v60, %v13848_v45  ;;  %v5403_v55 = vadd.f32 %v5246_v27, %v5161_v50  ;;  %v5725_v22 = vpop.f32.mrf.mxu0 }
 0x595   :  { %v14375_v32 = vadd.f32 %v5725_v22, %v5643_v53 }
 0x596   :  { %v5488_v30 = vpop.f32.mrf.mxu3 }
 0x597   :  { %v5645_v3 = vadd.f32 %v5488_v30, %v5403_v55  ;;  %8338 = vmatmul.msk.bf16.gmra.mxu0 %vm3542_vm3, %v17899_v0  ;;  %v17901_v30 = vld [vmem:[#allocation157_spill] sm:$0xff] }
 0x59b   :  { %v5009_v21 = vpop.f32.mrf.mxu1  ;;  %v5248_v23 = vpop.f32.mrf.mxu2 }
 0x59c   :  { %v5163_v17 = vadd.f32 %v5009_v21, %v13860_v41  ;;  %v5404_v35 = vadd.f32 %v5248_v23, %v5162_v1  ;;  %v5727_v47 = vpop.f32.mrf.mxu0 }
 0x59d   :  { %v14380_v59 = vadd.f32 %v5727_v47, %v5644_v46 }
 0x59e   :  { %v5490_v9 = vpop.f32.mrf.mxu3  ;;  %8228 = vmatmul.msk.bf16.gmra.mxu1 %vm3542_vm3, %v17900_v63 }
 0x59f   :  { %v5646_v45 = vadd.f32 %v5490_v9, %v5404_v35 }
 0x5a0   :  { %8266 = vmatmul.msk.bf16.gmra.mxu2 %vm3542_vm3, %v13518_v58 }
 0x5a3   :  { %8302 = vmatmul.msk.bf16.gmra.mxu3 %vm3542_vm3, %v13588_v44  ;;  %v5011_v53 = vpop.f32.mrf.mxu1  ;;  %v5251_v50 = vpop.f32.mrf.mxu2 }
 0x5a4   :  { %v5164_v13 = vadd.f32 %v5011_v53, %v13866_v6  ;;  %v5405_v41 = vadd.f32 %v5251_v50, %v5163_v17  ;;  %v5730_v7 = vpop.f32.mrf.mxu0 }
 0x5a5   :  { %v14389_v0 = vadd.f32 %v5730_v7, %v5645_v3 }
 0x5a6   :  { %v5493_v31 = vpop.f32.mrf.mxu3 }
 0x5a7   :  { %v5647_v46 = vadd.f32 %v5493_v31, %v5405_v41  ;;  %8339 = vmatmul.msk.bf16.gmra.mxu0 %vm3542_vm3, %v17900_v63  ;;  %v17902_v41 = vld [vmem:[#allocation78_spill] sm:$0xff] }
 0x5ab   :  { %v5014_v60 = vpop.f32.mrf.mxu1  ;;  %v5253_v27 = vpop.f32.mrf.mxu2 }
 0x5ac   :  { %v5165_v58 = vadd.f32 %v5014_v60, %v13878_v43  ;;  %v5406_v1 = vadd.f32 %v5253_v27, %v5164_v13  ;;  %v5732_v55 = vpop.f32.mrf.mxu0 }
 0x5ad   :  { %v14394_v22 = vadd.f32 %v5732_v55, %v5646_v45 }
 0x5ae   :  { %v5495_v44 = vpop.f32.mrf.mxu3  ;;  %8229 = vmatmul.msk.bf16.gmra.mxu1 %vm3542_vm3, %v17901_v30 }
 0x5af   :  { %v5648_v6 = vadd.f32 %v5495_v44, %v5406_v1 }
 0x5b0   :  { %8267 = vmatmul.msk.bf16.gmra.mxu2 %vm3542_vm3, %v13549_v34 }
 0x5b3   :  { %8303 = vmatmul.msk.bf16.gmra.mxu3 %vm3542_vm3, %v13609_v11  ;;  %v5016_v3 = vpop.f32.mrf.mxu1  ;;  %v5256_v21 = vpop.f32.mrf.mxu2 }
 0x5b4   :  { %v5166_v23 = vadd.f32 %v5016_v3, %v13884_v62  ;;  %v5407_v43 = vadd.f32 %v5256_v21, %v5165_v58  ;;  %v5735_v17 = vpop.f32.mrf.mxu0  ;;  %v17903_v21 = vld [vmem:[#allocation70_spill] sm:$0xff] }
 0x5b5   :  { %v14403_v47 = vadd.f32 %v5735_v17, %v5647_v46 }
 0x5b6   :  { %v5498_v35 = vpop.f32.mrf.mxu3 }
 0x5b7   :  { %v5649_v9 = vadd.f32 %v5498_v35, %v5407_v43  ;;  %8340 = vmatmul.msk.bf16.gmra.mxu0 %vm3542_vm3, %v17901_v30 }
 0x5bb   :  { %v5019_v63 = vpop.f32.mrf.mxu1  ;;  %v5258_v45 = vpop.f32.mrf.mxu2 }
 0x5bc   :  { %v5167_v34 = vadd.f32 %v5019_v63, %v13896_v20  ;;  %v5408_v53 = vadd.f32 %v5258_v45, %v5166_v23  ;;  %v5737_v50 = vpop.f32.mrf.mxu0 }
 0x5bd   :  { %v14408_v13 = vadd.f32 %v5737_v50, %v5648_v6 }
 0x5be   :  { %v5500_v11 = vpop.f32.mrf.mxu3  ;;  %8230 = vmatmul.msk.bf16.gmra.mxu1 %vm3542_vm3, %v17902_v41 }
 0x5bf   :  { %v5650_v62 = vadd.f32 %v5500_v11, %v5408_v53 }
 0x5c0   :  { %8268 = vmatmul.msk.bf16.gmra.mxu2 %vm3542_vm3, %v13250_v19 }
 0x5c3   :  { %8304 = vmatmul.msk.bf16.gmra.mxu3 %vm3542_vm3, %v13304_v49  ;;  %v5021_v7 = vpop.f32.mrf.mxu1  ;;  %v5261_v31 = vpop.f32.mrf.mxu2 }
 0x5c4   :  { %v5168_v46 = vadd.f32 %v5021_v7, %v13902_v33  ;;  %v5409_v20 = vadd.f32 %v5261_v31, %v5167_v34  ;;  %v5740_v60 = vpop.f32.mrf.mxu0 }
 0x5c5   :  { %v14417_v58 = vadd.f32 %v5740_v60, %v5649_v9 }
 0x5c6   :  { %v5503_v27 = vpop.f32.mrf.mxu3 }
 0x5c7   :  { %v5651_v1 = vadd.f32 %v5503_v27, %v5409_v20  ;;  %8341 = vmatmul.msk.bf16.gmra.mxu0 %vm3542_vm3, %v17902_v41 }
 0x5cb   :  { %v5024_v55 = vpop.f32.mrf.mxu1  ;;  %v5263_v44 = vpop.f32.mrf.mxu2 }
 0x5cc   :  { %v5169_v19 = vadd.f32 %v5024_v55, %v13914_v42  ;;  %v5410_v30 = vadd.f32 %v5263_v44, %v5168_v46  ;;  %v5742_v6 = vpop.f32.mrf.mxu0  ;;  %v17905_v46 = vld [vmem:[#allocation159_spill] sm:$0xff] }
 0x5cd   :  { %v14422_v3 = vadd.f32 %v5742_v6, %v5650_v62  ;;  %v17904_v62 = vld [vmem:[#allocation141_spill] sm:$0xff] }
 0x5ce   :  { %v5505_v49 = vpop.f32.mrf.mxu3  ;;  %8231 = vmatmul.msk.bf16.gmra.mxu1 %vm3542_vm3, %v17903_v21 }
 0x5cf   :  { %v5652_v33 = vadd.f32 %v5505_v49, %v5410_v30 }
 0x5d0   :  { %8269 = vmatmul.msk.bf16.gmra.mxu2 %vm3542_vm3, %v13263_v18 }
 0x5d3   :  { %8305 = vmatmul.msk.bf16.gmra.mxu3 %vm3542_vm3, %v13412_v5  ;;  %v5026_v23 = vpop.f32.mrf.mxu1  ;;  %v5266_v43 = vpop.f32.mrf.mxu2 }
 0x5d4   :  { %v5170_v17 = vadd.f32 %v5026_v23, %v13920_v25  ;;  %v5411_v42 = vadd.f32 %v5266_v43, %v5169_v19  ;;  %v5745_v35 = vpop.f32.mrf.mxu0 }
 0x5d5   :  { %v14431_v63 = vadd.f32 %v5745_v35, %v5651_v1 }
 0x5d6   :  { %v5508_v9 = vpop.f32.mrf.mxu3 }
 0x5d7   :  { %v5653_v45 = vadd.f32 %v5508_v9, %v5411_v42  ;;  %8342 = vmatmul.msk.bf16.gmra.mxu0 %vm3542_vm3, %v17903_v21  ;;  %v17906_v21 = vld [vmem:[#allocation77_spill] sm:$0xff] }
 0x5db   :  { %v5029_v34 = vpop.f32.mrf.mxu1  ;;  %v5268_v53 = vpop.f32.mrf.mxu2 }
 0x5dc   :  { %v5171_v18 = vadd.f32 %v5029_v34, %v13932_v38  ;;  %v5412_v50 = vadd.f32 %v5268_v53, %v5170_v17  ;;  %v5747_v11 = vpop.f32.mrf.mxu0  ;;  %v17907_v17 = vld [vmem:[#allocation59_spill] sm:$0xff] }
 0x5dd   :  { %v14436_v41 = vadd.f32 %v5747_v11, %v5652_v33 }
 0x5de   :  { %v5510_v5 = vpop.f32.mrf.mxu3  ;;  %8232 = vmatmul.msk.bf16.gmra.mxu1 %vm3542_vm3, %v17904_v62 }
 0x5df   :  { %v5654_v25 = vadd.f32 %v5510_v5, %v5412_v50 }
 0x5e0   :  { %8270 = vmatmul.msk.bf16.gmra.mxu2 %vm3542_vm3, %v13365_v56 }
 0x5e3   :  { %8306 = vmatmul.msk.bf16.gmra.mxu3 %vm3542_vm3, %v13516_v29  ;;  %v5031_v7 = vpop.f32.mrf.mxu1  ;;  %v5271_v31 = vpop.f32.mrf.mxu2 }
 0x5e4   :  { %v5172_v20 = vadd.f32 %v5031_v7, %v17905_v46  ;;  %v5413_v38 = vadd.f32 %v5271_v31, %v5171_v18  ;;  %v5750_v60 = vpop.f32.mrf.mxu0  ;;  %v17909_v7 = vld [vmem:[#allocation127_spill] sm:$0xff] }
 0x5e5   :  { %v14445_v1 = vadd.f32 %v5750_v60, %v5653_v45 }
 0x5e6   :  { %v5513_v27 = vpop.f32.mrf.mxu3 }
 0x5e7   :  { %v5655_v55 = vadd.f32 %v5513_v27, %v5413_v38  ;;  %8343 = vmatmul.msk.bf16.gmra.mxu0 %vm3542_vm3, %v17904_v62  ;;  %v17908_v62 = vld [vmem:[#allocation147_spill] sm:$0xff] }
 0x5eb   :  { %v5034_v44 = vpop.f32.mrf.mxu1  ;;  %v5273_v19 = vpop.f32.mrf.mxu2 }
 0x5ec   :  { %v5173_v56 = vadd.f32 %v5034_v44, %v13950_v40  ;;  %v5414_v30 = vadd.f32 %v5273_v19, %v5172_v20  ;;  %v5752_v6 = vpop.f32.mrf.mxu0  ;;  %v17910_v20 = vld [vmem:[#allocation158_spill] sm:$0xff] }
 0x5ed   :  { %v14450_v49 = vadd.f32 %v5752_v6, %v5654_v25 }
 0x5ee   :  { %v5515_v29 = vpop.f32.mrf.mxu3  ;;  %8233 = vmatmul.msk.bf16.gmra.mxu1 %vm3542_vm3, %v17906_v21 }
 0x5ef   :  { %v5656_v33 = vadd.f32 %v5515_v29, %v5414_v30 }
 0x5f0   :  { %8271 = vmatmul.msk.bf16.gmra.mxu2 %vm3542_vm3, %v13459_v15 }
 0x5f3   :  { %8307 = vmatmul.msk.bf16.gmra.mxu3 %vm3542_vm3, %v13561_v4  ;;  %v5036_v23 = vpop.f32.mrf.mxu1  ;;  %v5276_v43 = vpop.f32.mrf.mxu2 }
 0x5f4   :  { %v5174_v42 = vadd.f32 %v5036_v23, %v17907_v17  ;;  %v5415_v40 = vadd.f32 %v5276_v43, %v5173_v56  ;;  %v5755_v35 = vpop.f32.mrf.mxu0 }
 0x5f5   :  { %v14459_v45 = vadd.f32 %v5755_v35, %v5655_v55 }
 0x5f6   :  { %v5518_v9 = vpop.f32.mrf.mxu3 }
 0x5f7   :  { %v5657_v34 = vadd.f32 %v5518_v9, %v5415_v40  ;;  %8344 = vmatmul.msk.bf16.gmra.mxu0 %vm3542_vm3, %v17906_v21 }
 0x5fb   :  { %v5039_v53 = vpop.f32.mrf.mxu1  ;;  %v5278_v18 = vpop.f32.mrf.mxu2 }
 0x5fc   :  { %v5175_v15 = vadd.f32 %v5039_v53, %v13968_v36  ;;  %v5416_v50 = vadd.f32 %v5278_v18, %v5174_v42  ;;  %v5757_v11 = vpop.f32.mrf.mxu0  ;;  %v17912_v42 = vld [vmem:[#allocation139_spill] sm:$0xff] }
 0x5fd   :  { %v14464_v5 = vadd.f32 %v5757_v11, %v5656_v33  ;;  %v17911_v33 = vld [vmem:[#allocation156_spill] sm:$0xff] }
 0x5fe   :  { %v5520_v4 = vpop.f32.mrf.mxu3  ;;  %8234 = vmatmul.msk.bf16.gmra.mxu1 %vm3542_vm3, %v17908_v62 }
 0x5ff   :  { %v5658_v25 = vadd.f32 %v5520_v4, %v5416_v50 }
 0x600   :  { %8272 = vmatmul.msk.bf16.gmra.mxu2 %vm3542_vm3, %v17909_v7 }
 0x603   :  { %8308 = vmatmul.msk.bf16.gmra.mxu3 %vm3542_vm3, %v17759_v37  ;;  %v5041_v31 = vpop.f32.mrf.mxu1  ;;  %v5281_v46 = vpop.f32.mrf.mxu2 }
 0x604   :  { %v5176_v38 = vadd.f32 %v5041_v31, %v17910_v20  ;;  %v5417_v36 = vadd.f32 %v5281_v46, %v5175_v15  ;;  %v5760_v60 = vpop.f32.mrf.mxu0  ;;  %v17914_v46 = vld [vmem:[#allocation148_spill] sm:$0xff] }
 0x605   :  { %v14473_v55 = vadd.f32 %v5760_v60, %v5657_v34 }
 0x606   :  { %v5523_v27 = vpop.f32.mrf.mxu3 }
 0x607   :  { %v5659_v44 = vadd.f32 %v5523_v27, %v5417_v36  ;;  %8345 = vmatmul.msk.bf16.gmra.mxu0 %vm3542_vm3, %v17908_v62  ;;  %v17913_v62 = vld [vmem:[#allocation61_spill] sm:$0xff] }
 0x60b   :  { %v5044_v19 = vpop.f32.mrf.mxu1  ;;  %v5283_v56 = vpop.f32.mrf.mxu2 }
 0x60c   :  { %v5177_v30 = vadd.f32 %v5044_v19, %v13986_v52  ;;  %v5418_v6 = vadd.f32 %v5283_v56, %v5176_v38  ;;  %v5762_v29 = vpop.f32.mrf.mxu0 }
 0x60d   :  { %v14478_v21 = vadd.f32 %v5762_v29, %v5658_v25  ;;  %v17915_v29 = vld [vmem:[#allocation26_spill] sm:$0xff] }
 0x60e   :  { %v5525_v37 = vpop.f32.mrf.mxu3  ;;  %8235 = vmatmul.msk.bf16.gmra.mxu1 %vm3542_vm3, %v17911_v33 }
 0x60f   :  { %v5660_v23 = vadd.f32 %v5525_v37, %v5418_v6 }
 0x610   :  { %8273 = vmatmul.msk.bf16.gmra.mxu2 %vm3542_vm3, %v17756_v57 }
 0x613   :  { %8309 = vmatmul.msk.bf16.gmra.mxu3 %vm3542_vm3, %v17763_v8  ;;  %v5046_v43 = vpop.f32.mrf.mxu1  ;;  %v5286_v17 = vpop.f32.mrf.mxu2 }
 0x614   :  { %v5178_v40 = vadd.f32 %v5046_v43, %v17912_v42  ;;  %v5419_v52 = vadd.f32 %v5286_v17, %v5177_v30  ;;  %v5765_v35 = vpop.f32.mrf.mxu0  ;;  %v17917_v17 = vld [vmem:[#allocation63_spill] sm:$0xff] }
 0x615   :  { %v14487_v34 = vadd.f32 %v5765_v35, %v5659_v44 }
 0x616   :  { %v5528_v9 = vpop.f32.mrf.mxu3 }
 0x617   :  { %v5661_v53 = vadd.f32 %v5528_v9, %v5419_v52  ;;  %8346 = vmatmul.msk.bf16.gmra.mxu0 %vm3542_vm3, %v17911_v33  ;;  %v17916_v33 = vld [vmem:[#allocation38_spill] sm:$0xff] }
 0x61b   :  { %v5049_v18 = vpop.f32.mrf.mxu1  ;;  %v5288_v15 = vpop.f32.mrf.mxu2 }
 0x61c   :  { %v5179_v57 = vadd.f32 %v5049_v18, %v14004_v12  ;;  %v5420_v50 = vadd.f32 %v5288_v15, %v5178_v40  ;;  %v5767_v11 = vpop.f32.mrf.mxu0  ;;  %v17918_v15 = vld [vmem:[#allocation24_spill] sm:$0xff] }
 0x61d   :  { %v14492_v4 = vadd.f32 %v5767_v11, %v5660_v23 }
 0x61e   :  { %v5530_v8 = vpop.f32.mrf.mxu3  ;;  %8236 = vmatmul.msk.bf16.gmra.mxu1 %vm3542_vm3, %v17913_v62 }
 0x61f   :  { %v5662_v25 = vadd.f32 %v5530_v8, %v5420_v50 }
 0x620   :  { %8274 = vmatmul.msk.bf16.gmra.mxu2 %vm3542_vm3, %v17760_v24 }
 0x623   :  { %8310 = vmatmul.msk.bf16.gmra.mxu3 %vm3542_vm3, %v17766_v51  ;;  %v5051_v7 = vpop.f32.mrf.mxu1  ;;  %v5291_v31 = vpop.f32.mrf.mxu2 }
 0x624   :  { %v5180_v20 = vadd.f32 %v5051_v7, %v17914_v46  ;;  %v5421_v12 = vadd.f32 %v5291_v31, %v5179_v57  ;;  %v5770_v38 = vpop.f32.mrf.mxu0  ;;  %v17920_v7 = vld [vmem:[#allocation56_spill] sm:$0xff]  ;;  %v17921_v31 = vld [vmem:[#allocation33_spill] sm:$0xff] }
 0x625   :  { %v14501_v60 = vadd.f32 %v5770_v38, %v5661_v53 }
 0x626   :  { %v5533_v36 = vpop.f32.mrf.mxu3 }
 0x627   :  { %v5663_v27 = vadd.f32 %v5533_v36, %v5421_v12  ;;  %8347 = vmatmul.msk.bf16.gmra.mxu0 %vm3542_vm3, %v17913_v62  ;;  %v17919_v62 = vld [vmem:[#allocation104_spill] sm:$0xff]  ;;  %v17922_v12 = vld [vmem:[#allocation151_spill] sm:$0xff] }
 0x62b   :  { %v5054_v44 = vpop.f32.mrf.mxu1  ;;  %v5293_v19 = vpop.f32.mrf.mxu2 }
 0x62c   :  { %v5181_v24 = vadd.f32 %v5054_v44, %v14022_v2  ;;  %v5422_v56 = vadd.f32 %v5293_v19, %v5180_v20  ;;  %v5772_v30 = vpop.f32.mrf.mxu0 }
 0x62d   :  { %v14506_v6 = vadd.f32 %v5772_v30, %v5662_v25 }
 0x62e   :  { %v5535_v51 = vpop.f32.mrf.mxu3  ;;  %8237 = vmatmul.msk.bf16.gmra.mxu1 %vm3542_vm3, %v17915_v29 }
 0x62f   :  { %v5664_v37 = vadd.f32 %v5535_v51, %v5422_v56  ;;  %v17923_v51 = vld [vmem:[#allocation89_spill] sm:$0xff] }
 0x630   :  { %8275 = vmatmul.msk.bf16.gmra.mxu2 %vm3542_vm3, %v17604_v39 }
 0x633   :  { %8311 = vmatmul.msk.bf16.gmra.mxu3 %vm3542_vm3, %v17916_v33  ;;  %v5056_v23 = vpop.f32.mrf.mxu1  ;;  %v5296_v43 = vpop.f32.mrf.mxu2 }
 0x634   :  { %v5182_v42 = vadd.f32 %v5056_v23, %v17917_v17  ;;  %v5423_v2 = vadd.f32 %v5296_v43, %v5181_v24  ;;  %v5775_v40 = vpop.f32.mrf.mxu0  ;;  %v17925_v17 = vld [vmem:[#allocation41_spill] sm:$0xff] }
 0x635   :  { %v14515_v35 = vadd.f32 %v5775_v40, %v5663_v27  ;;  %v17927_v40 = vld [vmem:[#allocation85_spill] sm:$0xff] }
 0x636   :  { %v5538_v52 = vpop.f32.mrf.mxu3 }
 0x637   :  { %v5665_v9 = vadd.f32 %v5538_v52, %v5423_v2  ;;  %8348 = vmatmul.msk.bf16.gmra.mxu0 %vm3542_vm3, %v17915_v29  ;;  %v17926_v2 = vld [vmem:[#allocation107_spill] sm:$0xff] }
 0x63b   :  { %v5059_v53 = vpop.f32.mrf.mxu1  ;;  %v5298_v18 = vpop.f32.mrf.mxu2 }
 0x63c   :  { %v5183_v39 = vadd.f32 %v5059_v53, %v17918_v15  ;;  %v5424_v57 = vadd.f32 %v5298_v18, %v5182_v42  ;;  %v5777_v50 = vpop.f32.mrf.mxu0  ;;  %v17928_v53 = vld [vmem:[#allocation166_spill] sm:$0xff] }
 0x63d   :  { %v14520_v8 = vadd.f32 %v5777_v50, %v5664_v37 }
 0x63e   :  { %v5540_v11 = vpop.f32.mrf.mxu3  ;;  %8238 = vmatmul.msk.bf16.gmra.mxu1 %vm3542_vm3, %v17919_v62 }
 0x63f   :  { %v5666_v25 = vadd.f32 %v5540_v11, %v5424_v57 }
 0x640   :  { %8276 = vmatmul.msk.bf16.gmra.mxu2 %vm3542_vm3, %v17920_v7  ;;  %v17930_v7 = vld [vmem:[#allocation133_spill] sm:$0xff] }
 0x643   :  { %8312 = vmatmul.msk.bf16.gmra.mxu3 %vm3542_vm3, %v17921_v31  ;;  %v5061_v46 = vpop.f32.mrf.mxu1  ;;  %v5301_v20 = vpop.f32.mrf.mxu2 }
 0x644   :  { %v5184_v38 = vadd.f32 %v5061_v46, %v17922_v12  ;;  %v5425_v36 = vadd.f32 %v5301_v20, %v5183_v39  ;;  %v5780_v27 = vpop.f32.mrf.mxu0 }
 0x645   :  { %v14529_v19 = vadd.f32 %v5780_v27, %v5665_v9 }
 0x646   :  { %v5543_v44 = vpop.f32.mrf.mxu3 }
 0x647   :  { %v5667_v24 = vadd.f32 %v5543_v44, %v5425_v36  ;;  %8349 = vmatmul.msk.bf16.gmra.mxu0 %vm3542_vm3, %v17919_v62  ;;  %v17932_v36 = vld [vmem:[#allocation152_spill] sm:$0xff] }
 0x648   :  { %v17933_v44 = vld [vmem:[#allocation20_spill] sm:$0xff] }
 0x64b   :  { %v5064_v56 = vpop.f32.mrf.mxu1  ;;  %v5303_v30 = vpop.f32.mrf.mxu2 }
 0x64c   :  { %v5185_v29 = vadd.f32 %v5064_v56, %v17923_v51  ;;  %v5426_v37 = vadd.f32 %v5303_v30, %v5184_v38  ;;  %v5782_v33 = vpop.f32.mrf.mxu0  ;;  %v17935_v51 = vld [vmem:[#allocation42_spill] sm:$0xff] }
 0x64d   :  { %v14534_v43 = vadd.f32 %v5782_v33, %v5666_v25 }
 0x64e   :  { %v5545_v23 = vpop.f32.mrf.mxu3  ;;  %8239 = vmatmul.msk.bf16.gmra.mxu1 %vm3542_vm3, %v17925_v17 }
 0x64f   :  { %17924 = vst [vmem:[#allocation161_spill] sm:$0xff] %v14534_v43  ;;  %v5668_v42 = vadd.f32 %v5545_v23, %v5426_v37 }
 0x650   :  { %8277 = vmatmul.msk.bf16.gmra.mxu2 %vm3542_vm3, %v17926_v2 }
 0x653   :  { %8313 = vmatmul.msk.bf16.gmra.mxu3 %vm3542_vm3, %v17927_v40  ;;  %v5066_v52 = vpop.f32.mrf.mxu1  ;;  %v5306_v9 = vpop.f32.mrf.mxu2 }
 0x654   :  { %v5186_v18 = vadd.f32 %v5066_v52, %v17928_v53  ;;  %v5427_v15 = vadd.f32 %v5306_v9, %v5185_v29  ;;  %v5785_v39 = vpop.f32.mrf.mxu0  ;;  %v17937_v52 = vld [vmem:[#allocation29_spill] sm:$0xff] }
 0x655   :  { %v14543_v50 = vadd.f32 %v5785_v39, %v5667_v24  ;;  %v17934_v24 = vld [vmem:[#allocation117_spill] sm:$0xff] }
 0x656   :  { %v5548_v57 = vpop.f32.mrf.mxu3 }
 0x657   :  { %17929 = vst [vmem:[#allocation164_spill] sm:$0xff] %v14543_v50  ;;  %v5669_v11 = vadd.f32 %v5548_v57, %v5427_v15  ;;  %8350 = vmatmul.msk.bf16.gmra.mxu0 %vm3542_vm3, %v17925_v17  ;;  %v17939_v57 = vld [vmem:[#allocation71_spill] sm:$0xff] }
 0x65b   :  { %v5069_v62 = vpop.f32.mrf.mxu1  ;;  %v5308_v25 = vpop.f32.mrf.mxu2 }
 0x65c   :  { %v5187_v31 = vadd.f32 %v5069_v62, %v17930_v7  ;;  %v5428_v46 = vadd.f32 %v5308_v25, %v5186_v18  ;;  %v5787_v20 = vpop.f32.mrf.mxu0  ;;  %v17940_v25 = vld [vmem:[#allocation126_spill] sm:$0xff] }
 0x65d   :  { %v14548_v38 = vadd.f32 %v5787_v20, %v5668_v42 }
 0x65e   :  { %v5550_v12 = vpop.f32.mrf.mxu3  ;;  %8240 = vmatmul.msk.bf16.gmra.mxu1 %vm3542_vm3, %v17932_v36 }
 0x65f   :  { %17931 = vst [vmem:[#allocation140_spill] sm:$0xff] %v14548_v38  ;;  %v5670_v27 = vadd.f32 %v5550_v12, %v5428_v46  ;;  %v17942_v46 = vld [vmem:[#allocation44_spill] sm:$0xff] }
 0x660   :  { %8278 = vmatmul.msk.bf16.gmra.mxu2 %vm3542_vm3, %v17933_v44 }
 0x663   :  { %8314 = vmatmul.msk.bf16.gmra.mxu3 %vm3542_vm3, %v17934_v24  ;;  %v5071_v56 = vpop.f32.mrf.mxu1  ;;  %v5311_v30 = vpop.f32.mrf.mxu2 }
 0x664   :  { %v5188_v29 = vadd.f32 %v5071_v56, %v17935_v51  ;;  %v5429_v37 = vadd.f32 %v5311_v30, %v5187_v31  ;;  %v5790_v33 = vpop.f32.mrf.mxu0  ;;  %v17944_v51 = vld [vmem:[#allocation43_spill] sm:$0xff] }
 0x665   :  { %v14557_v17 = vadd.f32 %v5790_v33, %v5669_v11  ;;  %v17941_v11 = vld [vmem:[#allocation83_spill] sm:$0xff] }
 0x666   :  { %v5553_v23 = vpop.f32.mrf.mxu3 }
 0x667   :  { %17936 = vst [vmem:[#allocation163_spill] sm:$0xff] %v14557_v17  ;;  %v5671_v42 = vadd.f32 %v5553_v23, %v5429_v37  ;;  %8351 = vmatmul.msk.bf16.gmra.mxu0 %vm3542_vm3, %v17932_v36 }
 0x66b   :  { %v5074_v2 = vpop.f32.mrf.mxu1  ;;  %v5313_v40 = vpop.f32.mrf.mxu2 }
 0x66c   :  { %v5189_v9 = vadd.f32 %v5074_v2, %v17937_v52  ;;  %v5430_v53 = vadd.f32 %v5313_v40, %v5188_v29  ;;  %v5792_v18 = vpop.f32.mrf.mxu0  ;;  %v17946_v40 = vld [vmem:[#allocation167_spill] sm:$0xff] }
 0x66d   :  { %v14562_v39 = vadd.f32 %v5792_v18, %v5670_v27 }
 0x66e   :  { %v5555_v15 = vpop.f32.mrf.mxu3  ;;  %8241 = vmatmul.msk.bf16.gmra.mxu1 %vm3542_vm3, %v17939_v57 }
 0x66f   :  { %17938 = vst [vmem:[#allocation128_spill] sm:$0xff] %v14562_v39  ;;  %v5672_v62 = vadd.f32 %v5555_v15, %v5430_v53  ;;  %v17949_v15 = vld [vmem:[#allocation18_spill] sm:$0xff]  ;;  %v17989_v39 = vld [vmem:[#allocation76_spill] sm:$0xff] }
 0x670   :  { %8279 = vmatmul.msk.bf16.gmra.mxu2 %vm3542_vm3, %v17940_v25 }
 0x673   :  { %8315 = vmatmul.msk.bf16.gmra.mxu3 %vm3542_vm3, %v17941_v11  ;;  %v5076_v7 = vpop.f32.mrf.mxu1  ;;  %v5316_v31 = vpop.f32.mrf.mxu2 }
 0x674   :  { %v5190_v20 = vadd.f32 %v5076_v7, %v17942_v46  ;;  %v5431_v12 = vadd.f32 %v5316_v31, %v5189_v9  ;;  %v5795_v36 = vpop.f32.mrf.mxu0  ;;  %v17947_v9 = vld [vmem:[#allocation15_spill] sm:$0xff] }
 0x675   :  { %v14571_v24 = vadd.f32 %v5795_v36, %v5671_v42  ;;  %v17948_v42 = vld [vmem:[#allocation57_spill] sm:$0xff] }
 0x676   :  { %v5558_v44 = vpop.f32.mrf.mxu3 }
 0x677   :  { %17943 = vst [vmem:[#allocation129_spill] sm:$0xff] %v14571_v24  ;;  %v5673_v27 = vadd.f32 %v5558_v44, %v5431_v12  ;;  %8352 = vmatmul.msk.bf16.gmra.mxu0 %vm3542_vm3, %v17939_v57  ;;  %v17951_v12 = vld [vmem:[#allocation97_spill] sm:$0xff] }
 0x67b   :  { %v5079_v56 = vpop.f32.mrf.mxu1  ;;  %v5318_v30 = vpop.f32.mrf.mxu2 }
 0x67c   :  { %v5191_v29 = vadd.f32 %v5079_v56, %v17944_v51  ;;  %v5432_v37 = vadd.f32 %v5318_v30, %v5190_v20  ;;  %v5797_v33 = vpop.f32.mrf.mxu0 }
 0x67d   :  { %v14576_v2 = vadd.f32 %v5797_v33, %v5672_v62  ;;  %v17954_v33 = vld [vmem:[#allocation131_spill] sm:$0xff] }
 0x67e   :  { %v5560_v23 = vpop.f32.mrf.mxu3  ;;  %8242 = vmatmul.msk.bf16.gmra.mxu1 %vm3542_vm3, %v17946_v40 }
 0x67f   :  { %17945 = vst [vmem:[#allocation111_spill] sm:$0xff] %v14576_v2  ;;  %v5674_v52 = vadd.f32 %v5560_v23, %v5432_v37  ;;  %v17953_v37 = vld [vmem:[#allocation106_spill] sm:$0xff] }
 0x680   :  { %8280 = vmatmul.msk.bf16.gmra.mxu2 %vm3542_vm3, %v17947_v9  ;;  %v17956_v9 = vld [vmem:[#allocation45_spill] sm:$0xff] }
 0x683   :  { %8316 = vmatmul.msk.bf16.gmra.mxu3 %vm3542_vm3, %v17948_v42  ;;  %v5081_v53 = vpop.f32.mrf.mxu1  ;;  %v5321_v18 = vpop.f32.mrf.mxu2 }
 0x684   :  { %v5192_v57 = vadd.f32 %v5081_v53, %v17949_v15  ;;  %v5433_v25 = vadd.f32 %v5321_v18, %v5191_v29  ;;  %v5800_v11 = vpop.f32.mrf.mxu0 }
 0x685   :  { %v14585_v31 = vadd.f32 %v5800_v11, %v5673_v27  ;;  %v17955_v27 = vld [vmem:[#allocation169_spill] sm:$0xff] }
 0x686   :  { %v5563_v7 = vpop.f32.mrf.mxu3 }
 0x687   :  { %17950 = vst [vmem:[#allocation30_spill] sm:$0xff] %v14585_v31  ;;  %v5675_v62 = vadd.f32 %v5563_v7, %v5433_v25  ;;  %8353 = vmatmul.msk.bf16.gmra.mxu0 %vm3542_vm3, %v17946_v40  ;;  %v17958_v7 = vld [vmem:[#allocation109_spill] sm:$0xff] }
 0x68b   :  { %v5084_v46 = vpop.f32.mrf.mxu1  ;;  %v5323_v20 = vpop.f32.mrf.mxu2 }
 0x68c   :  { %v5193_v36 = vadd.f32 %v5084_v46, %v17951_v12  ;;  %v5434_v44 = vadd.f32 %v5323_v20, %v5192_v57  ;;  %v5802_v56 = vpop.f32.mrf.mxu0 }
 0x68d   :  { %v14590_v51 = vadd.f32 %v5802_v56, %v5674_v52 }
 0x68e   :  { %v5565_v30 = vpop.f32.mrf.mxu3  ;;  %8243 = vmatmul.msk.bf16.gmra.mxu1 %vm3542_vm3, %v17953_v37 }
 0x68f   :  { %17952 = vst [vmem:[#allocation12_spill] sm:$0xff] %v14590_v51  ;;  %v5676_v29 = vadd.f32 %v5565_v30, %v5434_v44  ;;  %v17960_v30 = vld [vmem:[#allocation19_spill] sm:$0xff] }
 0x690   :  { %8281 = vmatmul.msk.bf16.gmra.mxu2 %vm3542_vm3, %v17954_v33  ;;  %v17961_v33 = vld [vmem:[#allocation165_spill] sm:$0xff] }
 0x693   :  { %8317 = vmatmul.msk.bf16.gmra.mxu3 %vm3542_vm3, %v17955_v27  ;;  %v5086_v23 = vpop.f32.mrf.mxu1  ;;  %v5326_v40 = vpop.f32.mrf.mxu2  ;;  %v17962_v27 = vld [vmem:[#allocation99_spill] sm:$0xff] }
 0x694   :  { %v5194_v42 = vadd.f32 %v5086_v23, %v17956_v9  ;;  %v5435_v53 = vadd.f32 %v5326_v40, %v5193_v36  ;;  %v5805_v18 = vpop.f32.mrf.mxu0 }
 0x695   :  { %v14599_v57 = vadd.f32 %v5805_v18, %v5675_v62 }
 0x696   :  { %v5568_v15 = vpop.f32.mrf.mxu3 }
 0x697   :  { %17957 = vst [vmem:[#allocation91_spill] sm:$0xff] %v14599_v57  ;;  %v5677_v52 = vadd.f32 %v5568_v15, %v5435_v53  ;;  %8354 = vmatmul.msk.bf16.gmra.mxu0 %vm3542_vm3, %v17953_v37 }
 0x69b   :  { %v5089_v25 = vpop.f32.mrf.mxu1  ;;  %v5328_v11 = vpop.f32.mrf.mxu2 }
 0x69c   :  { %v5195_v46 = vadd.f32 %v5089_v25, %v17958_v7  ;;  %v5436_v20 = vadd.f32 %v5328_v11, %v5194_v42  ;;  %v5807_v12 = vpop.f32.mrf.mxu0  ;;  %v17964_v25 = vld [vmem:[#allocation114_spill] sm:$0xff] }
 0x69d   :  { %v14604_v56 = vadd.f32 %v5807_v12, %v5676_v29 }
 0x69e   :  { %v5570_v44 = vpop.f32.mrf.mxu3  ;;  %8244 = vmatmul.msk.bf16.gmra.mxu1 %vm3542_vm3, %v17960_v30 }
 0x69f   :  { %17959 = vst [vmem:[#allocation65_spill] sm:$0xff] %v14604_v56  ;;  %v5678_v36 = vadd.f32 %v5570_v44, %v5436_v20  ;;  %v17966_v44 = vld [vmem:[#allocation134_spill] sm:$0xff]  ;;  %v17982_v56 = vld [vmem:[#allocation105_spill] sm:$0xff] }
 0x6a0   :  { %8282 = vmatmul.msk.bf16.gmra.mxu2 %vm3542_vm3, %v17961_v33  ;;  %v17967_v33 = vld [vmem:[#allocation6_spill] sm:$0xff] }
 0x6a3   :  { %8318 = vmatmul.msk.bf16.gmra.mxu3 %vm3542_vm3, %v17817_v16  ;;  %v5091_v62 = vpop.f32.mrf.mxu1  ;;  %v5331_v37 = vpop.f32.mrf.mxu2 }
 0x6a4   :  { %v5196_v23 = vadd.f32 %v5091_v62, %v17962_v27  ;;  %v5437_v40 = vadd.f32 %v5331_v37, %v5195_v46  ;;  %v5810_v9 = vpop.f32.mrf.mxu0  ;;  %v17969_v37 = vld [vmem:[#allocation68_spill] sm:$0xff] }
 0x6a5   :  { %v14613_v53 = vadd.f32 %v5810_v9, %v5677_v52  ;;  %v17968_v52 = vld [vmem:[#allocation81_spill] sm:$0xff] }
 0x6a6   :  { %v5573_v42 = vpop.f32.mrf.mxu3 }
 0x6a7   :  { %17963 = vst [vmem:[#allocation13_spill] sm:$0xff] %v14613_v53  ;;  %v5679_v29 = vadd.f32 %v5573_v42, %v5437_v40  ;;  %8355 = vmatmul.msk.bf16.gmra.mxu0 %vm3542_vm3, %v17960_v30 }
 0x6ab   :  { %v5094_v18 = vpop.f32.mrf.mxu1  ;;  %v5333_v15 = vpop.f32.mrf.mxu2 }
 0x6ac   :  { %v5197_v11 = vadd.f32 %v5094_v18, %v17964_v25  ;;  %v5438_v7 = vadd.f32 %v5333_v15, %v5196_v23  ;;  %v5812_v20 = vpop.f32.mrf.mxu0  ;;  %v14631_v25 = vpop.permute.xlu1 %6083 }
 0x6ad   :  { %v14618_v12 = vadd.f32 %v5812_v20, %v5678_v36 }
 0x6ae   :  { %v5575_v16 = vpop.f32.mrf.mxu3  ;;  %8245 = vmatmul.msk.bf16.gmra.mxu1 %vm3542_vm3, %v17966_v44 }
 0x6af   :  { %17965 = vst [vmem:[#allocation74_spill] sm:$0xff] %v14618_v12  ;;  %v5680_v46 = vadd.f32 %v5575_v16, %v5438_v7  ;;  %v17971_v7 = vld [vmem:[#allocation40_spill] sm:$0xff] }
 0x6b0   :  { %8283 = vmatmul.msk.bf16.gmra.mxu2 %vm3542_vm3, %v17967_v33 }
 0x6b3   :  { %8319 = vmatmul.msk.bf16.gmra.mxu3 %vm3542_vm3, %v17968_v52  ;;  %v5096_v30 = vpop.f32.mrf.mxu1  ;;  %v5336_v62 = vpop.f32.mrf.mxu2 }
 0x6b4   :  { %v5198_v27 = vadd.f32 %v5096_v30, %v17969_v37  ;;  %v5439_v40 = vadd.f32 %v5336_v62, %v5197_v11  ;;  %v5815_v23 = vpop.f32.mrf.mxu0  ;;  %v14634_v52 = vpop.permute.xlu2 %6088  ;;  %v17973_v62 = vld [vmem:[#allocation37_spill] sm:$0xff] }
 0x6b5   :  { %v14627_v42 = vadd.f32 %v5815_v23, %v5679_v29  ;;  %v14640_v37 = vpop.permute.xlu0 %6093 }
 0x6b6   :  { %v5578_v9 = vpop.f32.mrf.mxu3 }
 0x6b7   :  { %17970 = vst [vmem:[#allocation53_spill] sm:$0xff] %v14627_v42  ;;  %v5681_v36 = vadd.f32 %v5578_v9, %v5439_v40  ;;  %8356 = vmatmul.msk.bf16.gmra.mxu0 %vm3542_vm3, %v17966_v44  ;;  %v17974_v44 = vld [vmem:[#allocation22_spill] sm:$0xff] }
 0x6bb   :  { %v5099_v18 = vpop.f32.mrf.mxu1  ;;  %v5338_v15 = vpop.f32.mrf.mxu2 }
 0x6bc   :  { %v5199_v20 = vadd.f32 %v5099_v18, %v17971_v7  ;;  %v5440_v16 = vadd.f32 %v5338_v15, %v5198_v27  ;;  %v5817_v33 = vpop.f32.mrf.mxu0  ;;  %v14646_v18 = vpop.permute.xlu1 %6098 }
 0x6bd   :  { %v14636_v11 = vadd.f32 %v5817_v33, %v5680_v46  ;;  %v14650_v33 = vpop.permute.xlu2 %6103 }
 0x6be   :  { %v5580_v30 = vpop.f32.mrf.mxu3  ;;  %8246 = vmatmul.msk.bf16.gmra.mxu1 %vm3542_vm3, %v17973_v62 }
 0x6bf   :  { %17972 = vst [vmem:[#allocation10_spill] sm:$0xff] %v14636_v11  ;;  %v5682_v29 = vadd.f32 %v5580_v30, %v5440_v16  ;;  %v14654_v16 = vpop.permute.xlu0 %6108 }
 0x6c0   :  { %8284 = vmatmul.msk.bf16.gmra.mxu2 %vm3542_vm3, %v17974_v44 }
 0x6c3   :  { %8320 = vmatmul.msk.bf16.gmra.mxu3 %vm3542_vm3, %v17830_v26  ;;  %v5101_v40 = vpop.f32.mrf.mxu1  ;;  %v5341_v27 = vpop.f32.mrf.mxu2 }
 0x6c4   :  { %v5441_v23 = vadd.f32 %v5341_v27, %v5199_v20  ;;  %v5820_v9 = vpop.f32.mrf.mxu0 }
 0x6c5   :  { %v14648_v15 = vadd.f32 %v5820_v9, %v5681_v36  ;;  %v14661_v36 = vpop.permute.xlu1 %6113  ;;  %v14665_v9 = vpop.permute.xlu2 %6118 }
 0x6c6   :  { %v5583_v46 = vpop.f32.mrf.mxu3 }
 0x6c7   :  { %17975 = vst [vmem:[#allocation168_spill] sm:$0xff] %v14648_v15  ;;  %v5683_v7 = vadd.f32 %v5583_v46, %v5441_v23  ;;  %8357 = vmatmul.msk.bf16.gmra.mxu0 %vm3542_vm3, %v17973_v62  ;;  %v17978_v23 = vld [vmem:[#allocation50_spill] sm:$0xff]  ;;  %v17979_v62 = vld [vmem:[#allocation136_spill] sm:$0xff] }
 0x6cb   :  { %v5104_v30 = vpop.f32.mrf.mxu1  ;;  %v5343_v44 = vpop.f32.mrf.mxu2 }
 0x6cc   :  { %v5201_v26 = vadd.f32 %v5104_v30, %v14214_v28  ;;  %v5822_v10 = vpop.f32.mrf.mxu0  ;;  %v14669_v28 = vpop.permute.xlu0 %6123 }
 0x6cd   :  { %v14657_v27 = vadd.f32 %v5822_v10, %v5682_v29  ;;  %v17980_v29 = vld [vmem:[#allocation47_spill] sm:$0xff]  ;;  %v14678_v12 = vpop.permute.xlu2 %6133 }
 0x6ce   :  { %v5585_v20 = vpop.f32.mrf.mxu3  ;;  %8247 = vmatmul.msk.bf16.gmra.mxu1 %vm3542_vm3, %v17977_v14  ;;  %v5200_v54 = vadd.f32 %v5101_v40, %v17980_v29 }
 0x6cf   :  { %17976 = vst [vmem:[#allocation25_spill] sm:$0xff] %v14657_v27 }
 0x6d0   :  { %8285 = vmatmul.msk.bf16.gmra.mxu2 %vm3542_vm3, %v17978_v23  ;;  %v5442_v11 = vadd.f32 %v5343_v44, %v5200_v54  ;;  %v14676_v23 = vpop.permute.xlu1 %6128  ;;  %v17985_v54 = vmov 0.0|0.0  }
 0x6d2   :  { %v5684_v53 = vadd.f32 %v5585_v20, %v5442_v11  ;;  %v17987_v20 = vld [vmem:[#allocation11_spill] sm:$0xff] }
 0x6d3   :  { %8321 = vmatmul.msk.bf16.gmra.mxu3 %vm3542_vm3, %v17979_v62  ;;  %v5106_v46 = vpop.f32.mrf.mxu1  ;;  %v5346_v61 = vpop.f32.mrf.mxu2 }
 0x6d4   :  { %v5443_v30 = vadd.f32 %v5346_v61, %v5201_v26  ;;  %v5825_v10 = vpop.f32.mrf.mxu0  ;;  %v14681_v57 = vpop.permute.xlu0 %6138  ;;  %v5202_v29 = vadd.f32 %v5106_v46, %v17987_v20 }
 0x6d5   :  { %v14672_v27 = vadd.f32 %v5825_v10, %v5683_v7 }
 0x6d6   :  { %v5588_v48 = vpop.f32.mrf.mxu3 }
 0x6d7   :  { %17981 = vst [vmem:[#allocation138_spill] sm:$0xff] %v14672_v27  ;;  %v5685_v15 = vadd.f32 %v5588_v48, %v5443_v30  ;;  %8358 = vmatmul.msk.bf16.gmra.mxu0 %vm3542_vm3, %v17977_v14  ;;  %v17984_v48 = vld [vmem:[#allocation39_spill] sm:$0xff]  ;;  %v17986_v14 = vld [vmem:[#allocation84_spill] sm:$0xff] }
 0x6d8   :  { %v14690_v10 = vpop.permute.xlu1 %6143 }
 0x6db   :  { %v5109_v42 = vpop.f32.mrf.mxu1  ;;  %v5348_v62 = vpop.f32.mrf.mxu2 }
 0x6dc   :  { %v5203_v61 = vadd.f32 %v5109_v42, %v17982_v56  ;;  %v5827_v26 = vpop.f32.mrf.mxu0  ;;  %v14692_v42 = vpop.permute.xlu2 %6148  ;;  %v5444_v51 = vadd.f32 %v5348_v62, %v5202_v29 }
 0x6dd   :  { %v14683_v7 = vadd.f32 %v5827_v26, %v5684_v53  ;;  %v14697_v27 = vpop.permute.xlu0 %6153 }
 0x6de   :  { %v5590_v40 = vpop.f32.mrf.mxu3  ;;  %8248 = vmatmul.msk.bf16.gmra.mxu1 %vm3542_vm3, %v17984_v48 }
 0x6df   :  { %17983 = vst [vmem:[#allocation73_spill] sm:$0xff] %v14683_v7  ;;  %v5686_v24 = vadd.f32 %v5590_v40, %v5444_v51 }
 0x6e0   :  { %5390 = vmatmul.bf16.gmra.mxu2 %v17985_v54  ;;  %v14702_v17 = vpop.permute.xlu1 %6158 }
 0x6e3   :  { %8322 = vmatmul.msk.bf16.gmra.mxu3 %vm3542_vm3, %v17986_v14  ;;  %v5111_v44 = vpop.f32.mrf.mxu1  ;;  %v5351_v30 = vpop.f32.mrf.mxu2 }
 0x6e4   :  { %v5445_v11 = vadd.f32 %v5351_v30, %v5203_v61  ;;  %v5830_v56 = vpop.f32.mrf.mxu0 }
 0x6e5   :  { %v14695_v26 = vadd.f32 %v5830_v56, %v5685_v15  ;;  %v17991_v15 = vld [vmem:[#allocation8_spill] sm:$0xff]  ;;  %v14711_v62 = vpop.permute.xlu0 %6168 }
 0x6e6   :  { %v5593_v53 = vpop.f32.mrf.mxu3 }
 0x6e7   :  { %17988 = vst [vmem:[#allocation100_spill] sm:$0xff] %v14695_v26  ;;  %v5687_v7 = vadd.f32 %v5593_v53, %v5445_v11  ;;  %8359 = vmatmul.msk.bf16.gmra.mxu0 %vm3542_vm3, %v17984_v48  ;;  %v14708_v11 = vpop.permute.xlu2 %6163  ;;  %v17992_v48 = vld [vmem:[#allocation48_spill] sm:$0xff] }
 0x6e8   :  { %v5204_v56 = vadd.f32 %v5111_v44, %v17992_v48  ;;  %v14718_v53 = vpop.permute.xlu1 %6173 }
 0x6eb   :  { %v5114_v31 = vpop.f32.mrf.mxu1  ;;  %v5353_v2 = vpop.f32.mrf.mxu2 }
 0x6ec   :  { %v5205_v61 = vadd.f32 %v5114_v31, %v17989_v39  ;;  %v5832_v30 = vpop.f32.mrf.mxu0 }
 0x6ed   :  { %v14704_v46 = vadd.f32 %v5832_v30, %v5686_v24  ;;  %v5446_v30 = vadd.f32 %v5353_v2, %v5204_v56  ;;  %v14729_v44 = vpop.permute.xlu0 %6183 }
 0x6ee   :  { %v5595_v38 = vpop.f32.mrf.mxu3  ;;  %8249 = vmatmul.msk.bf16.gmra.mxu1 %vm3542_vm3, %v17991_v15 }
 0x6ef   :  { %17990 = vst [vmem:[#allocation46_spill] sm:$0xff] %v14704_v46 }
 0x6f0   :  { %5395 = vmatmul.bf16.gmra.mxu2 %v17985_v54  ;;  %v14722_v54 = vpop.permute.xlu2 %6178  ;;  %v14746_v26 = vpop.permute.xlu1 %6188 }
 0x6f1   :  { %17999 = vst [vmem:[#allocation132_spill] sm:$0xff] %v14746_v26 }
 0x6f3   :  { %8323 = vmatmul.msk.bf16.gmra.mxu3 %vm3542_vm3, %v17986_v14  ;;  %v5116_v51 = vpop.f32.mrf.mxu1  ;;  %v5356_v39 = vpop.f32.mrf.mxu2  ;;  %v14727_v14 = vld [vmem:[%s16018_s4] ss:$0 sm:$0xff] }
 0x6f4   :  { %v5447_v31 = vadd.f32 %v5356_v39, %v5205_v61  ;;  %v5835_v40 = vpop.f32.mrf.mxu0  ;;  %v14734_v2 = vadd.f32 %v14727_v14, %v14375_v32  ;;  %v14744_v46 = vadd.f32 %v14727_v14, %v14389_v0 }
 0x6f5   :  { %v14716_v20 = vadd.f32 %v5835_v40, %v5687_v7  ;;  %v5688_v7 = vadd.f32 %v5595_v38, %v5446_v30  ;;  %v17994_v40 = vld [vmem:[#allocation9_spill] sm:$0xff]  ;;  %v14754_v30 = vadd.f32 %v14727_v14, %v14394_v22 }
 0x6f6   :  { %v5598_v24 = vpop.f32.mrf.mxu3  ;;  %17995 = vst [vmem:[#allocation153_spill] sm:$0xff] %v14734_v2  ;;  %v6401_v38 = vmul.f32 %v14631_v25, %v14734_v2  ;;  %v6403_v0 = vmul.f32 %v14640_v37, %v14744_v46 }
 0x6f7   :  { %17993 = vst [vmem:[#allocation116_spill] sm:$0xff] %v14716_v20  ;;  %v5689_v29 = vadd.f32 %v5598_v24, %v5447_v31  ;;  %8360 = vmatmul.msk.bf16.gmra.mxu0 %vm3542_vm3, %v17991_v15  ;;  %v14740_v20 = vadd.f32 %v14727_v14, %v14380_v59  ;;  %v6404_v37 = vmul.f32 %v14646_v18, %v14754_v30 }
 0x6f8   :  { %17998 = vst [vmem:[#allocation88_spill] sm:$0xff] %v14744_v46  ;;  %v6599_v22 = vmul.f32 %v6401_v38, %v14734_v2  ;;  %v14789_v18 = vadd.f32 %v14727_v14, %v14417_v58 }
 0x6f9   :  { %17997 = vst [vmem:[#allocation144_spill] sm:$0xff] %v14740_v20  ;;  %v6402_v32 = vmul.f32 %v14634_v52, %v14740_v20  ;;  %v18003_v52 = vld [vmem:[#allocation54_spill] sm:$0xff] }
 0x6fa   :  { %18000 = vst [vmem:[#allocation110_spill] sm:$0xff] %v14754_v30  ;;  %v5206_v50 = vadd.f32 %v5116_v51, %v18003_v52  ;;  %v14801_v52 = vpop.permute.xlu1 %6203 }
 0x6fb   :  { %v5119_v61 = vpop.f32.mrf.mxu1  ;;  %v5358_v39 = vpop.f32.mrf.mxu2  ;;  %v6467_v51 = vsel %vm6465_vm4, %v6402_v32, 0.0  ;;  %18005 = vst [vmem:[#allocation94_spill] sm:$0xff] %v14789_v18 }
 0x6fc   :  { %v5207_v31 = vadd.f32 %v5119_v61, %v17994_v40  ;;  %v5837_v48 = vpop.f32.mrf.mxu0 }
 0x6fd   :  { %v14736_v24 = vadd.f32 %v5837_v48, %v5688_v7  ;;  %v14758_v7 = vpop.permute.xlu2 %6193  ;;  %v14764_v48 = vadd.f32 %v14727_v14, %v14403_v47  ;;  %v14777_v47 = vadd.f32 %v14727_v14, %v14408_v13  ;;  %v6466_v13 = vsel %vm6465_vm4, %v6401_v38, 0.0 }
 0x6fe   :  { %v5600_v56 = vpop.f32.mrf.mxu3  ;;  %v6468_v58 = vadd.f32 %v6467_v51, %v6466_v13  ;;  %v6469_v38 = vsel %vm6465_vm4, %v6403_v0, 0.0 }
 0x6ff   :  { %17996 = vst [vmem:[#allocation142_spill] sm:$0xff] %v14736_v24  ;;  %v14766_v24 = vpop.permute.xlu0 %6198 }
 0x700   :  { %18001 = vst [vmem:[#allocation51_spill] sm:$0xff] %v14764_v48  ;;  %v6470_v13 = vadd.f32 %v6469_v38, %v6468_v58 }
 0x701   :  { %18002 = vst [vmem:[#allocation86_spill] sm:$0xff] %v14766_v24  ;;  %v5448_v24 = vadd.f32 %v5358_v39, %v5206_v50  ;;  %v6602_v39 = vmul.f32 %v6404_v37, %v14754_v30 }
 0x703   :  { %v14756_v61 = vpop.f32.mrf.mxu1  ;;  %v5361_v59 = vpop.f32.mrf.mxu2 }
 0x704   :  { %v5449_v40 = vadd.f32 %v5361_v59, %v5207_v31  ;;  %v5840_v25 = vpop.f32.mrf.mxu0  ;;  %v6600_v31 = vmul.f32 %v6402_v32, %v14740_v20  ;;  %v14799_v32 = vadd.f32 %v14727_v14, %v14422_v3  ;;  %v14811_v3 = vadd.f32 %v14727_v14, %v14431_v63 }
 0x705   :  { %v14770_v43 = vadd.f32 %v5840_v25, %v5689_v29  ;;  %v6601_v29 = vmul.f32 %v6403_v0, %v14744_v46  ;;  %v6405_v25 = vmul.f32 %v14650_v33, %v14764_v48  ;;  %v5690_v46 = vadd.f32 %v5600_v56, %v5448_v24 }
 0x706   :  { %v5603_v26 = vpop.f32.mrf.mxu3  ;;  %v6664_v50 = vsel %vm6465_vm4, %v6600_v31, 0.0  ;;  %18006 = vst [vmem:[#allocation95_spill] sm:$0xff] %v14799_v32  ;;  %v6471_v0 = vsel %vm6465_vm4, %v6404_v37, 0.0 }
 0x707   :  { %18004 = vst [vmem:[#allocation75_spill] sm:$0xff] %v14770_v43  ;;  %v14779_v59 = vadd.f32 %v5603_v26, %v5449_v40  ;;  %8361 = vmatmul.msk.bf16.gmra.mxu0 %vm3542_vm3, %v17991_v15  ;;  %v6663_v26 = vsel %vm6465_vm4, %v6599_v22, 0.0  ;;  %v6406_v15 = vmul.f32 %v14654_v16, %v14777_v47  ;;  %v18007_v22 = vld [vmem:[#allocation122_spill] sm:$0xff]  ;;  %v6666_v31 = vsel %vm6465_vm4, %v6601_v29, 0.0  ;;  %v14813_v43 = vpop.permute.xlu2 %6208 }
 0x708   :  { %v6603_v30 = vmul.f32 %v6405_v25, %v14764_v48  ;;  %v6407_v16 = vmul.f32 %v14661_v36, %v14789_v18  ;;  %18008 = vst [vmem:[#allocation98_spill] sm:$0xff] %v14811_v3  ;;  %v6665_v51 = vadd.f32 %v6664_v50, %v6663_v26  ;;  %v6668_v29 = vsel %vm6465_vm4, %v6602_v39, 0.0 }
 0x709   :  { %v6408_v36 = vmul.f32 %v14665_v9, %v14799_v32  ;;  %v6473_v48 = vsel %vm6465_vm4, %v6405_v25, 0.0  ;;  %v14827_v26 = vadd.f32 %v14727_v14, %v14436_v41  ;;  %v6472_v37 = vadd.f32 %v6471_v0, %v6470_v13 }
 0x70a   :  { %v6667_v63 = vadd.f32 %v6666_v31, %v6665_v51  ;;  %v6409_v50 = vmul.f32 %v14669_v28, %v14811_v3  ;;  %v6475_v9 = vsel %vm6465_vm4, %v6406_v15, 0.0  ;;  %v14838_v41 = vadd.f32 %v14727_v14, %v14445_v1 }
 0x70b   :  { %v5124_v33 = vpop.f32.mrf.mxu1  ;;  %v5363_v40 = vpop.f32.mrf.mxu2  ;;  %18009 = vst [vmem:[#allocation119_spill] sm:$0xff] %v14827_v26  ;;  %v6474_v58 = vadd.f32 %v6473_v48, %v6472_v37  ;;  %v6606_v25 = vmul.f32 %v6408_v36, %v14799_v32  ;;  %v6477_v0 = vsel %vm6465_vm4, %v6407_v16, 0.0  ;;  %v6410_v28 = vmul.f32 %v14676_v23, %v14827_v26 }
 0x70c   :  { %v5209_v20 = vadd.f32 %v5124_v33, %v18007_v22  ;;  %v5842_v2 = vpop.f32.mrf.mxu0  ;;  %v6604_v33 = vmul.f32 %v6406_v15, %v14777_v47  ;;  %v14822_v22 = vpop.permute.xlu0 %6213  ;;  %v6669_v39 = vadd.f32 %v6668_v29, %v6667_v63  ;;  %18010 = vst [vmem:[#allocation102_spill] sm:$0xff] %v14838_v41  ;;  %v6607_v29 = vmul.f32 %v6409_v50, %v14811_v3 }
 0x70d   :  { %v14816_v24 = vadd.f32 %v5842_v2, %v5690_v46  ;;  %v6670_v46 = vsel %vm6465_vm4, %v6603_v30, 0.0  ;;  %v6605_v2 = vmul.f32 %v6407_v16, %v14789_v18  ;;  %v6476_v15 = vadd.f32 %v6475_v9, %v6474_v58  ;;  %v14851_v63 = vpop.permute.xlu1 %6218  ;;  %v18012_v16 = vld [vmem:[#allocation36_spill] sm:$0xff] }
 0x70e   :  { %v5605_v56 = vpop.f32.mrf.mxu3  ;;  %v6672_v38 = vsel %vm6465_vm4, %v6604_v33, 0.0  ;;  %v6671_v51 = vadd.f32 %v6670_v46, %v6669_v39  ;;  %v14849_v33 = vadd.f32 %v14727_v14, %v14450_v49  ;;  %v6479_v46 = vsel %vm6465_vm4, %v6408_v36, 0.0 }
 0x70f   :  { %v6674_v48 = vsel %vm6465_vm4, %v6605_v2, 0.0  ;;  %v5208_v39 = vadd.f32 %v14756_v61, %v18012_v16  ;;  %v6478_v2 = vadd.f32 %v6477_v0, %v6476_v15  ;;  %v6676_v9 = vsel %vm6465_vm4, %v6606_v25, 0.0 }
 0x710   :  { %18011 = vst [vmem:[#allocation112_spill] sm:$0xff] %v14849_v33  ;;  %v6673_v37 = vadd.f32 %v6672_v38, %v6671_v51  ;;  %v6411_v49 = vmul.f32 %v14678_v12, %v14838_v41  ;;  %v6481_v36 = vsel %vm6465_vm4, %v6409_v50, 0.0  ;;  %v6608_v51 = vmul.f32 %v6410_v28, %v14827_v26 }
 0x711   :  { %v5450_v61 = vadd.f32 %v5363_v40, %v5208_v39  ;;  %v6480_v16 = vadd.f32 %v6479_v46, %v6478_v2  ;;  %v6412_v0 = vmul.f32 %v14681_v57, %v14849_v33  ;;  %v14873_v25 = vadd.f32 %v14727_v14, %v14459_v45  ;;  %v18015_v45 = vld [vmem:[#allocation14_spill] sm:$0xff] }
 0x712   :  { %v6675_v38 = vadd.f32 %v6674_v48, %v6673_v37  ;;  %v14879_v15 = vadd.f32 %v14727_v14, %v14464_v5  ;;  %v6483_v40 = vsel %vm6465_vm4, %v6410_v28, 0.0  ;;  %v6609_v48 = vmul.f32 %v6411_v49, %v14838_v41  ;;  %v18060_v41 = vld [vmem:[#allocation25_spill] sm:$0xff] }
 0x713   :  { %v14840_v31 = vpop.f32.mrf.mxu1  ;;  %v5366_v30 = vpop.f32.mrf.mxu2  ;;  %18013 = vst [vmem:[#allocation93_spill] sm:$0xff] %v14873_v25  ;;  %v6482_v50 = vadd.f32 %v6481_v36, %v6480_v16  ;;  %v6680_v57 = vsel %vm6465_vm4, %v6608_v51, 0.0  ;;  %v5692_v46 = vadd.f32 %v5605_v56, %v5450_v61  ;;  %v6610_v2 = vmul.f32 %v6412_v0, %v14849_v33 }
 0x714   :  { %v5451_v13 = vadd.f32 %v5366_v30, %v5209_v20  ;;  %v5845_v1 = vpop.f32.mrf.mxu0  ;;  %v14864_v30 = vpop.permute.xlu2 %6223  ;;  %18014 = vst [vmem:[#allocation72_spill] sm:$0xff] %v14879_v15  ;;  %v6413_v5 = vmul.f32 %v14690_v10, %v14873_v25  ;;  %v14891_v28 = vadd.f32 %v14727_v14, %v14473_v55  ;;  %v6414_v36 = vmul.f32 %v14692_v42, %v14879_v15 }
 0x715   :  { %v14857_v20 = vadd.f32 %v5845_v1, %v14779_v59  ;;  %v6678_v59 = vsel %vm6465_vm4, %v6607_v29, 0.0  ;;  %v14875_v12 = vpop.permute.xlu0 %6228  ;;  %v14897_v56 = vadd.f32 %v14727_v14, %v14478_v21  ;;  %v6682_v61 = vsel %vm6465_vm4, %v6609_v48, 0.0  ;;  %v14903_v16 = vpop.permute.xlu1 %6233 }
 0x716   :  { %v5608_v23 = vpop.f32.mrf.mxu3  ;;  %18016 = vst [vmem:[#allocation82_spill] sm:$0xff] %v14891_v28  ;;  %v6487_v10 = vsel %vm6465_vm4, %v6412_v0, 0.0  ;;  %v6684_v42 = vsel %vm6465_vm4, %v6610_v2, 0.0  ;;  %v6489_v21 = vsel %vm6465_vm4, %v6413_v5, 0.0 }
 0x717   :  { %v14862_v58 = vadd.f32 %v5608_v23, %v5451_v13  ;;  %v6677_v13 = vadd.f32 %v6676_v9, %v6675_v38  ;;  %v6485_v23 = vsel %vm6465_vm4, %v6411_v49, 0.0  ;;  %v6484_v38 = vadd.f32 %v6483_v40, %v6482_v50  ;;  %18017 = vst [vmem:[#allocation149_spill] sm:$0xff] %v14897_v56 }
 0x718   :  { %v6611_v50 = vmul.f32 %v6413_v5, %v14873_v25  ;;  %v6415_v40 = vmul.f32 %v14697_v27, %v14891_v28 }
 0x719   :  { %v6679_v37 = vadd.f32 %v6678_v59, %v6677_v13  ;;  %v6486_v59 = vadd.f32 %v6485_v23, %v6484_v38  ;;  %v14907_v13 = vadd.f32 %v14727_v14, %v14487_v34  ;;  %v14921_v34 = vadd.f32 %v14727_v14, %v14492_v4 }
 0x71a   :  { %v6686_v38 = vsel %vm6465_vm4, %v6611_v50, 0.0  ;;  %v14934_v4 = vadd.f32 %v14727_v14, %v14501_v60  ;;  %v14948_v60 = vadd.f32 %v14727_v14, %v14506_v6 }
 0x71b   :  { %v5129_v29 = vpop.f32.mrf.mxu1  ;;  %v5368_v1 = vpop.f32.mrf.mxu2  ;;  %v6681_v55 = vadd.f32 %v6680_v57, %v6679_v37  ;;  %18018 = vst [vmem:[#allocation49_spill] sm:$0xff] %v14907_v13  ;;  %v6612_v37 = vmul.f32 %v6414_v36, %v14879_v15  ;;  %v6416_v57 = vmul.f32 %v14702_v17, %v14897_v56  ;;  %v6417_v5 = vmul.f32 %v14708_v11, %v14907_v13 }
 0x71c   :  { %v5211_v39 = vadd.f32 %v5129_v29, %v18015_v45  ;;  %v5847_v9 = vpop.f32.mrf.mxu0  ;;  %v14914_v48 = vpop.permute.xlu2 %6238  ;;  %v6488_v29 = vadd.f32 %v6487_v10, %v6486_v59  ;;  %18019 = vst [vmem:[#allocation150_spill] sm:$0xff] %v14921_v34  ;;  %v6613_v17 = vmul.f32 %v6415_v40, %v14891_v28  ;;  %v6418_v50 = vmul.f32 %v14711_v62, %v14921_v34  ;;  %v18046_v28 = vld [vmem:[#allocation91_spill] sm:$0xff] }
 0x71d   :  { %v14899_v49 = vadd.f32 %v5847_v9, %v5692_v46  ;;  %v6683_v0 = vadd.f32 %v6682_v61, %v6681_v55  ;;  %v14925_v23 = vpop.permute.xlu0 %6243  ;;  %v6491_v61 = vsel %vm6465_vm4, %v6414_v36, 0.0  ;;  %18020 = vst [vmem:[#allocation52_spill] sm:$0xff] %v14934_v4  ;;  %v6688_v55 = vsel %vm6465_vm4, %v6612_v37, 0.0  ;;  %v14961_v6 = vpop.permute.xlu1 %6248 }
 0x71e   :  { %v5610_v51 = vpop.f32.mrf.mxu3  ;;  %v6490_v27 = vadd.f32 %v6489_v21, %v6488_v29  ;;  %v6614_v59 = vmul.f32 %v6416_v57, %v14897_v56  ;;  %v6493_v36 = vsel %vm6465_vm4, %v6415_v40, 0.0  ;;  %18022 = vst [vmem:[#allocation130_spill] sm:$0xff] %v14948_v60  ;;  %v6419_v40 = vmul.f32 %v14718_v53, %v14934_v4 }
 0x71f   :  { %v6685_v2 = vadd.f32 %v6684_v42, %v6683_v0  ;;  %v18021_v42 = vld [vmem:[#allocation123_spill] sm:$0xff]  ;;  %v14959_v62 = vadd.f32 %v14727_v14, %v14515_v35  ;;  %v14970_v53 = vadd.f32 %v14727_v14, %v14520_v8  ;;  %v14985_v8 = vadd.f32 %v14727_v14, %v14529_v19 }
 0x720   :  { %v5210_v21 = vadd.f32 %v14840_v31, %v18021_v42  ;;  %v6492_v37 = vadd.f32 %v6491_v61, %v6490_v27  ;;  %v6690_v42 = vsel %vm6465_vm4, %v6613_v17, 0.0  ;;  %v6497_v27 = vsel %vm6465_vm4, %v6417_v5, 0.0 }
 0x721   :  { %v6687_v29 = vadd.f32 %v6686_v38, %v6685_v2  ;;  %18023 = vst [vmem:[#allocation80_spill] sm:$0xff] %v14959_v62  ;;  %v6692_v2 = vsel %vm6465_vm4, %v6614_v59, 0.0 }
 0x722   :  { %v5452_v31 = vadd.f32 %v5368_v1, %v5210_v21  ;;  %v6616_v1 = vmul.f32 %v6418_v50, %v14921_v34  ;;  %18024 = vst [vmem:[#allocation135_spill] sm:$0xff] %v14970_v53 }
 0x723   :  { %v14923_v46 = vpop.f32.mrf.mxu1  ;;  %v5371_v45 = vpop.f32.mrf.mxu2  ;;  %18025 = vst [vmem:[#allocation35_spill] sm:$0xff] %v14985_v8 }
 0x724   :  { %v5453_v9 = vadd.f32 %v5371_v45, %v5211_v39  ;;  %v5850_v10 = vpop.f32.mrf.mxu0  ;;  %v6615_v45 = vmul.f32 %v6417_v5, %v14907_v13  ;;  %v5694_v59 = vadd.f32 %v5610_v51, %v5452_v31  ;;  %v14977_v21 = vpop.permute.xlu2 %6253  ;;  %v6499_v5 = vsel %vm6465_vm4, %v6418_v50, 0.0 }
 0x725   :  { %v14941_v39 = vadd.f32 %v5850_v10, %v14862_v58  ;;  %v6495_v58 = vsel %vm6465_vm4, %v6416_v57, 0.0  ;;  %v6494_v10 = vadd.f32 %v6493_v36, %v6492_v37  ;;  %v6420_v57 = vmul.f32 %v14722_v54, %v14948_v60 }
 0x726   :  { %v5613_v11 = vpop.f32.mrf.mxu3  ;;  %v6421_v54 = vmul.f32 %v14729_v44, %v14959_v62  ;;  %v6501_v44 = vsel %vm6465_vm4, %v6419_v40, 0.0 }
 0x727   :  { %v14950_v0 = vadd.f32 %v5613_v11, %v5453_v9  ;;  %v6689_v9 = vadd.f32 %v6688_v55, %v6687_v29  ;;  %v6496_v17 = vadd.f32 %v6495_v58, %v6494_v10  ;;  %v6694_v55 = vsel %vm6465_vm4, %v6615_v45, 0.0  ;;  %v14987_v29 = vpop.permute.xlu0 %6258  ;;  %v18026_v45 = vld [vmem:[#allocation161_spill] sm:$0xff] }
 0x728   :  { %v6617_v11 = vmul.f32 %v6419_v40, %v14934_v4  ;;  %v14991_v51 = vadd.f32 %v14727_v14, %v18026_v45  ;;  %v6696_v58 = vsel %vm6465_vm4, %v6616_v1, 0.0  ;;  %v6618_v19 = vmul.f32 %v6420_v57, %v14948_v60  ;;  %v18031_v60 = vld [vmem:[#allocation86_spill] sm:$0xff] }
 0x729   :  { %v6691_v61 = vadd.f32 %v6690_v42, %v6689_v9  ;;  %v6498_v42 = vadd.f32 %v6497_v27, %v6496_v17  ;;  %v18028_v9 = vld [vmem:[#allocation132_spill] sm:$0xff]  ;;  %v6423_v40 = vmul.f32 %v14758_v7, %v14985_v8  ;;  %v15024_v7 = vpop.permute.xlu1 %6263 }
 0x72a   :  { %18027 = vst [vmem:[#allocation146_spill] sm:$0xff] %v14991_v51  ;;  %v6422_v10 = vmul.f32 %v18028_v9, %v14970_v53  ;;  %v18029_v27 = vld [vmem:[#allocation164_spill] sm:$0xff]  ;;  %v6698_v17 = vsel %vm6465_vm4, %v6617_v11, 0.0  ;;  %v6424_v9 = vmul.f32 %v18031_v60, %v14991_v51 }
 0x72b   :  { %v14972_v38 = vpop.f32.mrf.mxu1  ;;  %v14974_v35 = vpop.f32.mrf.mxu2  ;;  %v6693_v37 = vadd.f32 %v6692_v2, %v6691_v61  ;;  %v6500_v2 = vadd.f32 %v6499_v5, %v6498_v42  ;;  %v15004_v61 = vadd.f32 %v14727_v14, %v18029_v27  ;;  %v6505_v5 = vsel %vm6465_vm4, %v6421_v54, 0.0  ;;  %v18032_v42 = vld [vmem:[#allocation140_spill] sm:$0xff] }
 0x72c   :  { %v5852_v36 = vpop.f32.mrf.mxu0  ;;  %v15018_v11 = vadd.f32 %v14727_v14, %v18032_v42  ;;  %v6622_v13 = vmul.f32 %v6424_v9, %v14991_v51 }
 0x72d   :  { %v14995_v50 = vadd.f32 %v5852_v36, %v5694_v59  ;;  %v6695_v4 = vadd.f32 %v6694_v55, %v6693_v37  ;;  %18030 = vst [vmem:[#allocation121_spill] sm:$0xff] %v15004_v61  ;;  %v6503_v59 = vsel %vm6465_vm4, %v6420_v57, 0.0  ;;  %v6619_v36 = vmul.f32 %v6421_v54, %v14959_v62 }
 0x72e   :  { %v14993_v31 = vpop.f32.mrf.mxu3  ;;  %v6502_v45 = vadd.f32 %v6501_v44, %v6500_v2  ;;  %v6700_v55 = vsel %vm6465_vm4, %v6618_v19, 0.0  ;;  %v6620_v37 = vmul.f32 %v6422_v10, %v14970_v53  ;;  %18033 = vst [vmem:[#allocation87_spill] sm:$0xff] %v15018_v11  ;;  %v6425_v60 = vmul.f32 %v14801_v52, %v15004_v61  ;;  %v18034_v2 = vld [vmem:[#allocation163_spill] sm:$0xff]  ;;  %v15041_v52 = vpop.permute.xlu2 %6268 }
 0x72f   :  { %v6697_v1 = vadd.f32 %v6696_v58, %v6695_v4  ;;  %v6702_v44 = vsel %vm6465_vm4, %v6619_v36, 0.0  ;;  %v6507_v54 = vsel %vm6465_vm4, %v6422_v10, 0.0  ;;  %v6621_v19 = vmul.f32 %v6423_v40, %v14985_v8 }
 0x730   :  { %v6504_v58 = vadd.f32 %v6503_v59, %v6502_v45  ;;  %v15033_v42 = vadd.f32 %v14727_v14, %v18034_v2  ;;  %v6704_v10 = vsel %vm6465_vm4, %v6620_v37, 0.0  ;;  %v6509_v36 = vsel %vm6465_vm4, %v6423_v40, 0.0  ;;  %v18036_v45 = vld [vmem:[#allocation128_spill] sm:$0xff]  ;;  %v18038_v37 = vld [vmem:[#allocation129_spill] sm:$0xff] }
 0x731   :  { %v6699_v4 = vadd.f32 %v6698_v17, %v6697_v1  ;;  %v6426_v1 = vmul.f32 %v14813_v43, %v15018_v11  ;;  %v6511_v2 = vsel %vm6465_vm4, %v6424_v9, 0.0  ;;  %v15060_v43 = vadd.f32 %v14727_v14, %v18038_v37 }
 0x732   :  { %18035 = vst [vmem:[#allocation113_spill] sm:$0xff] %v15033_v42  ;;  %v6506_v34 = vadd.f32 %v6505_v5, %v6504_v58  ;;  %v15051_v5 = vpop.permute.xlu0 %6273  ;;  %v6427_v40 = vmul.f32 %v14822_v22, %v15033_v42  ;;  %v6708_v8 = vsel %vm6465_vm4, %v6622_v13, 0.0 }
 0x733   :  { %v15020_v57 = vpop.f32.mrf.mxu1  ;;  %v15022_v27 = vpop.f32.mrf.mxu2  ;;  %v6701_v62 = vadd.f32 %v6700_v55, %v6699_v4  ;;  %v15049_v55 = vadd.f32 %v14727_v14, %v18036_v45  ;;  %18039 = vst [vmem:[#allocation7_spill] sm:$0xff] %v15060_v43 }
 0x734   :  { %v5855_v53 = vpop.f32.mrf.mxu0  ;;  %v6508_v58 = vadd.f32 %v6507_v54, %v6506_v34  ;;  %v6624_v34 = vmul.f32 %v6426_v1, %v15018_v11  ;;  %v18040_v54 = vld [vmem:[#allocation111_spill] sm:$0xff]  ;;  %v6625_v13 = vmul.f32 %v6427_v40, %v15033_v42  ;;  %v15086_v11 = vpop.permute.xlu1 %6278 }
 0x735   :  { %v15039_v59 = vadd.f32 %v5855_v53, %v14950_v0  ;;  %18037 = vst [vmem:[#allocation16_spill] sm:$0xff] %v15049_v55  ;;  %v6703_v4 = vadd.f32 %v6702_v44, %v6701_v62  ;;  %v6623_v0 = vmul.f32 %v6425_v60, %v15004_v61  ;;  %v6706_v53 = vsel %vm6465_vm4, %v6621_v19, 0.0 }
 0x736   :  { %v15036_v17 = vpop.f32.mrf.mxu3  ;;  %v6510_v45 = vadd.f32 %v6509_v36, %v6508_v58  ;;  %v6513_v62 = vsel %vm6465_vm4, %v6425_v60, 0.0  ;;  %v6428_v44 = vmul.f32 %v14851_v63, %v15049_v55  ;;  %v15069_v9 = vadd.f32 %v14727_v14, %v18040_v54 }
 0x737   :  { %v6705_v51 = vadd.f32 %v6704_v10, %v6703_v4  ;;  %v6710_v10 = vsel %vm6465_vm4, %v6623_v0, 0.0  ;;  %v6515_v36 = vsel %vm6465_vm4, %v6426_v1, 0.0  ;;  %v6429_v60 = vmul.f32 %v14864_v30, %v15060_v43  ;;  %v18042_v4 = vld [vmem:[#allocation30_spill] sm:$0xff]  ;;  %v18044_v0 = vld [vmem:[#allocation12_spill] sm:$0xff] }
 0x738   :  { %18041 = vst [vmem:[#allocation108_spill] sm:$0xff] %v15069_v9  ;;  %v6512_v37 = vadd.f32 %v6511_v2, %v6510_v45  ;;  %v15080_v63 = vadd.f32 %v14727_v14, %v18042_v4  ;;  %v15090_v1 = vadd.f32 %v14727_v14, %v18044_v0  ;;  %v6712_v30 = vsel %vm6465_vm4, %v6624_v34, 0.0 }
 0x739   :  { %v6707_v19 = vadd.f32 %v6706_v53, %v6705_v51  ;;  %v6517_v45 = vsel %vm6465_vm4, %v6427_v40, 0.0  ;;  %v6626_v4 = vmul.f32 %v6428_v44, %v15049_v55  ;;  %v6430_v42 = vmul.f32 %v14875_v12, %v15069_v9 }
 0x73a   :  { %18043 = vst [vmem:[#allocation137_spill] sm:$0xff] %v15080_v63  ;;  %v6514_v53 = vadd.f32 %v6513_v62, %v6512_v37  ;;  %v15103_v62 = vpop.permute.xlu2 %6283  ;;  %v6519_v37 = vsel %vm6465_vm4, %v6428_v44, 0.0  ;;  %v6627_v34 = vmul.f32 %v6429_v60, %v15060_v43  ;;  %v6431_v40 = vmul.f32 %v14903_v16, %v15080_v63  ;;  %v15110_v0 = vpop.permute.xlu0 %6288 }
 0x73b   :  { %v15071_v22 = vpop.f32.mrf.mxu2  ;;  %v15082_v58 = vpop.f32.mrf.mxu1  ;;  %v6709_v51 = vadd.f32 %v6708_v8, %v6707_v19  ;;  %18045 = vst [vmem:[#allocation32_spill] sm:$0xff] %v15090_v1  ;;  %v15101_v8 = vadd.f32 %v14727_v14, %v18046_v28  ;;  %v6714_v19 = vsel %vm6465_vm4, %v6625_v13, 0.0  ;;  %v6716_v28 = vsel %vm6465_vm4, %v6626_v4, 0.0 }
 0x73c   :  { %v15084_v54 = vpop.f32.mrf.mxu0  ;;  %v6516_v56 = vadd.f32 %v6515_v36, %v6514_v53  ;;  %v6432_v36 = vmul.f32 %v14914_v48, %v15090_v1  ;;  %v6628_v13 = vmul.f32 %v6430_v42, %v15069_v9  ;;  %v18048_v53 = vld [vmem:[#allocation65_spill] sm:$0xff]  ;;  %v6523_v48 = vsel %vm6465_vm4, %v6430_v42, 0.0 }
 0x73d   :  { %v6711_v61 = vadd.f32 %v6710_v10, %v6709_v51  ;;  %18047 = vst [vmem:[#allocation17_spill] sm:$0xff] %v15101_v8  ;;  %v6521_v51 = vsel %vm6465_vm4, %v6429_v60, 0.0  ;;  %v15119_v44 = vadd.f32 %v14727_v14, %v18048_v53  ;;  %v18050_v60 = vld [vmem:[#allocation13_spill] sm:$0xff] }
 0x73e   :  { %v15092_v2 = vpop.f32.mrf.mxu3  ;;  %v6518_v10 = vadd.f32 %v6517_v45, %v6516_v56  ;;  %v6433_v56 = vmul.f32 %v14925_v23, %v15101_v8  ;;  %v15130_v45 = vadd.f32 %v14727_v14, %v18050_v60  ;;  %v6720_v23 = vsel %vm6465_vm4, %v6628_v13, 0.0 }
 0x73f   :  { %v6713_v12 = vadd.f32 %v6712_v30, %v6711_v61  ;;  %18049 = vst [vmem:[#allocation28_spill] sm:$0xff] %v15119_v44  ;;  %v6718_v61 = vsel %vm6465_vm4, %v6627_v34, 0.0  ;;  %v6629_v30 = vmul.f32 %v6431_v40, %v15080_v63  ;;  %v6525_v34 = vsel %vm6465_vm4, %v6431_v40, 0.0  ;;  %v15147_v63 = vpop.permute.xlu1 %6293 }
 0x740   :  { %v6520_v55 = vadd.f32 %v6519_v37, %v6518_v10  ;;  %18051 = vst [vmem:[#allocation143_spill] sm:$0xff] %v15130_v45  ;;  %v6434_v42 = vmul.f32 %v14961_v6, %v15119_v44  ;;  %v6527_v13 = vsel %vm6465_vm4, %v6432_v36, 0.0  ;;  %v6435_v40 = vmul.f32 %v14977_v21, %v15130_v45  ;;  %v18054_v6 = vld [vmem:[#allocation53_spill] sm:$0xff] }
 0x741   :  { %v6715_v16 = vadd.f32 %v6714_v19, %v6713_v12  ;;  %v6630_v19 = vmul.f32 %v6432_v36, %v15090_v1  ;;  %v18052_v12 = vld [vmem:[#allocation74_spill] sm:$0xff]  ;;  %v15156_v1 = vadd.f32 %v14727_v14, %v18054_v6 }
 0x742   :  { %v6522_v9 = vadd.f32 %v6521_v51, %v6520_v55  ;;  %v15143_v10 = vadd.f32 %v14727_v14, %v18052_v12  ;;  %v6631_v51 = vmul.f32 %v6433_v56, %v15101_v8  ;;  %v15159_v33 = vpop.permute.xlu2 %6298 }
 0x743   :  { %v15121_v43 = vpop.f32.mrf.mxu2  ;;  %v6717_v53 = vadd.f32 %v6716_v28, %v6715_v16  ;;  %v15145_v60 = vpop.f32.mrf.mxu1  ;;  %v6722_v16 = vsel %vm6465_vm4, %v6629_v30, 0.0  ;;  %18055 = vst [vmem:[#allocation162_spill] sm:$0xff] %v15156_v1  ;;  %v6724_v25 = vsel %vm6465_vm4, %v6630_v19, 0.0 }
 0x744   :  { %v15132_v4 = vpop.f32.mrf.mxu0  ;;  %18053 = vst [vmem:[#allocation90_spill] sm:$0xff] %v15143_v10  ;;  %v6524_v28 = vadd.f32 %v6523_v48, %v6522_v9  ;;  %v6529_v9 = vsel %vm6465_vm4, %v6433_v56, 0.0  ;;  %v6436_v36 = vmul.f32 %v14987_v29, %v15143_v10  ;;  %v18056_v48 = vld [vmem:[#allocation10_spill] sm:$0xff]  ;;  %v6726_v19 = vsel %vm6465_vm4, %v6631_v51, 0.0  ;;  %v18058_v29 = vld [vmem:[#allocation168_spill] sm:$0xff] }
 0x745   :  { %v6719_v55 = vadd.f32 %v6718_v61, %v6717_v53  ;;  %v6632_v61 = vmul.f32 %v6434_v42, %v15119_v44  ;;  %v15167_v21 = vadd.f32 %v14727_v14, %v18056_v48  ;;  %v15171_v53 = vpop.permute.xlu0 %6303  ;;  %v6633_v56 = vmul.f32 %v6435_v40, %v15130_v45  ;;  %v18062_v45 = vld [vmem:[#allocation138_spill] sm:$0xff] }
 0x746   :  { %v15135_v37 = vpop.f32.mrf.mxu3  ;;  %v6526_v15 = vadd.f32 %v6525_v34, %v6524_v28  ;;  %v6437_v28 = vmul.f32 %v15024_v7, %v15156_v1  ;;  %v15180_v6 = vadd.f32 %v14727_v14, %v18058_v29 }
 0x747   :  { %v6721_v12 = vadd.f32 %v6720_v23, %v6719_v55  ;;  %18057 = vst [vmem:[#allocation96_spill] sm:$0xff] %v15167_v21  ;;  %v6531_v55 = vsel %vm6465_vm4, %v6434_v42, 0.0  ;;  %v6728_v51 = vsel %vm6465_vm4, %v6632_v61, 0.0  ;;  %v6533_v42 = vsel %vm6465_vm4, %v6435_v40, 0.0 }
 0x748   :  { %v6528_v34 = vadd.f32 %v6527_v13, %v6526_v15  ;;  %18059 = vst [vmem:[#allocation92_spill] sm:$0xff] %v15180_v6  ;;  %v15186_v15 = vadd.f32 %v14727_v14, %v18060_v41  ;;  %v6438_v7 = vmul.f32 %v15041_v52, %v15167_v21  ;;  %v6730_v41 = vsel %vm6465_vm4, %v6633_v56, 0.0  ;;  %v6309_v52 = vpop.permute.xlu1 %6308 }
 0x749   :  { %v6723_v23 = vadd.f32 %v6722_v16, %v6721_v12  ;;  %v6634_v16 = vmul.f32 %v6436_v36, %v15143_v10  ;;  %v6635_v61 = vmul.f32 %v6437_v28, %v15156_v1  ;;  %v6439_v40 = vmul.f32 %v15051_v5, %v15180_v6 }
 0x74a   :  { %v6530_v8 = vadd.f32 %v6529_v9, %v6528_v34  ;;  %18061 = vst [vmem:[#allocation118_spill] sm:$0xff] %v15186_v15  ;;  %v6535_v9 = vsel %vm6465_vm4, %v6436_v36, 0.0  ;;  %v18064_v36 = vld [vmem:[#allocation73_spill] sm:$0xff] }
 0x74b   :  { %v15169_v30 = vpop.f32.mrf.mxu2  ;;  %v6725_v44 = vadd.f32 %v6724_v25, %v6723_v23  ;;  %v15197_v25 = vadd.f32 %v14727_v14, %v18062_v45  ;;  %v15204_v23 = vpop.f32.mrf.mxu1  ;;  %v6537_v45 = vsel %vm6465_vm4, %v6437_v28, 0.0  ;;  %v6637_v28 = vmul.f32 %v6439_v40, %v15180_v6 }
 0x74c   :  { %v15182_v48 = vpop.f32.mrf.mxu0  ;;  %v6532_v29 = vadd.f32 %v6531_v55, %v6530_v8  ;;  %v6440_v8 = vmul.f32 %v15086_v11, %v15186_v15  ;;  %v15213_v55 = vadd.f32 %v14727_v14, %v18064_v36  ;;  %v6734_v11 = vsel %vm6465_vm4, %v6635_v61, 0.0  ;;  %v18068_v61 = vld [vmem:[#allocation46_spill] sm:$0xff] }
 0x74d   :  { %v6727_v12 = vadd.f32 %v6726_v19, %v6725_v44  ;;  %18063 = vst [vmem:[#allocation115_spill] sm:$0xff] %v15197_v25  ;;  %v6732_v44 = vsel %vm6465_vm4, %v6634_v16, 0.0  ;;  %v6636_v19 = vmul.f32 %v6438_v7, %v15167_v21  ;;  %v6539_v16 = vsel %vm6465_vm4, %v6438_v7, 0.0  ;;  %v6319_v21 = vpop.permute.xlu0 %6318 }
 0x74e   :  { %v15193_v13 = vpop.f32.mrf.mxu3  ;;  %v6534_v10 = vadd.f32 %v6533_v42, %v6532_v29  ;;  %18065 = vst [vmem:[#allocation21_spill] sm:$0xff] %v15213_v55  ;;  %v6314_v42 = vpop.permute.xlu2 %6313  ;;  %v6442_v7 = vmul.f32 %v15110_v0, %v15213_v55 }
 0x74f   :  { %v6729_v34 = vadd.f32 %v6728_v51, %v6727_v12  ;;  %v6441_v51 = vmul.f32 %v15103_v62, %v15197_v25  ;;  %v18066_v12 = vld [vmem:[#allocation100_spill] sm:$0xff]  ;;  %v6736_v62 = vsel %vm6465_vm4, %v6636_v19, 0.0 }
 0x750   :  { %v6536_v1 = vadd.f32 %v6535_v9, %v6534_v10  ;;  %v15224_v29 = vadd.f32 %v14727_v14, %v18066_v12  ;;  %v6638_v10 = vmul.f32 %v6440_v8, %v15186_v15  ;;  %v6541_v9 = vsel %vm6465_vm4, %v6439_v40, 0.0  ;;  %v18069_v19 = vld [vmem:[#allocation116_spill] sm:$0xff] }
 0x751   :  { %v6731_v5 = vadd.f32 %v6730_v41, %v6729_v34  ;;  %v15235_v34 = vadd.f32 %v14727_v14, %v18068_v61  ;;  %v6639_v3 = vmul.f32 %v6441_v51, %v15197_v25  ;;  %v15244_v40 = vadd.f32 %v14727_v14, %v18069_v19  ;;  %v6324_v19 = vpop.permute.xlu1 %6323 }
 0x752   :  { %18067 = vst [vmem:[#allocation103_spill] sm:$0xff] %v15224_v29  ;;  %v6538_v41 = vadd.f32 %v6537_v45, %v6536_v1  ;;  %v6543_v1 = vsel %vm6465_vm4, %v6440_v8, 0.0  ;;  %v6443_v45 = vmul.f32 %v15147_v63, %v15224_v29 }
 0x753   :  { %v15215_v56 = vpop.f32.mrf.mxu2  ;;  %v6733_v26 = vadd.f32 %v6732_v44, %v6731_v5  ;;  %v6738_v44 = vsel %vm6465_vm4, %v6637_v28, 0.0  ;;  %v6444_v8 = vmul.f32 %v15159_v33, %v15235_v34  ;;  %v18070_v28 = vld [vmem:[#allocation142_spill] sm:$0xff] }
 0x754   :  { %v15226_v36 = vpop.f32.mrf.mxu0  ;;  %v6540_v6 = vadd.f32 %v6539_v16, %v6538_v41  ;;  %v6640_v16 = vmul.f32 %v6442_v7, %v15213_v55  ;;  %v15255_v63 = vadd.f32 %v14727_v14, %v18070_v28  ;;  %v15257_v41 = vpop.f32.mrf.mxu1 }
 0x755   :  { %v6735_v12 = vadd.f32 %v6734_v11, %v6733_v26  ;;  %v6740_v26 = vsel %vm6465_vm4, %v6638_v10, 0.0  ;;  %v6545_v11 = vsel %vm6465_vm4, %v6441_v51, 0.0  ;;  %v6547_v10 = vsel %vm6465_vm4, %v6442_v7, 0.0 }
 0x756   :  { %v15246_v0 = vpop.f32.mrf.mxu3  ;;  %v6542_v61 = vadd.f32 %v6541_v9, %v6540_v6  ;;  %18071 = vst [vmem:[#allocation155_spill] sm:$0xff] %v15255_v63  ;;  %v6742_v6 = vsel %vm6465_vm4, %v6639_v3, 0.0  ;;  %v6641_v51 = vmul.f32 %v6443_v45, %v15224_v29  ;;  %v18072_v9 = vld [vmem:[#allocation75_spill] sm:$0xff]  ;;  %v6744_v3 = vsel %vm6465_vm4, %v6640_v16, 0.0 }
 0x757   :  { %v6737_v5 = vadd.f32 %v6736_v62, %v6735_v12  ;;  %v6445_v62 = vmul.f32 %v15171_v53, %v15244_v40  ;;  %v15266_v33 = vadd.f32 %v14727_v14, %v18072_v9  ;;  %v6549_v7 = vsel %vm6465_vm4, %v6443_v45, 0.0  ;;  %v6334_v53 = vpop.permute.xlu0 %6333 }
 0x758   :  { %v6544_v15 = vadd.f32 %v6543_v1, %v6542_v61  ;;  %v6329_v1 = vpop.permute.xlu2 %6328  ;;  %v6446_v61 = vmul.f32 %v6309_v52, %v15255_v63  ;;  %v15278_v9 = vadd.f32 %v14727_v14, %v14816_v24  ;;  %v6746_v18 = vsel %vm6465_vm4, %v6641_v51, 0.0 }
 0x759   :  { %v6739_v25 = vadd.f32 %v6738_v44, %v6737_v5  ;;  %18073 = vst [vmem:[#allocation58_spill] sm:$0xff] %v15266_v33  ;;  %v6642_v5 = vmul.f32 %v6444_v8, %v15235_v34  ;;  %v15286_v52 = vadd.f32 %v14727_v14, %v14857_v20  ;;  %v6553_v16 = vsel %vm6465_vm4, %v6445_v62, 0.0 }
 0x75a   :  { %v6546_v44 = vadd.f32 %v6545_v11, %v6544_v15  ;;  %v6551_v15 = vsel %vm6465_vm4, %v6444_v8, 0.0  ;;  %v6644_v24 = vmul.f32 %v6446_v61, %v15255_v63  ;;  %v6448_v51 = vmul.f32 %v6319_v21, %v15278_v9 }
 0x75b   :  { %v15268_v12 = vpop.f32.mrf.mxu2  ;;  %v6741_v55 = vadd.f32 %v6740_v26, %v6739_v25  ;;  %v6643_v25 = vmul.f32 %v6445_v62, %v15244_v40  ;;  %v6447_v26 = vmul.f32 %v6314_v42, %v15266_v33  ;;  %18074 = vst [vmem:[#allocation79_spill] sm:$0xff] %v15286_v52 }
 0x75c   :  { %v15270_v28 = vpop.f32.mrf.mxu0  ;;  %v6548_v32 = vadd.f32 %v6547_v10, %v6546_v44  ;;  %v15297_v20 = vpop.f32.mrf.mxu1  ;;  %v6752_v21 = vsel %vm6465_vm4, %v6644_v24, 0.0 }
 0x75d   :  { %v6743_v29 = vadd.f32 %v6742_v6, %v6741_v55  ;;  %v6748_v55 = vsel %vm6465_vm4, %v6642_v5, 0.0  ;;  %v6750_v42 = vsel %vm6465_vm4, %v6643_v25, 0.0  ;;  %v6449_v5 = vmul.f32 %v6324_v19, %v15286_v52 }
 0x75e   :  { %v6550_v11 = vadd.f32 %v6549_v7, %v6548_v32  ;;  %v15291_v6 = vpop.f32.mrf.mxu3  ;;  %v6555_v32 = vsel %vm6465_vm4, %v6446_v61, 0.0 }
 0x75f   :  { %v6745_v45 = vadd.f32 %v6744_v3, %v6743_v29  ;;  %v6645_v29 = vmul.f32 %v6447_v26, %v15266_v33  ;;  %v6339_v3 = vpop.permute.xlu1 %6338  ;;  %v6646_v33 = vmul.f32 %v6448_v51, %v15278_v9  ;;  %v6349_v24 = vpop.permute.xlu0 %6348 }
 0x760   :  { %v6552_v8 = vadd.f32 %v6551_v15, %v6550_v11  ;;  %v18076_v15 = vld [vmem:[#allocation124_spill] sm:$0xff]  ;;  %v6344_v63 = vpop.permute.xlu2 %6343 }
 0x761   :  { %v6747_v10 = vadd.f32 %v6746_v18, %v6745_v45  ;;  %v15304_v18 = vadd.f32 %v14727_v14, %v14899_v49  ;;  %v5212_v61 = vadd.f32 %v14923_v46, %v18076_v15  ;;  %v6754_v19 = vsel %vm6465_vm4, %v6645_v29, 0.0 }
 0x762   :  { %v6554_v7 = vadd.f32 %v6553_v16, %v6552_v8  ;;  %v18077_v16 = vld [vmem:[#allocation67_spill] sm:$0xff]  ;;  %v6647_v46 = vmul.f32 %v6449_v5, %v15286_v52  ;;  %v18135_v52 = vld [vmem:[#allocation118_spill] sm:$0xff] }
 0x763   :  { %v6749_v62 = vadd.f32 %v6748_v55, %v6747_v10  ;;  %18075 = vst [vmem:[#allocation31_spill] sm:$0xff] %v15304_v18  ;;  %v15309_v25 = vpop.f32.mrf.mxu2  ;;  %v6557_v55 = vsel %vm6465_vm4, %v6447_v26, 0.0  ;;  %v5213_v49 = vadd.f32 %v14972_v38, %v18077_v16  ;;  %v5454_v10 = vadd.f32 %v14974_v35, %v5212_v61  ;;  %v18079_v26 = vld [vmem:[#allocation125_spill] sm:$0xff] }
 0x764   :  { %v15299_v44 = vpop.f32.mrf.mxu0  ;;  %v6556_v11 = vadd.f32 %v6555_v32, %v6554_v7  ;;  %v6450_v15 = vmul.f32 %v6329_v1, %v15304_v18  ;;  %v6559_v32 = vsel %vm6465_vm4, %v6448_v51, 0.0  ;;  %v5214_v29 = vadd.f32 %v15020_v57, %v18079_v26  ;;  %v18081_v51 = vld [vmem:[#allocation170_spill] sm:$0xff] }
 0x765   :  { %v6751_v45 = vadd.f32 %v6750_v42, %v6749_v62  ;;  %v15321_v42 = vadd.f32 %v14727_v14, %v14941_v39  ;;  %v5455_v62 = vadd.f32 %v15022_v27, %v5213_v49  ;;  %v15332_v1 = vadd.f32 %v14727_v14, %v14995_v50  ;;  %v5151_v49 = vpop.f32.mrf.mxu1 }
 0x766   :  { %v15327_v38 = vpop.f32.mrf.mxu3  ;;  %v6558_v35 = vadd.f32 %v6557_v55, %v6556_v11  ;;  %v6561_v39 = vsel %vm6465_vm4, %v6449_v5, 0.0  ;;  %v5696_v61 = vadd.f32 %v14993_v31, %v5454_v10  ;;  %v5456_v57 = vadd.f32 %v15071_v22, %v5214_v29 }
 0x767   :  { %v6753_v8 = vadd.f32 %v6752_v21, %v6751_v45  ;;  %18078 = vst [vmem:[#allocation60_spill] sm:$0xff] %v15321_v42  ;;  %v6756_v21 = vsel %vm6465_vm4, %v6646_v33, 0.0  ;;  %v5215_v45 = vadd.f32 %v15082_v58, %v18081_v51  ;;  %v6758_v11 = vsel %vm6465_vm4, %v6647_v46, 0.0  ;;  %v6354_v22 = vpop.permute.xlu1 %6353 }
 0x768   :  { %18080 = vst [vmem:[#allocation154_spill] sm:$0xff] %v15332_v1  ;;  %v6560_v16 = vadd.f32 %v6559_v32, %v6558_v35  ;;  %v6648_v33 = vmul.f32 %v6450_v15, %v15304_v18  ;;  %v6451_v55 = vmul.f32 %v6334_v53, %v15321_v42  ;;  %v5697_v50 = vadd.f32 %v15036_v17, %v5455_v62  ;;  %v18083_v35 = vld [vmem:[#allocation171_spill] sm:$0xff]  ;;  %v18134_v18 = vld [vmem:[#allocation92_spill] sm:$0xff] }
 0x769   :  { %v6755_v7 = vadd.f32 %v6754_v19, %v6753_v8  ;;  %v5938_v5 = vadd.f32 %v15084_v54, %v5696_v61  ;;  %v18082_v19 = vld [vmem:[#allocation5_spill] sm:$0xff]  ;;  %v5457_v58 = vadd.f32 %v15121_v43, %v5215_v45  ;;  %v6563_v32 = vsel %vm6465_vm4, %v6450_v15, 0.0 }
 0x76a   :  { %v5216_v31 = vadd.f32 %v15145_v60, %v18082_v19  ;;  %v6562_v8 = vadd.f32 %v6561_v39, %v6560_v16  ;;  %v6452_v46 = vmul.f32 %v6339_v3, %v15332_v1  ;;  %v15353_v53 = vadd.f32 %v14727_v14, %v15039_v59  ;;  %v6359_v3 = vpop.permute.xlu2 %6358  ;;  %v18085_v61 = vld [vmem:[#allocation145_spill] sm:$0xff] }
 0x76b   :  { %v6757_v10 = vadd.f32 %v6756_v21, %v6755_v7  ;;  %v5698_v17 = vadd.f32 %v15092_v2, %v5456_v57  ;;  %v5939_v54 = vadd.f32 %v15132_v4, %v5697_v50  ;;  %v5393_v26 = vpop.f32.mrf.mxu2  ;;  %v6760_v29 = vsel %vm6465_vm4, %v6648_v33, 0.0  ;;  %v18086_v50 = vld [vmem:[#allocation64_spill] sm:$0xff] }
 0x76c   :  { %v15339_v27 = vpop.f32.mrf.mxu0  ;;  %v5458_v60 = vadd.f32 %v15169_v30, %v5216_v31  ;;  %v6565_v62 = vsel %vm6465_vm4, %v6451_v55, 0.0  ;;  %v5217_v15 = vadd.f32 %v15204_v23, %v18083_v35  ;;  %v6649_v7 = vmul.f32 %v6451_v55, %v15321_v42  ;;  %v6364_v30 = vpop.permute.xlu0 %6363  ;;  %v18087_v31 = vld [vmem:[#allocation69_spill] sm:$0xff] }
 0x76d   :  { %v6759_v43 = vadd.f32 %v6758_v11, %v6757_v10  ;;  %v15364_v59 = vadd.f32 %v14727_v14, %v5938_v5  ;;  %v5699_v2 = vadd.f32 %v15135_v37, %v5457_v58  ;;  %v5940_v4 = vadd.f32 %v15182_v48, %v5698_v17  ;;  %v5154_v17 = vpop.f32.mrf.mxu1  ;;  %v18137_v42 = vld [vmem:[#allocation21_spill] sm:$0xff] }
 0x76e   :  { %v6564_v21 = vadd.f32 %v6563_v32, %v6562_v8  ;;  %v6650_v39 = vmul.f32 %v6452_v46, %v15332_v1  ;;  %v5218_v51 = vadd.f32 %v15257_v41, %v18085_v61  ;;  %v5459_v45 = vadd.f32 %v15215_v56, %v5217_v15  ;;  %v5635_v11 = vpop.f32.mrf.mxu3  ;;  %v18136_v1 = vld [vmem:[#allocation115_spill] sm:$0xff] }
 0x76f   :  { %18084 = vst [vmem:[#allocation55_spill] sm:$0xff] %v15364_v59  ;;  %v6453_v23 = vmul.f32 %v6344_v63, %v15353_v53  ;;  %v15374_v57 = vadd.f32 %v14727_v14, %v5939_v54  ;;  %v5700_v16 = vadd.f32 %v15193_v13, %v5458_v60  ;;  %v5941_v37 = vadd.f32 %v15226_v36, %v5699_v2  ;;  %v15386_v14 = vld [vmem:[%s16018_s4] ss:$0 sm:$0xff]  ;;  %v6369_v54 = vpop.permute.xlu1 %6368 }
 0x770   :  { %v6761_v33 = vadd.f32 %v6760_v29, %v6759_v43  ;;  %v6566_v55 = vadd.f32 %v6565_v62, %v6564_v21  ;;  %v5219_v5 = vadd.f32 %v15297_v20, %v18086_v50  ;;  %v5460_v41 = vadd.f32 %v15268_v12, %v5218_v51 }
 0x771   :  { %v6762_v56 = vsel %vm6465_vm4, %v6649_v7, 0.0  ;;  %v6454_v63 = vmul.f32 %v6349_v24, %v15364_v59  ;;  %v15389_v13 = vadd.f32 %v15386_v14, %v5940_v4  ;;  %v5942_v36 = vadd.f32 %v15270_v28, %v5700_v16 }
 0x772   :  { %v6567_v19 = vsel %vm6465_vm4, %v6452_v46, 0.0  ;;  %v5701_v20 = vadd.f32 %v15246_v0, %v5459_v45  ;;  %v5220_v12 = vadd.f32 %v5151_v49, %v18087_v31  ;;  %v5461_v58 = vadd.f32 %v15309_v25, %v5219_v5 }
 0x773   :  { %v6764_v24 = vsel %vm6465_vm4, %v6650_v39, 0.0  ;;  %v6651_v10 = vmul.f32 %v6453_v23, %v15353_v53  ;;  %v6455_v8 = vmul.f32 %v6354_v22, %v15374_v57  ;;  %v15400_v32 = vadd.f32 %v15386_v14, %v5941_v37  ;;  %v5396_v22 = vpop.f32.mrf.mxu2  ;;  %v18088_v39 = vld [vmem:[#allocation62_spill] sm:$0xff] }
 0x774   :  { %v5875_v48 = vpop.f32.mrf.mxu0  ;;  %v6763_v28 = vadd.f32 %v6762_v56, %v6761_v33  ;;  %v5702_v46 = vadd.f32 %v15291_v6, %v5460_v41  ;;  %v5943_v0 = vadd.f32 %v15299_v44, %v5701_v20  ;;  %v5462_v60 = vadd.f32 %v5393_v26, %v5220_v12  ;;  %v6374_v6 = vpop.permute.xlu2 %6373 }
 0x775   :  { %v6568_v49 = vadd.f32 %v6567_v19, %v6566_v55  ;;  %v6652_v25 = vmul.f32 %v6454_v63, %v15364_v59  ;;  %v6456_v43 = vmul.f32 %v6359_v3, %v15389_v13  ;;  %v15407_v29 = vadd.f32 %v15386_v14, %v5942_v36  ;;  %v18138_v59 = vld [vmem:[#allocation103_spill] sm:$0xff] }
 0x776   :  { %v6765_v62 = vadd.f32 %v6764_v24, %v6763_v28  ;;  %v6569_v35 = vsel %vm6465_vm4, %v6453_v23, 0.0  ;;  %v5703_v15 = vadd.f32 %v15327_v38, %v5461_v58  ;;  %v5944_v7 = vadd.f32 %v15339_v27, %v5702_v46  ;;  %v6379_v38 = vpop.permute.xlu0 %6378  ;;  %v5638_v33 = vpop.f32.mrf.mxu3 }
 0x777   :  { %v6766_v44 = vsel %vm6465_vm4, %v6651_v10, 0.0  ;;  %v6571_v26 = vsel %vm6465_vm4, %v6454_v63, 0.0  ;;  %v6653_v2 = vmul.f32 %v6455_v8, %v15374_v57  ;;  %v6457_v3 = vmul.f32 %v6364_v30, %v15400_v32  ;;  %v5156_v24 = vpop.f32.mrf.mxu1  ;;  %v6384_v10 = vpop.permute.xlu1 %6383 }
 0x778   :  { %v15417_v21 = vadd.f32 %v15386_v14, %v5943_v0  ;;  %v5221_v61 = vadd.f32 %v5154_v17, %v18088_v39  ;;  %v5704_v51 = vadd.f32 %v5635_v11, %v5462_v60  ;;  %v5945_v45 = vadd.f32 %v5875_v48, %v5703_v15 }
 0x779   :  { %v6570_v23 = vadd.f32 %v6569_v35, %v6568_v49  ;;  %v6768_v27 = vsel %vm6465_vm4, %v6652_v25, 0.0  ;;  %v6654_v16 = vmul.f32 %v6456_v43, %v15389_v13  ;;  %v6458_v37 = vmul.f32 %v6369_v54, %v15407_v29 }
 0x77a   :  { %v6573_v55 = vsel %vm6465_vm4, %v6455_v8, 0.0  ;;  %v15425_v30 = vadd.f32 %v15386_v14, %v5944_v7  ;;  %v5463_v50 = vadd.f32 %v5396_v22, %v5221_v61  ;;  %v6767_v41 = vadd.f32 %v6766_v44, %v6765_v62  ;;  %v18089_v62 = vld [vmem:[#allocation160_spill] sm:$0xff] }
 0x77b   :  { %v6572_v56 = vadd.f32 %v6571_v26, %v6570_v23  ;;  %v6655_v11 = vmul.f32 %v6457_v3, %v15400_v32  ;;  %v6770_v48 = vsel %vm6465_vm4, %v6653_v2, 0.0  ;;  %v6575_v63 = vsel %vm6465_vm4, %v6456_v43, 0.0  ;;  %v5398_v25 = vpop.f32.mrf.mxu2 }
 0x77c   :  { %v5877_v4 = vpop.f32.mrf.mxu0  ;;  %v6459_v36 = vmul.f32 %v6374_v6, %v15417_v21  ;;  %v15432_v19 = vadd.f32 %v15386_v14, %v5945_v45  ;;  %v6769_v20 = vadd.f32 %v6768_v27, %v6767_v41  ;;  %v6772_v12 = vsel %vm6465_vm4, %v6654_v16, 0.0  ;;  %v6389_v6 = vpop.permute.xlu2 %6388 }
 0x77d   :  { %v5946_v5 = vadd.f32 %v5877_v4, %v5704_v51  ;;  %v6574_v31 = vadd.f32 %v6573_v55, %v6572_v56  ;;  %v6656_v58 = vmul.f32 %v6458_v37, %v15407_v29  ;;  %v6577_v8 = vsel %vm6465_vm4, %v6457_v3, 0.0 }
 0x77e   :  { %v6460_v17 = vmul.f32 %v6379_v38, %v15425_v30  ;;  %v5705_v54 = vadd.f32 %v5638_v33, %v5463_v50  ;;  %v6771_v46 = vadd.f32 %v6770_v48, %v6769_v20  ;;  %v6774_v60 = vsel %vm6465_vm4, %v6655_v11, 0.0  ;;  %v6394_v45 = vpop.permute.xlu0 %6393  ;;  %v5640_v27 = vpop.f32.mrf.mxu3 }
 0x77f   :  { %v15439_v28 = vadd.f32 %v15386_v14, %v5946_v5  ;;  %v6576_v0 = vadd.f32 %v6575_v63, %v6574_v31  ;;  %v6579_v49 = vsel %vm6465_vm4, %v6458_v37, 0.0  ;;  %v6657_v22 = vmul.f32 %v6459_v36, %v15417_v21 }
 0x780   :  { %v5222_v35 = vadd.f32 %v5156_v24, %v18089_v62  ;;  %v6461_v15 = vmul.f32 %v6384_v10, %v15432_v19  ;;  %v6773_v44 = vadd.f32 %v6772_v12, %v6771_v46  ;;  %v6776_v2 = vsel %vm6465_vm4, %v6656_v58, 0.0 }
 0x781   :  { %v6578_v26 = vadd.f32 %v6577_v8, %v6576_v0  ;;  %v6581_v3 = vsel %vm6465_vm4, %v6459_v36, 0.0  ;;  %v6658_v4 = vmul.f32 %v6460_v17, %v15425_v30  ;;  %v6462_v61 = vmul.f32 %v6389_v6, %v15439_v28  ;;  %v6399_v0 = vpop.permute.xlu1 %6398 }
 0x782   :  { %v5464_v39 = vadd.f32 %v5398_v25, %v5222_v35  ;;  %v6775_v38 = vadd.f32 %v6774_v60, %v6773_v44  ;;  %v6778_v16 = vsel %vm6465_vm4, %v6657_v22, 0.0  ;;  %v6583_v37 = vsel %vm6465_vm4, %v6460_v17, 0.0 }
 0x783   :  { %v6580_v23 = vadd.f32 %v6579_v49, %v6578_v26  ;;  %v6659_v33 = vmul.f32 %v6461_v15, %v15432_v19  ;;  %v6780_v41 = vsel %vm6465_vm4, %v6658_v4, 0.0  ;;  %v6585_v56 = vsel %vm6465_vm4, %v6461_v15, 0.0 }
 0x784   :  { %v5880_v43 = vpop.f32.mrf.mxu0  ;;  %v6777_v50 = vadd.f32 %v6776_v2, %v6775_v38  ;;  %v6660_v11 = vmul.f32 %v6462_v61, %v15439_v28  ;;  %v5706_v48 = vadd.f32 %v5640_v27, %v5464_v39  ;;  %v6587_v12 = vsel %vm6465_vm4, %v6462_v61, 0.0 }
 0x785   :  { %v5947_v7 = vadd.f32 %v5880_v43, %v5705_v54  ;;  %v6582_v5 = vadd.f32 %v6581_v3, %v6580_v23  ;;  %v6782_v31 = vsel %vm6465_vm4, %v6659_v33, 0.0 }
 0x786   :  { %v6779_v63 = vadd.f32 %v6778_v16, %v6777_v50  ;;  %v6784_v17 = vsel %vm6465_vm4, %v6660_v11, 0.0 }
 0x787   :  { %v15451_v51 = vadd.f32 %v15386_v14, %v5947_v7  ;;  %v6584_v36 = vadd.f32 %v6583_v37, %v6582_v5 }
 0x788   :  { %v6781_v10 = vadd.f32 %v6780_v41, %v6779_v63 }
 0x789   :  { %v6463_v55 = vmul.f32 %v6394_v45, %v15451_v51  ;;  %v6586_v8 = vadd.f32 %v6585_v56, %v6584_v36 }
 0x78a   :  { %v6783_v60 = vadd.f32 %v6782_v31, %v6781_v10 }
 0x78b   :  { %v6661_v58 = vmul.f32 %v6463_v55, %v15451_v51  ;;  %v6589_v54 = vsel %vm6465_vm4, %v6463_v55, 0.0  ;;  %v6588_v49 = vadd.f32 %v6587_v12, %v6586_v8 }
 0x78c   :  { %v5882_v20 = vpop.f32.mrf.mxu0  ;;  %v6785_v22 = vadd.f32 %v6784_v17, %v6783_v60 }
 0x78d   :  { %v5948_v24 = vadd.f32 %v5882_v20, %v5706_v48  ;;  %v6786_v25 = vsel %vm6465_vm4, %v6661_v58, 0.0  ;;  %v6590_v62 = vadd.f32 %v6589_v54, %v6588_v49  ;;  %v6800_v20 = vld [vmem:[%s16019_s5] sm:$0x1] }
 0x78e   :  { %v6787_v7 = vadd.f32 %v6786_v25, %v6785_v22  ;;  %v18092_v25 = vld [vmem:[#allocation144_spill] sm:$0xff] }
 0x78f   :  { %v6016_v46 = vadd.f32 %v15386_v14, %v5948_v24  ;;  %v6813_v24 = vld [vmem:[%s16020_s6] sm:$0x1] }
 0x790   :  { %v18094_v22 = vld [vmem:[#allocation88_spill] sm:$0xff] }
 0x791   :  { %v6464_v43 = vmul.f32 %v6399_v0, %v6016_v46  ;;  %v18091_v0 = vld [vmem:[#allocation153_spill] sm:$0xff] }
 0x793   :  { %v6591_v35 = vsel %vm6465_vm4, %v6464_v43, 0.0  ;;  %v6662_v15 = vmul.f32 %v6464_v43, %v6016_v46 }
 0x794   :  { %v6592_v6 = vadd.f32 %v6591_v35, %v6590_v62  ;;  %v18095_v35 = vld [vmem:[#allocation110_spill] sm:$0xff] }
 0x795   :  { %v6788_v44 = vsel %vm6465_vm4, %v6662_v15, 0.0 }
 0x796   :  { %v6593_v26 = vrot.slane %v6592_v6, 4  ;;  %v6789_v2 = vadd.f32 %v6788_v44, %v6787_v7  ;;  %v18096_v7 = vld [vmem:[#allocation51_spill] sm:$0xff]  ;;  %v18097_v44 = vld [vmem:[#allocation94_spill] sm:$0xff] }
 0x798   :  { %v6594_v3 = vadd.f32 %v6593_v26, %v6592_v6  ;;  %v6790_v4 = vrot.slane %v6789_v2, 4 }
 0x79a   :  { %v6595_v14 = vrot.slane %v6594_v3, 2  ;;  %v6791_v39 = vadd.f32 %v6790_v4, %v6789_v2  ;;  %v18098_v2 = vld [vmem:[#allocation95_spill] sm:$0xff] }
 0x79c   :  { %v6596_v61 = vadd.f32 %v6595_v14, %v6594_v3  ;;  %v6792_v45 = vrot.slane %v6791_v39, 2  ;;  %v18100_v14 = vld [vmem:[#allocation98_spill] sm:$0xff] }
 0x79e   :  { %v6597_v38 = vrot.slane %v6596_v61, 1  ;;  %v6793_v23 = vadd.f32 %v6792_v45, %v6791_v39 }
 0x7a0   :  { %v6598_v27 = vadd.f32 %v6597_v38, %v6596_v61  ;;  %v6794_v16 = vrot.slane %v6793_v23, 1  ;;  %v18101_v61 = vld [vmem:[#allocation119_spill] sm:$0xff] }
 0x7a2   :  { %v6795_v37 = vadd.f32 %v6794_v16, %v6793_v23  ;;  %v6796_v33 = vmul.f32 0.0034722222, %v6598_v27  ;;  %v18103_v23 = vld [vmem:[#allocation112_spill] sm:$0xff]  ;;  %v18104_v16 = vld [vmem:[#allocation93_spill] sm:$0xff] }
 0x7a4   :  { %v6797_v55 = vmul.f32 0.0034722222, %v6795_v37  ;;  %v6798_v50 = vmul.f32 %v6796_v33, %v6796_v33 }
 0x7a6   :  { %v6799_v5 = vsub.f32 %v6797_v55, %v6798_v50  ;;  %v18106_v50 = vld [vmem:[#allocation82_spill] sm:$0xff] }
 0x7a8   :  { %v6801_v41 = vadd.f32 1e-05, %v6799_v5 }
 0x7aa   :  { %8660 = vrsqrt.f32 %v6801_v41  ;;  %vm6808_vm6 = vweird.f32 %v6801_v41 }
 0x7b0   :  { %v8661_v56 = vpop.eup %8660 }
 0x7b1   :  { %v6803_v11 = vmul.f32 %v8661_v56, %v6801_v41  ;;  %vm6809_vm5 = vweird.f32 %v8661_v56  ;;  %v18107_v41 = vld [vmem:[#allocation149_spill] sm:$0xff] }
 0x7b2   :  { %vm6810_vm7 = vmor %vm6808_vm6, %vm6809_vm5 }
 0x7b3   :  { %v6804_v48 = vmul.f32 %v8661_v56, %v6803_v11  ;;  %v18108_v11 = vld [vmem:[#allocation49_spill] sm:$0xff] }
 0x7b5   :  { %v6805_v63 = vmul.f32 0.5, %v6804_v48 }
 0x7b7   :  { %v6806_v36 = vsub.f32 1.5, %v6805_v63  ;;  %v18110_v63 = vld [vmem:[#allocation150_spill] sm:$0xff] }
 0x7b9   :  { %v6807_v31 = vmul.f32 %v8661_v56, %v6806_v36 }
 0x7bb   :  { %v6811_v12 = vsel %vm6810_vm7, %v8661_v56, %v6807_v31 }
 0x7bc   :  { %v6812_v58 = vmul.f32 %v6811_v12, %v6800_v20  ;;  %v18112_v20 = vld [vmem:[#allocation52_spill] sm:$0xff] }
 0x7be   :  { %v6814_v10 = vmul.f32 %v6812_v58, %v6796_v33  ;;  %v15475_v8 = vperm.slane %v6812_v58, 0  ;;  %v18105_v33 = vld [vmem:[#allocation72_spill] sm:$0xff]  ;;  %v18113_v58 = vld [vmem:[#allocation130_spill] sm:$0xff] }
 0x7c0   :  { %18090 = vst [vmem:[#allocation23_spill] sm:$0xff] %v15475_v8  ;;  %v6815_v17 = vsub.f32 %v6813_v24, %v6814_v10  ;;  %v6882_v54 = vmul.f32 %v15475_v8, %v6016_v46  ;;  %v15480_v60 = vmul.f32 %v15475_v8, %v18091_v0  ;;  %v15486_v43 = vmul.f32 %v15475_v8, %v18092_v25  ;;  %v18114_v10 = vld [vmem:[#allocation80_spill] sm:$0xff]  ;;  %v18116_v25 = vld [vmem:[#allocation35_spill] sm:$0xff] }
 0x7c1   :  { %v15490_v62 = vmul.f32 %v15475_v8, %v18094_v22  ;;  %v15494_v15 = vmul.f32 %v15475_v8, %v18095_v35  ;;  %v15498_v46 = vmul.f32 %v15475_v8, %v18096_v7  ;;  %v15502_v6 = vmul.f32 %v15475_v8, %v14777_v47  ;;  %v18102_v47 = vld [vmem:[#allocation102_spill] sm:$0xff] }
 0x7c2   :  { %v15482_v49 = vperm.slane %v6815_v17, 0  ;;  %18093 = vst [vmem:[#allocation66_spill] sm:$0xff] %v15486_v43  ;;  %v15506_v26 = vmul.f32 %v15475_v8, %v18097_v44  ;;  %v15510_v3 = vmul.f32 %v15475_v8, %v18098_v2  ;;  %v15517_v39 = vmul.f32 %v15475_v8, %v18100_v14  ;;  %v18117_v35 = vld [vmem:[#allocation146_spill] sm:$0xff]  ;;  %v18118_v44 = vld [vmem:[#allocation121_spill] sm:$0xff]  ;;  %v18119_v14 = vld [vmem:[#allocation87_spill] sm:$0xff] }
 0x7c3   :  { %v15521_v45 = vmul.f32 %v15475_v8, %v18101_v61  ;;  %v15525_v38 = vmul.f32 %v15475_v8, %v18102_v47  ;;  %v15529_v27 = vmul.f32 %v15475_v8, %v18103_v23  ;;  %v6831_v37 = vmul.f32 %v15475_v8, %v18104_v16  ;;  %v18120_v47 = vld [vmem:[#allocation113_spill] sm:$0xff]  ;;  %v18121_v16 = vld [vmem:[#allocation16_spill] sm:$0xff] }
 0x7c4   :  { %v15513_v4 = vadd.f32 %v15482_v49, %v6882_v54  ;;  %v6832_v55 = vmul.f32 %v15475_v8, %v18105_v33  ;;  %v6833_v5 = vmul.f32 %v15475_v8, %v18106_v50  ;;  %v6834_v56 = vmul.f32 %v15475_v8, %v18107_v41  ;;  %v18115_v54 = vld [vmem:[#allocation135_spill] sm:$0xff] }
 0x7c5   :  { %v15541_v48 = vmul.f32 %v15475_v8, %v18108_v11  ;;  %v15545_v36 = vmul.f32 %v15475_v8, %v18110_v63  ;;  %v15549_v31 = vmul.f32 %v15475_v8, %v18112_v20  ;;  %v15554_v24 = vmul.f32 %v15475_v8, %v18113_v58  ;;  %v18122_v50 = vld [vmem:[#allocation7_spill] sm:$0xff]  ;;  %v18123_v11 = vld [vmem:[#allocation108_spill] sm:$0xff]  ;;  %v18124_v20 = vld [vmem:[#allocation137_spill] sm:$0xff] }
 0x7c6   :  { %18099 = vst [vmem:[#allocation34_spill] sm:$0xff] %v15513_v4  ;;  %v15558_v17 = vmul.f32 %v15475_v8, %v18114_v10  ;;  %v15562_v0 = vmul.f32 %v15475_v8, %v18115_v54  ;;  %v15566_v22 = vmul.f32 %v15475_v8, %v18116_v25  ;;  %v15570_v7 = vmul.f32 %v15475_v8, %v18117_v35  ;;  %v18125_v10 = vld [vmem:[#allocation32_spill] sm:$0xff]  ;;  %v18126_v25 = vld [vmem:[#allocation17_spill] sm:$0xff]  ;;  %v18139_v4 = vld [vmem:[#allocation155_spill] sm:$0xff] }
 0x7c7   :  { %18109 = vst [vmem:[#allocation120_spill] sm:$0xff] %v15541_v48  ;;  %v15574_v2 = vmul.f32 %v15475_v8, %v18118_v44  ;;  %v15578_v61 = vmul.f32 %v15475_v8, %v18119_v14  ;;  %v15582_v23 = vmul.f32 %v15475_v8, %v18120_v47  ;;  %v15586_v33 = vmul.f32 %v15475_v8, %v18121_v16  ;;  %v18128_v44 = vld [vmem:[#allocation28_spill] sm:$0xff]  ;;  %v18130_v47 = vld [vmem:[#allocation143_spill] sm:$0xff] }
 0x7c8   :  { %18111 = vst [vmem:[#allocation101_spill] sm:$0xff] %v15545_v36  ;;  %v15590_v41 = vmul.f32 %v15475_v8, %v18122_v50  ;;  %v15594_v63 = vmul.f32 %v15475_v8, %v18123_v11  ;;  %v6849_v58 = vmul.f32 %v15475_v8, %v18124_v20  ;;  %v6850_v54 = vmul.f32 %v15475_v8, %v18125_v10  ;;  %v18131_v50 = vld [vmem:[#allocation90_spill] sm:$0xff]  ;;  %v18133_v10 = vld [vmem:[#allocation96_spill] sm:$0xff] }
 0x7c9   :  { %v15602_v35 = vmul.f32 %v15475_v8, %v18126_v25  ;;  %v15606_v14 = vmul.f32 %v15475_v8, %v18128_v44  ;;  %v15610_v16 = vmul.f32 %v15475_v8, %v18130_v47  ;;  %v15614_v11 = vmul.f32 %v15475_v8, %v18131_v50  ;;  %v18132_v20 = vld [vmem:[#allocation162_spill] sm:$0xff] }
 0x7ca   :  { %v15618_v12 = vmul.f32 %v15475_v8, %v18132_v20  ;;  %v15622_v25 = vmul.f32 %v15475_v8, %v18133_v10  ;;  %v15626_v44 = vmul.f32 %v15475_v8, %v18134_v18  ;;  %v15630_v47 = vmul.f32 %v15475_v8, %v18135_v52 }
 0x7cb   :  { %18127 = vst [vmem:[#allocation157_spill] sm:$0xff] %v15602_v35  ;;  %v15634_v50 = vmul.f32 %v15475_v8, %v18136_v1  ;;  %v15638_v20 = vmul.f32 %v15475_v8, %v18137_v42  ;;  %v15642_v10 = vmul.f32 %v15475_v8, %v18138_v59  ;;  %v15646_v18 = vmul.f32 %v15475_v8, %v15235_v34  ;;  %v18140_v1 = vld [vmem:[#allocation58_spill] sm:$0xff] }
 0x7cc   :  { %18129 = vst [vmem:[#allocation78_spill] sm:$0xff] %v15606_v14  ;;  %v6863_v52 = vmul.f32 %v15475_v8, %v15244_v40  ;;  %v6864_v14 = vmul.f32 %v15475_v8, %v18139_v4  ;;  %v6865_v35 = vmul.f32 %v15475_v8, %v18140_v1  ;;  %v6866_v42 = vmul.f32 %v15475_v8, %v15278_v9 }
 0x7cd   :  { %v15658_v59 = vmul.f32 %v15475_v8, %v15353_v53  ;;  %v15662_v34 = vmul.f32 %v15475_v8, %v15374_v57  ;;  %v15666_v40 = vmul.f32 %v15475_v8, %v15389_v13  ;;  %v15670_v4 = vmul.f32 %v15475_v8, %v15400_v32 }
 0x7ce   :  { %v15674_v1 = vmul.f32 %v15475_v8, %v15407_v29  ;;  %v15678_v9 = vmul.f32 %v15475_v8, %v15417_v21  ;;  %v15682_v53 = vmul.f32 %v15475_v8, %v15425_v30  ;;  %v15686_v57 = vmul.f32 %v15475_v8, %v15432_v19 }
 0x7cf   :  { %18141 = vst [vmem:[#allocation70_spill] sm:$0xff] %v15658_v59  ;;  %v15690_v13 = vmul.f32 %v15475_v8, %v15439_v28  ;;  %v6881_v32 = vmul.f32 %v15475_v8, %v15451_v51  ;;  %v6900_v29 = vadd.f32 %v15482_v49, %v6833_v5  ;;  %v6901_v21 = vadd.f32 %v15482_v49, %v6834_v56 }
 0x7d0   :  { %18142 = vst [vmem:[#allocation141_spill] sm:$0xff] %v15662_v34  ;;  %v6916_v59 = vadd.f32 %v15482_v49, %v6849_v58  ;;  %v6917_v30 = vadd.f32 %v15482_v49, %v6850_v54  ;;  %v6933_v19 = vadd.f32 %v15482_v49, %v6866_v42  ;;  %v6898_v28 = vadd.f32 %v15482_v49, %v6831_v37 }
 0x7d1   :  { %18143 = vst [vmem:[#allocation159_spill] sm:$0xff] %v15666_v40  ;;  %v6932_v40 = vadd.f32 %v15482_v49, %v6865_v35  ;;  %v15701_v34 = vadd.f32 %v15482_v49, %v6881_v32  ;;  %v6899_v58 = vadd.f32 %v15482_v49, %v6832_v55  ;;  %v6914_v55 = vadd.f32 %v15482_v49, %v15590_v41 }
 0x7d2   :  { %18144 = vst [vmem:[#allocation77_spill] sm:$0xff] %v15670_v4  ;;  %v6965_v4 = vmax.f32 %v6901_v21, 0.0  ;;  %v6980_v51 = vmax.f32 %v6916_v59, 0.0  ;;  %v6981_v8 = vmax.f32 %v6917_v30, 0.0  ;;  %v6962_v32 = vmax.f32 %v6898_v28, 0.0 }
 0x7d3   :  { %18145 = vst [vmem:[#allocation59_spill] sm:$0xff] %v15674_v1  ;;  %v6964_v1 = vmax.f32 %v6900_v29, 0.0  ;;  %v6996_v5 = vmax.f32 %v6932_v40, 0.0  ;;  %v6963_v36 = vmax.f32 %v6899_v58, 0.0  ;;  %v6930_v28 = vadd.f32 %v15482_v49, %v6863_v52 }
 0x7d4   :  { %18146 = vst [vmem:[#allocation147_spill] sm:$0xff] %v15678_v9  ;;  %v7029_v9 = vpack.c.bf16 %v6965_v4, %v6965_v4  ;;  %v7044_v35 = vpack.c.bf16 %v6980_v51, %v6980_v51  ;;  %v7026_v40 = vpack.c.bf16 %v6962_v32, %v6962_v32  ;;  %v6912_v51 = vadd.f32 %v15482_v49, %v15582_v23 }
 0x7d5   :  { %18147 = vst [vmem:[#allocation127_spill] sm:$0xff] %v15682_v53  ;;  %v6997_v53 = vmax.f32 %v6933_v19, 0.0  ;;  %v7028_v54 = vpack.c.bf16 %v6964_v1, %v6964_v1  ;;  %v7060_v42 = vpack.c.bf16 %v6996_v5, %v6996_v5  ;;  %v7027_v19 = vpack.c.bf16 %v6963_v36, %v6963_v36 }
 0x7d6   :  { %18148 = vst [vmem:[#allocation158_spill] sm:$0xff] %v15686_v57  ;;  %v7139_v37 = vunpack.c.l.b16 %v7029_v9  ;;  %v7154_v29 = vunpack.c.l.b16 %v7044_v35  ;;  %v7136_v1 = vunpack.c.l.b16 %v7026_v40  ;;  %v6978_v9 = vmax.f32 %v6914_v55, 0.0 }
 0x7d7   :  { %18149 = vst [vmem:[#allocation156_spill] sm:$0xff] %v15690_v13  ;;  %v7045_v13 = vpack.c.bf16 %v6981_v8, %v6981_v8  ;;  %v7061_v57 = vpack.c.bf16 %v6997_v53, %v6997_v53  ;;  %v7138_v48 = vunpack.c.l.b16 %v7028_v54  ;;  %v7272_v59 = vunpack.c.l.b16 %v7060_v42 }
 0x7d8   :  { %v6915_v8 = vadd.f32 %v15482_v49, %v15594_v63  ;;  %v7137_v53 = vunpack.c.l.b16 %v7027_v19  ;;  %v6994_v41 = vmax.f32 %v6930_v28, 0.0  ;;  %v6897_v63 = vadd.f32 %v15482_v49, %v15529_v27 }
 0x7d9   :  { %v7155_v21 = vunpack.c.l.b16 %v7045_v13  ;;  %v7273_v30 = vunpack.c.l.b16 %v7061_v57  ;;  %v7163_v43 = vpack.c.b16 %v7139_v37, %v7138_v48  ;;  %v6931_v57 = vadd.f32 %v15482_v49, %v6864_v14 }
 0x7da   :  { %v6979_v13 = vmax.f32 %v6915_v8, 0.0  ;;  %v6896_v48 = vadd.f32 %v15482_v49, %v15525_v38  ;;  %v7162_v36 = vpack.c.b16 %v7137_v53, %v7136_v1  ;;  %v7042_v5 = vpack.c.bf16 %v6978_v9, %v6978_v9 }
 0x7db   :  { %v7171_v56 = vpack.c.b16 %v7155_v21, %v7154_v29  ;;  %v7297_v4 = vpack.c.b16 %v7273_v30, %v7272_v59  ;;  %7188 = vmatpush.bf16.msrb.mxu1 %v7163_v43  ;;  %v6995_v43 = vmax.f32 %v6931_v57, 0.0  ;;  %v7058_v58 = vpack.c.bf16 %v6994_v41, %v6994_v41 }
 0x7dc   :  { %v7043_v52 = vpack.c.bf16 %v6979_v13, %v6979_v13  ;;  %v6961_v54 = vmax.f32 %v6897_v63, 0.0  ;;  %v6913_v14 = vadd.f32 %v15482_v49, %v15586_v33  ;;  %v6976_v35 = vmax.f32 %v6912_v51, 0.0 }
 0x7dd   :  { %7202 = vmatpush.bf16.msrb.mxu2 %v7171_v56  ;;  %7322 = vmatpush.bf16.msrb.mxu3 %v7297_v4  ;;  %v6960_v56 = vmax.f32 %v6896_v48, 0.0  ;;  %v7152_v38 = vunpack.c.l.b16 %v7042_v5  ;;  %v7059_v32 = vpack.c.bf16 %v6995_v43, %v6995_v43  ;;  %v7270_v29 = vunpack.c.l.b16 %v7058_v58 }
 0x7de   :  { %v7153_v42 = vunpack.c.l.b16 %v7043_v52  ;;  %v7025_v27 = vpack.c.bf16 %v6961_v54, %v6961_v54  ;;  %v6977_v21 = vmax.f32 %v6913_v14, 0.0  ;;  %v7040_v59 = vpack.c.bf16 %v6976_v35, %v6976_v35 }
 0x7df   :  { %7189 = vmatpush.bf16.msrb.mxu1 %v7162_v36  ;;  %v7024_v37 = vpack.c.bf16 %v6960_v56, %v6960_v56  ;;  %v7271_v30 = vunpack.c.l.b16 %v7059_v32  ;;  %v6928_v19 = vadd.f32 %v15482_v49, %v15642_v10  ;;  %v6929_v33 = vadd.f32 %v15482_v49, %v15646_v18 }
 0x7e0   :  { %v7170_v23 = vpack.c.b16 %v7153_v42, %v7152_v38  ;;  %v7135_v55 = vunpack.c.l.b16 %v7025_v27  ;;  %v7041_v8 = vpack.c.bf16 %v6977_v21, %v6977_v21  ;;  %v7150_v4 = vunpack.c.l.b16 %v7040_v59 }
 0x7e1   :  { %v7134_v40 = vunpack.c.l.b16 %v7024_v37  ;;  %v7296_v1 = vpack.c.b16 %v7271_v30, %v7270_v29  ;;  %v6992_v53 = vmax.f32 %v6928_v19, 0.0  ;;  %v6894_v28 = vadd.f32 %v15482_v49, %v15517_v39 }
 0x7e2   :  { %7203 = vmatpush.bf16.msrb.mxu2 %v7170_v23  ;;  %v6895_v9 = vadd.f32 %v15482_v49, %v15521_v45  ;;  %v7151_v57 = vunpack.c.l.b16 %v7041_v8  ;;  %v6993_v48 = vmax.f32 %v6929_v33, 0.0  ;;  %v6910_v10 = vadd.f32 %v15482_v49, %v15574_v2 }
 0x7e3   :  { %v7161_v13 = vpack.c.b16 %v7135_v55, %v7134_v40  ;;  %7323 = vmatpush.bf16.msrb.mxu3 %v7296_v1  ;;  %v7056_v36 = vpack.c.bf16 %v6992_v53, %v6992_v53  ;;  %v6958_v41 = vmax.f32 %v6894_v28, 0.0  ;;  %v6911_v18 = vadd.f32 %v15482_v49, %v15578_v61 }
 0x7e4   :  { %v6959_v63 = vmax.f32 %v6895_v9, 0.0  ;;  %v7169_v51 = vpack.c.b16 %v7151_v57, %v7150_v4  ;;  %v7057_v5 = vpack.c.bf16 %v6993_v48, %v6993_v48  ;;  %v6974_v39 = vmax.f32 %v6910_v10, 0.0 }
 0x7e5   :  { %7190 = vmatpush.bf16.msrb.mxu1 %v7161_v13  ;;  %v6926_v45 = vadd.f32 %v15482_v49, %v15634_v50  ;;  %v7268_v52 = vunpack.c.l.b16 %v7056_v36  ;;  %v7022_v43 = vpack.c.bf16 %v6958_v41, %v6958_v41  ;;  %v6975_v58 = vmax.f32 %v6911_v18, 0.0 }
 0x7e6   :  { %v7023_v56 = vpack.c.bf16 %v6959_v63, %v6959_v63  ;;  %7204 = vmatpush.bf16.msrb.mxu2 %v7169_v51  ;;  %v7269_v2 = vunpack.c.l.b16 %v7057_v5  ;;  %v7038_v54 = vpack.c.bf16 %v6974_v39, %v6974_v39  ;;  %v6927_v14 = vadd.f32 %v15482_v49, %v15638_v20 }
 0x7e7   :  { %v6990_v35 = vmax.f32 %v6926_v45, 0.0  ;;  %v7132_v38 = vunpack.c.l.b16 %v7022_v43  ;;  %v7039_v42 = vpack.c.bf16 %v6975_v58, %v6975_v58  ;;  %v6892_v32 = vadd.f32 %v15482_v49, %v15506_v26 }
 0x7e8   :  { %v7133_v61 = vunpack.c.l.b16 %v7023_v56  ;;  %v7295_v37 = vpack.c.b16 %v7269_v2, %v7268_v52  ;;  %v7148_v29 = vunpack.c.l.b16 %v7038_v54  ;;  %v6991_v50 = vmax.f32 %v6927_v14, 0.0 }
 0x7e9   :  { %v7054_v27 = vpack.c.bf16 %v6990_v35, %v6990_v35  ;;  %v7149_v59 = vunpack.c.l.b16 %v7039_v42  ;;  %v6893_v23 = vadd.f32 %v15482_v49, %v15510_v3  ;;  %v6956_v30 = vmax.f32 %v6892_v32, 0.0 }
 0x7ea   :  { %v7160_v21 = vpack.c.b16 %v7133_v61, %v7132_v38  ;;  %7324 = vmatpush.bf16.msrb.mxu3 %v7295_v37  ;;  %v7055_v40 = vpack.c.bf16 %v6991_v50, %v6991_v50  ;;  %v6908_v19 = vadd.f32 %v15482_v49, %v15566_v22  ;;  %v6909_v55 = vadd.f32 %v15482_v49, %v15570_v7 }
 0x7eb   :  { %v7266_v20 = vunpack.c.l.b16 %v7054_v27  ;;  %v7168_v26 = vpack.c.b16 %v7149_v59, %v7148_v29  ;;  %v6957_v8 = vmax.f32 %v6893_v23, 0.0  ;;  %v7020_v4 = vpack.c.bf16 %v6956_v30, %v6956_v30 }
 0x7ec   :  { %7191 = vmatpush.bf16.msrb.mxu1 %v7160_v21  ;;  %v6924_v33 = vadd.f32 %v15482_v49, %v15626_v44  ;;  %v7267_v1 = vunpack.c.l.b16 %v7055_v40  ;;  %v6972_v53 = vmax.f32 %v6908_v19, 0.0  ;;  %v6973_v3 = vmax.f32 %v6909_v55, 0.0 }
 0x7ed   :  { %v6925_v28 = vadd.f32 %v15482_v49, %v15630_v47  ;;  %7205 = vmatpush.bf16.msrb.mxu2 %v7168_v26  ;;  %v7021_v9 = vpack.c.bf16 %v6957_v8, %v6957_v8  ;;  %v7130_v13 = vunpack.c.l.b16 %v7020_v4  ;;  %v6890_v7 = vadd.f32 %v15482_v49, %v15498_v46 }
 0x7ee   :  { %v6988_v22 = vmax.f32 %v6924_v33, 0.0  ;;  %v7294_v57 = vpack.c.b16 %v7267_v1, %v7266_v20  ;;  %v7036_v48 = vpack.c.bf16 %v6972_v53, %v6972_v53  ;;  %v7037_v10 = vpack.c.bf16 %v6973_v3, %v6973_v3 }
 0x7ef   :  { %v6989_v36 = vmax.f32 %v6925_v28, 0.0  ;;  %v7131_v41 = vunpack.c.l.b16 %v7021_v9  ;;  %v6891_v44 = vadd.f32 %v15482_v49, %v15502_v6  ;;  %v6954_v18 = vmax.f32 %v6890_v7, 0.0 }
 0x7f0   :  { %v7052_v63 = vpack.c.bf16 %v6988_v22, %v6988_v22  ;;  %7325 = vmatpush.bf16.msrb.mxu3 %v7294_v57  ;;  %v7146_v51 = vunpack.c.l.b16 %v7036_v48  ;;  %v7147_v47 = vunpack.c.l.b16 %v7037_v10  ;;  %v6906_v39 = vadd.f32 %v15482_v49, %v15558_v17  ;;  %v18150_v57 = vld [vmem:[#allocation66_spill] sm:$0xff] }
 0x7f1   :  { %v7053_v5 = vpack.c.bf16 %v6989_v36, %v6989_v36  ;;  %v7159_v45 = vpack.c.b16 %v7131_v41, %v7130_v13  ;;  %v6955_v46 = vmax.f32 %v6891_v44, 0.0  ;;  %v7018_v43 = vpack.c.bf16 %v6954_v18, %v6954_v18  ;;  %v18151_v41 = vld [vmem:[#allocation120_spill] sm:$0xff] }
 0x7f2   :  { %v7264_v52 = vunpack.c.l.b16 %v7052_v63  ;;  %v7167_v56 = vpack.c.b16 %v7147_v47, %v7146_v51  ;;  %v6907_v2 = vadd.f32 %v15482_v49, %v15562_v0  ;;  %v6970_v54 = vmax.f32 %v6906_v39, 0.0  ;;  %v18152_v51 = vld [vmem:[#allocation101_spill] sm:$0xff] }
 0x7f3   :  { %v7265_v58 = vunpack.c.l.b16 %v7053_v5  ;;  %7192 = vmatpush.bf16.msrb.mxu1 %v7159_v45  ;;  %v7019_v6 = vpack.c.bf16 %v6955_v46, %v6955_v46  ;;  %v7128_v14 = vunpack.c.l.b16 %v7018_v43  ;;  %v6922_v35 = vadd.f32 %v15482_v49, %v15618_v12  ;;  %v18153_v45 = vld [vmem:[#allocation157_spill] sm:$0xff] }
 0x7f4   :  { %v6923_v38 = vadd.f32 %v15482_v49, %v15622_v25  ;;  %7206 = vmatpush.bf16.msrb.mxu2 %v7167_v56  ;;  %v6971_v61 = vmax.f32 %v6907_v2, 0.0  ;;  %v7034_v42 = vpack.c.bf16 %v6970_v54, %v6970_v54  ;;  %v6888_v32 = vadd.f32 %v15482_v49, %v15490_v62 }
 0x7f5   :  { %v7293_v17 = vpack.c.b16 %v7265_v58, %v7264_v52  ;;  %v7129_v37 = vunpack.c.l.b16 %v7019_v6  ;;  %v6986_v29 = vmax.f32 %v6922_v35, 0.0  ;;  %v6889_v50 = vadd.f32 %v15482_v49, %v15494_v15  ;;  %v18154_v6 = vld [vmem:[#allocation78_spill] sm:$0xff] }
 0x7f6   :  { %v6987_v0 = vmax.f32 %v6923_v38, 0.0  ;;  %v7035_v27 = vpack.c.bf16 %v6971_v61, %v6971_v61  ;;  %v7144_v21 = vunpack.c.l.b16 %v7034_v42  ;;  %v6952_v12 = vmax.f32 %v6888_v32, 0.0 }
 0x7f7   :  { %7326 = vmatpush.bf16.msrb.mxu3 %v7293_v17  ;;  %v6904_v25 = vadd.f32 %v15482_v49, %v15549_v31  ;;  %v7158_v59 = vpack.c.b16 %v7129_v37, %v7128_v14  ;;  %v7050_v23 = vpack.c.bf16 %v6986_v29, %v6986_v29  ;;  %v6953_v40 = vmax.f32 %v6889_v50, 0.0 }
 0x7f8   :  { %v7051_v30 = vpack.c.bf16 %v6987_v0, %v6987_v0  ;;  %v7145_v20 = vunpack.c.l.b16 %v7035_v27  ;;  %v7016_v19 = vpack.c.bf16 %v6952_v12, %v6952_v12  ;;  %v6905_v62 = vadd.f32 %v15482_v49, %v15554_v24  ;;  %v18156_v12 = vld [vmem:[#allocation34_spill] sm:$0xff] }
 0x7f9   :  { %v6968_v55 = vmax.f32 %v6904_v25, 0.0  ;;  %7193 = vmatpush.bf16.msrb.mxu1 %v7158_v59  ;;  %v7262_v26 = vunpack.c.l.b16 %v7050_v23  ;;  %v7017_v8 = vpack.c.bf16 %v6953_v40, %v6953_v40  ;;  %v6920_v4 = vadd.f32 %v15482_v49, %v15610_v16 }
 0x7fa   :  { %v7263_v15 = vunpack.c.l.b16 %v7051_v30  ;;  %v7166_v33 = vpack.c.b16 %v7145_v20, %v7144_v21  ;;  %v7126_v1 = vunpack.c.l.b16 %v7016_v19  ;;  %v6969_v31 = vmax.f32 %v6905_v62, 0.0  ;;  %v18158_v20 = vld [vmem:[#allocation158_spill] sm:$0xff] }
 0x7fb   :  { %v7032_v53 = vpack.c.bf16 %v6968_v55, %v6968_v55  ;;  %v7127_v28 = vunpack.c.l.b16 %v7017_v8  ;;  %v6921_v9 = vadd.f32 %v15482_v49, %v15614_v11  ;;  %v6984_v13 = vmax.f32 %v6920_v4, 0.0  ;;  %v18161_v4 = vld [vmem:[#allocation127_spill] sm:$0xff] }
 0x7fc   :  { %v7292_v3 = vpack.c.b16 %v7263_v15, %v7262_v26  ;;  %7207 = vmatpush.bf16.msrb.mxu2 %v7166_v33  ;;  %v7033_v24 = vpack.c.bf16 %v6969_v31, %v6969_v31  ;;  %v6886_v7 = vadd.f32 %v15482_v49, %v15480_v60  ;;  %v6887_v48 = vadd.f32 %v15482_v49, %v18150_v57  ;;  %v18160_v15 = vld [vmem:[#allocation147_spill] sm:$0xff] }
 0x7fd   :  { %v7142_v22 = vunpack.c.l.b16 %v7032_v53  ;;  %v7157_v16 = vpack.c.b16 %v7127_v28, %v7126_v1  ;;  %v6985_v10 = vmax.f32 %v6921_v9, 0.0  ;;  %v7048_v36 = vpack.c.bf16 %v6984_v13, %v6984_v13 }
 0x7fe   :  { %7327 = vmatpush.bf16.msrb.mxu3 %v7292_v3  ;;  %v6902_v63 = vadd.f32 %v15482_v49, %v18151_v41  ;;  %v7143_v44 = vunpack.c.l.b16 %v7033_v24  ;;  %v6950_v18 = vmax.f32 %v6886_v7, 0.0  ;;  %v6951_v11 = vmax.f32 %v6887_v48, 0.0  ;;  %v18162_v3 = vld [vmem:[#allocation77_spill] sm:$0xff] }
 0x7ff   :  { %v6903_v47 = vadd.f32 %v15482_v49, %v18152_v51  ;;  %7194 = vmatpush.bf16.msrb.mxu1 %v7157_v16  ;;  %v7049_v5 = vpack.c.bf16 %v6985_v10, %v6985_v10  ;;  %v7260_v39 = vunpack.c.l.b16 %v7048_v36  ;;  %v6918_v52 = vadd.f32 %v15482_v49, %v18153_v45  ;;  %v18167_v45 = vld [vmem:[#allocation23_spill] sm:$0xff] }
 0x800   :  { %v6966_v60 = vmax.f32 %v6902_v63, 0.0  ;;  %v7165_v46 = vpack.c.b16 %v7143_v44, %v7142_v22  ;;  %v7014_v43 = vpack.c.bf16 %v6950_v18, %v6950_v18  ;;  %v7015_v56 = vpack.c.bf16 %v6951_v11, %v6951_v11  ;;  %v18163_v22 = vld [vmem:[#allocation59_spill] sm:$0xff]  ;;  %v18164_v44 = vld [vmem:[#allocation141_spill] sm:$0xff] }
 0x801   :  { %v6967_v58 = vmax.f32 %v6903_v47, 0.0  ;;  %v7261_v2 = vunpack.c.l.b16 %v7049_v5  ;;  %v6919_v14 = vadd.f32 %v15482_v49, %v18154_v6  ;;  %v6982_v35 = vmax.f32 %v6918_v52, 0.0  ;;  %v18165_v5 = vld [vmem:[#allocation159_spill] sm:$0xff]  ;;  %v18168_v6 = vld [vmem:[#allocation70_spill] sm:$0xff] }
 0x802   :  { %v7030_v54 = vpack.c.bf16 %v6966_v60, %v6966_v60  ;;  %7208 = vmatpush.bf16.msrb.mxu2 %v7165_v46  ;;  %v7124_v38 = vunpack.c.l.b16 %v7014_v43  ;;  %v7125_v17 = vunpack.c.l.b16 %v7015_v56  ;;  %v18155_v42 = vmax.f32 %v15701_v34, 0.0  ;;  %v18159_v34 = vld [vmem:[#allocation156_spill] sm:$0xff]  ;;  %v18166_v60 = vld [vmem:[#allocation55_spill] sm:$0xff] }
 0x803   :  { %v7031_v61 = vpack.c.bf16 %v6967_v58, %v6967_v58  ;;  %v7291_v37 = vpack.c.b16 %v7261_v2, %v7260_v39  ;;  %v6983_v0 = vmax.f32 %v6919_v14, 0.0  ;;  %v7046_v50 = vpack.c.bf16 %v6982_v35, %v6982_v35  ;;  %v18169_v35 = vld [vmem:[#allocation60_spill] sm:$0xff] }
 0x804   :  { %v7076_v32 = vpack.c.bf16 %v18155_v42, %v18155_v42  ;;  %v7140_v29 = vunpack.c.l.b16 %v7030_v54  ;;  %v7156_v27 = vpack.c.b16 %v7125_v17, %v7124_v38  ;;  %v18157_v25 = vmax.f32 %v18156_v12, 0.0 }
 0x805   :  { %v7141_v21 = vunpack.c.l.b16 %v7031_v61  ;;  %7328 = vmatpush.bf16.msrb.mxu3 %v7291_v37  ;;  %v7047_v30 = vpack.c.bf16 %v6983_v0, %v6983_v0  ;;  %v7258_v40 = vunpack.c.l.b16 %v7046_v50  ;;  %v6946_v19 = vadd.f32 %v15482_v49, %v18158_v20  ;;  %v18170_v61 = vld [vmem:[#allocation154_spill] sm:$0xff]  ;;  %v8364_v0 = vld [vmem:[%s16022_s8] sm:$0xf]  ;;  %v8600_v20 = vld [vmem:[%s16022_s8 + $0x4] sm:$0xf] }
 0x806   :  { %v7077_v59 = vpack.c.bf16 %v18157_v25, %v18157_v25  ;;  %v7288_v23 = vunpack.c.l.b16 %v7076_v32  ;;  %v6947_v62 = vadd.f32 %v15482_v49, %v18159_v34  ;;  %7195 = vmatpush.bf16.msrb.mxu1 %v7156_v27  ;;  %v6944_v8 = vadd.f32 %v15482_v49, %v18160_v15  ;;  %v8601_v50 = vld [vmem:[%s16022_s8 + $0x4] sm:$0xf0]  ;;  %v18171_v25 = vld [vmem:[#allocation79_spill] sm:$0xff] }
 0x807   :  { %v7164_v55 = vpack.c.b16 %v7141_v21, %v7140_v29  ;;  %v6945_v33 = vadd.f32 %v15482_v49, %v18161_v4  ;;  %v7259_v1 = vunpack.c.l.b16 %v7047_v30  ;;  %v7010_v31 = vmax.f32 %v6946_v19, 0.0  ;;  %v8366_v19 = vld [vmem:[%s16022_s8 + $0x8] sm:$0xf0] }
 0x808   :  { %v7289_v26 = vunpack.c.l.b16 %v7077_v59  ;;  %v7011_v53 = vmax.f32 %v6947_v62, 0.0  ;;  %v6942_v28 = vadd.f32 %v15482_v49, %v18162_v3  ;;  %v7008_v13 = vmax.f32 %v6944_v8, 0.0  ;;  %v8372_v62 = vld [vmem:[%s16022_s8 + $0x10] sm:$0xf] }
 0x809   :  { %7209 = vmatpush.bf16.msrb.mxu2 %v7164_v55  ;;  %v7009_v24 = vmax.f32 %v6945_v33, 0.0  ;;  %v6943_v7 = vadd.f32 %v15482_v49, %v18163_v22  ;;  %v7290_v57 = vpack.c.b16 %v7259_v1, %v7258_v40  ;;  %v7074_v48 = vpack.c.bf16 %v7010_v31, %v7010_v31  ;;  %v8603_v55 = vld [vmem:[%s16022_s8 + $0x14] sm:$0xf0] }
 0x80a   :  { %v7305_v9 = vpack.c.b16 %v7289_v26, %v7288_v23  ;;  %v7075_v16 = vpack.c.bf16 %v7011_v53, %v7011_v53  ;;  %v7006_v10 = vmax.f32 %v6942_v28, 0.0  ;;  %v7072_v36 = vpack.c.bf16 %v7008_v13, %v7008_v13  ;;  %v18172_v26 = vld [vmem:[#allocation31_spill] sm:$0xff] }
 0x80b   :  { %v7073_v41 = vpack.c.bf16 %v7009_v24, %v7009_v24  ;;  %v7007_v63 = vmax.f32 %v6943_v7, 0.0  ;;  %v6940_v18 = vadd.f32 %v15482_v49, %v18164_v44  ;;  %7329 = vmatpush.bf16.msrb.mxu3 %v7290_v57  ;;  %v7286_v11 = vunpack.c.l.b16 %v7074_v48 }
 0x80c   :  { %7336 = vmatpush.bf16.msra.mxu1 %v7305_v9  ;;  %v7287_v51 = vunpack.c.l.b16 %v7075_v16  ;;  %v7070_v47 = vpack.c.bf16 %v7006_v10, %v7006_v10  ;;  %v6941_v39 = vadd.f32 %v15482_v49, %v18165_v5  ;;  %v6872_v52 = vmul.f32 %v18167_v45, %v18166_v60  ;;  %v8602_v5 = vld [vmem:[%s16022_s8 + $0x14] sm:$0xf] }
 0x80d   :  { %v7284_v46 = vunpack.c.l.b16 %v7072_v36  ;;  %v7071_v43 = vpack.c.bf16 %v7007_v63, %v7007_v63  ;;  %v7004_v56 = vmax.f32 %v6940_v18, 0.0  ;;  %v7285_v2 = vunpack.c.l.b16 %v7073_v41 }
 0x80e   :  { %v7304_v58 = vpack.c.b16 %v7287_v51, %v7286_v11  ;;  %v7005_v54 = vmax.f32 %v6941_v39, 0.0  ;;  %v6938_v14 = vadd.f32 %v15482_v49, %v18168_v6  ;;  %v6869_v38 = vmul.f32 %v18167_v45, %v18169_v35  ;;  %v8374_v39 = vld [vmem:[%s16022_s8 + $0x18] sm:$0xf0]  ;;  %v8608_v6 = vld [vmem:[%s16023_s9 + $0x20] sm:$0xff] }
 0x80f   :  { %v6939_v17 = vadd.f32 %v15482_v49, %v6872_v52  ;;  %v6870_v42 = vmul.f32 %v18167_v45, %v18170_v61  ;;  %v7282_v32 = vunpack.c.l.b16 %v7070_v47  ;;  %v7283_v37 = vunpack.c.l.b16 %v7071_v43  ;;  %v8607_v52 = vld [vmem:[%s16023_s9 + $0x18] sm:$0xff]  ;;  %v8606_v43 = vld [vmem:[%s16023_s9 + $0x10] sm:$0xff]  ;;  %v8613_v61 = vld [vmem:[%s16023_s9 + $0x48] sm:$0xff] }
 0x810   :  { %7337 = vmatpush.bf16.msra.mxu1 %v7304_v58  ;;  %v7068_v29 = vpack.c.bf16 %v7004_v56, %v7004_v56  ;;  %v7069_v27 = vpack.c.bf16 %v7005_v54, %v7005_v54  ;;  %v7002_v21 = vmax.f32 %v6938_v14, 0.0  ;;  %v6936_v12 = vadd.f32 %v15482_v49, %v6869_v38  ;;  %7390 = vmatpush.bf16.msra.mxu2 %v8607_v52  ;;  %v8604_v56 = vld [vmem:[%s16023_s9] sm:$0xff]  ;;  %v8609_v58 = vld [vmem:[%s16023_s9 + $0x28] sm:$0xff]  ;;  %v8610_v14 = vld [vmem:[%s16023_s9 + $0x30] sm:$0xff] }
 0x811   :  { %v6867_v59 = vmul.f32 %v18167_v45, %v18171_v25  ;;  %v7303_v23 = vpack.c.b16 %v7285_v2, %v7284_v46  ;;  %v7003_v30 = vmax.f32 %v6939_v17, 0.0  ;;  %v6937_v40 = vadd.f32 %v15482_v49, %v6870_v42  ;;  %v8605_v46 = vld [vmem:[%s16023_s9 + $0x8] sm:$0xff]  ;;  %v8611_v2 = vld [vmem:[%s16023_s9 + $0x38] sm:$0xff] }
 0x812   :  { %v8365_v34 = vor.u32 %v8601_v50, %v8364_v0  ;;  %v6868_v15 = vmul.f32 %v18167_v45, %v18172_v26  ;;  %v7302_v8 = vpack.c.b16 %v7283_v37, %v7282_v32  ;;  %v7280_v4 = vunpack.c.l.b16 %v7068_v29  ;;  %7421 = vmatpush.bf16.msra.mxu3 %v8605_v46  ;;  %v8619_v26 = vld [vmem:[%s16023_s9 + $0x78] sm:$0xff] }
 0x813   :  { %v6934_v33 = vadd.f32 %v15482_v49, %v6867_v59  ;;  %v7281_v1 = vunpack.c.l.b16 %v7069_v27  ;;  %v7066_v31 = vpack.c.bf16 %v7002_v21, %v7002_v21  ;;  %v7000_v53 = vmax.f32 %v6936_v12, 0.0  ;;  %v8615_v59 = vld [vmem:[%s16023_s9 + $0x58] sm:$0xff] }
 0x814   :  { %7338 = vmatpush.bf16.msra.mxu1 %v7303_v23  ;;  %v8369_v3 = vor.u32 %v8600_v20, %v8366_v19  ;;  %v7067_v28 = vpack.c.bf16 %v7003_v30, %v7003_v30  ;;  %v7001_v9 = vmax.f32 %v6937_v40, 0.0  ;;  %v6935_v13 = vadd.f32 %v15482_v49, %v6868_v15  ;;  %7391 = vmatpush.bf16.msra.mxu2 %v8606_v43  ;;  %v8617_v40 = vld [vmem:[%s16023_s9 + $0x68] sm:$0xff]  ;;  %v8612_v19 = vld [vmem:[%s16023_s9 + $0x40] sm:$0xff] }
 0x815   :  { %7196 = vmatmul.bf16.vlgmr.msrb.gmra.mxu1 %v8365_v34  ;;  %v8373_v24 = vor.u32 %v8603_v55, %v8372_v62  ;;  %v7301_v22 = vpack.c.b16 %v7281_v1, %v7280_v4  ;;  %v7278_v7 = vunpack.c.l.b16 %v7066_v31  ;;  %v6998_v57 = vmax.f32 %v6934_v33, 0.0  ;;  %v8614_v34 = vld [vmem:[%s16023_s9 + $0x50] sm:$0xff]  ;;  %v8616_v15 = vld [vmem:[%s16023_s9 + $0x60] sm:$0xff] }
 0x816   :  { %7210 = vmatmul.bf16.vlgmr.msrb.gmra.mxu2 %v8369_v3  ;;  %v7279_v48 = vunpack.c.l.b16 %v7067_v28  ;;  %v7064_v16 = vpack.c.bf16 %v7000_v53, %v7000_v53  ;;  %v7065_v10 = vpack.c.bf16 %v7001_v9, %v7001_v9  ;;  %v6999_v36 = vmax.f32 %v6935_v13, 0.0  ;;  %7422 = vmatpush.bf16.msra.mxu3 %v8604_v56  ;;  %v8621_v9 = vld [vmem:[%s16023_s9 + $0x88] sm:$0xff]  ;;  %v8627_v56 = vld [vmem:[%s16023_s9 + $0xb8] sm:$0xff] }
 0x817   :  { %7330 = vmatmul.bf16.vlgmr.msrb.gmra.mxu3 %v8373_v24  ;;  %v7062_v41 = vpack.c.bf16 %v6998_v57, %v6998_v57  ;;  %v8377_v45 = vor.u32 %v8602_v5, %v8374_v39  ;;  %v8623_v24 = vld [vmem:[%s16023_s9 + $0x98] sm:$0xff]  ;;  %v8620_v57 = vld [vmem:[%s16023_s9 + $0x80] sm:$0xff] }
 0x818   :  { %7339 = vmatpush.bf16.msra.mxu1 %v7302_v8  ;;  %v7300_v63 = vpack.c.b16 %v7279_v48, %v7278_v7  ;;  %v7276_v44 = vunpack.c.l.b16 %v7064_v16  ;;  %v7277_v18 = vunpack.c.l.b16 %v7065_v10  ;;  %v7063_v11 = vpack.c.bf16 %v6999_v36, %v6999_v36  ;;  %7458 = vmatpush.bf16.msrb.mxu2 %v8609_v58  ;;  %v8618_v7 = vld [vmem:[%s16023_s9 + $0x70] sm:$0xff]  ;;  %v8625_v10 = vld [vmem:[%s16023_s9 + $0xa8] sm:$0xff] }
 0x819   :  { %v7274_v49 = vunpack.c.l.b16 %v7062_v41 }
 0x81a   :  { %v7299_v51 = vpack.c.b16 %v7277_v18, %v7276_v44  ;;  %v7275_v47 = vunpack.c.l.b16 %v7063_v11  ;;  %7496 = vmatpush.bf16.msrb.mxu3 %v8611_v2 }
 0x81c   :  { %7340 = vmatpush.bf16.msra.mxu1 %v7301_v22  ;;  %v7298_v60 = vpack.c.b16 %v7275_v47, %v7274_v49  ;;  %7459 = vmatpush.bf16.msrb.mxu2 %v8608_v6  ;;  %v8629_v6 = vld [vmem:[%s16023_s9 + $0xc8] sm:$0xff] }
 0x81e   :  { %7497 = vmatpush.bf16.msrb.mxu3 %v8610_v14 }
 0x820   :  { %7341 = vmatpush.bf16.msra.mxu1 %v7300_v63  ;;  %v8622_v63 = vld [vmem:[%s16023_s9 + $0x90] sm:$0xff] }
 0x824   :  { %7342 = vmatpush.bf16.msra.mxu1 %v7299_v51 }
 0x828   :  { %7343 = vmatpush.bf16.msra.mxu1 %v7298_v60 }
 0x82b   :  { %7344 = vmatmul.bf16.vlgmr.msra.gmra.mxu1 %v8377_v45 }
 0x82c   :  { %7534 = vmatpush.bf16.msrb.mxu1 %v8613_v61 }
 0x830   :  { %7535 = vmatpush.bf16.msrb.mxu1 %v8612_v19 }
 0x834   :  { %7648 = vmatpush.bf16.msra.mxu1 %v8619_v26 }
 0x838   :  { %7649 = vmatpush.bf16.msra.mxu1 %v8618_v7 }
 0x892   :  { %v7197_v54 = vpop.f32.mrf.mxu1 }
 0x899   :  { %v7211_v38 = vpop.f32.mrf.mxu2 }
 0x89a   :  { %v15871_v35 = vpop.f32.mrf.mxu1  ;;  %v7212_v17 = vadd.f32 %v7211_v38, %v7197_v54  ;;  %v7331_v32 = vpop.f32.mrf.mxu3  ;;  %v8626_v38 = vld [vmem:[%s16023_s9 + $0xb0] sm:$0xff] }
 0x89c   :  { %v7350_v42 = vpack.c.bf16 %v7212_v17, %v7212_v17 }
 0x89e   :  { %v15876_v29 = vunpack.c.l.b16 %v7350_v42  ;;  %v8631_v42 = vld [vmem:[%s16023_s9 + $0xd8] sm:$0xff] }
 0x8a0   :  { %v7365_v21 = vrot.slane %v15876_v29, 1  ;;  %v7509_v62 = vrot.slane %v15876_v29, 4  ;;  %v7433_v1 = vrot.slane %v15876_v29, 2  ;;  %v7471_v3 = vrot.slane %v15876_v29, 3 }
 0x8a1   :  { %v7623_v48 = vrot.slane %v15876_v29, 7  ;;  %v7213_v41 = vpop.f32.mrf.mxu2  ;;  %v7547_v5 = vrot.slane %v15876_v29, 5  ;;  %v7585_v46 = vrot.slane %v15876_v29, 6 }
 0x8a2   :  { %v7333_v18 = vpop.f32.mrf.mxu3  ;;  %v7214_v49 = vadd.f32 %v7213_v41, %v15871_v35  ;;  %v8624_v35 = vld [vmem:[%s16023_s9 + $0xa0] sm:$0xff] }
 0x8a4   :  { %v7656_v45 = vpack.c.bf16 %v7214_v49, %v7214_v49 }
 0x8a6   :  { %v7665_v54 = vunpack.c.l.b16 %v7656_v45 }
 0x8a8   :  { %v7345_v37 = vpop.f32.mrf.mxu1  ;;  %v7741_v17 = vrot.slane %v7665_v54, 2 }
 0x8a9   :  { %v7346_v0 = vadd.f32 %v7345_v37, %v7331_v32  ;;  %v8628_v32 = vld [vmem:[%s16023_s9 + $0xc0] sm:$0xff] }
 0x8ab   :  { %v7351_v50 = vpack.c.bf16 %v7346_v0, %v7346_v0 }
 0x8ad   :  { %v15878_v27 = vunpack.c.l.b16 %v7351_v50 }
 0x8af   :  { %v7367_v12 = vsel %vm7366_vm8, %v15878_v27, %v7365_v21  ;;  %v7397_v25 = vrot.slane %v15878_v27, 7  ;;  %v7510_v55 = vrot.slane %v15878_v27, 3  ;;  %v7434_v33 = vrot.slane %v15878_v27, 1 }
 0x8b0   :  { %v7368_v23 = vpack.c.b16 %v7367_v12, %v7367_v12  ;;  %v7472_v31 = vrot.slane %v15878_v27, 2  ;;  %v7624_v16 = vrot.slane %v15878_v27, 6  ;;  %v7347_v36 = vpop.f32.mrf.mxu1  ;;  %v7548_v47 = vrot.slane %v15878_v27, 4  ;;  %v8633_v12 = vld [vmem:[%s16023_s9 + $0xe8] sm:$0xff] }
 0x8b1   :  { %v7398_v30 = vsel %vm7366_vm8, %v7397_v25, %v15876_v29  ;;  %v7511_v8 = vsel %vm7366_vm8, %v7510_v55, %v7509_v62  ;;  %v7435_v53 = vsel %vm7366_vm8, %v7434_v33, %v7433_v1  ;;  %v7348_v51 = vadd.f32 %v7347_v36, %v7333_v18 }
 0x8b2   :  { %8390 = vmatmul.msk.bf16.vlgmr.msra.gmra.mxu2 %vm6465_vm4, %v7368_v23  ;;  %v7399_v20 = vpack.c.b16 %v7398_v30, %v7398_v30  ;;  %v7512_v4 = vpack.c.b16 %v7511_v8, %v7511_v8  ;;  %v7473_v28 = vsel %vm7366_vm8, %v7472_v31, %v7471_v3  ;;  %v7436_v13 = vpack.c.b16 %v7435_v53, %v7435_v53  ;;  %v8630_v30 = vld [vmem:[%s16023_s9 + $0xd0] sm:$0xff] }
 0x8b3   :  { %7572 = vmatpush.bf16.msra.mxu2 %v8615_v59  ;;  %v7474_v22 = vpack.c.b16 %v7473_v28, %v7473_v28  ;;  %v7625_v44 = vsel %vm7366_vm8, %v7624_v16, %v7623_v48  ;;  %v7586_v39 = vrot.slane %v15878_v27, 5  ;;  %v7657_v60 = vpack.c.bf16 %v7348_v51, %v7348_v51  ;;  %v8635_v59 = vld [vmem:[%s16023_s9 + $0xf8] sm:$0xff] }
 0x8b4   :  { %8399 = vmatmul.msk.bf16.vlgmr.msra.gmra.mxu3 %vm6465_vm4, %v7399_v20  ;;  %8438 = vmatmul.msk.bf16.vlgmr.msrb.gmra.mxu1 %vm6465_vm4, %v7512_v4  ;;  %v7626_v11 = vpack.c.b16 %v7625_v44, %v7625_v44  ;;  %v7549_v52 = vsel %vm7366_vm8, %v7548_v47, %v7547_v5  ;;  %v7704_v27 = vrot.slane %v7665_v54, 1  ;;  %v7855_v20 = vrot.slane %v7665_v54, 5 }
 0x8b5   :  { %7610 = vmatpush.bf16.msra.mxu3 %v8617_v40  ;;  %7766 = vmatpush.bf16.msrb.mxu1 %v8625_v10  ;;  %v7587_v43 = vsel %vm7366_vm8, %v7586_v39, %v7585_v46  ;;  %v7550_v58 = vpack.c.b16 %v7549_v52, %v7549_v52  ;;  %v7666_v2 = vunpack.c.l.b16 %v7657_v60  ;;  %v8632_v40 = vld [vmem:[%s16023_s9 + $0xe0] sm:$0xff]  ;;  %v7817_v33 = vrot.slane %v7665_v54, 4 }
 0x8b6   :  { %v7588_v14 = vpack.c.b16 %v7587_v43, %v7587_v43  ;;  %v7893_v28 = vrot.slane %v7665_v54, 6 }
 0x8b7   :  { %7573 = vmatpush.bf16.msra.mxu2 %v8614_v34  ;;  %v7742_v61 = vrot.slane %v7666_v2, 1  ;;  %v7667_v0 = vrot.slane %v7666_v2, 7  ;;  %v7705_v21 = vsel %vm7366_vm8, %v7666_v2, %v7704_v27  ;;  %v7856_v19 = vrot.slane %v7666_v2, 4  ;;  %v8634_v34 = vld [vmem:[%s16023_s9 + $0xf0] sm:$0xff] }
 0x8b8   :  { %v7706_v23 = vpack.c.b16 %v7705_v21, %v7705_v21  ;;  %v7780_v26 = vrot.slane %v7666_v2, 2  ;;  %v7818_v8 = vrot.slane %v7666_v2, 3  ;;  %v7894_v3 = vrot.slane %v7666_v2, 5 }
 0x8b9   :  { %7611 = vmatpush.bf16.msra.mxu3 %v8616_v15  ;;  %7767 = vmatpush.bf16.msrb.mxu1 %v8624_v35  ;;  %v7743_v37 = vsel %vm7366_vm8, %v7742_v61, %v7741_v17  ;;  %v7668_v50 = vsel %vm7366_vm8, %v7667_v0, %v7665_v54  ;;  %v7857_v62 = vsel %vm7366_vm8, %v7856_v19, %v7855_v20  ;;  %v7779_v15 = vrot.slane %v7665_v54, 3  ;;  %v8637_v61 = vld [vmem:[%s16025_s11 + $0x8] sm:$0xff] }
 0x8ba   :  { %v7744_v29 = vpack.c.b16 %v7743_v37, %v7743_v37  ;;  %v7669_v25 = vpack.c.b16 %v7668_v50, %v7668_v50  ;;  %v7858_v55 = vpack.c.b16 %v7857_v62, %v7857_v62  ;;  %v7819_v1 = vsel %vm7366_vm8, %v7818_v8, %v7817_v33 }
 0x8bb   :  { %v7781_v4 = vsel %vm7366_vm8, %v7780_v26, %v7779_v15  ;;  %v7820_v53 = vpack.c.b16 %v7819_v1, %v7819_v1  ;;  %v8659_v1 = vld [vmem:[%s16026_s12] ss:$0 sm:$0xff] }
 0x8bc   :  { %v7782_v31 = vpack.c.b16 %v7781_v4, %v7781_v4 }
 0x8c2   :  { %8412 = vmatmul.msk.bf16.vlgmr.msrb.gmra.mxu2 %vm6465_vm4, %v7436_v13  ;;  %v7895_v13 = vsel %vm7366_vm8, %v7894_v3, %v7893_v28 }
 0x8c3   :  { %7691 = vmatpush.bf16.msrb.mxu2 %v8621_v9  ;;  %v7932_v9 = vrot.slane %v7666_v2, 6  ;;  %v7896_v7 = vpack.c.b16 %v7895_v13, %v7895_v13 }
 0x8c4   :  { %8425 = vmatmul.msk.bf16.vlgmr.msrb.gmra.mxu3 %vm6465_vm4, %v7474_v22  ;;  %8477 = vmatmul.msk.bf16.vlgmr.msra.gmra.mxu1 %vm6465_vm4, %v7626_v11 }
 0x8c5   :  { %7728 = vmatpush.bf16.msrb.mxu3 %v8623_v24  ;;  %7880 = vmatpush.bf16.msra.mxu1 %v8631_v42  ;;  %v7931_v24 = vrot.slane %v7665_v54, 7 }
 0x8c7   :  { %7692 = vmatpush.bf16.msrb.mxu2 %v8620_v57  ;;  %v7933_v22 = vsel %vm7366_vm8, %v7932_v9, %v7931_v24 }
 0x8c8   :  { %v7934_v57 = vpack.c.b16 %v7933_v22, %v7933_v22 }
 0x8c9   :  { %7729 = vmatpush.bf16.msrb.mxu3 %v8622_v63  ;;  %7881 = vmatpush.bf16.msra.mxu1 %v8630_v30 }
 0x8d2   :  { %8451 = vmatmul.msk.bf16.vlgmr.msra.gmra.mxu2 %vm6465_vm4, %v7550_v58 }
 0x8d3   :  { %7804 = vmatpush.bf16.msra.mxu2 %v8627_v56 }
 0x8d4   :  { %8464 = vmatmul.msk.bf16.vlgmr.msra.gmra.mxu3 %vm6465_vm4, %v7588_v14  ;;  %8516 = vmatmul.msk.bf16.vlgmr.msrb.gmra.mxu1 %vm6465_vm4, %v7744_v29  ;;  %v8636_v29 = vld [vmem:[%s16025_s11] sm:$0xff] }
 0x8d5   :  { %7842 = vmatpush.bf16.msra.mxu3 %v8629_v6  ;;  %8000 = vmatpush.bf16.msrb.mxu1 %v8637_v61 }
 0x8d7   :  { %7805 = vmatpush.bf16.msra.mxu2 %v8626_v38 }
 0x8d9   :  { %7843 = vmatpush.bf16.msra.mxu3 %v8628_v32  ;;  %8001 = vmatpush.bf16.msrb.mxu1 %v8636_v29 }
 0x8e2   :  { %8490 = vmatmul.msk.bf16.vlgmr.msrb.gmra.mxu2 %vm6465_vm4, %v7669_v25 }
 0x8e3   :  { %7918 = vmatpush.bf16.msrb.mxu2 %v8633_v12 }
 0x8e4   :  { %8503 = vmatmul.msk.bf16.vlgmr.msrb.gmra.mxu3 %vm6465_vm4, %v7706_v23  ;;  %8555 = vmatmul.msk.bf16.vlgmr.msra.gmra.mxu1 %vm6465_vm4, %v7858_v55 }
 0x8e5   :  { %7956 = vmatpush.bf16.msrb.mxu3 %v8635_v59 }
 0x8e7   :  { %7919 = vmatpush.bf16.msrb.mxu2 %v8632_v40 }
 0x8e9   :  { %7957 = vmatpush.bf16.msrb.mxu3 %v8634_v34  ;;  %v8658_v34 = vld [vmem:[%s16024_s10] ss:$0 sm:$0xff] }
 0x8f2   :  { %8529 = vmatmul.msk.bf16.vlgmr.msra.gmra.mxu2 %vm6465_vm4, %v7782_v31 }
 0x8f4   :  { %8542 = vmatmul.msk.bf16.vlgmr.msra.gmra.mxu3 %vm6465_vm4, %v7820_v53 }
 0x902   :  { %8568 = vmatmul.msk.bf16.vlgmr.msrb.gmra.mxu2 %vm6465_vm4, %v7896_v7 }
 0x904   :  { %8581 = vmatmul.msk.bf16.vlgmr.msrb.gmra.mxu3 %vm6465_vm4, %v7934_v57 }
 0x931   :  { %v7537_v16 = vpop.f32.mrf.mxu1 }
 0x935   :  { %v7393_v48 = vpop.f32.mrf.mxu2 }
 0x937   :  { %v7424_v10 = vpop.f32.mrf.mxu3 }
 0x938   :  { %v7425_v45 = vadd.f32 %v7424_v10, %v7393_v48 }
 0x939   :  { %v7539_v41 = vpop.f32.mrf.mxu1 }
 0x93d   :  { %v7395_v36 = vpop.f32.mrf.mxu2 }
 0x93f   :  { %v7426_v63 = vpop.f32.mrf.mxu3 }
 0x941   :  { %v7651_v18 = vpop.f32.mrf.mxu1 }
 0x945   :  { %v7461_v44 = vpop.f32.mrf.mxu2 }
 0x946   :  { %v7465_v46 = vadd.f32 %v7461_v44, %v7425_v45 }
 0x947   :  { %v7499_v11 = vpop.f32.mrf.mxu3 }
 0x948   :  { %v7503_v58 = vadd.f32 %v7499_v11, %v7465_v46 }
 0x949   :  { %v7653_v49 = vpop.f32.mrf.mxu1 }
 0x94a   :  { %v7541_v54 = vadd.f32 %v7537_v16, %v7503_v58 }
 0x94d   :  { %v7463_v51 = vpop.f32.mrf.mxu2 }
 0x94f   :  { %v7501_v47 = vpop.f32.mrf.mxu3 }
 0x951   :  { %v7769_v39 = vpop.f32.mrf.mxu1 }
 0x955   :  { %v7575_v5 = vpop.f32.mrf.mxu2 }
 0x956   :  { %v7579_v35 = vadd.f32 %v7575_v5, %v7541_v54 }
 0x957   :  { %v7613_v60 = vpop.f32.mrf.mxu3 }
 0x958   :  { %v7617_v38 = vadd.f32 %v7613_v60, %v7579_v35 }
 0x959   :  { %v7771_v43 = vpop.f32.mrf.mxu1 }
 0x95a   :  { %v7655_v37 = vadd.f32 %v7651_v18, %v7617_v38 }
 0x95d   :  { %v7577_v52 = vpop.f32.mrf.mxu2 }
 0x95f   :  { %v7615_v56 = vpop.f32.mrf.mxu3 }
 0x961   :  { %v7883_v6 = vpop.f32.mrf.mxu1 }
 0x965   :  { %v7694_v2 = vpop.f32.mrf.mxu2 }
 0x966   :  { %v7698_v0 = vadd.f32 %v7694_v2, %v7655_v37 }
 0x967   :  { %v7731_v14 = vpop.f32.mrf.mxu3 }
 0x968   :  { %v7735_v27 = vadd.f32 %v7731_v14, %v7698_v0 }
 0x969   :  { %v7885_v42 = vpop.f32.mrf.mxu1 }
 0x96a   :  { %v7773_v12 = vadd.f32 %v7769_v39, %v7735_v27 }
 0x96d   :  { %v7696_v17 = vpop.f32.mrf.mxu2 }
 0x96f   :  { %v7733_v32 = vpop.f32.mrf.mxu3 }
 0x975   :  { %v7807_v50 = vpop.f32.mrf.mxu2 }
 0x976   :  { %v7811_v25 = vadd.f32 %v7807_v50, %v7773_v12 }
 0x977   :  { %v7845_v21 = vpop.f32.mrf.mxu3 }
 0x978   :  { %v7849_v30 = vadd.f32 %v7845_v21, %v7811_v25 }
 0x97a   :  { %v7887_v40 = vadd.f32 %v7883_v6, %v7849_v30 }
 0x97d   :  { %v7809_v59 = vpop.f32.mrf.mxu2 }
 0x97f   :  { %v7847_v23 = vpop.f32.mrf.mxu3 }
 0x985   :  { %v7921_v20 = vpop.f32.mrf.mxu2 }
 0x986   :  { %v7925_v19 = vadd.f32 %v7921_v20, %v7887_v40 }
 0x987   :  { %v7959_v62 = vpop.f32.mrf.mxu3 }
 0x988   :  { %v7963_v55 = vadd.f32 %v7959_v62, %v7925_v19 }
 0x98a   :  { %v7968_v26 = vadd.f32 %v8658_v34, %v7963_v55 }
 0x98c   :  { %v7969_v15 = vmax.f32 %v7968_v26, 0.0 }
 0x98d   :  { %v7923_v8 = vpop.f32.mrf.mxu2 }
 0x98e   :  { %v7970_v4 = vpack.c.bf16 %v7969_v15, %v7969_v15 }
 0x98f   :  { %v7961_v33 = vpop.f32.mrf.mxu3 }
 0x990   :  { %8590 = vmatmul.msk.bf16.vlgmr.msrb.gmra.mxu1 %vm6465_vm4, %v7970_v4 }
 0xa0d   :  { %v8003_v31 = vpop.f32.mrf.mxu1 }
 0xa0e   :  { %v8004_v53 = vadd.f32 %v8659_v1, %v8003_v31 }
 0xa10   :  { %8008 = vst.msk [vmem:[#allocation2] sm:$0x3] %vm8007_vm9, %v8004_v53 }
 0xa11   :  { %8019 = dma.vmem_to_hbm [thread:$0]  %s8015_s18, 32, %s8017_s21, [#allocation3]  }
 0xa15   :  { %v8005_v3 = vpop.f32.mrf.mxu1 }
 0xa16   :  { %8718 = dma.done.wait [#allocation3], 32  }
 0xa17   :  { %8719 = vsyncadd [#allocation3], 4294967264 }
 0xa18   :  { %8024 = vsyncpa [#allocation3], 1 }

</bundles_post_ra>
